<compile_context>
chip_gen: v5e
topology: v5e:2x2
jax: 0.10.0
libtpu: 0.0.40
codegen_flags: <defaults>
</compile_context>

<pallas_src>
import numpy as np
import jax
import jax.numpy as jnp
from jax.experimental import pallas as pl
from jax.experimental.pallas import tpu as pltpu

# Small, forward-consistent shapes (the real model uses 1500/1500/2/vocab).
VOCAB = 64
EMBED = 32
HIDDEN = 32
NUM_LAYERS = 2
BATCH = 2
SEQ = 8

LANE = 128      # TPU lane width (last dim)
SUBLANE = 8     # TPU sublane width (second-to-last dim)


def _round_up(x, m):
    return (x + m - 1) // m * m


# ----------------------------------------------------------------------------
# Generic tiled matmul + bias kernel (K-accumulating, f32 VMEM accumulator).
# Used for the hoisted layer-0 input projection and the vocab projection.
# ----------------------------------------------------------------------------
def _matmul_bias_kernel(x_ref, w_ref, b_ref, o_ref, acc_ref):
    @pl.when(pl.program_id(2) == 0)
    def _():
        acc_ref[...] = jnp.zeros_like(acc_ref)

    acc_ref[...] += jnp.dot(x_ref[...], w_ref[...],
                            preferred_element_type=jnp.float32)

    @pl.when(pl.program_id(2) == pl.num_programs(2) - 1)
    def _():
        o_ref[...] = (acc_ref[...] + b_ref[...]).astype(o_ref.dtype)


def matmul_bias(x, w, b, *, tm=256, tn=512, tk=512):
    """x: (M, K) bf16; w: (K, N) bf16; b: (1, N) f32 -> (M, N) f32."""
    M, K = x.shape
    N = w.shape[1]
    # Fall back to full extent when the toy dims don't divide the target tile.
    tm = tm if M % tm == 0 else M
    tn = tn if N % tn == 0 else N
    tk = tk if K % tk == 0 else K
    return pl.pallas_call(
        _matmul_bias_kernel,
        out_shape=jax.ShapeDtypeStruct((M, N), jnp.float32),
        grid=(M // tm, N // tn, K // tk),
        in_specs=[
            pl.BlockSpec((tm, tk), lambda i, j, k: (i, k)),
            pl.BlockSpec((tk, tn), lambda i, j, k: (k, j)),
            pl.BlockSpec((1, tn), lambda i, j, k: (0, j)),
        ],
        out_specs=pl.BlockSpec((tm, tn), lambda i, j, k: (i, j)),
        scratch_shapes=[pltpu.VMEM((tm, tn), jnp.float32)],
        compiler_params=pltpu.CompilerParams(
            dimension_semantics=("parallel", "parallel", "arbitrary")),
    )(x, w, b)


# ----------------------------------------------------------------------------
# Fused 2-layer LSTM recurrence kernel.
#   - grid=(1,), time loop unrolled inside the kernel, h/c in VMEM scratch.
#   - layer 0 uses precomputed input gates gx (only h@W_hh inside the loop);
#   - layer 1 fuses [h1|h2] @ [W_ih1;W_hh1] into one MXU push.
# Gate order follows PyTorch nn.LSTM: [i, f, g, o]; every gate block is padded
# to a lane multiple (Hp) so the slices below are aligned, free views.
# ----------------------------------------------------------------------------
def _fused_lstm_kernel(gx_ref, whh0_ref, wcat1_ref, b1_ref, h0_ref, c0_ref,
                       out_ref, hT_ref, cT_ref,
                       h1_sc, c1_sc, h2_sc, c2_sc):
    Hp = whh0_ref.shape[0]
    T = gx_ref.shape[0]

    h1_sc[...] = h0_ref[0]
    c1_sc[...] = c0_ref[0]
    h2_sc[...] = h0_ref[1]
    c2_sc[...] = c0_ref[1]

    def cell(gates, c_prev):
        i_g = jax.nn.sigmoid(gates[:, 0 * Hp:1 * Hp])
        f_g = jax.nn.sigmoid(gates[:, 1 * Hp:2 * Hp])
        g_g = jnp.tanh(gates[:, 2 * Hp:3 * Hp])
        o_g = jax.nn.sigmoid(gates[:, 3 * Hp:4 * Hp])
        c_new = f_g * c_prev + i_g * g_g
        h_new = o_g * jnp.tanh(c_new)
        return h_new, c_new

    def step(t, carry):
        # Layer 0: input projection precomputed; only h @ W_hh on the
        # sequential critical path (bf16 operands, f32 accumulation).
        g0 = gx_ref[t] + jnp.dot(h1_sc[...].astype(jnp.bfloat16),
                                 whh0_ref[...],
                                 preferred_element_type=jnp.float32)
        h1, c1 = cell(g0, c1_sc[...])
        h1_sc[...] = h1
        c1_sc[...] = c1

        # Layer 1: fused [x, h] @ [W_ih; W_hh] in a single MXU push.
        xin = jnp.concatenate([h1, h2_sc[...]], axis=-1).astype(jnp.bfloat16)
        g1 = (jnp.dot(xin, wcat1_ref[...],
                      preferred_element_type=jnp.float32) + b1_ref[...])
        h2, c2 = cell(g1, c2_sc[...])
        h2_sc[...] = h2
        c2_sc[...] = c2

        out_ref[t] = h2
        return carry

    jax.lax.fori_loop(0, T, step, 0, unroll=True)

    # Final states written exactly once (no per-step hT/cT stores).
    hT_ref[0] = h1_sc[...]
    hT_ref[1] = h2_sc[...]
    cT_ref[0] = c1_sc[...]
    cT_ref[1] = c2_sc[...]


def fused_lstm(gx0, w_hh0, w_cat1, b1, h0_p, c0_p):
    """gx0: (T, Bp, 4Hp) f32; w_hh0: (Hp, 4Hp) bf16; w_cat1: (2Hp, 4Hp) bf16;
    b1: (1, 4Hp) f32; h0_p/c0_p: (2, Bp, Hp) f32."""
    T, Bp, G = gx0.shape
    Hp = w_hh0.shape[0]
    L = h0_p.shape[0]
    return pl.pallas_call(
        _fused_lstm_kernel,
        out_shape=(jax.ShapeDtypeStruct((T, Bp, Hp), jnp.float32),
                   jax.ShapeDtypeStruct((L, Bp, Hp), jnp.float32),
                   jax.ShapeDtypeStruct((L, Bp, Hp), jnp.float32)),
        grid=(1,),
        in_specs=[
            pl.BlockSpec((T, Bp, G), lambda i: (0, 0, 0)),
            pl.BlockSpec((Hp, G), lambda i: (0, 0)),
            pl.BlockSpec((2 * Hp, G), lambda i: (0, 0)),
            pl.BlockSpec((1, G), lambda i: (0, 0)),
            pl.BlockSpec((L, Bp, Hp), lambda i: (0, 0, 0)),
            pl.BlockSpec((L, Bp, Hp), lambda i: (0, 0, 0)),
        ],
        out_specs=(
            pl.BlockSpec((T, Bp, Hp), lambda i: (0, 0, 0)),
            pl.BlockSpec((L, Bp, Hp), lambda i: (0, 0, 0)),
            pl.BlockSpec((L, Bp, Hp), lambda i: (0, 0, 0)),
        ),
        scratch_shapes=[pltpu.VMEM((Bp, Hp), jnp.float32)] * 4,
        compiler_params=pltpu.CompilerParams(
            dimension_semantics=("arbitrary",)),
    )(gx0, w_hh0, w_cat1, b1, h0_p, c0_p)


# ----------------------------------------------------------------------------
# Parameters (deterministic synthetic init; shapes follow nn.Embedding,
# nn.LSTM(embed, hidden, num_layers, batch_first=True), nn.Linear).
# ----------------------------------------------------------------------------
def init_params(key):
    params = {}
    n_keys = 2 + 4 * NUM_LAYERS + 2
    keys = jax.random.split(key, n_keys)
    it = iter(keys)
    params["embed"] = jax.random.normal(next(it), (VOCAB, EMBED), jnp.float32) * 0.1
    for l in range(NUM_LAYERS):
        in_dim = EMBED if l == 0 else HIDDEN
        params[f"w_ih_{l}"] = jax.random.normal(next(it), (4 * HIDDEN, in_dim), jnp.float32) * 0.1
        params[f"w_hh_{l}"] = jax.random.normal(next(it), (4 * HIDDEN, HIDDEN), jnp.float32) * 0.1
        params[f"b_ih_{l}"] = jax.random.normal(next(it), (4 * HIDDEN,), jnp.float32) * 0.1
        params[f"b_hh_{l}"] = jax.random.normal(next(it), (4 * HIDDEN,), jnp.float32) * 0.1
    params["w_lin"] = jax.random.normal(next(it), (VOCAB, HIDDEN), jnp.float32) * 0.1
    params["b_lin"] = jax.random.normal(next(it), (VOCAB,), jnp.float32) * 0.1
    return params


# ----------------------------------------------------------------------------
# One-time weight packing: transpose, lane-pad each gate block to Hp,
# combine biases, stack layer-1 [W_ih; W_hh], cast weights to bf16.
# (Padded gate columns have zero weight + zero bias, so padded hidden/cell
#  columns stay exactly 0 through the recurrence.)
# ----------------------------------------------------------------------------
def pack_params(params):
    assert NUM_LAYERS == 2
    H = HIDDEN
    Hp = _round_up(HIDDEN, LANE)
    Vp = _round_up(VOCAB, LANE)

    def pad_gate_cols(w_t, in_dim_p):
        # w_t: (in_dim, 4H) with [i,f,g,o] blocks -> (in_dim_p, 4*Hp).
        in_dim = w_t.shape[0]
        out = jnp.zeros((in_dim_p, 4, Hp), jnp.float32)
        out = out.at[:in_dim, :, :H].set(w_t.reshape(in_dim, 4, H))
        return out.reshape(in_dim_p, 4 * Hp)

    def pad_gate_bias(b):
        out = jnp.zeros((4, Hp), jnp.float32)
        out = out.at[:, :H].set(b.reshape(4, H))
        return out.reshape(1, 4 * Hp)

    packed = {"embed": params["embed"]}

    # Layer 0.
    packed["w_ih0"] = pad_gate_cols(params["w_ih_0"].T, EMBED).astype(jnp.bfloat16)
    packed["w_hh0"] = pad_gate_cols(params["w_hh_0"].T, Hp).astype(jnp.bfloat16)
    packed["b0"] = pad_gate_bias(params["b_ih_0"] + params["b_hh_0"])

    # Layer 1: stacked [W_ih1; W_hh1] acting on [h1 | h2] (each lane-padded).
    w_ih1_p = pad_gate_cols(params["w_ih_1"].T, Hp)
    w_hh1_p = pad_gate_cols(params["w_hh_1"].T, Hp)
    packed["w_cat1"] = jnp.concatenate([w_ih1_p, w_hh1_p], axis=0).astype(jnp.bfloat16)
    packed["b1"] = pad_gate_bias(params["b_ih_1"] + params["b_hh_1"])

    # Output projection, padded to (Hp, Vp) for lane-dense stores.
    w_lin_p = jnp.zeros((Hp, Vp), jnp.float32).at[:H, :VOCAB].set(params["w_lin"].T)
    packed["w_lin"] = w_lin_p.astype(jnp.bfloat16)
    packed["b_lin"] = jnp.zeros((1, Vp), jnp.float32).at[:, :VOCAB].set(
        params["b_lin"].reshape(1, VOCAB))
    return packed


# ----------------------------------------------------------------------------
# Forward pass (Pallas for the hoisted input projection, the fused 2-layer
# recurrence, and the vocab projection; embedding gather and pad/reshape are
# plain-JAX glue).
# ----------------------------------------------------------------------------
@jax.jit
def rnnlm_forward(packed, x_ids, h0, c0):
    B, T = x_ids.shape
    H = HIDDEN
    Hp = packed["w_hh0"].shape[0]
    Bp = _round_up(B, SUBLANE)

    # TODO(synk): embedding gather stays in XLA (data-dependent row gather).
    emb = jnp.take(packed["embed"], x_ids, axis=0)        # (B, T, E)
    x_seq = jnp.transpose(emb, (1, 0, 2))                 # (T, B, E)
    x_seq = jnp.pad(x_seq, ((0, 0), (0, Bp - B), (0, 0)))  # (T, Bp, E)

    # Hoisted layer-0 input projection: one big parallel matmul (+ bias).
    gx0 = matmul_bias(x_seq.reshape(T * Bp, EMBED).astype(jnp.bfloat16),
                      packed["w_ih0"], packed["b0"])       # (T*Bp, 4Hp) f32
    gx0 = gx0.reshape(T, Bp, 4 * Hp)

    h0_p = jnp.pad(h0, ((0, 0), (0, Bp - B), (0, Hp - H)))
    c0_p = jnp.pad(c0, ((0, 0), (0, Bp - B), (0, Hp - H)))

    out_seq, hT_p, cT_p = fused_lstm(gx0, packed["w_hh0"], packed["w_cat1"],
                                     packed["b1"], h0_p, c0_p)

    # out.reshape(B*T, H) @ W_lin^T + b_lin  (padded K=Hp, N=Vp; tiled kernel).
    out = jnp.transpose(out_seq, (1, 0, 2))[:B].reshape(B * T, Hp)
    logits_p = matmul_bias(out.astype(jnp.bfloat16),
                           packed["w_lin"], packed["b_lin"])  # (B*T, Vp)
    logits = logits_p[:, :VOCAB]
    return logits, (hT_p[:, :B, :H], cT_p[:, :B, :H])


# ----------------------------------------------------------------------------
# Pure-JAX f32 reference (mirrors PyTorch nn.LSTM semantics) for a sanity check.
# ----------------------------------------------------------------------------
def rnnlm_ref(params, x_ids, h0, c0):
    emb = jnp.take(params["embed"], x_ids, axis=0)        # (B, T, E)
    x_seq = emb
    h_fin, c_fin = [], []
    for l in range(NUM_LAYERS):
        w_ih = params[f"w_ih_{l}"]
        w_hh = params[f"w_hh_{l}"]
        b = params[f"b_ih_{l}"] + params[f"b_hh_{l}"]
        h, c = h0[l], c0[l]
        outs = []
        for t in range(SEQ):
            x_t = x_seq[:, t, :]
            g = x_t @ w_ih.T + h @ w_hh.T + b
            i_g = jax.nn.sigmoid(g[:, 0 * HIDDEN:1 * HIDDEN])
            f_g = jax.nn.sigmoid(g[:, 1 * HIDDEN:2 * HIDDEN])
            g_g = jnp.tanh(g[:, 2 * HIDDEN:3 * HIDDEN])
            o_g = jax.nn.sigmoid(g[:, 3 * HIDDEN:4 * HIDDEN])
            c = f_g * c + i_g * g_g
            h = o_g * jnp.tanh(c)
            outs.append(h)
        x_seq = jnp.stack(outs, axis=1)                   # (B, T, H)
        h_fin.append(h)
        c_fin.append(c)
    out = x_seq.reshape(BATCH * SEQ, HIDDEN)
    logits = out @ params["w_lin"].T + params["b_lin"]
    return logits, (jnp.stack(h_fin, axis=0), jnp.stack(c_fin, axis=0))


if __name__ == "__main__":
    params = init_params(jax.random.PRNGKey(0))
    packed = pack_params(params)

    kx, kh, kc = jax.random.split(jax.random.PRNGKey(1), 3)
    x_ids = jax.random.randint(kx, (BATCH, SEQ), 0, VOCAB, dtype=jnp.int32)
    h0 = jax.random.normal(kh, (NUM_LAYERS, BATCH, HIDDEN), jnp.float32) * 0.1
    c0 = jax.random.normal(kc, (NUM_LAYERS, BATCH, HIDDEN), jnp.float32) * 0.1

    logits, (h_n, c_n) = rnnlm_forward(packed, x_ids, h0, c0)
    jax.block_until_ready((logits, h_n, c_n))

    ref_logits, (ref_h, ref_c) = rnnlm_ref(params, x_ids, h0, c0)
    assert logits.shape == (BATCH * SEQ, VOCAB)
    assert h_n.shape == (NUM_LAYERS, BATCH, HIDDEN)
    assert c_n.shape == (NUM_LAYERS, BATCH, HIDDEN)
    np.testing.assert_allclose(np.asarray(logits), np.asarray(ref_logits),
                               rtol=2e-2, atol=2e-2)
    np.testing.assert_allclose(np.asarray(h_n), np.asarray(ref_h),
                               rtol=2e-2, atol=2e-2)
    np.testing.assert_allclose(np.asarray(c_n), np.asarray(ref_c),
                               rtol=2e-2, atol=2e-2)
    print("KERNEL_OK")
</pallas_src>

<mosaic_0001>
module attributes {stable_mosaic.version = 11 : i64} {
  func.func @_matmul_bias_kernel(%arg0: i32, %arg1: i32, %arg2: i32, %arg3: memref<64x32xbf16, #tpu.memory_space<vmem>>, %arg4: memref<32x512xbf16, #tpu.memory_space<vmem>>, %arg5: memref<1x512xf32, #tpu.memory_space<vmem>>, %arg6: memref<64x512xf32, #tpu.memory_space<vmem>>, %arg7: memref<64x512xf32, #tpu.memory_space<vmem>>) attributes {dimension_semantics = [#tpu.dimension_semantics<parallel>, #tpu.dimension_semantics<parallel>, #tpu.dimension_semantics<arbitrary>], iteration_bounds = array<i64: 1, 1, 1>, scalar_prefetch = 0 : i64, scratch_operands = 1 : i64, tpu.core_type = #tpu.core_type<tc>, window_params = [{transform_indices = @transform_0, window_bounds = array<i64: 64, 32>}, {transform_indices = @transform_1, window_bounds = array<i64: 32, 512>}, {transform_indices = @transform_2, window_bounds = array<i64: 1, 512>}, {transform_indices = @transform_3, window_bounds = array<i64: 64, 512>}]} {
    %c0_i32 = arith.constant 0 : i32
    %0 = arith.cmpi eq, %arg2, %c0_i32 : i32
    %1 = arith.extui %0 : i1 to i32
    %c0_i32_0 = arith.constant 0 : i32
    %2 = arith.cmpi ne, %1, %c0_i32_0 : i32
    scf.if %2 {
      %cst_10 = arith.constant 0.000000e+00 : f32
      %12 = vector.broadcast %cst_10 : f32 to vector<64x512xf32>
      %c0_11 = arith.constant 0 : index
      %c0_12 = arith.constant 0 : index
      %13 = vector.load %arg7[%c0_11, %c0_12] : memref<64x512xf32, #tpu.memory_space<vmem>>, vector<64x512xf32>
      tpu.vector_store %arg7[%c0_11, %c0_12], %12 {strides = array<i32>} : memref<64x512xf32, #tpu.memory_space<vmem>>, vector<64x512xf32>,
    } else {
    }
    %c0 = arith.constant 0 : index
    %c0_1 = arith.constant 0 : index
    %3 = vector.load %arg7[%c0, %c0_1] : memref<64x512xf32, #tpu.memory_space<vmem>>, vector<64x512xf32>
    %c0_2 = arith.constant 0 : index
    %c0_3 = arith.constant 0 : index
    %4 = vector.load %arg3[%c0_2, %c0_3] : memref<64x32xbf16, #tpu.memory_space<vmem>>, vector<64x32xbf16>
    %c0_4 = arith.constant 0 : index
    %c0_5 = arith.constant 0 : index
    %5 = vector.load %arg4[%c0_4, %c0_5] : memref<32x512xbf16, #tpu.memory_space<vmem>>, vector<32x512xbf16>
    %cst = arith.constant dense<0.000000e+00> : vector<64x512xf32>
    %6 = tpu.matmul %4, %5, %cst {dimension_numbers = #tpu.dot_dimension_numbers<[1], [0], [0], [1], [0, 0, 1, 1], [], []>} : vector<64x32xbf16>, vector<32x512xbf16>, vector<64x512xf32> -> vector<64x512xf32>
    %7 = arith.addf %3, %6 : vector<64x512xf32>
    %c0_6 = arith.constant 0 : index
    %c0_7 = arith.constant 0 : index
    %8 = vector.load %arg7[%c0_6, %c0_7] : memref<64x512xf32, #tpu.memory_space<vmem>>, vector<64x512xf32>
    tpu.vector_store %arg7[%c0_6, %c0_7], %7 {strides = array<i32>} : memref<64x512xf32, #tpu.memory_space<vmem>>, vector<64x512xf32>,
    %c0_i32_8 = arith.constant 0 : i32
    %9 = arith.cmpi eq, %arg2, %c0_i32_8 : i32
    %10 = arith.extui %9 : i1 to i32
    %c0_i32_9 = arith.constant 0 : i32
    %11 = arith.cmpi ne, %10, %c0_i32_9 : i32
    scf.if %11 {
      %c0_10 = arith.constant 0 : index
      %c0_11 = arith.constant 0 : index
      %12 = vector.load %arg7[%c0_10, %c0_11] : memref<64x512xf32, #tpu.memory_space<vmem>>, vector<64x512xf32>
      %c0_12 = arith.constant 0 : index
      %c0_13 = arith.constant 0 : index
      %13 = vector.load %arg5[%c0_12, %c0_13] : memref<1x512xf32, #tpu.memory_space<vmem>>, vector<1x512xf32>
      %14 = vector.broadcast %13 : vector<1x512xf32> to vector<64x512xf32>
      %15 = arith.addf %12, %14 : vector<64x512xf32>
      %c0_14 = arith.constant 0 : index
      %c0_15 = arith.constant 0 : index
      %16 = vector.load %arg6[%c0_14, %c0_15] : memref<64x512xf32, #tpu.memory_space<vmem>>, vector<64x512xf32>
      tpu.vector_store %arg6[%c0_14, %c0_15], %15 {strides = array<i32>} : memref<64x512xf32, #tpu.memory_space<vmem>>, vector<64x512xf32>,
    } else {
    }
    return
  }
  func.func @transform_0(%arg0: i32, %arg1: i32, %arg2: i32) -> (i32, i32) {
    %c0_i32 = arith.constant 0 : i32
    return %arg0, %arg2 : i32, i32
  }
  func.func @transform_1(%arg0: i32, %arg1: i32, %arg2: i32) -> (i32, i32) {
    %c0_i32 = arith.constant 0 : i32
    return %arg2, %arg1 : i32, i32
  }
  func.func @transform_2(%arg0: i32, %arg1: i32, %arg2: i32) -> (i32, i32) {
    %c0_i32 = arith.constant 0 : i32
    %c0_i32_0 = arith.constant 0 : i32
    return %c0_i32, %arg1 : i32, i32
  }
  func.func @transform_3(%arg0: i32, %arg1: i32, %arg2: i32) -> (i32, i32) {
    %c0_i32 = arith.constant 0 : i32
    return %arg0, %arg1 : i32, i32
  }
}

module attributes {stable_mosaic.version = 11 : i64} {
  func.func @_fused_lstm_kernel(%arg0: i32, %arg1: memref<8x8x512xf32, #tpu.memory_space<vmem>>, %arg2: memref<128x512xbf16, #tpu.memory_space<vmem>>, %arg3: memref<256x512xbf16, #tpu.memory_space<vmem>>, %arg4: memref<1x512xf32, #tpu.memory_space<vmem>>, %arg5: memref<2x8x128xf32, #tpu.memory_space<vmem>>, %arg6: memref<2x8x128xf32, #tpu.memory_space<vmem>>, %arg7: memref<8x8x128xf32, #tpu.memory_space<vmem>>, %arg8: memref<2x8x128xf32, #tpu.memory_space<vmem>>, %arg9: memref<2x8x128xf32, #tpu.memory_space<vmem>>, %arg10: memref<8x128xf32, #tpu.memory_space<vmem>>, %arg11: memref<8x128xf32, #tpu.memory_space<vmem>>, %arg12: memref<8x128xf32, #tpu.memory_space<vmem>>, %arg13: memref<8x128xf32, #tpu.memory_space<vmem>>) attributes {dimension_semantics = [#tpu.dimension_semantics<arbitrary>], iteration_bounds = array<i64: 1>, scalar_prefetch = 0 : i64, scratch_operands = 4 : i64, tpu.core_type = #tpu.core_type<tc>, window_params = [{pipeline_mode = #tpu.pipeline_mode<synchronous>, transform_indices = @transform_0, window_bounds = array<i64: 8, 8, 512>}, {pipeline_mode = #tpu.pipeline_mode<synchronous>, transform_indices = @transform_1, window_bounds = array<i64: 128, 512>}, {pipeline_mode = #tpu.pipeline_mode<synchronous>, transform_indices = @transform_2, window_bounds = array<i64: 256, 512>}, {pipeline_mode = #tpu.pipeline_mode<synchronous>, transform_indices = @transform_3, window_bounds = array<i64: 1, 512>}, {pipeline_mode = #tpu.pipeline_mode<synchronous>, transform_indices = @transform_4, window_bounds = array<i64: 2, 8, 128>}, {pipeline_mode = #tpu.pipeline_mode<synchronous>, transform_indices = @transform_5, window_bounds = array<i64: 2, 8, 128>}, {pipeline_mode = #tpu.pipeline_mode<synchronous>, transform_indices = @transform_6, window_bounds = array<i64: 8, 8, 128>}, {pipeline_mode = #tpu.pipeline_mode<synchronous>, transform_indices = @transform_7, window_bounds = array<i64: 2, 8, 128>}, {pipeline_mode = #tpu.pipeline_mode<synchronous>, transform_indices = @transform_8, window_bounds = array<i64: 2, 8, 128>}]} {
    %c0 = arith.constant 0 : index
    %c0_0 = arith.constant 0 : index
    %c0_1 = arith.constant 0 : index
    %0 = vector.load %arg5[%c0, %c0_0, %c0_1] : memref<2x8x128xf32, #tpu.memory_space<vmem>>, vector<1x8x128xf32>
    %1 = vector.shape_cast %0 : vector<1x8x128xf32> to vector<8x128xf32>
    %c0_2 = arith.constant 0 : index
    %c0_3 = arith.constant 0 : index
    %2 = vector.load %arg10[%c0_2, %c0_3] : memref<8x128xf32, #tpu.memory_space<vmem>>, vector<8x128xf32>
    tpu.vector_store %arg10[%c0_2, %c0_3], %1 {strides = array<i32>} : memref<8x128xf32, #tpu.memory_space<vmem>>, vector<8x128xf32>,
    %c0_4 = arith.constant 0 : index
    %c0_5 = arith.constant 0 : index
    %c0_6 = arith.constant 0 : index
    %3 = vector.load %arg6[%c0_4, %c0_5, %c0_6] : memref<2x8x128xf32, #tpu.memory_space<vmem>>, vector<1x8x128xf32>
    %4 = vector.shape_cast %3 : vector<1x8x128xf32> to vector<8x128xf32>
    %c0_7 = arith.constant 0 : index
    %c0_8 = arith.constant 0 : index
    %5 = vector.load %arg11[%c0_7, %c0_8] : memref<8x128xf32, #tpu.memory_space<vmem>>, vector<8x128xf32>
    tpu.vector_store %arg11[%c0_7, %c0_8], %4 {strides = array<i32>} : memref<8x128xf32, #tpu.memory_space<vmem>>, vector<8x128xf32>,
    %c1 = arith.constant 1 : index
    %c0_9 = arith.constant 0 : index
    %c0_10 = arith.constant 0 : index
    %6 = vector.load %arg5[%c1, %c0_9, %c0_10] : memref<2x8x128xf32, #tpu.memory_space<vmem>>, vector<1x8x128xf32>
    %7 = vector.shape_cast %6 : vector<1x8x128xf32> to vector<8x128xf32>
    %c0_11 = arith.constant 0 : index
    %c0_12 = arith.constant 0 : index
    %8 = vector.load %arg12[%c0_11, %c0_12] : memref<8x128xf32, #tpu.memory_space<vmem>>, vector<8x128xf32>
    tpu.vector_store %arg12[%c0_11, %c0_12], %7 {strides = array<i32>} : memref<8x128xf32, #tpu.memory_space<vmem>>, vector<8x128xf32>,
    %c1_13 = arith.constant 1 : index
    %c0_14 = arith.constant 0 : index
    %c0_15 = arith.constant 0 : index
    %9 = vector.load %arg6[%c1_13, %c0_14, %c0_15] : memref<2x8x128xf32, #tpu.memory_space<vmem>>, vector<1x8x128xf32>
    %10 = vector.shape_cast %9 : vector<1x8x128xf32> to vector<8x128xf32>
    %c0_16 = arith.constant 0 : index
    %c0_17 = arith.constant 0 : index
    %11 = vector.load %arg13[%c0_16, %c0_17] : memref<8x128xf32, #tpu.memory_space<vmem>>, vector<8x128xf32>
    tpu.vector_store %arg13[%c0_16, %c0_17], %10 {strides = array<i32>} : memref<8x128xf32, #tpu.memory_space<vmem>>, vector<8x128xf32>,
    %c0_i32 = arith.constant 0 : i32
    %12 = arith.index_cast %c0_i32 : i32 to index
    %c0_18 = arith.constant 0 : index
    %c0_19 = arith.constant 0 : index
    %13 = vector.load %arg1[%12, %c0_18, %c0_19] : memref<8x8x512xf32, #tpu.memory_space<vmem>>, vector<1x8x512xf32>
    %14 = vector.shape_cast %13 : vector<1x8x512xf32> to vector<8x512xf32>
    %c0_20 = arith.constant 0 : index
    %c0_21 = arith.constant 0 : index
    %15 = vector.load %arg10[%c0_20, %c0_21] : memref<8x128xf32, #tpu.memory_space<vmem>>, vector<8x128xf32>
    %16 = arith.truncf %15 : vector<8x128xf32> to vector<8x128xbf16>
    %c0_22 = arith.constant 0 : index
    %c0_23 = arith.constant 0 : index
    %17 = vector.load %arg2[%c0_22, %c0_23] : memref<128x512xbf16, #tpu.memory_space<vmem>>, vector<128x512xbf16>
    %cst = arith.constant dense<0.000000e+00> : vector<8x512xf32>
    %18 = tpu.matmul %16, %17, %cst {dimension_numbers = #tpu.dot_dimension_numbers<[1], [0], [0], [1], [0, 0, 1, 1], [], []>} : vector<8x128xbf16>, vector<128x512xbf16>, vector<8x512xf32> -> vector<8x512xf32>
    %19 = arith.addf %14, %18 : vector<8x512xf32>
    %c0_24 = arith.constant 0 : index
    %c0_25 = arith.constant 0 : index
    %20 = vector.load %arg11[%c0_24, %c0_25] : memref<8x128xf32, #tpu.memory_space<vmem>>, vector<8x128xf32>
    %21 = vector.extract_strided_slice %19 {offsets = [0, 0], sizes = [8, 128], strides = [1, 1]} : vector<8x512xf32> to vector<8x128xf32>
    %22 = arith.negf %21 : vector<8x128xf32>
    %23 = math.exp %22 : vector<8x128xf32>
    %cst_26 = arith.constant 1.000000e+00 : f32
    %24 = vector.broadcast %cst_26 : f32 to vector<8x128xf32>
    %25 = arith.addf %24, %23 : vector<8x128xf32>
    %26 = arith.divf %24, %25 : vector<8x128xf32>
    %27 = vector.extract_strided_slice %19 {offsets = [0, 128], sizes = [8, 128], strides = [1, 1]} : vector<8x512xf32> to vector<8x128xf32>
    %28 = arith.negf %27 : vector<8x128xf32>
    %29 = math.exp %28 : vector<8x128xf32>
    %cst_27 = arith.constant 1.000000e+00 : f32
    %30 = vector.broadcast %cst_27 : f32 to vector<8x128xf32>
    %31 = arith.addf %30, %29 : vector<8x128xf32>
    %32 = arith.divf %30, %31 : vector<8x128xf32>
    %33 = vector.extract_strided_slice %19 {offsets = [0, 256], sizes = [8, 128], strides = [1, 1]} : vector<8x512xf32> to vector<8x128xf32>
    %34 = math.tanh %33 : vector<8x128xf32>
    %35 = vector.extract_strided_slice %19 {offsets = [0, 384], sizes = [8, 128], strides = [1, 1]} : vector<8x512xf32> to vector<8x128xf32>
    %36 = arith.negf %35 : vector<8x128xf32>
    %37 = math.exp %36 : vector<8x128xf32>
    %cst_28 = arith.constant 1.000000e+00 : f32
    %38 = vector.broadcast %cst_28 : f32 to vector<8x128xf32>
    %39 = arith.addf %38, %37 : vector<8x128xf32>
    %40 = arith.divf %38, %39 : vector<8x128xf32>
    %41 = arith.mulf %32, %20 : vector<8x128xf32>
    %42 = arith.mulf %26, %34 : vector<8x128xf32>
    %43 = arith.addf %41, %42 : vector<8x128xf32>
    %44 = math.tanh %43 : vector<8x128xf32>
    %45 = arith.mulf %40, %44 : vector<8x128xf32>
    %c0_29 = arith.constant 0 : index
    %c0_30 = arith.constant 0 : index
    %46 = vector.load %arg10[%c0_29, %c0_30] : memref<8x128xf32, #tpu.memory_space<vmem>>, vector<8x128xf32>
    tpu.vector_store %arg10[%c0_29, %c0_30], %45 {strides = array<i32>} : memref<8x128xf32, #tpu.memory_space<vmem>>, vector<8x128xf32>,
    %c0_31 = arith.constant 0 : index
    %c0_32 = arith.constant 0 : index
    %47 = vector.load %arg11[%c0_31, %c0_32] : memref<8x128xf32, #tpu.memory_space<vmem>>, vector<8x128xf32>
    tpu.vector_store %arg11[%c0_31, %c0_32], %43 {strides = array<i32>} : memref<8x128xf32, #tpu.memory_space<vmem>>, vector<8x128xf32>,
    %c0_33 = arith.constant 0 : index
    %c0_34 = arith.constant 0 : index
    %48 = vector.load %arg12[%c0_33, %c0_34] : memref<8x128xf32, #tpu.memory_space<vmem>>, vector<8x128xf32>
    %49 = tpu.concatenate %45, %48 in 1 : vector<8x128xf32>, vector<8x128xf32> -> vector<8x256xf32>
    %50 = arith.truncf %49 : vector<8x256xf32> to vector<8x256xbf16>
    %c0_35 = arith.constant 0 : index
    %c0_36 = arith.constant 0 : index
    %51 = vector.load %arg3[%c0_35, %c0_36] : memref<256x512xbf16, #tpu.memory_space<vmem>>, vector<256x512xbf16>
    %cst_37 = arith.constant dense<0.000000e+00> : vector<8x512xf32>
    %52 = tpu.matmul %50, %51, %cst_37 {dimension_numbers = #tpu.dot_dimension_numbers<[1], [0], [0], [1], [0, 0, 1, 1], [], []>} : vector<8x256xbf16>, vector<256x512xbf16>, vector<8x512xf32> -> vector<8x512xf32>
    %c0_38 = arith.constant 0 : index
    %c0_39 = arith.constant 0 : index
    %53 = vector.load %arg4[%c0_38, %c0_39] : memref<1x512xf32, #tpu.memory_space<vmem>>, vector<1x512xf32>
    %54 = vector.broadcast %53 : vector<1x512xf32> to vector<8x512xf32>
    %55 = arith.addf %52, %54 : vector<8x512xf32>
    %c0_40 = arith.constant 0 : index
    %c0_41 = arith.constant 0 : index
    %56 = vector.load %arg13[%c0_40, %c0_41] : memref<8x128xf32, #tpu.memory_space<vmem>>, vector<8x128xf32>
    %57 = vector.extract_strided_slice %55 {offsets = [0, 0], sizes = [8, 128], strides = [1, 1]} : vector<8x512xf32> to vector<8x128xf32>
    %58 = arith.negf %57 : vector<8x128xf32>
    %59 = math.exp %58 : vector<8x128xf32>
    %cst_42 = arith.constant 1.000000e+00 : f32
    %60 = vector.broadcast %cst_42 : f32 to vector<8x128xf32>
    %61 = arith.addf %60, %59 : vector<8x128xf32>
    %62 = arith.divf %60, %61 : vector<8x128xf32>
    %63 = vector.extract_strided_slice %55 {offsets = [0, 128], sizes = [8, 128], strides = [1, 1]} : vector<8x512xf32> to vector<8x128xf32>
    %64 = arith.negf %63 : vector<8x128xf32>
    %65 = math.exp %64 : vector<8x128xf32>
    %cst_43 = arith.constant 1.000000e+00 : f32
    %66 = vector.broadcast %cst_43 : f32 to vector<8x128xf32>
    %67 = arith.addf %66, %65 : vector<8x128xf32>
    %68 = arith.divf %66, %67 : vector<8x128xf32>
    %69 = vector.extract_strided_slice %55 {offsets = [0, 256], sizes = [8, 128], strides = [1, 1]} : vector<8x512xf32> to vector<8x128xf32>
    %70 = math.tanh %69 : vector<8x128xf32>
    %71 = vector.extract_strided_slice %55 {offsets = [0, 384], sizes = [8, 128], strides = [1, 1]} : vector<8x512xf32> to vector<8x128xf32>
    %72 = arith.negf %71 : vector<8x128xf32>
    %73 = math.exp %72 : vector<8x128xf32>
    %cst_44 = arith.constant 1.000000e+00 : f32
    %74 = vector.broadcast %cst_44 : f32 to vector<8x128xf32>
    %75 = arith.addf %74, %73 : vector<8x128xf32>
    %76 = arith.divf %74, %75 : vector<8x128xf32>
    %77 = arith.mulf %68, %56 : vector<8x128xf32>
    %78 = arith.mulf %62, %70 : vector<8x128xf32>
    %79 = arith.addf %77, %78 : vector<8x128xf32>
    %80 = math.tanh %79 : vector<8x128xf32>
    %81 = arith.mulf %76, %80 : vector<8x128xf32>
    %c0_45 = arith.constant 0 : index
    %c0_46 = arith.constant 0 : index
    %82 = vector.load %arg12[%c0_45, %c0_46] : memref<8x128xf32, #tpu.memory_space<vmem>>, vector<8x128xf32>
    tpu.vector_store %arg12[%c0_45, %c0_46], %81 {strides = array<i32>} : memref<8x128xf32, #tpu.memory_space<vmem>>, vector<8x128xf32>,
    %c0_47 = arith.constant 0 : index
    %c0_48 = arith.constant 0 : index
    %83 = vector.load %arg13[%c0_47, %c0_48] : memref<8x128xf32, #tpu.memory_space<vmem>>, vector<8x128xf32>
    tpu.vector_store %arg13[%c0_47, %c0_48], %79 {strides = array<i32>} : memref<8x128xf32, #tpu.memory_space<vmem>>, vector<8x128xf32>,
    %84 = arith.index_cast %c0_i32 : i32 to index
    %c0_49 = arith.constant 0 : index
    %c0_50 = arith.constant 0 : index
    %85 = vector.load %arg7[%84, %c0_49, %c0_50] : memref<8x8x128xf32, #tpu.memory_space<vmem>>, vector<1x8x128xf32>
    %86 = vector.shape_cast %85 : vector<1x8x128xf32> to vector<8x128xf32>
    %87 = vector.shape_cast %81 : vector<8x128xf32> to vector<1x8x128xf32>
    tpu.vector_store %arg7[%84, %c0_49, %c0_50], %87 {strides = array<i32>} : memref<8x8x128xf32, #tpu.memory_space<vmem>>, vector<1x8x128xf32>,
    %c1_i32 = arith.constant 1 : i32
    %88 = arith.index_cast %c1_i32 : i32 to index
    %c0_51 = arith.constant 0 : index
    %c0_52 = arith.constant 0 : index
    %89 = vector.load %arg1[%88, %c0_51, %c0_52] : memref<8x8x512xf32, #tpu.memory_space<vmem>>, vector<1x8x512xf32>
    %90 = vector.shape_cast %89 : vector<1x8x512xf32> to vector<8x512xf32>
    %c0_53 = arith.constant 0 : index
    %c0_54 = arith.constant 0 : index
    %91 = vector.load %arg10[%c0_53, %c0_54] : memref<8x128xf32, #tpu.memory_space<vmem>>, vector<8x128xf32>
    %92 = arith.truncf %91 : vector<8x128xf32> to vector<8x128xbf16>
    %c0_55 = arith.constant 0 : index
    %c0_56 = arith.constant 0 : index
    %93 = vector.load %arg2[%c0_55, %c0_56] : memref<128x512xbf16, #tpu.memory_space<vmem>>, vector<128x512xbf16>
    %cst_57 = arith.constant dense<0.000000e+00> : vector<8x512xf32>
    %94 = tpu.matmul %92, %93, %cst_57 {dimension_numbers = #tpu.dot_dimension_numbers<[1], [0], [0], [1], [0, 0, 1, 1], [], []>} : vector<8x128xbf16>, vector<128x512xbf16>, vector<8x512xf32> -> vector<8x512xf32>
    %95 = arith.addf %90, %94 : vector<8x512xf32>
    %c0_58 = arith.constant 0 : index
    %c0_59 = arith.constant 0 : index
    %96 = vector.load %arg11[%c0_58, %c0_59] : memref<8x128xf32, #tpu.memory_space<vmem>>, vector<8x128xf32>
    %97 = vector.extract_strided_slice %95 {offsets = [0, 0], sizes = [8, 128], strides = [1, 1]} : vector<8x512xf32> to vector<8x128xf32>
    %98 = arith.negf %97 : vector<8x128xf32>
    %99 = math.exp %98 : vector<8x128xf32>
    %cst_60 = arith.constant 1.000000e+00 : f32
    %100 = vector.broadcast %cst_60 : f32 to vector<8x128xf32>
    %101 = arith.addf %100, %99 : vector<8x128xf32>
    %102 = arith.divf %100, %101 : vector<8x128xf32>
    %103 = vector.extract_strided_slice %95 {offsets = [0, 128], sizes = [8, 128], strides = [1, 1]} : vector<8x512xf32> to vector<8x128xf32>
    %104 = arith.negf %103 : vector<8x128xf32>
    %105 = math.exp %104 : vector<8x128xf32>
    %cst_61 = arith.constant 1.000000e+00 : f32
    %106 = vector.broadcast %cst_61 : f32 to vector<8x128xf32>
    %107 = arith.addf %106, %105 : vector<8x128xf32>
    %108 = arith.divf %106, %107 : vector<8x128xf32>
    %109 = vector.extract_strided_slice %95 {offsets = [0, 256], sizes = [8, 128], strides = [1, 1]} : vector<8x512xf32> to vector<8x128xf32>
    %110 = math.tanh %109 : vector<8x128xf32>
    %111 = vector.extract_strided_slice %95 {offsets = [0, 384], sizes = [8, 128], strides = [1, 1]} : vector<8x512xf32> to vector<8x128xf32>
    %112 = arith.negf %111 : vector<8x128xf32>
    %113 = math.exp %112 : vector<8x128xf32>
    %cst_62 = arith.constant 1.000000e+00 : f32
    %114 = vector.broadcast %cst_62 : f32 to vector<8x128xf32>
    %115 = arith.addf %114, %113 : vector<8x128xf32>
    %116 = arith.divf %114, %115 : vector<8x128xf32>
    %117 = arith.mulf %108, %96 : vector<8x128xf32>
    %118 = arith.mulf %102, %110 : vector<8x128xf32>
    %119 = arith.addf %117, %118 : vector<8x128xf32>
    %120 = math.tanh %119 : vector<8x128xf32>
    %121 = arith.mulf %116, %120 : vector<8x128xf32>
    %c0_63 = arith.constant 0 : index
    %c0_64 = arith.constant 0 : index
    %122 = vector.load %arg10[%c0_63, %c0_64] : memref<8x128xf32, #tpu.memory_space<vmem>>, vector<8x128xf32>
    tpu.vector_store %arg10[%c0_63, %c0_64], %121 {strides = array<i32>} : memref<8x128xf32, #tpu.memory_space<vmem>>, vector<8x128xf32>,
    %c0_65 = arith.constant 0 : index
    %c0_66 = arith.constant 0 : index
    %123 = vector.load %arg11[%c0_65, %c0_66] : memref<8x128xf32, #tpu.memory_space<vmem>>, vector<8x128xf32>
    tpu.vector_store %arg11[%c0_65, %c0_66], %119 {strides = array<i32>} : memref<8x128xf32, #tpu.memory_space<vmem>>, vector<8x128xf32>,
    %c0_67 = arith.constant 0 : index
    %c0_68 = arith.constant 0 : index
    %124 = vector.load %arg12[%c0_67, %c0_68] : memref<8x128xf32, #tpu.memory_space<vmem>>, vector<8x128xf32>
    %125 = tpu.concatenate %121, %124 in 1 : vector<8x128xf32>, vector<8x128xf32> -> vector<8x256xf32>
    %126 = arith.truncf %125 : vector<8x256xf32> to vector<8x256xbf16>
    %c0_69 = arith.constant 0 : index
    %c0_70 = arith.constant 0 : index
    %127 = vector.load %arg3[%c0_69, %c0_70] : memref<256x512xbf16, #tpu.memory_space<vmem>>, vector<256x512xbf16>
    %cst_71 = arith.constant dense<0.000000e+00> : vector<8x512xf32>
    %128 = tpu.matmul %126, %127, %cst_71 {dimension_numbers = #tpu.dot_dimension_numbers<[1], [0], [0], [1], [0, 0, 1, 1], [], []>} : vector<8x256xbf16>, vector<256x512xbf16>, vector<8x512xf32> -> vector<8x512xf32>
    %c0_72 = arith.constant 0 : index
    %c0_73 = arith.constant 0 : index
    %129 = vector.load %arg4[%c0_72, %c0_73] : memref<1x512xf32, #tpu.memory_space<vmem>>, vector<1x512xf32>
    %130 = vector.broadcast %129 : vector<1x512xf32> to vector<8x512xf32>
    %131 = arith.addf %128, %130 : vector<8x512xf32>
    %c0_74 = arith.constant 0 : index
    %c0_75 = arith.constant 0 : index
    %132 = vector.load %arg13[%c0_74, %c0_75] : memref<8x128xf32, #tpu.memory_space<vmem>>, vector<8x128xf32>
    %133 = vector.extract_strided_slice %131 {offsets = [0, 0], sizes = [8, 128], strides = [1, 1]} : vector<8x512xf32> to vector<8x128xf32>
    %134 = arith.negf %133 : vector<8x128xf32>
    %135 = math.exp %134 : vector<8x128xf32>
    %cst_76 = arith.constant 1.000000e+00 : f32
    %136 = vector.broadcast %cst_76 : f32 to vector<8x128xf32>
    %137 = arith.addf %136, %135 : vector<8x128xf32>
    %138 = arith.divf %136, %137 : vector<8x128xf32>
    %139 = vector.extract_strided_slice %131 {offsets = [0, 128], sizes = [8, 128], strides = [1, 1]} : vector<8x512xf32> to vector<8x128xf32>
    %140 = arith.negf %139 : vector<8x128xf32>
    %141 = math.exp %140 : vector<8x128xf32>
    %cst_77 = arith.constant 1.000000e+00 : f32
    %142 = vector.broadcast %cst_77 : f32 to vector<8x128xf32>
    %143 = arith.addf %142, %141 : vector<8x128xf32>
    %144 = arith.divf %142, %143 : vector<8x128xf32>
    %145 = vector.extract_strided_slice %131 {offsets = [0, 256], sizes = [8, 128], strides = [1, 1]} : vector<8x512xf32> to vector<8x128xf32>
    %146 = math.tanh %145 : vector<8x128xf32>
    %147 = vector.extract_strided_slice %131 {offsets = [0, 384], sizes = [8, 128], strides = [1, 1]} : vector<8x512xf32> to vector<8x128xf32>
    %148 = arith.negf %147 : vector<8x128xf32>
    %149 = math.exp %148 : vector<8x128xf32>
    %cst_78 = arith.constant 1.000000e+00 : f32
    %150 = vector.broadcast %cst_78 : f32 to vector<8x128xf32>
    %151 = arith.addf %150, %149 : vector<8x128xf32>
    %152 = arith.divf %150, %151 : vector<8x128xf32>
    %153 = arith.mulf %144, %132 : vector<8x128xf32>
    %154 = arith.mulf %138, %146 : vector<8x128xf32>
    %155 = arith.addf %153, %154 : vector<8x128xf32>
    %156 = math.tanh %155 : vector<8x128xf32>
    %157 = arith.mulf %152, %156 : vector<8x128xf32>
    %c0_79 = arith.constant 0 : index
    %c0_80 = arith.constant 0 : index
    %158 = vector.load %arg12[%c0_79, %c0_80] : memref<8x128xf32, #tpu.memory_space<vmem>>, vector<8x128xf32>
    tpu.vector_store %arg12[%c0_79, %c0_80], %157 {strides = array<i32>} : memref<8x128xf32, #tpu.memory_space<vmem>>, vector<8x128xf32>,
    %c0_81 = arith.constant 0 : index
    %c0_82 = arith.constant 0 : index
    %159 = vector.load %arg13[%c0_81, %c0_82] : memref<8x128xf32, #tpu.memory_space<vmem>>, vector<8x128xf32>
    tpu.vector_store %arg13[%c0_81, %c0_82], %155 {strides = array<i32>} : memref<8x128xf32, #tpu.memory_space<vmem>>, vector<8x128xf32>,
    %160 = arith.index_cast %c1_i32 : i32 to index
    %c0_83 = arith.constant 0 : index
    %c0_84 = arith.constant 0 : index
    %161 = vector.load %arg7[%160, %c0_83, %c0_84] : memref<8x8x128xf32, #tpu.memory_space<vmem>>, vector<1x8x128xf32>
    %162 = vector.shape_cast %161 : vector<1x8x128xf32> to vector<8x128xf32>
    %163 = vector.shape_cast %157 : vector<8x128xf32> to vector<1x8x128xf32>
    tpu.vector_store %arg7[%160, %c0_83, %c0_84], %163 {strides = array<i32>} : memref<8x8x128xf32, #tpu.memory_space<vmem>>, vector<1x8x128xf32>,
    %c2_i32 = arith.constant 2 : i32
    %164 = arith.index_cast %c2_i32 : i32 to index
    %c0_85 = arith.constant 0 : index
    %c0_86 = arith.constant 0 : index
    %165 = vector.load %arg1[%164, %c0_85, %c0_86] : memref<8x8x512xf32, #tpu.memory_space<vmem>>, vector<1x8x512xf32>
    %166 = vector.shape_cast %165 : vector<1x8x512xf32> to vector<8x512xf32>
    %c0_87 = arith.constant 0 : index
    %c0_88 = arith.constant 0 : index
    %167 = vector.load %arg10[%c0_87, %c0_88] : memref<8x128xf32, #tpu.memory_space<vmem>>, vector<8x128xf32>
    %168 = arith.truncf %167 : vector<8x128xf32> to vector<8x128xbf16>
    %c0_89 = arith.constant 0 : index
    %c0_90 = arith.constant 0 : index
    %169 = vector.load %arg2[%c0_89, %c0_90] : memref<128x512xbf16, #tpu.memory_space<vmem>>, vector<128x512xbf16>
    %cst_91 = arith.constant dense<0.000000e+00> : vector<8x512xf32>
    %170 = tpu.matmul %168, %169, %cst_91 {dimension_numbers = #tpu.dot_dimension_numbers<[1], [0], [0], [1], [0, 0, 1, 1], [], []>} : vector<8x128xbf16>, vector<128x512xbf16>, vector<8x512xf32> -> vector<8x512xf32>
    %171 = arith.addf %166, %170 : vector<8x512xf32>
    %c0_92 = arith.constant 0 : index
    %c0_93 = arith.constant 0 : index
    %172 = vector.load %arg11[%c0_92, %c0_93] : memref<8x128xf32, #tpu.memory_space<vmem>>, vector<8x128xf32>
    %173 = vector.extract_strided_slice %171 {offsets = [0, 0], sizes = [8, 128], strides = [1, 1]} : vector<8x512xf32> to vector<8x128xf32>
    %174 = arith.negf %173 : vector<8x128xf32>
    %175 = math.exp %174 : vector<8x128xf32>
    %cst_94 = arith.constant 1.000000e+00 : f32
    %176 = vector.broadcast %cst_94 : f32 to vector<8x128xf32>
    %177 = arith.addf %176, %175 : vector<8x128xf32>
    %178 = arith.divf %176, %177 : vector<8x128xf32>
    %179 = vector.extract_strided_slice %171 {offsets = [0, 128], sizes = [8, 128], strides = [1, 1]} : vector<8x512xf32> to vector<8x128xf32>
    %180 = arith.negf %179 : vector<8x128xf32>
    %181 = math.exp %180 : vector<8x128xf32>
    %cst_95 = arith.constant 1.000000e+00 : f32
    %182 = vector.broadcast %cst_95 : f32 to vector<8x128xf32>
    %183 = arith.addf %182, %181 : vector<8x128xf32>
    %184 = arith.divf %182, %183 : vector<8x128xf32>
    %185 = vector.extract_strided_slice %171 {offsets = [0, 256], sizes = [8, 128], strides = [1, 1]} : vector<8x512xf32> to vector<8x128xf32>
    %186 = math.tanh %185 : vector<8x128xf32>
    %187 = vector.extract_strided_slice %171 {offsets = [0, 384], sizes = [8, 128], strides = [1, 1]} : vector<8x512xf32> to vector<8x128xf32>
    %188 = arith.negf %187 : vector<8x128xf32>
    %189 = math.exp %188 : vector<8x128xf32>
    %cst_96 = arith.constant 1.000000e+00 : f32
    %190 = vector.broadcast %cst_96 : f32 to vector<8x128xf32>
    %191 = arith.addf %190, %189 : vector<8x128xf32>
    %192 = arith.divf %190, %191 : vector<8x128xf32>
    %193 = arith.mulf %184, %172 : vector<8x128xf32>
    %194 = arith.mulf %178, %186 : vector<8x128xf32>
    %195 = arith.addf %193, %194 : vector<8x128xf32>
    %196 = math.tanh %195 : vector<8x128xf32>
    %197 = arith.mulf %192, %196 : vector<8x128xf32>
    %c0_97 = arith.constant 0 : index
    %c0_98 = arith.constant 0 : index
    %198 = vector.load %arg10[%c0_97, %c0_98] : memref<8x128xf32, #tpu.memory_space<vmem>>, vector<8x128xf32>
    tpu.vector_store %arg10[%c0_97, %c0_98], %197 {strides = array<i32>} : memref<8x128xf32, #tpu.memory_space<vmem>>, vector<8x128xf32>,
    %c0_99 = arith.constant 0 : index
    %c0_100 = arith.constant 0 : index
    %199 = vector.load %arg11[%c0_99, %c0_100] : memref<8x128xf32, #tpu.memory_space<vmem>>, vector<8x128xf32>
    tpu.vector_store %arg11[%c0_99, %c0_100], %195 {strides = array<i32>} : memref<8x128xf32, #tpu.memory_space<vmem>>, vector<8x128xf32>,
    %c0_101 = arith.constant 0 : index
    %c0_102 = arith.constant 0 : index
    %200 = vector.load %arg12[%c0_101, %c0_102] : memref<8x128xf32, #tpu.memory_space<vmem>>, vector<8x128xf32>
    %201 = tpu.concatenate %197, %200 in 1 : vector<8x128xf32>, vector<8x128xf32> -> vector<8x256xf32>
    %202 = arith.truncf %201 : vector<8x256xf32> to vector<8x256xbf16>
    %c0_103 = arith.constant 0 : index
    %c0_104 = arith.constant 0 : index
    %203 = vector.load %arg3[%c0_103, %c0_104] : memref<256x512xbf16, #tpu.memory_space<vmem>>, vector<256x512xbf16>
    %cst_105 = arith.constant dense<0.000000e+00> : vector<8x512xf32>
    %204 = tpu.matmul %202, %203, %cst_105 {dimension_numbers = #tpu.dot_dimension_numbers<[1], [0], [0], [1], [0, 0, 1, 1], [], []>} : vector<8x256xbf16>, vector<256x512xbf16>, vector<8x512xf32> -> vector<8x512xf32>
    %c0_106 = arith.constant 0 : index
    %c0_107 = arith.constant 0 : index
    %205 = vector.load %arg4[%c0_106, %c0_107] : memref<1x512xf32, #tpu.memory_space<vmem>>, vector<1x512xf32>
    %206 = vector.broadcast %205 : vector<1x512xf32> to vector<8x512xf32>
    %207 = arith.addf %204, %206 : vector<8x512xf32>
    %c0_108 = arith.constant 0 : index
    %c0_109 = arith.constant 0 : index
    %208 = vector.load %arg13[%c0_108, %c0_109] : memref<8x128xf32, #tpu.memory_space<vmem>>, vector<8x128xf32>
    %209 = vector.extract_strided_slice %207 {offsets = [0, 0], sizes = [8, 128], strides = [1, 1]} : vector<8x512xf32> to vector<8x128xf32>
    %210 = arith.negf %209 : vector<8x128xf32>
    %211 = math.exp %210 : vector<8x128xf32>
    %cst_110 = arith.constant 1.000000e+00 : f32
    %212 = vector.broadcast %cst_110 : f32 to vector<8x128xf32>
    %213 = arith.addf %212, %211 : vector<8x128xf32>
    %214 = arith.divf %212, %213 : vector<8x128xf32>
    %215 = vector.extract_strided_slice %207 {offsets = [0, 128], sizes = [8, 128], strides = [1, 1]} : vector<8x512xf32> to vector<8x128xf32>
    %216 = arith.negf %215 : vector<8x128xf32>
    %217 = math.exp %216 : vector<8x128xf32>
    %cst_111 = arith.constant 1.000000e+00 : f32
    %218 = vector.broadcast %cst_111 : f32 to vector<8x128xf32>
    %219 = arith.addf %218, %217 : vector<8x128xf32>
    %220 = arith.divf %218, %219 : vector<8x128xf32>
    %221 = vector.extract_strided_slice %207 {offsets = [0, 256], sizes = [8, 128], strides = [1, 1]} : vector<8x512xf32> to vector<8x128xf32>
    %222 = math.tanh %221 : vector<8x128xf32>
    %223 = vector.extract_strided_slice %207 {offsets = [0, 384], sizes = [8, 128], strides = [1, 1]} : vector<8x512xf32> to vector<8x128xf32>
    %224 = arith.negf %223 : vector<8x128xf32>
    %225 = math.exp %224 : vector<8x128xf32>
    %cst_112 = arith.constant 1.000000e+00 : f32
    %226 = vector.broadcast %cst_112 : f32 to vector<8x128xf32>
    %227 = arith.addf %226, %225 : vector<8x128xf32>
    %228 = arith.divf %226, %227 : vector<8x128xf32>
    %229 = arith.mulf %220, %208 : vector<8x128xf32>
    %230 = arith.mulf %214, %222 : vector<8x128xf32>
    %231 = arith.addf %229, %230 : vector<8x128xf32>
    %232 = math.tanh %231 : vector<8x128xf32>
    %233 = arith.mulf %228, %232 : vector<8x128xf32>
    %c0_113 = arith.constant 0 : index
    %c0_114 = arith.constant 0 : index
    %234 = vector.load %arg12[%c0_113, %c0_114] : memref<8x128xf32, #tpu.memory_space<vmem>>, vector<8x128xf32>
    tpu.vector_store %arg12[%c0_113, %c0_114], %233 {strides = array<i32>} : memref<8x128xf32, #tpu.memory_space<vmem>>, vector<8x128xf32>,
    %c0_115 = arith.constant 0 : index
    %c0_116 = arith.constant 0 : index
    %235 = vector.load %arg13[%c0_115, %c0_116] : memref<8x128xf32, #tpu.memory_space<vmem>>, vector<8x128xf32>
    tpu.vector_store %arg13[%c0_115, %c0_116], %231 {strides = array<i32>} : memref<8x128xf32, #tpu.memory_space<vmem>>, vector<8x128xf32>,
    %236 = arith.index_cast %c2_i32 : i32 to index
    %c0_117 = arith.constant 0 : index
    %c0_118 = arith.constant 0 : index
    %237 = vector.load %arg7[%236, %c0_117, %c0_118] : memref<8x8x128xf32, #tpu.memory_space<vmem>>, vector<1x8x128xf32>
    %238 = vector.shape_cast %237 : vector<1x8x128xf32> to vector<8x128xf32>
    %239 = vector.shape_cast %233 : vector<8x128xf32> to vector<1x8x128xf32>
    tpu.vector_store %arg7[%236, %c0_117, %c0_118], %239 {strides = array<i32>} : memref<8x8x128xf32, #tpu.memory_space<vmem>>, vector<1x8x128xf32>,
    %c3_i32 = arith.constant 3 : i32
    %240 = arith.index_cast %c3_i32 : i32 to index
    %c0_119 = arith.constant 0 : index
    %c0_120 = arith.constant 0 : index
    %241 = vector.load %arg1[%240, %c0_119, %c0_120] : memref<8x8x512xf32, #tpu.memory_space<vmem>>, vector<1x8x512xf32>
    %242 = vector.shape_cast %241 : vector<1x8x512xf32> to vector<8x512xf32>
    %c0_121 = arith.constant 0 : index
    %c0_122 = arith.constant 0 : index
    %243 = vector.load %arg10[%c0_121, %c0_122] : memref<8x128xf32, #tpu.memory_space<vmem>>, vector<8x128xf32>
    %244 = arith.truncf %243 : vector<8x128xf32> to vector<8x128xbf16>
    %c0_123 = arith.constant 0 : index
    %c0_124 = arith.constant 0 : index
    %245 = vector.load %arg2[%c0_123, %c0_124] : memref<128x512xbf16, #tpu.memory_space<vmem>>, vector<128x512xbf16>
    %cst_125 = arith.constant dense<0.000000e+00> : vector<8x512xf32>
    %246 = tpu.matmul %244, %245, %cst_125 {dimension_numbers = #tpu.dot_dimension_numbers<[1], [0], [0], [1], [0, 0, 1, 1], [], []>} : vector<8x128xbf16>, vector<128x512xbf16>, vector<8x512xf32> -> vector<8x512xf32>
    %247 = arith.addf %242, %246 : vector<8x512xf32>
    %c0_126 = arith.constant 0 : index
    %c0_127 = arith.constant 0 : index
    %248 = vector.load %arg11[%c0_126, %c0_127] : memref<8x128xf32, #tpu.memory_space<vmem>>, vector<8x128xf32>
    %249 = vector.extract_strided_slice %247 {offsets = [0, 0], sizes = [8, 128], strides = [1, 1]} : vector<8x512xf32> to vector<8x128xf32>
    %250 = arith.negf %249 : vector<8x128xf32>
    %251 = math.exp %250 : vector<8x128xf32>
    %cst_128 = arith.constant 1.000000e+00 : f32
    %252 = vector.broadcast %cst_128 : f32 to vector<8x128xf32>
    %253 = arith.addf %252, %251 : vector<8x128xf32>
    %254 = arith.divf %252, %253 : vector<8x128xf32>
    %255 = vector.extract_strided_slice %247 {offsets = [0, 128], sizes = [8, 128], strides = [1, 1]} : vector<8x512xf32> to vector<8x128xf32>
    %256 = arith.negf %255 : vector<8x128xf32>
    %257 = math.exp %256 : vector<8x128xf32>
    %cst_129 = arith.constant 1.000000e+00 : f32
    %258 = vector.broadcast %cst_129 : f32 to vector<8x128xf32>
    %259 = arith.addf %258, %257 : vector<8x128xf32>
    %260 = arith.divf %258, %259 : vector<8x128xf32>
    %261 = vector.extract_strided_slice %247 {offsets = [0, 256], sizes = [8, 128], strides = [1, 1]} : vector<8x512xf32> to vector<8x128xf32>
    %262 = math.tanh %261 : vector<8x128xf32>
    %263 = vector.extract_strided_slice %247 {offsets = [0, 384], sizes = [8, 128], strides = [1, 1]} : vector<8x512xf32> to vector<8x128xf32>
    %264 = arith.negf %263 : vector<8x128xf32>
    %265 = math.exp %264 : vector<8x128xf32>
    %cst_130 = arith.constant 1.000000e+00 : f32
    %266 = vector.broadcast %cst_130 : f32 to vector<8x128xf32>
    %267 = arith.addf %266, %265 : vector<8x128xf32>
    %268 = arith.divf %266, %267 : vector<8x128xf32>
    %269 = arith.mulf %260, %248 : vector<8x128xf32>
    %270 = arith.mulf %254, %262 : vector<8x128xf32>
    %271 = arith.addf %269, %270 : vector<8x128xf32>
    %272 = math.tanh %271 : vector<8x128xf32>
    %273 = arith.mulf %268, %272 : vector<8x128xf32>
    %c0_131 = arith.constant 0 : index
    %c0_132 = arith.constant 0 : index
    %274 = vector.load %arg10[%c0_131, %c0_132] : memref<8x128xf32, #tpu.memory_space<vmem>>, vector<8x128xf32>
    tpu.vector_store %arg10[%c0_131, %c0_132], %273 {strides = array<i32>} : memref<8x128xf32, #tpu.memory_space<vmem>>, vector<8x128xf32>,
    %c0_133 = arith.constant 0 : index
    %c0_134 = arith.constant 0 : index
    %275 = vector.load %arg11[%c0_133, %c0_134] : memref<8x128xf32, #tpu.memory_space<vmem>>, vector<8x128xf32>
    tpu.vector_store %arg11[%c0_133, %c0_134], %271 {strides = array<i32>} : memref<8x128xf32, #tpu.memory_space<vmem>>, vector<8x128xf32>,
    %c0_135 = arith.constant 0 : index
    %c0_136 = arith.constant 0 : index
    %276 = vector.load %arg12[%c0_135, %c0_136] : memref<8x128xf32, #tpu.memory_space<vmem>>, vector<8x128xf32>
    %277 = tpu.concatenate %273, %276 in 1 : vector<8x128xf32>, vector<8x128xf32> -> vector<8x256xf32>
    %278 = arith.truncf %277 : vector<8x256xf32> to vector<8x256xbf16>
    %c0_137 = arith.constant 0 : index
    %c0_138 = arith.constant 0 : index
    %279 = vector.load %arg3[%c0_137, %c0_138] : memref<256x512xbf16, #tpu.memory_space<vmem>>, vector<256x512xbf16>
    %cst_139 = arith.constant dense<0.000000e+00> : vector<8x512xf32>
    %280 = tpu.matmul %278, %279, %cst_139 {dimension_numbers = #tpu.dot_dimension_numbers<[1], [0], [0], [1], [0, 0, 1, 1], [], []>} : vector<8x256xbf16>, vector<256x512xbf16>, vector<8x512xf32> -> vector<8x512xf32>
    %c0_140 = arith.constant 0 : index
    %c0_141 = arith.constant 0 : index
    %281 = vector.load %arg4[%c0_140, %c0_141] : memref<1x512xf32, #tpu.memory_space<vmem>>, vector<1x512xf32>
    %282 = vector.broadcast %281 : vector<1x512xf32> to vector<8x512xf32>
    %283 = arith.addf %280, %282 : vector<8x512xf32>
    %c0_142 = arith.constant 0 : index
    %c0_143 = arith.constant 0 : index
    %284 = vector.load %arg13[%c0_142, %c0_143] : memref<8x128xf32, #tpu.memory_space<vmem>>, vector<8x128xf32>
    %285 = vector.extract_strided_slice %283 {offsets = [0, 0], sizes = [8, 128], strides = [1, 1]} : vector<8x512xf32> to vector<8x128xf32>
    %286 = arith.negf %285 : vector<8x128xf32>
    %287 = math.exp %286 : vector<8x128xf32>
    %cst_144 = arith.constant 1.000000e+00 : f32
    %288 = vector.broadcast %cst_144 : f32 to vector<8x128xf32>
    %289 = arith.addf %288, %287 : vector<8x128xf32>
    %290 = arith.divf %288, %289 : vector<8x128xf32>
    %291 = vector.extract_strided_slice %283 {offsets = [0, 128], sizes = [8, 128], strides = [1, 1]} : vector<8x512xf32> to vector<8x128xf32>
    %292 = arith.negf %291 : vector<8x128xf32>
    %293 = math.exp %292 : vector<8x128xf32>
    %cst_145 = arith.constant 1.000000e+00 : f32
    %294 = vector.broadcast %cst_145 : f32 to vector<8x128xf32>
    %295 = arith.addf %294, %293 : vector<8x128xf32>
    %296 = arith.divf %294, %295 : vector<8x128xf32>
    %297 = vector.extract_strided_slice %283 {offsets = [0, 256], sizes = [8, 128], strides = [1, 1]} : vector<8x512xf32> to vector<8x128xf32>
    %298 = math.tanh %297 : vector<8x128xf32>
    %299 = vector.extract_strided_slice %283 {offsets = [0, 384], sizes = [8, 128], strides = [1, 1]} : vector<8x512xf32> to vector<8x128xf32>
    %300 = arith.negf %299 : vector<8x128xf32>
    %301 = math.exp %300 : vector<8x128xf32>
    %cst_146 = arith.constant 1.000000e+00 : f32
    %302 = vector.broadcast %cst_146 : f32 to vector<8x128xf32>
    %303 = arith.addf %302, %301 : vector<8x128xf32>
    %304 = arith.divf %302, %303 : vector<8x128xf32>
    %305 = arith.mulf %296, %284 : vector<8x128xf32>
    %306 = arith.mulf %290, %298 : vector<8x128xf32>
    %307 = arith.addf %305, %306 : vector<8x128xf32>
    %308 = math.tanh %307 : vector<8x128xf32>
    %309 = arith.mulf %304, %308 : vector<8x128xf32>
    %c0_147 = arith.constant 0 : index
    %c0_148 = arith.constant 0 : index
    %310 = vector.load %arg12[%c0_147, %c0_148] : memref<8x128xf32, #tpu.memory_space<vmem>>, vector<8x128xf32>
    tpu.vector_store %arg12[%c0_147, %c0_148], %309 {strides = array<i32>} : memref<8x128xf32, #tpu.memory_space<vmem>>, vector<8x128xf32>,
    %c0_149 = arith.constant 0 : index
    %c0_150 = arith.constant 0 : index
    %311 = vector.load %arg13[%c0_149, %c0_150] : memref<8x128xf32, #tpu.memory_space<vmem>>, vector<8x128xf32>
    tpu.vector_store %arg13[%c0_149, %c0_150], %307 {strides = array<i32>} : memref<8x128xf32, #tpu.memory_space<vmem>>, vector<8x128xf32>,
    %312 = arith.index_cast %c3_i32 : i32 to index
    %c0_151 = arith.constant 0 : index
    %c0_152 = arith.constant 0 : index
    %313 = vector.load %arg7[%312, %c0_151, %c0_152] : memref<8x8x128xf32, #tpu.memory_space<vmem>>, vector<1x8x128xf32>
    %314 = vector.shape_cast %313 : vector<1x8x128xf32> to vector<8x128xf32>
    %315 = vector.shape_cast %309 : vector<8x128xf32> to vector<1x8x128xf32>
    tpu.vector_store %arg7[%312, %c0_151, %c0_152], %315 {strides = array<i32>} : memref<8x8x128xf32, #tpu.memory_space<vmem>>, vector<1x8x128xf32>,
    %c4_i32 = arith.constant 4 : i32
    %316 = arith.index_cast %c4_i32 : i32 to index
    %c0_153 = arith.constant 0 : index
    %c0_154 = arith.constant 0 : index
    %317 = vector.load %arg1[%316, %c0_153, %c0_154] : memref<8x8x512xf32, #tpu.memory_space<vmem>>, vector<1x8x512xf32>
    %318 = vector.shape_cast %317 : vector<1x8x512xf32> to vector<8x512xf32>
    %c0_155 = arith.constant 0 : index
    %c0_156 = arith.constant 0 : index
    %319 = vector.load %arg10[%c0_155, %c0_156] : memref<8x128xf32, #tpu.memory_space<vmem>>, vector<8x128xf32>
    %320 = arith.truncf %319 : vector<8x128xf32> to vector<8x128xbf16>
    %c0_157 = arith.constant 0 : index
    %c0_158 = arith.constant 0 : index
    %321 = vector.load %arg2[%c0_157, %c0_158] : memref<128x512xbf16, #tpu.memory_space<vmem>>, vector<128x512xbf16>
    %cst_159 = arith.constant dense<0.000000e+00> : vector<8x512xf32>
    %322 = tpu.matmul %320, %321, %cst_159 {dimension_numbers = #tpu.dot_dimension_numbers<[1], [0], [0], [1], [0, 0, 1, 1], [], []>} : vector<8x128xbf16>, vector<128x512xbf16>, vector<8x512xf32> -> vector<8x512xf32>
    %323 = arith.addf %318, %322 : vector<8x512xf32>
    %c0_160 = arith.constant 0 : index
    %c0_161 = arith.constant 0 : index
    %324 = vector.load %arg11[%c0_160, %c0_161] : memref<8x128xf32, #tpu.memory_space<vmem>>, vector<8x128xf32>
    %325 = vector.extract_strided_slice %323 {offsets = [0, 0], sizes = [8, 128], strides = [1, 1]} : vector<8x512xf32> to vector<8x128xf32>
    %326 = arith.negf %325 : vector<8x128xf32>
    %327 = math.exp %326 : vector<8x128xf32>
    %cst_162 = arith.constant 1.000000e+00 : f32
    %328 = vector.broadcast %cst_162 : f32 to vector<8x128xf32>
    %329 = arith.addf %328, %327 : vector<8x128xf32>
    %330 = arith.divf %328, %329 : vector<8x128xf32>
    %331 = vector.extract_strided_slice %323 {offsets = [0, 128], sizes = [8, 128], strides = [1, 1]} : vector<8x512xf32> to vector<8x128xf32>
    %332 = arith.negf %331 : vector<8x128xf32>
    %333 = math.exp %332 : vector<8x128xf32>
    %cst_163 = arith.constant 1.000000e+00 : f32
    %334 = vector.broadcast %cst_163 : f32 to vector<8x128xf32>
    %335 = arith.addf %334, %333 : vector<8x128xf32>
    %336 = arith.divf %334, %335 : vector<8x128xf32>
    %337 = vector.extract_strided_slice %323 {offsets = [0, 256], sizes = [8, 128], strides = [1, 1]} : vector<8x512xf32> to vector<8x128xf32>
    %338 = math.tanh %337 : vector<8x128xf32>
    %339 = vector.extract_strided_slice %323 {offsets = [0, 384], sizes = [8, 128], strides = [1, 1]} : vector<8x512xf32> to vector<8x128xf32>
    %340 = arith.negf %339 : vector<8x128xf32>
    %341 = math.exp %340 : vector<8x128xf32>
    %cst_164 = arith.constant 1.000000e+00 : f32
    %342 = vector.broadcast %cst_164 : f32 to vector<8x128xf32>
    %343 = arith.addf %342, %341 : vector<8x128xf32>
    %344 = arith.divf %342, %343 : vector<8x128xf32>
    %345 = arith.mulf %336, %324 : vector<8x128xf32>
    %346 = arith.mulf %330, %338 : vector<8x128xf32>
    %347 = arith.addf %345, %346 : vector<8x128xf32>
    %348 = math.tanh %347 : vector<8x128xf32>
    %349 = arith.mulf %344, %348 : vector<8x128xf32>
    %c0_165 = arith.constant 0 : index
    %c0_166 = arith.constant 0 : index
    %350 = vector.load %arg10[%c0_165, %c0_166] : memref<8x128xf32, #tpu.memory_space<vmem>>, vector<8x128xf32>
    tpu.vector_store %arg10[%c0_165, %c0_166], %349 {strides = array<i32>} : memref<8x128xf32, #tpu.memory_space<vmem>>, vector<8x128xf32>,
    %c0_167 = arith.constant 0 : index
    %c0_168 = arith.constant 0 : index
    %351 = vector.load %arg11[%c0_167, %c0_168] : memref<8x128xf32, #tpu.memory_space<vmem>>, vector<8x128xf32>
    tpu.vector_store %arg11[%c0_167, %c0_168], %347 {strides = array<i32>} : memref<8x128xf32, #tpu.memory_space<vmem>>, vector<8x128xf32>,
    %c0_169 = arith.constant 0 : index
    %c0_170 = arith.constant 0 : index
    %352 = vector.load %arg12[%c0_169, %c0_170] : memref<8x128xf32, #tpu.memory_space<vmem>>, vector<8x128xf32>
    %353 = tpu.concatenate %349, %352 in 1 : vector<8x128xf32>, vector<8x128xf32> -> vector<8x256xf32>
    %354 = arith.truncf %353 : vector<8x256xf32> to vector<8x256xbf16>
    %c0_171 = arith.constant 0 : index
    %c0_172 = arith.constant 0 : index
    %355 = vector.load %arg3[%c0_171, %c0_172] : memref<256x512xbf16, #tpu.memory_space<vmem>>, vector<256x512xbf16>
    %cst_173 = arith.constant dense<0.000000e+00> : vector<8x512xf32>
    %356 = tpu.matmul %354, %355, %cst_173 {dimension_numbers = #tpu.dot_dimension_numbers<[1], [0], [0], [1], [0, 0, 1, 1], [], []>} : vector<8x256xbf16>, vector<256x512xbf16>, vector<8x512xf32> -> vector<8x512xf32>
    %c0_174 = arith.constant 0 : index
    %c0_175 = arith.constant 0 : index
    %357 = vector.load %arg4[%c0_174, %c0_175] : memref<1x512xf32, #tpu.memory_space<vmem>>, vector<1x512xf32>
    %358 = vector.broadcast %357 : vector<1x512xf32> to vector<8x512xf32>
    %359 = arith.addf %356, %358 : vector<8x512xf32>
    %c0_176 = arith.constant 0 : index
    %c0_177 = arith.constant 0 : index
    %360 = vector.load %arg13[%c0_176, %c0_177] : memref<8x128xf32, #tpu.memory_space<vmem>>, vector<8x128xf32>
    %361 = vector.extract_strided_slice %359 {offsets = [0, 0], sizes = [8, 128], strides = [1, 1]} : vector<8x512xf32> to vector<8x128xf32>
    %362 = arith.negf %361 : vector<8x128xf32>
    %363 = math.exp %362 : vector<8x128xf32>
    %cst_178 = arith.constant 1.000000e+00 : f32
    %364 = vector.broadcast %cst_178 : f32 to vector<8x128xf32>
    %365 = arith.addf %364, %363 : vector<8x128xf32>
    %366 = arith.divf %364, %365 : vector<8x128xf32>
    %367 = vector.extract_strided_slice %359 {offsets = [0, 128], sizes = [8, 128], strides = [1, 1]} : vector<8x512xf32> to vector<8x128xf32>
    %368 = arith.negf %367 : vector<8x128xf32>
    %369 = math.exp %368 : vector<8x128xf32>
    %cst_179 = arith.constant 1.000000e+00 : f32
    %370 = vector.broadcast %cst_179 : f32 to vector<8x128xf32>
    %371 = arith.addf %370, %369 : vector<8x128xf32>
    %372 = arith.divf %370, %371 : vector<8x128xf32>
    %373 = vector.extract_strided_slice %359 {offsets = [0, 256], sizes = [8, 128], strides = [1, 1]} : vector<8x512xf32> to vector<8x128xf32>
    %374 = math.tanh %373 : vector<8x128xf32>
    %375 = vector.extract_strided_slice %359 {offsets = [0, 384], sizes = [8, 128], strides = [1, 1]} : vector<8x512xf32> to vector<8x128xf32>
    %376 = arith.negf %375 : vector<8x128xf32>
    %377 = math.exp %376 : vector<8x128xf32>
    %cst_180 = arith.constant 1.000000e+00 : f32
    %378 = vector.broadcast %cst_180 : f32 to vector<8x128xf32>
    %379 = arith.addf %378, %377 : vector<8x128xf32>
    %380 = arith.divf %378, %379 : vector<8x128xf32>
    %381 = arith.mulf %372, %360 : vector<8x128xf32>
    %382 = arith.mulf %366, %374 : vector<8x128xf32>
    %383 = arith.addf %381, %382 : vector<8x128xf32>
    %384 = math.tanh %383 : vector<8x128xf32>
    %385 = arith.mulf %380, %384 : vector<8x128xf32>
    %c0_181 = arith.constant 0 : index
    %c0_182 = arith.constant 0 : index
    %386 = vector.load %arg12[%c0_181, %c0_182] : memref<8x128xf32, #tpu.memory_space<vmem>>, vector<8x128xf32>
    tpu.vector_store %arg12[%c0_181, %c0_182], %385 {strides = array<i32>} : memref<8x128xf32, #tpu.memory_space<vmem>>, vector<8x128xf32>,
    %c0_183 = arith.constant 0 : index
    %c0_184 = arith.constant 0 : index
    %387 = vector.load %arg13[%c0_183, %c0_184] : memref<8x128xf32, #tpu.memory_space<vmem>>, vector<8x128xf32>
    tpu.vector_store %arg13[%c0_183, %c0_184], %383 {strides = array<i32>} : memref<8x128xf32, #tpu.memory_space<vmem>>, vector<8x128xf32>,
    %388 = arith.index_cast %c4_i32 : i32 to index
    %c0_185 = arith.constant 0 : index
    %c0_186 = arith.constant 0 : index
    %389 = vector.load %arg7[%388, %c0_185, %c0_186] : memref<8x8x128xf32, #tpu.memory_space<vmem>>, vector<1x8x128xf32>
    %390 = vector.shape_cast %389 : vector<1x8x128xf32> to vector<8x128xf32>
    %391 = vector.shape_cast %385 : vector<8x128xf32> to vector<1x8x128xf32>
    tpu.vector_store %arg7[%388, %c0_185, %c0_186], %391 {strides = array<i32>} : memref<8x8x128xf32, #tpu.memory_space<vmem>>, vector<1x8x128xf32>,
    %c5_i32 = arith.constant 5 : i32
    %392 = arith.index_cast %c5_i32 : i32 to index
    %c0_187 = arith.constant 0 : index
    %c0_188 = arith.constant 0 : index
    %393 = vector.load %arg1[%392, %c0_187, %c0_188] : memref<8x8x512xf32, #tpu.memory_space<vmem>>, vector<1x8x512xf32>
    %394 = vector.shape_cast %393 : vector<1x8x512xf32> to vector<8x512xf32>
    %c0_189 = arith.constant 0 : index
    %c0_190 = arith.constant 0 : index
    %395 = vector.load %arg10[%c0_189, %c0_190] : memref<8x128xf32, #tpu.memory_space<vmem>>, vector<8x128xf32>
    %396 = arith.truncf %395 : vector<8x128xf32> to vector<8x128xbf16>
    %c0_191 = arith.constant 0 : index
    %c0_192 = arith.constant 0 : index
    %397 = vector.load %arg2[%c0_191, %c0_192] : memref<128x512xbf16, #tpu.memory_space<vmem>>, vector<128x512xbf16>
    %cst_193 = arith.constant dense<0.000000e+00> : vector<8x512xf32>
    %398 = tpu.matmul %396, %397, %cst_193 {dimension_numbers = #tpu.dot_dimension_numbers<[1], [0], [0], [1], [0, 0, 1, 1], [], []>} : vector<8x128xbf16>, vector<128x512xbf16>, vector<8x512xf32> -> vector<8x512xf32>
    %399 = arith.addf %394, %398 : vector<8x512xf32>
    %c0_194 = arith.constant 0 : index
    %c0_195 = arith.constant 0 : index
    %400 = vector.load %arg11[%c0_194, %c0_195] : memref<8x128xf32, #tpu.memory_space<vmem>>, vector<8x128xf32>
    %401 = vector.extract_strided_slice %399 {offsets = [0, 0], sizes = [8, 128], strides = [1, 1]} : vector<8x512xf32> to vector<8x128xf32>
    %402 = arith.negf %401 : vector<8x128xf32>
    %403 = math.exp %402 : vector<8x128xf32>
    %cst_196 = arith.constant 1.000000e+00 : f32
    %404 = vector.broadcast %cst_196 : f32 to vector<8x128xf32>
    %405 = arith.addf %404, %403 : vector<8x128xf32>
    %406 = arith.divf %404, %405 : vector<8x128xf32>
    %407 = vector.extract_strided_slice %399 {offsets = [0, 128], sizes = [8, 128], strides = [1, 1]} : vector<8x512xf32> to vector<8x128xf32>
    %408 = arith.negf %407 : vector<8x128xf32>
    %409 = math.exp %408 : vector<8x128xf32>
    %cst_197 = arith.constant 1.000000e+00 : f32
    %410 = vector.broadcast %cst_197 : f32 to vector<8x128xf32>
    %411 = arith.addf %410, %409 : vector<8x128xf32>
    %412 = arith.divf %410, %411 : vector<8x128xf32>
    %413 = vector.extract_strided_slice %399 {offsets = [0, 256], sizes = [8, 128], strides = [1, 1]} : vector<8x512xf32> to vector<8x128xf32>
    %414 = math.tanh %413 : vector<8x128xf32>
    %415 = vector.extract_strided_slice %399 {offsets = [0, 384], sizes = [8, 128], strides = [1, 1]} : vector<8x512xf32> to vector<8x128xf32>
    %416 = arith.negf %415 : vector<8x128xf32>
    %417 = math.exp %416 : vector<8x128xf32>
    %cst_198 = arith.constant 1.000000e+00 : f32
    %418 = vector.broadcast %cst_198 : f32 to vector<8x128xf32>
    %419 = arith.addf %418, %417 : vector<8x128xf32>
    %420 = arith.divf %418, %419 : vector<8x128xf32>
    %421 = arith.mulf %412, %400 : vector<8x128xf32>
    %422 = arith.mulf %406, %414 : vector<8x128xf32>
    %423 = arith.addf %421, %422 : vector<8x128xf32>
    %424 = math.tanh %423 : vector<8x128xf32>
    %425 = arith.mulf %420, %424 : vector<8x128xf32>
    %c0_199 = arith.constant 0 : index
    %c0_200 = arith.constant 0 : index
    %426 = vector.load %arg10[%c0_199, %c0_200] : memref<8x128xf32, #tpu.memory_space<vmem>>, vector<8x128xf32>
    tpu.vector_store %arg10[%c0_199, %c0_200], %425 {strides = array<i32>} : memref<8x128xf32, #tpu.memory_space<vmem>>, vector<8x128xf32>,
    %c0_201 = arith.constant 0 : index
    %c0_202 = arith.constant 0 : index
    %427 = vector.load %arg11[%c0_201, %c0_202] : memref<8x128xf32, #tpu.memory_space<vmem>>, vector<8x128xf32>
    tpu.vector_store %arg11[%c0_201, %c0_202], %423 {strides = array<i32>} : memref<8x128xf32, #tpu.memory_space<vmem>>, vector<8x128xf32>,
    %c0_203 = arith.constant 0 : index
    %c0_204 = arith.constant 0 : index
    %428 = vector.load %arg12[%c0_203, %c0_204] : memref<8x128xf32, #tpu.memory_space<vmem>>, vector<8x128xf32>
    %429 = tpu.concatenate %425, %428 in 1 : vector<8x128xf32>, vector<8x128xf32> -> vector<8x256xf32>
    %430 = arith.truncf %429 : vector<8x256xf32> to vector<8x256xbf16>
    %c0_205 = arith.constant 0 : index
    %c0_206 = arith.constant 0 : index
    %431 = vector.load %arg3[%c0_205, %c0_206] : memref<256x512xbf16, #tpu.memory_space<vmem>>, vector<256x512xbf16>
    %cst_207 = arith.constant dense<0.000000e+00> : vector<8x512xf32>
    %432 = tpu.matmul %430, %431, %cst_207 {dimension_numbers = #tpu.dot_dimension_numbers<[1], [0], [0], [1], [0, 0, 1, 1], [], []>} : vector<8x256xbf16>, vector<256x512xbf16>, vector<8x512xf32> -> vector<8x512xf32>
    %c0_208 = arith.constant 0 : index
    %c0_209 = arith.constant 0 : index
    %433 = vector.load %arg4[%c0_208, %c0_209] : memref<1x512xf32, #tpu.memory_space<vmem>>, vector<1x512xf32>
    %434 = vector.broadcast %433 : vector<1x512xf32> to vector<8x512xf32>
    %435 = arith.addf %432, %434 : vector<8x512xf32>
    %c0_210 = arith.constant 0 : index
    %c0_211 = arith.constant 0 : index
    %436 = vector.load %arg13[%c0_210, %c0_211] : memref<8x128xf32, #tpu.memory_space<vmem>>, vector<8x128xf32>
    %437 = vector.extract_strided_slice %435 {offsets = [0, 0], sizes = [8, 128], strides = [1, 1]} : vector<8x512xf32> to vector<8x128xf32>
    %438 = arith.negf %437 : vector<8x128xf32>
    %439 = math.exp %438 : vector<8x128xf32>
    %cst_212 = arith.constant 1.000000e+00 : f32
    %440 = vector.broadcast %cst_212 : f32 to vector<8x128xf32>
    %441 = arith.addf %440, %439 : vector<8x128xf32>
    %442 = arith.divf %440, %441 : vector<8x128xf32>
    %443 = vector.extract_strided_slice %435 {offsets = [0, 128], sizes = [8, 128], strides = [1, 1]} : vector<8x512xf32> to vector<8x128xf32>
    %444 = arith.negf %443 : vector<8x128xf32>
    %445 = math.exp %444 : vector<8x128xf32>
    %cst_213 = arith.constant 1.000000e+00 : f32
    %446 = vector.broadcast %cst_213 : f32 to vector<8x128xf32>
    %447 = arith.addf %446, %445 : vector<8x128xf32>
    %448 = arith.divf %446, %447 : vector<8x128xf32>
    %449 = vector.extract_strided_slice %435 {offsets = [0, 256], sizes = [8, 128], strides = [1, 1]} : vector<8x512xf32> to vector<8x128xf32>
    %450 = math.tanh %449 : vector<8x128xf32>
    %451 = vector.extract_strided_slice %435 {offsets = [0, 384], sizes = [8, 128], strides = [1, 1]} : vector<8x512xf32> to vector<8x128xf32>
    %452 = arith.negf %451 : vector<8x128xf32>
    %453 = math.exp %452 : vector<8x128xf32>
    %cst_214 = arith.constant 1.000000e+00 : f32
    %454 = vector.broadcast %cst_214 : f32 to vector<8x128xf32>
    %455 = arith.addf %454, %453 : vector<8x128xf32>
    %456 = arith.divf %454, %455 : vector<8x128xf32>
    %457 = arith.mulf %448, %436 : vector<8x128xf32>
    %458 = arith.mulf %442, %450 : vector<8x128xf32>
    %459 = arith.addf %457, %458 : vector<8x128xf32>
    %460 = math.tanh %459 : vector<8x128xf32>
    %461 = arith.mulf %456, %460 : vector<8x128xf32>
    %c0_215 = arith.constant 0 : index
    %c0_216 = arith.constant 0 : index
    %462 = vector.load %arg12[%c0_215, %c0_216] : memref<8x128xf32, #tpu.memory_space<vmem>>, vector<8x128xf32>
    tpu.vector_store %arg12[%c0_215, %c0_216], %461 {strides = array<i32>} : memref<8x128xf32, #tpu.memory_space<vmem>>, vector<8x128xf32>,
    %c0_217 = arith.constant 0 : index
    %c0_218 = arith.constant 0 : index
    %463 = vector.load %arg13[%c0_217, %c0_218] : memref<8x128xf32, #tpu.memory_space<vmem>>, vector<8x128xf32>
    tpu.vector_store %arg13[%c0_217, %c0_218], %459 {strides = array<i32>} : memref<8x128xf32, #tpu.memory_space<vmem>>, vector<8x128xf32>,
    %464 = arith.index_cast %c5_i32 : i32 to index
    %c0_219 = arith.constant 0 : index
    %c0_220 = arith.constant 0 : index
    %465 = vector.load %arg7[%464, %c0_219, %c0_220] : memref<8x8x128xf32, #tpu.memory_space<vmem>>, vector<1x8x128xf32>
    %466 = vector.shape_cast %465 : vector<1x8x128xf32> to vector<8x128xf32>
    %467 = vector.shape_cast %461 : vector<8x128xf32> to vector<1x8x128xf32>
    tpu.vector_store %arg7[%464, %c0_219, %c0_220], %467 {strides = array<i32>} : memref<8x8x128xf32, #tpu.memory_space<vmem>>, vector<1x8x128xf32>,
    %c6_i32 = arith.constant 6 : i32
    %468 = arith.index_cast %c6_i32 : i32 to index
    %c0_221 = arith.constant 0 : index
    %c0_222 = arith.constant 0 : index
    %469 = vector.load %arg1[%468, %c0_221, %c0_222] : memref<8x8x512xf32, #tpu.memory_space<vmem>>, vector<1x8x512xf32>
    %470 = vector.shape_cast %469 : vector<1x8x512xf32> to vector<8x512xf32>
    %c0_223 = arith.constant 0 : index
    %c0_224 = arith.constant 0 : index
    %471 = vector.load %arg10[%c0_223, %c0_224] : memref<8x128xf32, #tpu.memory_space<vmem>>, vector<8x128xf32>
    %472 = arith.truncf %471 : vector<8x128xf32> to vector<8x128xbf16>
    %c0_225 = arith.constant 0 : index
    %c0_226 = arith.constant 0 : index
    %473 = vector.load %arg2[%c0_225, %c0_226] : memref<128x512xbf16, #tpu.memory_space<vmem>>, vector<128x512xbf16>
    %cst_227 = arith.constant dense<0.000000e+00> : vector<8x512xf32>
    %474 = tpu.matmul %472, %473, %cst_227 {dimension_numbers = #tpu.dot_dimension_numbers<[1], [0], [0], [1], [0, 0, 1, 1], [], []>} : vector<8x128xbf16>, vector<128x512xbf16>, vector<8x512xf32> -> vector<8x512xf32>
    %475 = arith.addf %470, %474 : vector<8x512xf32>
    %c0_228 = arith.constant 0 : index
    %c0_229 = arith.constant 0 : index
    %476 = vector.load %arg11[%c0_228, %c0_229] : memref<8x128xf32, #tpu.memory_space<vmem>>, vector<8x128xf32>
    %477 = vector.extract_strided_slice %475 {offsets = [0, 0], sizes = [8, 128], strides = [1, 1]} : vector<8x512xf32> to vector<8x128xf32>
    %478 = arith.negf %477 : vector<8x128xf32>
    %479 = math.exp %478 : vector<8x128xf32>
    %cst_230 = arith.constant 1.000000e+00 : f32
    %480 = vector.broadcast %cst_230 : f32 to vector<8x128xf32>
    %481 = arith.addf %480, %479 : vector<8x128xf32>
    %482 = arith.divf %480, %481 : vector<8x128xf32>
    %483 = vector.extract_strided_slice %475 {offsets = [0, 128], sizes = [8, 128], strides = [1, 1]} : vector<8x512xf32> to vector<8x128xf32>
    %484 = arith.negf %483 : vector<8x128xf32>
    %485 = math.exp %484 : vector<8x128xf32>
    %cst_231 = arith.constant 1.000000e+00 : f32
    %486 = vector.broadcast %cst_231 : f32 to vector<8x128xf32>
    %487 = arith.addf %486, %485 : vector<8x128xf32>
    %488 = arith.divf %486, %487 : vector<8x128xf32>
    %489 = vector.extract_strided_slice %475 {offsets = [0, 256], sizes = [8, 128], strides = [1, 1]} : vector<8x512xf32> to vector<8x128xf32>
    %490 = math.tanh %489 : vector<8x128xf32>
    %491 = vector.extract_strided_slice %475 {offsets = [0, 384], sizes = [8, 128], strides = [1, 1]} : vector<8x512xf32> to vector<8x128xf32>
    %492 = arith.negf %491 : vector<8x128xf32>
    %493 = math.exp %492 : vector<8x128xf32>
    %cst_232 = arith.constant 1.000000e+00 : f32
    %494 = vector.broadcast %cst_232 : f32 to vector<8x128xf32>
    %495 = arith.addf %494, %493 : vector<8x128xf32>
    %496 = arith.divf %494, %495 : vector<8x128xf32>
    %497 = arith.mulf %488, %476 : vector<8x128xf32>
    %498 = arith.mulf %482, %490 : vector<8x128xf32>
    %499 = arith.addf %497, %498 : vector<8x128xf32>
    %500 = math.tanh %499 : vector<8x128xf32>
    %501 = arith.mulf %496, %500 : vector<8x128xf32>
    %c0_233 = arith.constant 0 : index
    %c0_234 = arith.constant 0 : index
    %502 = vector.load %arg10[%c0_233, %c0_234] : memref<8x128xf32, #tpu.memory_space<vmem>>, vector<8x128xf32>
    tpu.vector_store %arg10[%c0_233, %c0_234], %501 {strides = array<i32>} : memref<8x128xf32, #tpu.memory_space<vmem>>, vector<8x128xf32>,
    %c0_235 = arith.constant 0 : index
    %c0_236 = arith.constant 0 : index
    %503 = vector.load %arg11[%c0_235, %c0_236] : memref<8x128xf32, #tpu.memory_space<vmem>>, vector<8x128xf32>
    tpu.vector_store %arg11[%c0_235, %c0_236], %499 {strides = array<i32>} : memref<8x128xf32, #tpu.memory_space<vmem>>, vector<8x128xf32>,
    %c0_237 = arith.constant 0 : index
    %c0_238 = arith.constant 0 : index
    %504 = vector.load %arg12[%c0_237, %c0_238] : memref<8x128xf32, #tpu.memory_space<vmem>>, vector<8x128xf32>
    %505 = tpu.concatenate %501, %504 in 1 : vector<8x128xf32>, vector<8x128xf32> -> vector<8x256xf32>
    %506 = arith.truncf %505 : vector<8x256xf32> to vector<8x256xbf16>
    %c0_239 = arith.constant 0 : index
    %c0_240 = arith.constant 0 : index
    %507 = vector.load %arg3[%c0_239, %c0_240] : memref<256x512xbf16, #tpu.memory_space<vmem>>, vector<256x512xbf16>
    %cst_241 = arith.constant dense<0.000000e+00> : vector<8x512xf32>
    %508 = tpu.matmul %506, %507, %cst_241 {dimension_numbers = #tpu.dot_dimension_numbers<[1], [0], [0], [1], [0, 0, 1, 1], [], []>} : vector<8x256xbf16>, vector<256x512xbf16>, vector<8x512xf32> -> vector<8x512xf32>
    %c0_242 = arith.constant 0 : index
    %c0_243 = arith.constant 0 : index
    %509 = vector.load %arg4[%c0_242, %c0_243] : memref<1x512xf32, #tpu.memory_space<vmem>>, vector<1x512xf32>
    %510 = vector.broadcast %509 : vector<1x512xf32> to vector<8x512xf32>
    %511 = arith.addf %508, %510 : vector<8x512xf32>
    %c0_244 = arith.constant 0 : index
    %c0_245 = arith.constant 0 : index
    %512 = vector.load %arg13[%c0_244, %c0_245] : memref<8x128xf32, #tpu.memory_space<vmem>>, vector<8x128xf32>
    %513 = vector.extract_strided_slice %511 {offsets = [0, 0], sizes = [8, 128], strides = [1, 1]} : vector<8x512xf32> to vector<8x128xf32>
    %514 = arith.negf %513 : vector<8x128xf32>
    %515 = math.exp %514 : vector<8x128xf32>
    %cst_246 = arith.constant 1.000000e+00 : f32
    %516 = vector.broadcast %cst_246 : f32 to vector<8x128xf32>
    %517 = arith.addf %516, %515 : vector<8x128xf32>
    %518 = arith.divf %516, %517 : vector<8x128xf32>
    %519 = vector.extract_strided_slice %511 {offsets = [0, 128], sizes = [8, 128], strides = [1, 1]} : vector<8x512xf32> to vector<8x128xf32>
    %520 = arith.negf %519 : vector<8x128xf32>
    %521 = math.exp %520 : vector<8x128xf32>
    %cst_247 = arith.constant 1.000000e+00 : f32
    %522 = vector.broadcast %cst_247 : f32 to vector<8x128xf32>
    %523 = arith.addf %522, %521 : vector<8x128xf32>
    %524 = arith.divf %522, %523 : vector<8x128xf32>
    %525 = vector.extract_strided_slice %511 {offsets = [0, 256], sizes = [8, 128], strides = [1, 1]} : vector<8x512xf32> to vector<8x128xf32>
    %526 = math.tanh %525 : vector<8x128xf32>
    %527 = vector.extract_strided_slice %511 {offsets = [0, 384], sizes = [8, 128], strides = [1, 1]} : vector<8x512xf32> to vector<8x128xf32>
    %528 = arith.negf %527 : vector<8x128xf32>
    %529 = math.exp %528 : vector<8x128xf32>
    %cst_248 = arith.constant 1.000000e+00 : f32
    %530 = vector.broadcast %cst_248 : f32 to vector<8x128xf32>
    %531 = arith.addf %530, %529 : vector<8x128xf32>
    %532 = arith.divf %530, %531 : vector<8x128xf32>
    %533 = arith.mulf %524, %512 : vector<8x128xf32>
    %534 = arith.mulf %518, %526 : vector<8x128xf32>
    %535 = arith.addf %533, %534 : vector<8x128xf32>
    %536 = math.tanh %535 : vector<8x128xf32>
    %537 = arith.mulf %532, %536 : vector<8x128xf32>
    %c0_249 = arith.constant 0 : index
    %c0_250 = arith.constant 0 : index
    %538 = vector.load %arg12[%c0_249, %c0_250] : memref<8x128xf32, #tpu.memory_space<vmem>>, vector<8x128xf32>
    tpu.vector_store %arg12[%c0_249, %c0_250], %537 {strides = array<i32>} : memref<8x128xf32, #tpu.memory_space<vmem>>, vector<8x128xf32>,
    %c0_251 = arith.constant 0 : index
    %c0_252 = arith.constant 0 : index
    %539 = vector.load %arg13[%c0_251, %c0_252] : memref<8x128xf32, #tpu.memory_space<vmem>>, vector<8x128xf32>
    tpu.vector_store %arg13[%c0_251, %c0_252], %535 {strides = array<i32>} : memref<8x128xf32, #tpu.memory_space<vmem>>, vector<8x128xf32>,
    %540 = arith.index_cast %c6_i32 : i32 to index
    %c0_253 = arith.constant 0 : index
    %c0_254 = arith.constant 0 : index
    %541 = vector.load %arg7[%540, %c0_253, %c0_254] : memref<8x8x128xf32, #tpu.memory_space<vmem>>, vector<1x8x128xf32>
    %542 = vector.shape_cast %541 : vector<1x8x128xf32> to vector<8x128xf32>
    %543 = vector.shape_cast %537 : vector<8x128xf32> to vector<1x8x128xf32>
    tpu.vector_store %arg7[%540, %c0_253, %c0_254], %543 {strides = array<i32>} : memref<8x8x128xf32, #tpu.memory_space<vmem>>, vector<1x8x128xf32>,
    %c7_i32 = arith.constant 7 : i32
    %544 = arith.index_cast %c7_i32 : i32 to index
    %c0_255 = arith.constant 0 : index
    %c0_256 = arith.constant 0 : index
    %545 = vector.load %arg1[%544, %c0_255, %c0_256] : memref<8x8x512xf32, #tpu.memory_space<vmem>>, vector<1x8x512xf32>
    %546 = vector.shape_cast %545 : vector<1x8x512xf32> to vector<8x512xf32>
    %c0_257 = arith.constant 0 : index
    %c0_258 = arith.constant 0 : index
    %547 = vector.load %arg10[%c0_257, %c0_258] : memref<8x128xf32, #tpu.memory_space<vmem>>, vector<8x128xf32>
    %548 = arith.truncf %547 : vector<8x128xf32> to vector<8x128xbf16>
    %c0_259 = arith.constant 0 : index
    %c0_260 = arith.constant 0 : index
    %549 = vector.load %arg2[%c0_259, %c0_260] : memref<128x512xbf16, #tpu.memory_space<vmem>>, vector<128x512xbf16>
    %cst_261 = arith.constant dense<0.000000e+00> : vector<8x512xf32>
    %550 = tpu.matmul %548, %549, %cst_261 {dimension_numbers = #tpu.dot_dimension_numbers<[1], [0], [0], [1], [0, 0, 1, 1], [], []>} : vector<8x128xbf16>, vector<128x512xbf16>, vector<8x512xf32> -> vector<8x512xf32>
    %551 = arith.addf %546, %550 : vector<8x512xf32>
    %c0_262 = arith.constant 0 : index
    %c0_263 = arith.constant 0 : index
    %552 = vector.load %arg11[%c0_262, %c0_263] : memref<8x128xf32, #tpu.memory_space<vmem>>, vector<8x128xf32>
    %553 = vector.extract_strided_slice %551 {offsets = [0, 0], sizes = [8, 128], strides = [1, 1]} : vector<8x512xf32> to vector<8x128xf32>
    %554 = arith.negf %553 : vector<8x128xf32>
    %555 = math.exp %554 : vector<8x128xf32>
    %cst_264 = arith.constant 1.000000e+00 : f32
    %556 = vector.broadcast %cst_264 : f32 to vector<8x128xf32>
    %557 = arith.addf %556, %555 : vector<8x128xf32>
    %558 = arith.divf %556, %557 : vector<8x128xf32>
    %559 = vector.extract_strided_slice %551 {offsets = [0, 128], sizes = [8, 128], strides = [1, 1]} : vector<8x512xf32> to vector<8x128xf32>
    %560 = arith.negf %559 : vector<8x128xf32>
    %561 = math.exp %560 : vector<8x128xf32>
    %cst_265 = arith.constant 1.000000e+00 : f32
    %562 = vector.broadcast %cst_265 : f32 to vector<8x128xf32>
    %563 = arith.addf %562, %561 : vector<8x128xf32>
    %564 = arith.divf %562, %563 : vector<8x128xf32>
    %565 = vector.extract_strided_slice %551 {offsets = [0, 256], sizes = [8, 128], strides = [1, 1]} : vector<8x512xf32> to vector<8x128xf32>
    %566 = math.tanh %565 : vector<8x128xf32>
    %567 = vector.extract_strided_slice %551 {offsets = [0, 384], sizes = [8, 128], strides = [1, 1]} : vector<8x512xf32> to vector<8x128xf32>
    %568 = arith.negf %567 : vector<8x128xf32>
    %569 = math.exp %568 : vector<8x128xf32>
    %cst_266 = arith.constant 1.000000e+00 : f32
    %570 = vector.broadcast %cst_266 : f32 to vector<8x128xf32>
    %571 = arith.addf %570, %569 : vector<8x128xf32>
    %572 = arith.divf %570, %571 : vector<8x128xf32>
    %573 = arith.mulf %564, %552 : vector<8x128xf32>
    %574 = arith.mulf %558, %566 : vector<8x128xf32>
    %575 = arith.addf %573, %574 : vector<8x128xf32>
    %576 = math.tanh %575 : vector<8x128xf32>
    %577 = arith.mulf %572, %576 : vector<8x128xf32>
    %c0_267 = arith.constant 0 : index
    %c0_268 = arith.constant 0 : index
    %578 = vector.load %arg10[%c0_267, %c0_268] : memref<8x128xf32, #tpu.memory_space<vmem>>, vector<8x128xf32>
    tpu.vector_store %arg10[%c0_267, %c0_268], %577 {strides = array<i32>} : memref<8x128xf32, #tpu.memory_space<vmem>>, vector<8x128xf32>,
    %c0_269 = arith.constant 0 : index
    %c0_270 = arith.constant 0 : index
    %579 = vector.load %arg11[%c0_269, %c0_270] : memref<8x128xf32, #tpu.memory_space<vmem>>, vector<8x128xf32>
    tpu.vector_store %arg11[%c0_269, %c0_270], %575 {strides = array<i32>} : memref<8x128xf32, #tpu.memory_space<vmem>>, vector<8x128xf32>,
    %c0_271 = arith.constant 0 : index
    %c0_272 = arith.constant 0 : index
    %580 = vector.load %arg12[%c0_271, %c0_272] : memref<8x128xf32, #tpu.memory_space<vmem>>, vector<8x128xf32>
    %581 = tpu.concatenate %577, %580 in 1 : vector<8x128xf32>, vector<8x128xf32> -> vector<8x256xf32>
    %582 = arith.truncf %581 : vector<8x256xf32> to vector<8x256xbf16>
    %c0_273 = arith.constant 0 : index
    %c0_274 = arith.constant 0 : index
    %583 = vector.load %arg3[%c0_273, %c0_274] : memref<256x512xbf16, #tpu.memory_space<vmem>>, vector<256x512xbf16>
    %cst_275 = arith.constant dense<0.000000e+00> : vector<8x512xf32>
    %584 = tpu.matmul %582, %583, %cst_275 {dimension_numbers = #tpu.dot_dimension_numbers<[1], [0], [0], [1], [0, 0, 1, 1], [], []>} : vector<8x256xbf16>, vector<256x512xbf16>, vector<8x512xf32> -> vector<8x512xf32>
    %c0_276 = arith.constant 0 : index
    %c0_277 = arith.constant 0 : index
    %585 = vector.load %arg4[%c0_276, %c0_277] : memref<1x512xf32, #tpu.memory_space<vmem>>, vector<1x512xf32>
    %586 = vector.broadcast %585 : vector<1x512xf32> to vector<8x512xf32>
    %587 = arith.addf %584, %586 : vector<8x512xf32>
    %c0_278 = arith.constant 0 : index
    %c0_279 = arith.constant 0 : index
    %588 = vector.load %arg13[%c0_278, %c0_279] : memref<8x128xf32, #tpu.memory_space<vmem>>, vector<8x128xf32>
    %589 = vector.extract_strided_slice %587 {offsets = [0, 0], sizes = [8, 128], strides = [1, 1]} : vector<8x512xf32> to vector<8x128xf32>
    %590 = arith.negf %589 : vector<8x128xf32>
    %591 = math.exp %590 : vector<8x128xf32>
    %cst_280 = arith.constant 1.000000e+00 : f32
    %592 = vector.broadcast %cst_280 : f32 to vector<8x128xf32>
    %593 = arith.addf %592, %591 : vector<8x128xf32>
    %594 = arith.divf %592, %593 : vector<8x128xf32>
    %595 = vector.extract_strided_slice %587 {offsets = [0, 128], sizes = [8, 128], strides = [1, 1]} : vector<8x512xf32> to vector<8x128xf32>
    %596 = arith.negf %595 : vector<8x128xf32>
    %597 = math.exp %596 : vector<8x128xf32>
    %cst_281 = arith.constant 1.000000e+00 : f32
    %598 = vector.broadcast %cst_281 : f32 to vector<8x128xf32>
    %599 = arith.addf %598, %597 : vector<8x128xf32>
    %600 = arith.divf %598, %599 : vector<8x128xf32>
    %601 = vector.extract_strided_slice %587 {offsets = [0, 256], sizes = [8, 128], strides = [1, 1]} : vector<8x512xf32> to vector<8x128xf32>
    %602 = math.tanh %601 : vector<8x128xf32>
    %603 = vector.extract_strided_slice %587 {offsets = [0, 384], sizes = [8, 128], strides = [1, 1]} : vector<8x512xf32> to vector<8x128xf32>
    %604 = arith.negf %603 : vector<8x128xf32>
    %605 = math.exp %604 : vector<8x128xf32>
    %cst_282 = arith.constant 1.000000e+00 : f32
    %606 = vector.broadcast %cst_282 : f32 to vector<8x128xf32>
    %607 = arith.addf %606, %605 : vector<8x128xf32>
    %608 = arith.divf %606, %607 : vector<8x128xf32>
    %609 = arith.mulf %600, %588 : vector<8x128xf32>
    %610 = arith.mulf %594, %602 : vector<8x128xf32>
    %611 = arith.addf %609, %610 : vector<8x128xf32>
    %612 = math.tanh %611 : vector<8x128xf32>
    %613 = arith.mulf %608, %612 : vector<8x128xf32>
    %c0_283 = arith.constant 0 : index
    %c0_284 = arith.constant 0 : index
    %614 = vector.load %arg12[%c0_283, %c0_284] : memref<8x128xf32, #tpu.memory_space<vmem>>, vector<8x128xf32>
    tpu.vector_store %arg12[%c0_283, %c0_284], %613 {strides = array<i32>} : memref<8x128xf32, #tpu.memory_space<vmem>>, vector<8x128xf32>,
    %c0_285 = arith.constant 0 : index
    %c0_286 = arith.constant 0 : index
    %615 = vector.load %arg13[%c0_285, %c0_286] : memref<8x128xf32, #tpu.memory_space<vmem>>, vector<8x128xf32>
    tpu.vector_store %arg13[%c0_285, %c0_286], %611 {strides = array<i32>} : memref<8x128xf32, #tpu.memory_space<vmem>>, vector<8x128xf32>,
    %616 = arith.index_cast %c7_i32 : i32 to index
    %c0_287 = arith.constant 0 : index
    %c0_288 = arith.constant 0 : index
    %617 = vector.load %arg7[%616, %c0_287, %c0_288] : memref<8x8x128xf32, #tpu.memory_space<vmem>>, vector<1x8x128xf32>
    %618 = vector.shape_cast %617 : vector<1x8x128xf32> to vector<8x128xf32>
    %619 = vector.shape_cast %613 : vector<8x128xf32> to vector<1x8x128xf32>
    tpu.vector_store %arg7[%616, %c0_287, %c0_288], %619 {strides = array<i32>} : memref<8x8x128xf32, #tpu.memory_space<vmem>>, vector<1x8x128xf32>,
    %c8_i32 = arith.constant 8 : i32
    %c0_289 = arith.constant 0 : index
    %c0_290 = arith.constant 0 : index
    %620 = vector.load %arg10[%c0_289, %c0_290] : memref<8x128xf32, #tpu.memory_space<vmem>>, vector<8x128xf32>
    %c0_291 = arith.constant 0 : index
    %c0_292 = arith.constant 0 : index
    %c0_293 = arith.constant 0 : index
    %621 = vector.load %arg8[%c0_291, %c0_292, %c0_293] : memref<2x8x128xf32, #tpu.memory_space<vmem>>, vector<1x8x128xf32>
    %622 = vector.shape_cast %621 : vector<1x8x128xf32> to vector<8x128xf32>
    %623 = vector.shape_cast %620 : vector<8x128xf32> to vector<1x8x128xf32>
    tpu.vector_store %arg8[%c0_291, %c0_292, %c0_293], %623 {strides = array<i32>} : memref<2x8x128xf32, #tpu.memory_space<vmem>>, vector<1x8x128xf32>,
    %c0_294 = arith.constant 0 : index
    %c0_295 = arith.constant 0 : index
    %624 = vector.load %arg12[%c0_294, %c0_295] : memref<8x128xf32, #tpu.memory_space<vmem>>, vector<8x128xf32>
    %c1_296 = arith.constant 1 : index
    %c0_297 = arith.constant 0 : index
    %c0_298 = arith.constant 0 : index
    %625 = vector.load %arg8[%c1_296, %c0_297, %c0_298] : memref<2x8x128xf32, #tpu.memory_space<vmem>>, vector<1x8x128xf32>
    %626 = vector.shape_cast %625 : vector<1x8x128xf32> to vector<8x128xf32>
    %627 = vector.shape_cast %624 : vector<8x128xf32> to vector<1x8x128xf32>
    tpu.vector_store %arg8[%c1_296, %c0_297, %c0_298], %627 {strides = array<i32>} : memref<2x8x128xf32, #tpu.memory_space<vmem>>, vector<1x8x128xf32>,
    %c0_299 = arith.constant 0 : index
    %c0_300 = arith.constant 0 : index
    %628 = vector.load %arg11[%c0_299, %c0_300] : memref<8x128xf32, #tpu.memory_space<vmem>>, vector<8x128xf32>
    %c0_301 = arith.constant 0 : index
    %c0_302 = arith.constant 0 : index
    %c0_303 = arith.constant 0 : index
    %629 = vector.load %arg9[%c0_301, %c0_302, %c0_303] : memref<2x8x128xf32, #tpu.memory_space<vmem>>, vector<1x8x128xf32>
    %630 = vector.shape_cast %629 : vector<1x8x128xf32> to vector<8x128xf32>
    %631 = vector.shape_cast %628 : vector<8x128xf32> to vector<1x8x128xf32>
    tpu.vector_store %arg9[%c0_301, %c0_302, %c0_303], %631 {strides = array<i32>} : memref<2x8x128xf32, #tpu.memory_space<vmem>>, vector<1x8x128xf32>,
    %c0_304 = arith.constant 0 : index
    %c0_305 = arith.constant 0 : index
    %632 = vector.load %arg13[%c0_304, %c0_305] : memref<8x128xf32, #tpu.memory_space<vmem>>, vector<8x128xf32>
    %c1_306 = arith.constant 1 : index
    %c0_307 = arith.constant 0 : index
    %c0_308 = arith.constant 0 : index
    %633 = vector.load %arg9[%c1_306, %c0_307, %c0_308] : memref<2x8x128xf32, #tpu.memory_space<vmem>>, vector<1x8x128xf32>
    %634 = vector.shape_cast %633 : vector<1x8x128xf32> to vector<8x128xf32>
    %635 = vector.shape_cast %632 : vector<8x128xf32> to vector<1x8x128xf32>
    tpu.vector_store %arg9[%c1_306, %c0_307, %c0_308], %635 {strides = array<i32>} : memref<2x8x128xf32, #tpu.memory_space<vmem>>, vector<1x8x128xf32>,
    return
  }
  func.func @transform_0(%arg0: i32) -> (i32, i32, i32) {
    %c0_i32 = arith.constant 0 : i32
    %c0_i32_0 = arith.constant 0 : i32
    %c0_i32_1 = arith.constant 0 : i32
    %c0_i32_2 = arith.constant 0 : i32
    return %c0_i32, %c0_i32_0, %c0_i32_1 : i32, i32, i32
  }
  func.func @transform_1(%arg0: i32) -> (i32, i32) {
    %c0_i32 = arith.constant 0 : i32
    %c0_i32_0 = arith.constant 0 : i32
    %c0_i32_1 = arith.constant 0 : i32
    return %c0_i32, %c0_i32_0 : i32, i32
  }
  func.func @transform_2(%arg0: i32) -> (i32, i32) {
    %c0_i32 = arith.constant 0 : i32
    %c0_i32_0 = arith.constant 0 : i32
    %c0_i32_1 = arith.constant 0 : i32
    return %c0_i32, %c0_i32_0 : i32, i32
  }
  func.func @transform_3(%arg0: i32) -> (i32, i32) {
    %c0_i32 = arith.constant 0 : i32
    %c0_i32_0 = arith.constant 0 : i32
    %c0_i32_1 = arith.constant 0 : i32
    return %c0_i32, %c0_i32_0 : i32, i32
  }
  func.func @transform_4(%arg0: i32) -> (i32, i32, i32) {
    %c0_i32 = arith.constant 0 : i32
    %c0_i32_0 = arith.constant 0 : i32
    %c0_i32_1 = arith.constant 0 : i32
    %c0_i32_2 = arith.constant 0 : i32
    return %c0_i32, %c0_i32_0, %c0_i32_1 : i32, i32, i32
  }
  func.func @transform_5(%arg0: i32) -> (i32, i32, i32) {
    %c0_i32 = arith.constant 0 : i32
    %c0_i32_0 = arith.constant 0 : i32
    %c0_i32_1 = arith.constant 0 : i32
    %c0_i32_2 = arith.constant 0 : i32
    return %c0_i32, %c0_i32_0, %c0_i32_1 : i32, i32, i32
  }
  func.func @transform_6(%arg0: i32) -> (i32, i32, i32) {
    %c0_i32 = arith.constant 0 : i32
    %c0_i32_0 = arith.constant 0 : i32
    %c0_i32_1 = arith.constant 0 : i32
    %c0_i32_2 = arith.constant 0 : i32
    return %c0_i32, %c0_i32_0, %c0_i32_1 : i32, i32, i32
  }
  func.func @transform_7(%arg0: i32) -> (i32, i32, i32) {
    %c0_i32 = arith.constant 0 : i32
    %c0_i32_0 = arith.constant 0 : i32
    %c0_i32_1 = arith.constant 0 : i32
    %c0_i32_2 = arith.constant 0 : i32
    return %c0_i32, %c0_i32_0, %c0_i32_1 : i32, i32, i32
  }
  func.func @transform_8(%arg0: i32) -> (i32, i32, i32) {
    %c0_i32 = arith.constant 0 : i32
    %c0_i32_0 = arith.constant 0 : i32
    %c0_i32_1 = arith.constant 0 : i32
    %c0_i32_2 = arith.constant 0 : i32
    return %c0_i32, %c0_i32_0, %c0_i32_1 : i32, i32, i32
  }
}

module attributes {stable_mosaic.version = 11 : i64} {
  func.func @_matmul_bias_kernel(%arg0: i32, %arg1: i32, %arg2: i32, %arg3: memref<16x128xbf16, #tpu.memory_space<vmem>>, %arg4: memref<128x128xbf16, #tpu.memory_space<vmem>>, %arg5: memref<1x128xf32, #tpu.memory_space<vmem>>, %arg6: memref<16x128xf32, #tpu.memory_space<vmem>>, %arg7: memref<16x128xf32, #tpu.memory_space<vmem>>) attributes {dimension_semantics = [#tpu.dimension_semantics<parallel>, #tpu.dimension_semantics<parallel>, #tpu.dimension_semantics<arbitrary>], iteration_bounds = array<i64: 1, 1, 1>, scalar_prefetch = 0 : i64, scratch_operands = 1 : i64, tpu.core_type = #tpu.core_type<tc>, window_params = [{transform_indices = @transform_0, window_bounds = array<i64: 16, 128>}, {transform_indices = @transform_1, window_bounds = array<i64: 128, 128>}, {transform_indices = @transform_2, window_bounds = array<i64: 1, 128>}, {transform_indices = @transform_3, window_bounds = array<i64: 16, 128>}]} {
    %c0_i32 = arith.constant 0 : i32
    %0 = arith.cmpi eq, %arg2, %c0_i32 : i32
    %1 = arith.extui %0 : i1 to i32
    %c0_i32_0 = arith.constant 0 : i32
    %2 = arith.cmpi ne, %1, %c0_i32_0 : i32
    scf.if %2 {
      %cst_10 = arith.constant 0.000000e+00 : f32
      %12 = vector.broadcast %cst_10 : f32 to vector<16x128xf32>
      %c0_11 = arith.constant 0 : index
      %c0_12 = arith.constant 0 : index
      %13 = vector.load %arg7[%c0_11, %c0_12] : memref<16x128xf32, #tpu.memory_space<vmem>>, vector<16x128xf32>
      tpu.vector_store %arg7[%c0_11, %c0_12], %12 {strides = array<i32>} : memref<16x128xf32, #tpu.memory_space<vmem>>, vector<16x128xf32>,
    } else {
    }
    %c0 = arith.constant 0 : index
    %c0_1 = arith.constant 0 : index
    %3 = vector.load %arg7[%c0, %c0_1] : memref<16x128xf32, #tpu.memory_space<vmem>>, vector<16x128xf32>
    %c0_2 = arith.constant 0 : index
    %c0_3 = arith.constant 0 : index
    %4 = vector.load %arg3[%c0_2, %c0_3] : memref<16x128xbf16, #tpu.memory_space<vmem>>, vector<16x128xbf16>
    %c0_4 = arith.constant 0 : index
    %c0_5 = arith.constant 0 : index
    %5 = vector.load %arg4[%c0_4, %c0_5] : memref<128x128xbf16, #tpu.memory_space<vmem>>, vector<128x128xbf16>
    %cst = arith.constant dense<0.000000e+00> : vector<16x128xf32>
    %6 = tpu.matmul %4, %5, %cst {dimension_numbers = #tpu.dot_dimension_numbers<[1], [0], [0], [1], [0, 0, 1, 1], [], []>} : vector<16x128xbf16>, vector<128x128xbf16>, vector<16x128xf32> -> vector<16x128xf32>
    %7 = arith.addf %3, %6 : vector<16x128xf32>
    %c0_6 = arith.constant 0 : index
    %c0_7 = arith.constant 0 : index
    %8 = vector.load %arg7[%c0_6, %c0_7] : memref<16x128xf32, #tpu.memory_space<vmem>>, vector<16x128xf32>
    tpu.vector_store %arg7[%c0_6, %c0_7], %7 {strides = array<i32>} : memref<16x128xf32, #tpu.memory_space<vmem>>, vector<16x128xf32>,
    %c0_i32_8 = arith.constant 0 : i32
    %9 = arith.cmpi eq, %arg2, %c0_i32_8 : i32
    %10 = arith.extui %9 : i1 to i32
    %c0_i32_9 = arith.constant 0 : i32
    %11 = arith.cmpi ne, %10, %c0_i32_9 : i32
    scf.if %11 {
      %c0_10 = arith.constant 0 : index
      %c0_11 = arith.constant 0 : index
      %12 = vector.load %arg7[%c0_10, %c0_11] : memref<16x128xf32, #tpu.memory_space<vmem>>, vector<16x128xf32>
      %c0_12 = arith.constant 0 : index
      %c0_13 = arith.constant 0 : index
      %13 = vector.load %arg5[%c0_12, %c0_13] : memref<1x128xf32, #tpu.memory_space<vmem>>, vector<1x128xf32>
      %14 = vector.broadcast %13 : vector<1x128xf32> to vector<16x128xf32>
      %15 = arith.addf %12, %14 : vector<16x128xf32>
      %c0_14 = arith.constant 0 : index
      %c0_15 = arith.constant 0 : index
      %16 = vector.load %arg6[%c0_14, %c0_15] : memref<16x128xf32, #tpu.memory_space<vmem>>, vector<16x128xf32>
      tpu.vector_store %arg6[%c0_14, %c0_15], %15 {strides = array<i32>} : memref<16x128xf32, #tpu.memory_space<vmem>>, vector<16x128xf32>,
    } else {
    }
    return
  }
  func.func @transform_0(%arg0: i32, %arg1: i32, %arg2: i32) -> (i32, i32) {
    %c0_i32 = arith.constant 0 : i32
    return %arg0, %arg2 : i32, i32
  }
  func.func @transform_1(%arg0: i32, %arg1: i32, %arg2: i32) -> (i32, i32) {
    %c0_i32 = arith.constant 0 : i32
    return %arg2, %arg1 : i32, i32
  }
  func.func @transform_2(%arg0: i32, %arg1: i32, %arg2: i32) -> (i32, i32) {
    %c0_i32 = arith.constant 0 : i32
    %c0_i32_0 = arith.constant 0 : i32
    return %c0_i32, %arg1 : i32, i32
  }
  func.func @transform_3(%arg0: i32, %arg1: i32, %arg2: i32) -> (i32, i32) {
    %c0_i32 = arith.constant 0 : i32
    return %arg0, %arg1 : i32, i32
  }
}

</mosaic_0001>

<bundles_post_ra>
// kernel: rnnlm_forward.5
= control target key start
LH: loop header
LB: loop body
LE: loop exit
PB: predicated region body
PF: predicated region fallthrough
CT: control target
= control target key end

     0   :  { %s275_s0 = inlined_call_operand.vmem [shape: bf16[16,128], index: 0, kind: input, shape index: {}]   ;;  %s276_s1 = inlined_call_operand.vmem [shape: bf16[128,128], index: 1, kind: input, shape index: {}]   ;;  %s277_s2 = inlined_call_operand.vmem [shape: f32[1,128], index: 2, kind: input, shape index: {}]   ;;  %s278_s3 = inlined_call_operand.hbm [shape: f32[16,128], index: 3, kind: output, shape index: {}]  }
   0x1   :  { %v188_v0 = vld [vmem:[%s276_s1 + $0x38] sm:$0xff]  ;;  %v187_v1 = vld [vmem:[%s276_s1 + $0x30] sm:$0xff] }
   0x2   :  { %95 = vmatpush.bf16.msra.mxu0 %v188_v0 }
   0x3   :  { %8 = vsyncpa [#allocation4], 0  ;;  %v186_v2 = vld [vmem:[%s276_s1 + $0x28] sm:$0xff]  ;;  %v185_v3 = vld [vmem:[%s276_s1 + $0x20] sm:$0xff]  ;;  %s219_s5 = smov [#allocation3]   ;;  %s132_s9 = sshll.u32 %s278_s3, 4  ;;  %s133_s9 = int_to_ptr.hbm [resolvable:$true] %s132_s9 }
   0x4   :  { %v184_v4 = vld [vmem:[%s276_s1 + $0x18] sm:$0xff]  ;;  %v183_v5 = vld [vmem:[%s276_s1 + $0x10] sm:$0xff]  ;;  %v182_v6 = vld [vmem:[%s276_s1 + $0x8] sm:$0xff]  ;;  %s130_s6 = sshll.u32 %s219_s5, 4  ;;  %s131_s6 = int_to_ptr.vmem [resolvable:$true] %s130_s6 }
   0x5   :  { %v181_v7 = vld [vmem:[%s276_s1] sm:$0xff]  ;;  %s221_s1 = smov 8  }
   0x6   :  { %96 = vmatpush.bf16.msra.mxu0 %v187_v1  ;;  %v180_v8 = vld [vmem:[%s275_s0] sm:$0xff]  ;;  %s220_s0 = smov 128  }
   0x7   :  { %v192_v9 = vld [vmem:[%s277_s2] ss:$0 sm:$0xff] }
   0xa   :  { %97 = vmatpush.bf16.msra.mxu0 %v186_v2 }
   0xe   :  { %98 = vmatpush.bf16.msra.mxu0 %v185_v3 }
  0x12   :  { %99 = vmatpush.bf16.msra.mxu0 %v184_v4 }
  0x16   :  { %100 = vmatpush.bf16.msra.mxu0 %v183_v5 }
  0x1a   :  { %101 = vmatpush.bf16.msra.mxu0 %v182_v6 }
  0x1e   :  { %102 = vmatpush.bf16.msra.mxu0 %v181_v7 }
  0x21   :  { %103 = vmatmul.bf16.vlgmr.msra.gmra.mxu0 %v180_v8 }
  0x9e   :  { %v104_v10 = vpop.f32.mrf.mxu0 }
  0x9f   :  { %v122_v11 = vadd.f32 %v192_v9, %v104_v10 }
  0xa1   :  { %124 = vst [vmem:[#allocation3] sm:$0xff] %v122_v11 }
  0xa6   :  { %v106_v12 = vpop.f32.mrf.mxu0 }
  0xa7   :  { %v123_v13 = vadd.f32 %v192_v9, %v106_v12 }
  0xa9   :  { %125 = vst [vmem:[#allocation3 + $0x8] sm:$0xff] %v123_v13 }
  0xaa   :  { %138 = dma.vmem_to_hbm [thread:$0]  %s131_s6, 256, %s133_s9, [#allocation4], %s220_s0, %s220_s0, %s221_s1  }
  0xab   :  { %217 = dma.done.wait [#allocation4], 256  }
  0xac   :  { %218 = vsyncadd [#allocation4], 4294967040 }
  0xad   :  { %143 = vsyncpa [#allocation4], 1 }

// kernel: rnnlm_forward.3
= control target key start
LH: loop header
LB: loop body
LE: loop exit
PB: predicated region body
PF: predicated region fallthrough
CT: control target
= control target key end

     0   :  { %vm159_vm0 = vcmask 261120   ;;  %s776_s1 = inlined_call_operand.vmem [shape: bf16[32,512], index: 1, kind: input, shape index: {}]   ;;  %s777_s0 = inlined_call_operand.vmem [shape: bf16[64,32], index: 0, kind: input, shape index: {}]   ;;  %s778_s2 = inlined_call_operand.vmem [shape: f32[1,512], index: 2, kind: input, shape index: {}]   ;;  %s779_s3 = inlined_call_operand.vmem [shape: f32[64,512], index: 3, kind: output, shape index: {}]  }
   0x1   :  { %v499_v0 = vld [vmem:[%s776_s1 + $0x20] sm:$0xf]  ;;  %v539_v1 = vld [vmem:[%s776_s1 + $0x2c] sm:$0xf0]  ;;  %v537_v2 = vld [vmem:[%s776_s1 + $0x24] sm:$0xf] }
   0x2   :  { %v500_v3 = vor.u32 %v539_v1, %v499_v0  ;;  %v501_v4 = vld [vmem:[%s776_s1 + $0x30] sm:$0xf0]  ;;  %v507_v5 = vld [vmem:[%s776_s1 + $0x28] sm:$0xf]  ;;  %v540_v6 = vld [vmem:[%s776_s1 + $0x34] sm:$0xf0] }
   0x3   :  { %v504_v7 = vor.u32 %v537_v2, %v501_v4  ;;  %v508_v8 = vor.u32 %v540_v6, %v507_v5  ;;  %v538_v9 = vld [vmem:[%s776_s1 + $0x2c] sm:$0xf]  ;;  %v509_v10 = vld [vmem:[%s776_s1 + $0x38] sm:$0xf0]  ;;  %v483_v11 = vld [vmem:[%s776_s1] sm:$0xf] }
   0x4   :  { %178 = vmatpush.bf16.msra.mxu0 %v500_v3  ;;  %v512_v12 = vor.u32 %v538_v9, %v509_v10  ;;  %v535_v13 = vld [vmem:[%s776_s1 + $0xc] sm:$0xf0]  ;;  %v533_v14 = vld [vmem:[%s776_s1 + $0x4] sm:$0xf]  ;;  %v485_v15 = vld [vmem:[%s776_s1 + $0x10] sm:$0xf0] }
   0x5   :  { %207 = vmatpush.bf16.msra.mxu1 %v504_v7  ;;  %236 = vmatpush.bf16.msra.mxu2 %v508_v8  ;;  %v484_v16 = vor.u32 %v535_v13, %v483_v11  ;;  %v488_v17 = vor.u32 %v533_v14, %v485_v15  ;;  %v491_v18 = vld [vmem:[%s776_s1 + $0x8] sm:$0xf]  ;;  %v536_v19 = vld [vmem:[%s776_s1 + $0x14] sm:$0xf0]  ;;  %v534_v20 = vld [vmem:[%s776_s1 + $0xc] sm:$0xf] }
   0x6   :  { %265 = vmatpush.bf16.msra.mxu3 %v512_v12  ;;  %v492_v21 = vor.u32 %v536_v19, %v491_v18  ;;  %v493_v22 = vld [vmem:[%s776_s1 + $0x18] sm:$0xf0]  ;;  %v529_v24 = vld [vmem:[%s777_s0] sm:$0xff]  ;;  %v530_v25 = vld [vmem:[%s777_s0 + $0x8] sm:$0xff] }
   0x7   :  { %v496_v23 = vor.u32 %v534_v20, %v493_v22  ;;  %v531_v26 = vld [vmem:[%s777_s0 + $0x10] sm:$0xff]  ;;  %v532_v27 = vld [vmem:[%s777_s0 + $0x18] sm:$0xff]  ;;  %v387_v28 = vld [vmem:[%s778_s2] sm:$0xf] }
   0x8   :  { %179 = vmatpush.bf16.msra.mxu0 %v484_v16  ;;  %v640_v29 = vperm.slane %v387_v28, 0  ;;  %v642_v30 = vperm.slane %v387_v28, 1  ;;  %v652_v35 = vperm.slane %v387_v28, 2  ;;  %v654_v36 = vperm.slane %v387_v28, 3 }
   0x9   :  { %208 = vmatpush.bf16.msra.mxu1 %v488_v17  ;;  %237 = vmatpush.bf16.msra.mxu2 %v492_v21 }
   0xa   :  { %266 = vmatpush.bf16.msra.mxu3 %v496_v23 }
   0xb   :  { %513 = vmatmul.msk.bf16.vlgmr.msra.gmra.mxu0 %vm159_vm0, %v529_v24 }
   0xc   :  { %517 = vmatmul.msk.bf16.vlgmr.msra.gmra.mxu1 %vm159_vm0, %v529_v24  ;;  %521 = vmatmul.msk.bf16.vlgmr.msra.gmra.mxu2 %vm159_vm0, %v529_v24 }
   0xd   :  { %525 = vmatmul.msk.bf16.vlgmr.msra.gmra.mxu3 %vm159_vm0, %v529_v24 }
  0x1b   :  { %514 = vmatmul.msk.bf16.gmra.mxu0 %vm159_vm0, %v530_v25 }
  0x1c   :  { %518 = vmatmul.msk.bf16.gmra.mxu1 %vm159_vm0, %v530_v25  ;;  %522 = vmatmul.msk.bf16.gmra.mxu2 %vm159_vm0, %v530_v25 }
  0x1d   :  { %526 = vmatmul.msk.bf16.gmra.mxu3 %vm159_vm0, %v530_v25 }
  0x2b   :  { %515 = vmatmul.msk.bf16.gmra.mxu0 %vm159_vm0, %v531_v26 }
  0x2c   :  { %519 = vmatmul.msk.bf16.gmra.mxu1 %vm159_vm0, %v531_v26  ;;  %523 = vmatmul.msk.bf16.gmra.mxu2 %vm159_vm0, %v531_v26 }
  0x2d   :  { %527 = vmatmul.msk.bf16.gmra.mxu3 %vm159_vm0, %v531_v26 }
  0x3b   :  { %516 = vmatmul.msk.bf16.gmra.mxu0 %vm159_vm0, %v532_v27 }
  0x3c   :  { %520 = vmatmul.msk.bf16.gmra.mxu1 %vm159_vm0, %v532_v27  ;;  %524 = vmatmul.msk.bf16.gmra.mxu2 %vm159_vm0, %v532_v27 }
  0x3d   :  { %528 = vmatmul.msk.bf16.gmra.mxu3 %vm159_vm0, %v532_v27 }
  0x88   :  { %v181_v31 = vpop.f32.mrf.mxu0 }
  0x89   :  { %v397_v32 = vadd.f32 %v640_v29, %v181_v31  ;;  %v210_v33 = vpop.f32.mrf.mxu1 }
  0x8a   :  { %v398_v34 = vadd.f32 %v642_v30, %v210_v33 }
  0x8b   :  { %429 = vst [vmem:[%s779_s3] sm:$0xff] %v397_v32 }
  0x8c   :  { %430 = vst [vmem:[%s779_s3 + $0x8] sm:$0xff] %v398_v34 }
  0x8f   :  { %v239_v37 = vpop.f32.mrf.mxu2 }
  0x90   :  { %v399_v38 = vadd.f32 %v652_v35, %v239_v37  ;;  %v268_v39 = vpop.f32.mrf.mxu3  ;;  %v183_v40 = vpop.f32.mrf.mxu0 }
  0x91   :  { %v400_v41 = vadd.f32 %v654_v36, %v268_v39  ;;  %v401_v42 = vadd.f32 %v640_v29, %v183_v40  ;;  %v212_v43 = vpop.f32.mrf.mxu1 }
  0x92   :  { %431 = vst [vmem:[%s779_s3 + $0x10] sm:$0xff] %v399_v38  ;;  %v402_v44 = vadd.f32 %v642_v30, %v212_v43 }
  0x93   :  { %432 = vst [vmem:[%s779_s3 + $0x18] sm:$0xff] %v400_v41 }
  0x94   :  { %433 = vst [vmem:[%s779_s3 + $0x20] sm:$0xff] %v401_v42 }
  0x95   :  { %434 = vst [vmem:[%s779_s3 + $0x28] sm:$0xff] %v402_v44 }
  0x97   :  { %v241_v45 = vpop.f32.mrf.mxu2 }
  0x98   :  { %v403_v46 = vadd.f32 %v652_v35, %v241_v45  ;;  %v270_v47 = vpop.f32.mrf.mxu3  ;;  %v186_v48 = vpop.f32.mrf.mxu0 }
  0x99   :  { %v404_v49 = vadd.f32 %v654_v36, %v270_v47  ;;  %v405_v50 = vadd.f32 %v640_v29, %v186_v48  ;;  %v215_v51 = vpop.f32.mrf.mxu1 }
  0x9a   :  { %435 = vst [vmem:[%s779_s3 + $0x30] sm:$0xff] %v403_v46  ;;  %v406_v52 = vadd.f32 %v642_v30, %v215_v51 }
  0x9b   :  { %436 = vst [vmem:[%s779_s3 + $0x38] sm:$0xff] %v404_v49 }
  0x9c   :  { %437 = vst [vmem:[%s779_s3 + $0x40] sm:$0xff] %v405_v50 }
  0x9d   :  { %438 = vst [vmem:[%s779_s3 + $0x48] sm:$0xff] %v406_v52 }
  0x9f   :  { %v244_v53 = vpop.f32.mrf.mxu2 }
  0xa0   :  { %v407_v54 = vadd.f32 %v652_v35, %v244_v53  ;;  %v273_v55 = vpop.f32.mrf.mxu3  ;;  %v188_v56 = vpop.f32.mrf.mxu0 }
  0xa1   :  { %v408_v57 = vadd.f32 %v654_v36, %v273_v55  ;;  %v409_v58 = vadd.f32 %v640_v29, %v188_v56  ;;  %v217_v59 = vpop.f32.mrf.mxu1 }
  0xa2   :  { %439 = vst [vmem:[%s779_s3 + $0x50] sm:$0xff] %v407_v54  ;;  %v410_v60 = vadd.f32 %v642_v30, %v217_v59 }
  0xa3   :  { %440 = vst [vmem:[%s779_s3 + $0x58] sm:$0xff] %v408_v57 }
  0xa4   :  { %441 = vst [vmem:[%s779_s3 + $0x60] sm:$0xff] %v409_v58 }
  0xa5   :  { %442 = vst [vmem:[%s779_s3 + $0x68] sm:$0xff] %v410_v60 }
  0xa7   :  { %v246_v61 = vpop.f32.mrf.mxu2 }
  0xa8   :  { %v411_v62 = vadd.f32 %v652_v35, %v246_v61  ;;  %v275_v63 = vpop.f32.mrf.mxu3  ;;  %v191_v0 = vpop.f32.mrf.mxu0 }
  0xa9   :  { %v412_v1 = vadd.f32 %v654_v36, %v275_v63  ;;  %v413_v2 = vadd.f32 %v640_v29, %v191_v0  ;;  %v220_v3 = vpop.f32.mrf.mxu1 }
  0xaa   :  { %443 = vst [vmem:[%s779_s3 + $0x70] sm:$0xff] %v411_v62  ;;  %v414_v4 = vadd.f32 %v642_v30, %v220_v3 }
  0xab   :  { %444 = vst [vmem:[%s779_s3 + $0x78] sm:$0xff] %v412_v1 }
  0xac   :  { %445 = vst [vmem:[%s779_s3 + $0x80] sm:$0xff] %v413_v2 }
  0xad   :  { %446 = vst [vmem:[%s779_s3 + $0x88] sm:$0xff] %v414_v4 }
  0xaf   :  { %v249_v5 = vpop.f32.mrf.mxu2 }
  0xb0   :  { %v415_v6 = vadd.f32 %v652_v35, %v249_v5  ;;  %v278_v7 = vpop.f32.mrf.mxu3  ;;  %v193_v8 = vpop.f32.mrf.mxu0 }
  0xb1   :  { %v416_v9 = vadd.f32 %v654_v36, %v278_v7  ;;  %v417_v10 = vadd.f32 %v640_v29, %v193_v8  ;;  %v222_v11 = vpop.f32.mrf.mxu1 }
  0xb2   :  { %447 = vst [vmem:[%s779_s3 + $0x90] sm:$0xff] %v415_v6  ;;  %v418_v12 = vadd.f32 %v642_v30, %v222_v11 }
  0xb3   :  { %448 = vst [vmem:[%s779_s3 + $0x98] sm:$0xff] %v416_v9 }
  0xb4   :  { %449 = vst [vmem:[%s779_s3 + $0xa0] sm:$0xff] %v417_v10 }
  0xb5   :  { %450 = vst [vmem:[%s779_s3 + $0xa8] sm:$0xff] %v418_v12 }
  0xb7   :  { %v251_v13 = vpop.f32.mrf.mxu2 }
  0xb8   :  { %v419_v14 = vadd.f32 %v652_v35, %v251_v13  ;;  %v280_v15 = vpop.f32.mrf.mxu3  ;;  %v196_v16 = vpop.f32.mrf.mxu0 }
  0xb9   :  { %v420_v17 = vadd.f32 %v654_v36, %v280_v15  ;;  %v421_v18 = vadd.f32 %v640_v29, %v196_v16  ;;  %v225_v19 = vpop.f32.mrf.mxu1 }
  0xba   :  { %451 = vst [vmem:[%s779_s3 + $0xb0] sm:$0xff] %v419_v14  ;;  %v422_v20 = vadd.f32 %v642_v30, %v225_v19 }
  0xbb   :  { %452 = vst [vmem:[%s779_s3 + $0xb8] sm:$0xff] %v420_v17 }
  0xbc   :  { %453 = vst [vmem:[%s779_s3 + $0xc0] sm:$0xff] %v421_v18 }
  0xbd   :  { %454 = vst [vmem:[%s779_s3 + $0xc8] sm:$0xff] %v422_v20 }
  0xbf   :  { %v254_v21 = vpop.f32.mrf.mxu2 }
  0xc0   :  { %v423_v22 = vadd.f32 %v652_v35, %v254_v21  ;;  %v283_v23 = vpop.f32.mrf.mxu3  ;;  %v198_v24 = vpop.f32.mrf.mxu0 }
  0xc1   :  { %v424_v25 = vadd.f32 %v654_v36, %v283_v23  ;;  %v425_v26 = vadd.f32 %v640_v29, %v198_v24  ;;  %v227_v27 = vpop.f32.mrf.mxu1 }
  0xc2   :  { %455 = vst [vmem:[%s779_s3 + $0xd0] sm:$0xff] %v423_v22  ;;  %v426_v28 = vadd.f32 %v642_v30, %v227_v27 }
  0xc3   :  { %456 = vst [vmem:[%s779_s3 + $0xd8] sm:$0xff] %v424_v25 }
  0xc4   :  { %457 = vst [vmem:[%s779_s3 + $0xe0] sm:$0xff] %v425_v26 }
  0xc5   :  { %458 = vst [vmem:[%s779_s3 + $0xe8] sm:$0xff] %v426_v28 }
  0xc7   :  { %v256_v29 = vpop.f32.mrf.mxu2 }
  0xc8   :  { %v427_v31 = vadd.f32 %v652_v35, %v256_v29  ;;  %v285_v32 = vpop.f32.mrf.mxu3 }
  0xc9   :  { %v428_v33 = vadd.f32 %v654_v36, %v285_v32 }
  0xca   :  { %459 = vst [vmem:[%s779_s3 + $0xf0] sm:$0xff] %v427_v31 }
  0xcb   :  { %460 = vst [vmem:[%s779_s3 + $0xf8] sm:$0xff] %v428_v33 }

// kernel: rnnlm_forward.4
= control target key start
LH: loop header
LB: loop body
LE: loop exit
PB: predicated region body
PF: predicated region fallthrough
CT: control target
= control target key end

     0   :  { %14 = vsyncpa [#allocation7], 0  ;;  %s12711_s0 = inlined_call_operand.vmem [shape: f32[8,8,512], index: 0, kind: input, shape index: {}]   ;;  %s12712_s1 = inlined_call_operand.hbm [shape: bf16[128,512], index: 1, kind: input, shape index: {}]   ;;  %s12713_s2 = inlined_call_operand.hbm [shape: bf16[256,512], index: 2, kind: input, shape index: {}]   ;;  %s12714_s3 = inlined_call_operand.vmem [shape: f32[1,512], index: 3, kind: input, shape index: {}]   ;;  %s12715_s4 = inlined_call_operand.vmem [shape: f32[2,8,128], index: 4, kind: input, shape index: {}]   ;;  %s12716_s5 = inlined_call_operand.vmem [shape: f32[2,8,128], index: 5, kind: input, shape index: {}]   ;;  %s12717_s6 = inlined_call_operand.vmem [shape: f32[8,8,128], index: 6, kind: output, shape index: {0}]   ;;  %s12718_s7 = inlined_call_operand.vmem [shape: f32[2,8,128], index: 7, kind: output, shape index: {1}]   ;;  %s12719_s8 = inlined_call_operand.vmem [shape: f32[2,8,128], index: 8, kind: output, shape index: {2}]  }
   0x1   :  { %s22_s29 = sshll.u32 %s12712_s1, 4  ;;  %s23_s29 = int_to_ptr.hbm [resolvable:$true] %s22_s29 }
   0x2   :  { %15 = vsyncpa [#allocation9], 0  ;;  %s11449_s30 = smov [#allocation6]   ;;  %s35_s12 = sshll.u32 %s12713_s2, 4  ;;  %s36_s12 = int_to_ptr.hbm [resolvable:$true] %s35_s12 }
   0x3   :  { %s24_s9 = sshll.u32 %s11449_s30, 4  ;;  %s11450_s13 = smov 256   ;;  %s25_s9 = int_to_ptr.vmem [resolvable:$true] %s24_s9 }
   0x4   :  { %s11451_s14 = smov 16   ;;  %s11452_s15 = smov [#allocation8]  }
   0x5   :  { %30 = dma.hbm_to_vmem [thread:$0]  %s23_s29, 4096, %s25_s9, [#allocation7], %s11450_s13, %s11450_s13, %s11451_s14  }
   0x6   :  { %s37_s16 = sshll.u32 %s11452_s15, 4  ;;  %s38_s16 = int_to_ptr.vmem [resolvable:$true] %s37_s16 }
   0x7   :  { %43 = dma.hbm_to_vmem [thread:$0]  %s36_s12, 8192, %s38_s16, [#allocation9], %s11450_s13, %s11450_s13, %s11451_s14  }
   0x8   :  { %11445 = dma.done.wait [#allocation7], 4096  }
   0x9   :  { %11446 = vsyncadd [#allocation7], 4294963200 }
   0xa   :  { %11447 = dma.done.wait [#allocation9], 8192  }
   0xb   :  { %11448 = vsyncadd [#allocation9], 4294959104  ;;  %v7326_v0 = vld [vmem:[#allocation6 + $0xe0] sm:$0xf]  ;;  %v10399_v1 = vld [vmem:[#allocation6 + $0xec] sm:$0xf0] }
   0xc   :  { %v10397_v2 = vld [vmem:[#allocation6 + $0xe4] sm:$0xf]  ;;  %v7327_v3 = vor.u32 %v10399_v1, %v7326_v0  ;;  %v7328_v4 = vld [vmem:[#allocation6 + $0xf0] sm:$0xf0]  ;;  %v10398_v5 = vld [vmem:[#allocation6 + $0xec] sm:$0xf] }
   0xd   :  { %v7336_v6 = vld [vmem:[#allocation6 + $0xf8] sm:$0xf0]  ;;  %v7331_v7 = vor.u32 %v10397_v2, %v7328_v4  ;;  %v7310_v9 = vld [vmem:[#allocation6 + $0xc0] sm:$0xf]  ;;  %v10395_v10 = vld [vmem:[#allocation6 + $0xcc] sm:$0xf0] }
   0xe   :  { %v7339_v8 = vor.u32 %v10398_v5, %v7336_v6  ;;  %v10393_v11 = vld [vmem:[#allocation6 + $0xc4] sm:$0xf]  ;;  %266 = vmatpush.bf16.msra.mxu0 %v7327_v3  ;;  %v7311_v12 = vor.u32 %v10395_v10, %v7310_v9  ;;  %v7312_v13 = vld [vmem:[#allocation6 + $0xd0] sm:$0xf0]  ;;  %v10394_v14 = vld [vmem:[#allocation6 + $0xcc] sm:$0xf] }
   0xf   :  { %v7320_v15 = vld [vmem:[#allocation6 + $0xd8] sm:$0xf0]  ;;  %279 = vmatpush.bf16.msra.mxu1 %v7331_v7  ;;  %v7315_v16 = vor.u32 %v10393_v11, %v7312_v13  ;;  %v7334_v18 = vld [vmem:[#allocation6 + $0xe8] sm:$0xf]  ;;  %v10400_v19 = vld [vmem:[#allocation6 + $0xf4] sm:$0xf0] }
  0x10   :  { %305 = vmatpush.bf16.msra.mxu3 %v7339_v8  ;;  %v7323_v17 = vor.u32 %v10394_v14, %v7320_v15  ;;  %v7294_v20 = vld [vmem:[#allocation6 + $0xa0] sm:$0xf]  ;;  %v7335_v21 = vor.u32 %v10400_v19, %v7334_v18  ;;  %v10391_v22 = vld [vmem:[#allocation6 + $0xac] sm:$0xf0]  ;;  %v10389_v23 = vld [vmem:[#allocation6 + $0xa4] sm:$0xf] }
  0x11   :  { %v7296_v24 = vld [vmem:[#allocation6 + $0xb0] sm:$0xf0]  ;;  %v10390_v25 = vld [vmem:[#allocation6 + $0xac] sm:$0xf]  ;;  %v7304_v26 = vld [vmem:[#allocation6 + $0xb8] sm:$0xf0]  ;;  %v7295_v28 = vor.u32 %v10391_v22, %v7294_v20 }
  0x12   :  { %v7318_v27 = vld [vmem:[#allocation6 + $0xc8] sm:$0xf]  ;;  %267 = vmatpush.bf16.msra.mxu0 %v7311_v12  ;;  %292 = vmatpush.bf16.msra.mxu2 %v7335_v21  ;;  %v10396_v29 = vld [vmem:[#allocation6 + $0xd4] sm:$0xf0]  ;;  %v7278_v30 = vld [vmem:[#allocation6 + $0x80] sm:$0xf]  ;;  %v7299_v32 = vor.u32 %v10389_v23, %v7296_v24  ;;  %v7307_v33 = vor.u32 %v10390_v25, %v7304_v26 }
  0x13   :  { %v10387_v31 = vld [vmem:[#allocation6 + $0x8c] sm:$0xf0]  ;;  %280 = vmatpush.bf16.msra.mxu1 %v7315_v16  ;;  %v7319_v34 = vor.u32 %v10396_v29, %v7318_v27  ;;  %v10385_v35 = vld [vmem:[#allocation6 + $0x84] sm:$0xf]  ;;  %v7280_v36 = vld [vmem:[#allocation6 + $0x90] sm:$0xf0] }
  0x14   :  { %306 = vmatpush.bf16.msra.mxu3 %v7323_v17  ;;  %v10386_v37 = vld [vmem:[#allocation6 + $0x8c] sm:$0xf]  ;;  %v7288_v38 = vld [vmem:[#allocation6 + $0x98] sm:$0xf0]  ;;  %v7302_v39 = vld [vmem:[#allocation6 + $0xa8] sm:$0xf]  ;;  %v7279_v41 = vor.u32 %v10387_v31, %v7278_v30  ;;  %v7283_v45 = vor.u32 %v10385_v35, %v7280_v36 }
  0x15   :  { %v10392_v40 = vld [vmem:[#allocation6 + $0xb4] sm:$0xf0]  ;;  %v7262_v43 = vld [vmem:[#allocation6 + $0x60] sm:$0xf]  ;;  %v10383_v44 = vld [vmem:[#allocation6 + $0x6c] sm:$0xf0]  ;;  %v7291_v46 = vor.u32 %v10386_v37, %v7288_v38 }
  0x16   :  { %268 = vmatpush.bf16.msra.mxu0 %v7295_v28  ;;  %293 = vmatpush.bf16.msra.mxu2 %v7319_v34  ;;  %v7303_v42 = vor.u32 %v10392_v40, %v7302_v39  ;;  %v10381_v47 = vld [vmem:[#allocation6 + $0x64] sm:$0xf]  ;;  %v7286_v48 = vld [vmem:[#allocation6 + $0x88] sm:$0xf]  ;;  %v10388_v49 = vld [vmem:[#allocation6 + $0x94] sm:$0xf0]  ;;  %v7263_v53 = vor.u32 %v10383_v44, %v7262_v43 }
  0x17   :  { %281 = vmatpush.bf16.msra.mxu1 %v7299_v32  ;;  %v7264_v50 = vld [vmem:[#allocation6 + $0x70] sm:$0xf0]  ;;  %v10382_v51 = vld [vmem:[#allocation6 + $0x6c] sm:$0xf]  ;;  %v7272_v52 = vld [vmem:[#allocation6 + $0x78] sm:$0xf0]  ;;  %v7287_v54 = vor.u32 %v10388_v49, %v7286_v48 }
  0x18   :  { %307 = vmatpush.bf16.msra.mxu3 %v7307_v33  ;;  %v7246_v55 = vld [vmem:[#allocation6 + $0x40] sm:$0xf]  ;;  %v10379_v56 = vld [vmem:[#allocation6 + $0x4c] sm:$0xf0]  ;;  %v7267_v57 = vor.u32 %v10381_v47, %v7264_v50  ;;  %v7275_v58 = vor.u32 %v10382_v51, %v7272_v52  ;;  %v10377_v59 = vld [vmem:[#allocation6 + $0x44] sm:$0xf] }
  0x19   :  { %v7270_v60 = vld [vmem:[#allocation6 + $0x68] sm:$0xf]  ;;  %v10384_v61 = vld [vmem:[#allocation6 + $0x74] sm:$0xf0]  ;;  %v7248_v62 = vld [vmem:[#allocation6 + $0x50] sm:$0xf0]  ;;  %v7247_v1 = vor.u32 %v10379_v56, %v7246_v55 }
  0x1a   :  { %269 = vmatpush.bf16.msra.mxu0 %v7279_v41  ;;  %294 = vmatpush.bf16.msra.mxu2 %v7303_v42  ;;  %v10378_v63 = vld [vmem:[#allocation6 + $0x4c] sm:$0xf]  ;;  %v7256_v0 = vld [vmem:[#allocation6 + $0x58] sm:$0xf0]  ;;  %v7271_v2 = vor.u32 %v10384_v61, %v7270_v60  ;;  %v7230_v3 = vld [vmem:[#allocation6 + $0x20] sm:$0xf]  ;;  %v7251_v5 = vor.u32 %v10377_v59, %v7248_v62 }
  0x1b   :  { %282 = vmatpush.bf16.msra.mxu1 %v7283_v45  ;;  %v10375_v4 = vld [vmem:[#allocation6 + $0x2c] sm:$0xf0]  ;;  %v7259_v6 = vor.u32 %v10378_v63, %v7256_v0  ;;  %v10373_v7 = vld [vmem:[#allocation6 + $0x24] sm:$0xf]  ;;  %v7254_v8 = vld [vmem:[#allocation6 + $0x48] sm:$0xf] }
  0x1c   :  { %308 = vmatpush.bf16.msra.mxu3 %v7291_v46  ;;  %v10380_v9 = vld [vmem:[#allocation6 + $0x54] sm:$0xf0]  ;;  %v7232_v10 = vld [vmem:[#allocation6 + $0x30] sm:$0xf0]  ;;  %v10374_v11 = vld [vmem:[#allocation6 + $0x2c] sm:$0xf]  ;;  %v7231_v13 = vor.u32 %v10375_v4, %v7230_v3 }
  0x1d   :  { %v7240_v12 = vld [vmem:[#allocation6 + $0x38] sm:$0xf0]  ;;  %v7255_v14 = vor.u32 %v10380_v9, %v7254_v8  ;;  %v7214_v15 = vld [vmem:[#allocation6] sm:$0xf]  ;;  %v10371_v16 = vld [vmem:[#allocation6 + $0xc] sm:$0xf0]  ;;  %v7235_v18 = vor.u32 %v10373_v7, %v7232_v10 }
  0x1e   :  { %270 = vmatpush.bf16.msra.mxu0 %v7263_v53  ;;  %295 = vmatpush.bf16.msra.mxu2 %v7287_v54  ;;  %v10369_v17 = vld [vmem:[#allocation6 + $0x4] sm:$0xf]  ;;  %v7243_v19 = vor.u32 %v10374_v11, %v7240_v12  ;;  %v7216_v20 = vld [vmem:[#allocation6 + $0x10] sm:$0xf0]  ;;  %v7238_v21 = vld [vmem:[#allocation6 + $0x28] sm:$0xf]  ;;  %v7215_v29 = vor.u32 %v10371_v16, %v7214_v15 }
  0x1f   :  { %283 = vmatpush.bf16.msra.mxu1 %v7267_v57  ;;  %v10376_v22 = vld [vmem:[#allocation6 + $0x34] sm:$0xf0]  ;;  %v10370_v23 = vld [vmem:[#allocation6 + $0xc] sm:$0xf]  ;;  %v7224_v24 = vld [vmem:[#allocation6 + $0x18] sm:$0xf0]  ;;  %v7219_v32 = vor.u32 %v10369_v17, %v7216_v20 }
  0x20   :  { %309 = vmatpush.bf16.msra.mxu3 %v7275_v58  ;;  %v7585_v25 = vld [vmem:[#allocation8 + $0x1e0] sm:$0xf]  ;;  %v10463_v26 = vld [vmem:[#allocation8 + $0x1ec] sm:$0xf0]  ;;  %v10461_v27 = vld [vmem:[#allocation8 + $0x1e4] sm:$0xf]  ;;  %v7239_v31 = vor.u32 %v10376_v22, %v7238_v21  ;;  %v7227_v33 = vor.u32 %v10370_v23, %v7224_v24 }
  0x21   :  { %v7587_v28 = vld [vmem:[#allocation8 + $0x1f0] sm:$0xf0]  ;;  %v58_v30 = vld [vmem:[%s12715_s4] sm:$0xff]  ;;  %v7222_v34 = vld [vmem:[#allocation6 + $0x8] sm:$0xf]  ;;  %v7586_v36 = vor.u32 %v10463_v26, %v7585_v25 }
  0x22   :  { %271 = vmatpush.bf16.msra.mxu0 %v7247_v1  ;;  %296 = vmatpush.bf16.msra.mxu2 %v7271_v2  ;;  %v10372_v35 = vld [vmem:[#allocation6 + $0x14] sm:$0xf0]  ;;  %v7590_v37 = vor.u32 %v10461_v27, %v7587_v28  ;;  %v7569_v38 = vld [vmem:[#allocation8 + $0x1c0] sm:$0xf]  ;;  %v73_v39 = vpack.c.bf16 %v58_v30, %v58_v30  ;;  %v10459_v40 = vld [vmem:[#allocation8 + $0x1cc] sm:$0xf0] }
  0x23   :  { %284 = vmatpush.bf16.msra.mxu1 %v7251_v5  ;;  %v10457_v41 = vld [vmem:[#allocation8 + $0x1c4] sm:$0xf]  ;;  %v7571_v42 = vld [vmem:[#allocation8 + $0x1d0] sm:$0xf0]  ;;  %v7223_v43 = vor.u32 %v10372_v35, %v7222_v34  ;;  %v7553_v44 = vld [vmem:[#allocation8 + $0x1a0] sm:$0xf]  ;;  %v7570_v46 = vor.u32 %v10459_v40, %v7569_v38 }
  0x24   :  { %310 = vmatpush.bf16.msra.mxu3 %v7259_v6  ;;  %v10455_v45 = vld [vmem:[#allocation8 + $0x1ac] sm:$0xf0]  ;;  %v7574_v47 = vor.u32 %v10457_v41, %v7571_v42  ;;  %v10453_v48 = vld [vmem:[#allocation8 + $0x1a4] sm:$0xf]  ;;  %v7555_v49 = vld [vmem:[#allocation8 + $0x1b0] sm:$0xf0] }
  0x25   :  { %v7457_v50 = vld [vmem:[#allocation8 + $0xe0] sm:$0xf]  ;;  %v10431_v51 = vld [vmem:[#allocation8 + $0xec] sm:$0xf0]  ;;  %v10429_v52 = vld [vmem:[#allocation8 + $0xe4] sm:$0xf]  ;;  %v7554_v58 = vor.u32 %v10455_v45, %v7553_v44  ;;  %v7558_v59 = vor.u32 %v10453_v48, %v7555_v49 }
  0x26   :  { %272 = vmatpush.bf16.msra.mxu0 %v7231_v13  ;;  %297 = vmatpush.bf16.msra.mxu2 %v7255_v14  ;;  %v7459_v53 = vld [vmem:[#allocation8 + $0xf0] sm:$0xf0]  ;;  %v7458_v54 = vor.u32 %v10431_v51, %v7457_v50  ;;  %v7441_v56 = vld [vmem:[#allocation8 + $0xc0] sm:$0xf]  ;;  %v10427_v57 = vld [vmem:[#allocation8 + $0xcc] sm:$0xf0] }
  0x27   :  { %285 = vmatpush.bf16.msra.mxu1 %v7235_v18  ;;  %v7462_v55 = vor.u32 %v10429_v52, %v7459_v53  ;;  %v7537_v60 = vld [vmem:[#allocation8 + $0x180] sm:$0xf]  ;;  %v10425_v61 = vld [vmem:[#allocation8 + $0xc4] sm:$0xf]  ;;  %v7443_v62 = vld [vmem:[#allocation8 + $0xd0] sm:$0xf0]  ;;  %v7442_v2 = vor.u32 %v10427_v57, %v7441_v56 }
  0x28   :  { %311 = vmatpush.bf16.msra.mxu3 %v7243_v19  ;;  %v10451_v63 = vld [vmem:[#allocation8 + $0x18c] sm:$0xf0]  ;;  %v10449_v0 = vld [vmem:[#allocation8 + $0x184] sm:$0xf]  ;;  %v7539_v1 = vld [vmem:[#allocation8 + $0x190] sm:$0xf0]  ;;  %v7446_v3 = vor.u32 %v10425_v61, %v7443_v62 }
  0x29   :  { %v7425_v4 = vld [vmem:[#allocation8 + $0xa0] sm:$0xf]  ;;  %v10423_v5 = vld [vmem:[#allocation8 + $0xac] sm:$0xf0]  ;;  %v10421_v6 = vld [vmem:[#allocation8 + $0xa4] sm:$0xf]  ;;  %v7538_v8 = vor.u32 %v10451_v63, %v7537_v60  ;;  %v7542_v9 = vor.u32 %v10449_v0, %v7539_v1 }
  0x2a   :  { %273 = vmatpush.bf16.msra.mxu0 %v7215_v29  ;;  %298 = vmatpush.bf16.msra.mxu2 %v7239_v31  ;;  %v7427_v7 = vld [vmem:[#allocation8 + $0xb0] sm:$0xf0]  ;;  %v7521_v10 = vld [vmem:[#allocation8 + $0x160] sm:$0xf]  ;;  %v10447_v11 = vld [vmem:[#allocation8 + $0x16c] sm:$0xf0]  ;;  %v7426_v14 = vor.u32 %v10423_v5, %v7425_v4 }
  0x2b   :  { %286 = vmatpush.bf16.msra.mxu1 %v7219_v32  ;;  %v10445_v12 = vld [vmem:[#allocation8 + $0x164] sm:$0xf]  ;;  %v7523_v13 = vld [vmem:[#allocation8 + $0x170] sm:$0xf0]  ;;  %v7430_v15 = vor.u32 %v10421_v6, %v7427_v7  ;;  %v7522_v16 = vor.u32 %v10447_v11, %v7521_v10  ;;  %v7505_v18 = vld [vmem:[#allocation8 + $0x140] sm:$0xf] }
  0x2c   :  { %312 = vmatpush.bf16.msra.mxu3 %v7227_v33  ;;  %v7526_v17 = vor.u32 %v10445_v12, %v7523_v13  ;;  %v10443_v19 = vld [vmem:[#allocation8 + $0x14c] sm:$0xf0]  ;;  %v10441_v20 = vld [vmem:[#allocation8 + $0x144] sm:$0xf]  ;;  %v7507_v21 = vld [vmem:[#allocation8 + $0x150] sm:$0xf0] }
  0x2d   :  { %274 = vmatmul.bf16.vlgmr.msra.gmra.mxu0 %v73_v39  ;;  %v7506_v22 = vor.u32 %v10443_v19, %v7505_v18  ;;  %v7510_v23 = vor.u32 %v10441_v20, %v7507_v21  ;;  %v7489_v24 = vld [vmem:[#allocation8 + $0x120] sm:$0xf]  ;;  %v10439_v25 = vld [vmem:[#allocation8 + $0x12c] sm:$0xf0]  ;;  %v10437_v26 = vld [vmem:[#allocation8 + $0x124] sm:$0xf] }
  0x2e   :  { %287 = vmatmul.bf16.vlgmr.msra.gmra.mxu1 %v73_v39  ;;  %299 = vmatpush.bf16.msra.mxu2 %v7223_v43  ;;  %v7491_v27 = vld [vmem:[#allocation8 + $0x130] sm:$0xf0]  ;;  %v7490_v28 = vor.u32 %v10439_v25, %v7489_v24  ;;  %v7473_v30 = vld [vmem:[#allocation8 + $0x100] sm:$0xf]  ;;  %v10435_v31 = vld [vmem:[#allocation8 + $0x10c] sm:$0xf0] }
  0x2f   :  { %798 = vmatpush.bf16.msrb.mxu1 %v7586_v36  ;;  %313 = vmatmul.bf16.vlgmr.msra.gmra.mxu3 %v73_v39  ;;  %v7494_v29 = vor.u32 %v10437_v26, %v7491_v27  ;;  %v10433_v32 = vld [vmem:[#allocation8 + $0x104] sm:$0xf]  ;;  %v7475_v33 = vld [vmem:[#allocation8 + $0x110] sm:$0xf0]  ;;  %v7593_v34 = vld [vmem:[#allocation8 + $0x1e8] sm:$0xf]  ;;  %v7474_v38 = vor.u32 %v10435_v31, %v7473_v30 }
  0x30   :  { %824 = vmatpush.bf16.msrb.mxu3 %v7590_v37  ;;  %785 = vmatpush.bf16.msrb.mxu0 %v7458_v54  ;;  %v10464_v35 = vld [vmem:[#allocation8 + $0x1f4] sm:$0xf0]  ;;  %v10462_v36 = vld [vmem:[#allocation8 + $0x1ec] sm:$0xf]  ;;  %v7595_v37 = vld [vmem:[#allocation8 + $0x1f8] sm:$0xf0] }
  0x31   :  { %300 = vmatmul.bf16.vlgmr.msra.gmra.mxu2 %v73_v39  ;;  %v7478_v39 = vor.u32 %v10433_v32, %v7475_v33  ;;  %v7594_v40 = vor.u32 %v10464_v35, %v7593_v34  ;;  %v7598_v41 = vor.u32 %v10462_v36, %v7595_v37  ;;  %v7577_v42 = vld [vmem:[#allocation8 + $0x1c8] sm:$0xf]  ;;  %v10460_v43 = vld [vmem:[#allocation8 + $0x1d4] sm:$0xf0]  ;;  %v10458_v44 = vld [vmem:[#allocation8 + $0x1cc] sm:$0xf] }
  0x32   :  { %811 = vmatpush.bf16.msrb.mxu2 %v7462_v55  ;;  %v7579_v45 = vld [vmem:[#allocation8 + $0x1d8] sm:$0xf0]  ;;  %v7561_v48 = vld [vmem:[#allocation8 + $0x1a8] sm:$0xf]  ;;  %v10456_v49 = vld [vmem:[#allocation8 + $0x1b4] sm:$0xf0] }
  0x33   :  { %799 = vmatpush.bf16.msrb.mxu1 %v7570_v46  ;;  %v7578_v46 = vor.u32 %v10460_v43, %v7577_v42  ;;  %v10454_v50 = vld [vmem:[#allocation8 + $0x1ac] sm:$0xf]  ;;  %v7563_v51 = vld [vmem:[#allocation8 + $0x1b8] sm:$0xf0]  ;;  %v7562_v52 = vor.u32 %v10456_v49, %v7561_v48  ;;  %v7545_v54 = vld [vmem:[#allocation8 + $0x188] sm:$0xf] }
  0x34   :  { %825 = vmatpush.bf16.msrb.mxu3 %v7574_v47  ;;  %786 = vmatpush.bf16.msrb.mxu0 %v7442_v2  ;;  %v7582_v47 = vor.u32 %v10458_v44, %v7579_v45  ;;  %v7566_v53 = vor.u32 %v10454_v50, %v7563_v51  ;;  %v10452_v55 = vld [vmem:[#allocation8 + $0x194] sm:$0xf0]  ;;  %v10450_v56 = vld [vmem:[#allocation8 + $0x18c] sm:$0xf]  ;;  %v7547_v57 = vld [vmem:[#allocation8 + $0x198] sm:$0xf0] }
  0x35   :  { %v7409_v60 = vld [vmem:[#allocation8 + $0x80] sm:$0xf]  ;;  %v10419_v61 = vld [vmem:[#allocation8 + $0x8c] sm:$0xf0]  ;;  %v10417_v62 = vld [vmem:[#allocation8 + $0x84] sm:$0xf] }
  0x36   :  { %812 = vmatpush.bf16.msrb.mxu2 %v7446_v3  ;;  %v7410_v63 = vor.u32 %v10419_v61, %v7409_v60  ;;  %v7411_v0 = vld [vmem:[#allocation8 + $0x90] sm:$0xf0]  ;;  %v7529_v1 = vld [vmem:[#allocation8 + $0x168] sm:$0xf]  ;;  %v10448_v2 = vld [vmem:[#allocation8 + $0x174] sm:$0xf0] }
  0x37   :  { %800 = vmatpush.bf16.msrb.mxu1 %v7554_v58  ;;  %v7546_v58 = vor.u32 %v10452_v55, %v7545_v54  ;;  %v7414_v3 = vor.u32 %v10417_v62, %v7411_v0  ;;  %v7530_v4 = vor.u32 %v10448_v2, %v7529_v1  ;;  %v10446_v5 = vld [vmem:[#allocation8 + $0x16c] sm:$0xf]  ;;  %v7531_v6 = vld [vmem:[#allocation8 + $0x178] sm:$0xf0]  ;;  %v10413_v10 = vld [vmem:[#allocation8 + $0x64] sm:$0xf] }
  0x38   :  { %826 = vmatpush.bf16.msrb.mxu3 %v7558_v59  ;;  %787 = vmatpush.bf16.msrb.mxu0 %v7426_v14  ;;  %v7550_v59 = vor.u32 %v10450_v56, %v7547_v57  ;;  %v7534_v7 = vor.u32 %v10446_v5, %v7531_v6  ;;  %v7395_v12 = vld [vmem:[#allocation8 + $0x70] sm:$0xf0]  ;;  %v7513_v13 = vld [vmem:[#allocation8 + $0x148] sm:$0xf]  ;;  %v10444_v14 = vld [vmem:[#allocation8 + $0x154] sm:$0xf0] }
  0x39   :  { %v7515_v18 = vld [vmem:[#allocation8 + $0x158] sm:$0xf0]  ;;  %v7377_v20 = vld [vmem:[#allocation8 + $0x40] sm:$0xf]  ;;  %v10411_v21 = vld [vmem:[#allocation8 + $0x4c] sm:$0xf0] }
  0x3a   :  { %813 = vmatpush.bf16.msrb.mxu2 %v7430_v15  ;;  %v7398_v15 = vor.u32 %v10413_v10, %v7395_v12  ;;  %v7379_v24 = vld [vmem:[#allocation8 + $0x50] sm:$0xf0]  ;;  %v7497_v25 = vld [vmem:[#allocation8 + $0x128] sm:$0xf]  ;;  %v10440_v27 = vld [vmem:[#allocation8 + $0x134] sm:$0xf0] }
  0x3b   :  { %801 = vmatpush.bf16.msrb.mxu1 %v7538_v8  ;;  %v7393_v8 = vld [vmem:[#allocation8 + $0x60] sm:$0xf]  ;;  %v7498_v30 = vor.u32 %v10440_v27, %v7497_v25  ;;  %v10407_v33 = vld [vmem:[#allocation8 + $0x2c] sm:$0xf0]  ;;  %v10405_v34 = vld [vmem:[#allocation8 + $0x24] sm:$0xf] }
  0x3c   :  { %827 = vmatpush.bf16.msrb.mxu3 %v7542_v9  ;;  %788 = vmatpush.bf16.msrb.mxu0 %v7410_v63  ;;  %v10415_v9 = vld [vmem:[#allocation8 + $0x6c] sm:$0xf0]  ;;  %v7361_v32 = vld [vmem:[#allocation8 + $0x20] sm:$0xf]  ;;  %v7363_v36 = vld [vmem:[#allocation8 + $0x30] sm:$0xf0] }
  0x3d   :  { %v7394_v11 = vor.u32 %v10415_v9, %v7393_v8  ;;  %v7362_v35 = vor.u32 %v10407_v33, %v7361_v32  ;;  %v7210_v37 = vld [vmem:[%s12715_s4 + $0x8] sm:$0xff]  ;;  %v7483_v43 = vld [vmem:[#allocation8 + $0x118] sm:$0xf0]  ;;  %v7345_v51 = vld [vmem:[#allocation8] sm:$0xf] }
  0x3e   :  { %814 = vmatpush.bf16.msrb.mxu2 %v7414_v3  ;;  %v10434_v42 = vld [vmem:[#allocation8 + $0x10c] sm:$0xf]  ;;  %v7730_v50 = vld [vmem:[#allocation6 + $0xf8] sm:$0xf0]  ;;  %v10401_v55 = vld [vmem:[#allocation8 + $0x4] sm:$0xf] }
  0x3f   :  { %802 = vmatpush.bf16.msrb.mxu1 %v7522_v16  ;;  %v7514_v16 = vor.u32 %v10444_v14, %v7513_v13  ;;  %v7486_v45 = vor.u32 %v10434_v42, %v7483_v43  ;;  %v10494_v48 = vld [vmem:[#allocation6 + $0xec] sm:$0xf]  ;;  %v7347_v56 = vld [vmem:[#allocation8 + $0x10] sm:$0xf0]  ;;  %v7465_v57 = vld [vmem:[#allocation8 + $0xe8] sm:$0xf] }
  0x40   :  { %828 = vmatpush.bf16.msrb.mxu3 %v7526_v17  ;;  %v10442_v17 = vld [vmem:[#allocation8 + $0x14c] sm:$0xf]  ;;  %789 = vmatpush.bf16.msrb.mxu0 %v7394_v11  ;;  %v7467_v61 = vld [vmem:[#allocation8 + $0xf8] sm:$0xf0]  ;;  %v10489_v0 = vld [vmem:[#allocation6 + $0xc4] sm:$0xf] }
  0x41   :  { %v7518_v19 = vor.u32 %v10442_v17, %v7515_v18  ;;  %v10430_v60 = vld [vmem:[#allocation8 + $0xec] sm:$0xf]  ;;  %v7706_v1 = vld [vmem:[#allocation6 + $0xd0] sm:$0xf0]  ;;  %v7449_v6 = vld [vmem:[#allocation8 + $0xc8] sm:$0xf] }
  0x42   :  { %815 = vmatpush.bf16.msrb.mxu2 %v7398_v15  ;;  %v7470_v63 = vor.u32 %v10430_v60, %v7467_v61  ;;  %v10490_v2 = vld [vmem:[#allocation6 + $0xcc] sm:$0xf]  ;;  %v7709_v3 = vor.u32 %v10489_v0, %v7706_v1  ;;  %v7451_v10 = vld [vmem:[#allocation8 + $0xd8] sm:$0xf0]  ;;  %v10485_v11 = vld [vmem:[#allocation6 + $0xa4] sm:$0xf] }
  0x43   :  { %803 = vmatpush.bf16.msrb.mxu1 %v7506_v22  ;;  %v7378_v22 = vor.u32 %v10411_v21, %v7377_v20  ;;  %v10426_v8 = vld [vmem:[#allocation8 + $0xcc] sm:$0xf]  ;;  %v7690_v13 = vld [vmem:[#allocation6 + $0xb0] sm:$0xf0]  ;;  %v7698_v15 = vld [vmem:[#allocation6 + $0xb8] sm:$0xf0] }
  0x44   :  { %829 = vmatpush.bf16.msrb.mxu3 %v7510_v23  ;;  %v10409_v23 = vld [vmem:[#allocation8 + $0x44] sm:$0xf]  ;;  %v7454_v12 = vor.u32 %v10426_v8, %v7451_v10  ;;  %v10486_v14 = vld [vmem:[#allocation6 + $0xac] sm:$0xf]  ;;  %v7433_v18 = vld [vmem:[#allocation8 + $0xa8] sm:$0xf] }
  0x45   :  { %v7382_v26 = vor.u32 %v10409_v23, %v7379_v24  ;;  %790 = vmatpush.bf16.msrb.mxu0 %v7378_v22  ;;  %v7701_v17 = vor.u32 %v10486_v14, %v7698_v15  ;;  %v10422_v20 = vld [vmem:[#allocation8 + $0xac] sm:$0xf]  ;;  %v7435_v22 = vld [vmem:[#allocation8 + $0xb8] sm:$0xf0]  ;;  %v10481_v23 = vld [vmem:[#allocation6 + $0x84] sm:$0xf] }
  0x46   :  { %v7674_v24 = vld [vmem:[#allocation6 + $0x90] sm:$0xf0]  ;;  %v7438_v25 = vor.u32 %v10422_v20, %v7435_v22  ;;  %v10482_v27 = vld [vmem:[#allocation6 + $0x8c] sm:$0xf]  ;;  %v10420_v32 = vld [vmem:[#allocation8 + $0x94] sm:$0xf0] }
  0x47   :  { %804 = vmatpush.bf16.msrb.mxu1 %v7490_v28  ;;  %v10438_v28 = vld [vmem:[#allocation8 + $0x12c] sm:$0xf]  ;;  %816 = vmatpush.bf16.msrb.mxu2 %v7382_v26  ;;  %v7677_v26 = vor.u32 %v10481_v23, %v7674_v24  ;;  %v7666_v43 = vld [vmem:[#allocation6 + $0x78] sm:$0xf0]  ;;  %v10412_v0 = vld [vmem:[#allocation8 + $0x54] sm:$0xf0] }
  0x48   :  { %830 = vmatpush.bf16.msrb.mxu3 %v7494_v29  ;;  %v7499_v29 = vld [vmem:[#allocation8 + $0x138] sm:$0xf0]  ;;  %v10418_v33 = vld [vmem:[#allocation8 + $0x8c] sm:$0xf]  ;;  %v7369_v15 = vld [vmem:[#allocation8 + $0x28] sm:$0xf] }
  0x49   :  { %v7502_v31 = vor.u32 %v10438_v28, %v7499_v29  ;;  %791 = vmatpush.bf16.msrb.mxu0 %v7362_v35  ;;  %v7682_v28 = vld [vmem:[#allocation6 + $0x98] sm:$0xf0]  ;;  %v68_v29 = vld [vmem:[%s12711_s0] sm:$0xff]  ;;  %v10478_v42 = vld [vmem:[#allocation6 + $0x6c] sm:$0xf] }
  0x4a   :  { %v7419_v35 = vld [vmem:[#allocation8 + $0x98] sm:$0xf0]  ;;  %v10410_v1 = vld [vmem:[#allocation8 + $0x4c] sm:$0xf] }
  0x4b   :  { %805 = vmatpush.bf16.msrb.mxu1 %v7474_v38  ;;  %v7481_v38 = vld [vmem:[#allocation8 + $0x108] sm:$0xf]  ;;  %v7650_v60 = vld [vmem:[#allocation6 + $0x58] sm:$0xf0] }
  0x4c   :  { %831 = vmatpush.bf16.msrb.mxu3 %v7478_v39  ;;  %v7366_v39 = vor.u32 %v10405_v34, %v7363_v36  ;;  %v10477_v36 = vld [vmem:[#allocation6 + $0x64] sm:$0xf]  ;;  %v7634_v10 = vld [vmem:[#allocation6 + $0x38] sm:$0xf0] }
  0x4d   :  { %v7371_v20 = vld [vmem:[#allocation8 + $0x38] sm:$0xf0] }
  0x4e   :  { %817 = vmatpush.bf16.msrb.mxu2 %v7366_v39  ;;  %v7422_v39 = vor.u32 %v10418_v33, %v7419_v35  ;;  %v7353_v33 = vld [vmem:[#allocation8 + $0x8] sm:$0xf]  ;;  %v10402_v35 = vld [vmem:[#allocation8 + $0xc] sm:$0xf] }
  0x4f   :  { %850 = vmatpush.bf16.msra.mxu1 %v7594_v40  ;;  %v11510_v40 = vpack.c.bf16 %v7210_v37, %v7210_v37  ;;  %v7658_v37 = vld [vmem:[#allocation6 + $0x70] sm:$0xf0] }
  0x50   :  { %876 = vmatpush.bf16.msra.mxu3 %v7598_v41  ;;  %v10436_v41 = vld [vmem:[#allocation8 + $0x114] sm:$0xf0] }
  0x51   :  { %v7482_v44 = vor.u32 %v10436_v41, %v7481_v38  ;;  %806 = vmatmul.bf16.vlgmr.msrb.gmra.mxu1 %v11510_v40  ;;  %832 = vmatmul.bf16.vlgmr.msrb.gmra.mxu3 %v11510_v40  ;;  %v69_v38 = vld [vmem:[%s12711_s0 + $0x8] sm:$0xff]  ;;  %v7661_v41 = vor.u32 %v10477_v36, %v7658_v37  ;;  %v70_v36 = vld [vmem:[%s12711_s0 + $0x10] sm:$0xff] }
  0x53   :  { %851 = vmatpush.bf16.msra.mxu1 %v7578_v46  ;;  %v10493_v46 = vld [vmem:[#allocation6 + $0xe4] sm:$0xf] }
  0x54   :  { %877 = vmatpush.bf16.msra.mxu3 %v7582_v47  ;;  %v7722_v47 = vld [vmem:[#allocation6 + $0xf0] sm:$0xf0] }
  0x55   :  { %v7725_v49 = vor.u32 %v10493_v46, %v7722_v47 }
  0x57   :  { %852 = vmatpush.bf16.msra.mxu1 %v7562_v52  ;;  %v10403_v52 = vld [vmem:[#allocation8 + $0xc] sm:$0xf0] }
  0x58   :  { %878 = vmatpush.bf16.msra.mxu3 %v7566_v53  ;;  %v7733_v53 = vor.u32 %v10494_v48, %v7730_v50  ;;  %v7346_v54 = vor.u32 %v10403_v52, %v7345_v51  ;;  %v7401_v48 = vld [vmem:[#allocation8 + $0x68] sm:$0xf]  ;;  %v10414_v50 = vld [vmem:[#allocation8 + $0x6c] sm:$0xf] }
  0x5a   :  { %792 = vmatpush.bf16.msrb.mxu0 %v7346_v54  ;;  %v10473_v54 = vld [vmem:[#allocation6 + $0x44] sm:$0xf] }
  0x5b   :  { %853 = vmatpush.bf16.msra.mxu1 %v7546_v58  ;;  %v7350_v58 = vor.u32 %v10401_v55, %v7347_v56  ;;  %v7642_v55 = vld [vmem:[#allocation6 + $0x50] sm:$0xf0] }
  0x5c   :  { %879 = vmatpush.bf16.msra.mxu3 %v7550_v59  ;;  %v10432_v59 = vld [vmem:[#allocation8 + $0xf4] sm:$0xf0] }
  0x5d   :  { %v7466_v62 = vor.u32 %v10432_v59, %v7465_v57  ;;  %818 = vmatpush.bf16.msrb.mxu2 %v7350_v58  ;;  %v7645_v58 = vor.u32 %v10473_v54, %v7642_v55  ;;  %v10474_v59 = vld [vmem:[#allocation6 + $0x4c] sm:$0xf] }
  0x5f   :  { %854 = vmatpush.bf16.msra.mxu1 %v7530_v4  ;;  %v7714_v4 = vld [vmem:[#allocation6 + $0xd8] sm:$0xf0]  ;;  %837 = vmatpush.bf16.msra.mxu0 %v7466_v62 }
  0x60   :  { %880 = vmatpush.bf16.msra.mxu3 %v7534_v7  ;;  %v7717_v5 = vor.u32 %v10490_v2, %v7714_v4  ;;  %v10428_v7 = vld [vmem:[#allocation8 + $0xd4] sm:$0xf0]  ;;  %v10469_v4 = vld [vmem:[#allocation6 + $0x24] sm:$0xf] }
  0x61   :  { %863 = vmatpush.bf16.msra.mxu2 %v7470_v63  ;;  %v7450_v9 = vor.u32 %v10428_v7, %v7449_v6  ;;  %v71_v62 = vld [vmem:[%s12711_s0 + $0x18] sm:$0xff]  ;;  %v7653_v63 = vor.u32 %v10474_v59, %v7650_v60 }
  0x63   :  { %855 = vmatpush.bf16.msra.mxu1 %v7514_v16  ;;  %v7693_v16 = vor.u32 %v10485_v11, %v7690_v13  ;;  %838 = vmatpush.bf16.msra.mxu0 %v7450_v9  ;;  %v10470_v9 = vld [vmem:[#allocation6 + $0x2c] sm:$0xf] }
  0x64   :  { %881 = vmatpush.bf16.msra.mxu3 %v7518_v19  ;;  %v10424_v19 = vld [vmem:[#allocation8 + $0xb4] sm:$0xf0]  ;;  %v7637_v13 = vor.u32 %v10470_v9, %v7634_v10 }
  0x65   :  { %864 = vmatpush.bf16.msra.mxu2 %v7454_v12  ;;  %v7434_v21 = vor.u32 %v10424_v19, %v7433_v18 }
  0x67   :  { %856 = vmatpush.bf16.msra.mxu1 %v7498_v30  ;;  %v7685_v30 = vor.u32 %v10482_v27, %v7682_v28  ;;  %839 = vmatpush.bf16.msra.mxu0 %v7434_v21  ;;  %v10465_v21 = vld [vmem:[#allocation6 + $0x4] sm:$0xf]  ;;  %v7618_v27 = vld [vmem:[#allocation6 + $0x18] sm:$0xf0] }
  0x68   :  { %882 = vmatpush.bf16.msra.mxu3 %v7502_v31  ;;  %v7417_v31 = vld [vmem:[#allocation8 + $0x88] sm:$0xf] }
  0x69   :  { %865 = vmatpush.bf16.msra.mxu2 %v7438_v25  ;;  %v7418_v34 = vor.u32 %v10420_v32, %v7417_v31  ;;  %v7610_v25 = vld [vmem:[#allocation6 + $0x10] sm:$0xf0] }
  0x6b   :  { %857 = vmatpush.bf16.msra.mxu1 %v7482_v44  ;;  %840 = vmatpush.bf16.msra.mxu0 %v7418_v34  ;;  %v10404_v34 = vld [vmem:[#allocation8 + $0x14] sm:$0xf0] }
  0x6c   :  { %883 = vmatpush.bf16.msra.mxu3 %v7486_v45  ;;  %v7669_v45 = vor.u32 %v10478_v42, %v7666_v43 }
  0x6d   :  { %866 = vmatpush.bf16.msra.mxu2 %v7422_v39  ;;  %v7354_v39 = vor.u32 %v10404_v34, %v7353_v33  ;;  %v7696_v33 = vld [vmem:[#allocation6 + $0xa8] sm:$0xf]  ;;  %v10488_v34 = vld [vmem:[#allocation6 + $0xb4] sm:$0xf0] }
  0x6e   :  { %858 = vmatmul.bf16.vlgmr.msra.gmra.mxu1 %v11510_v40 }
  0x6f   :  { %1168 = vmatpush.bf16.msrb.mxu1 %v7725_v49  ;;  %v10416_v49 = vld [vmem:[#allocation8 + $0x74] sm:$0xf0]  ;;  %884 = vmatmul.bf16.vlgmr.msra.gmra.mxu3 %v11510_v40  ;;  %v7385_v40 = vld [vmem:[#allocation8 + $0x48] sm:$0xf] }
  0x70   :  { %1194 = vmatpush.bf16.msrb.mxu3 %v7733_v53  ;;  %v7402_v52 = vor.u32 %v10416_v49, %v7401_v48  ;;  %v7403_v53 = vld [vmem:[#allocation8 + $0x78] sm:$0xf0]  ;;  %v7386_v2 = vor.u32 %v10412_v0, %v7385_v40  ;;  %v60_v0 = vld [vmem:[%s12716_s5] sm:$0xff] }
  0x71   :  { %v7406_v57 = vor.u32 %v10414_v50, %v7403_v53 }
  0x72   :  { %841 = vmatpush.bf16.msra.mxu0 %v7402_v52 }
  0x73   :  { %1169 = vmatpush.bf16.msrb.mxu1 %v7709_v3  ;;  %867 = vmatpush.bf16.msra.mxu2 %v7406_v57  ;;  %v7387_v3 = vld [vmem:[#allocation8 + $0x58] sm:$0xf0] }
  0x74   :  { %1195 = vmatpush.bf16.msrb.mxu3 %v7717_v5  ;;  %v7626_v5 = vld [vmem:[#allocation6 + $0x30] sm:$0xf0]  ;;  %v7390_v7 = vor.u32 %v10410_v1, %v7387_v3 }
  0x75   :  { %v7629_v8 = vor.u32 %v10469_v4, %v7626_v5 }
  0x76   :  { %842 = vmatpush.bf16.msra.mxu0 %v7386_v2 }
  0x77   :  { %1170 = vmatpush.bf16.msrb.mxu1 %v7693_v16  ;;  %868 = vmatpush.bf16.msra.mxu2 %v7390_v7  ;;  %v10408_v16 = vld [vmem:[#allocation8 + $0x34] sm:$0xf0] }
  0x78   :  { %1196 = vmatpush.bf16.msrb.mxu3 %v7701_v17  ;;  %v10406_v17 = vld [vmem:[#allocation8 + $0x2c] sm:$0xf]  ;;  %v7370_v19 = vor.u32 %v10408_v16, %v7369_v15  ;;  %v7720_v15 = vld [vmem:[#allocation6 + $0xe0] sm:$0xf] }
  0x79   :  { %v7374_v24 = vor.u32 %v10406_v17, %v7371_v20  ;;  %v10496_v20 = vld [vmem:[#allocation6 + $0xf4] sm:$0xf0] }
  0x7a   :  { %843 = vmatpush.bf16.msra.mxu0 %v7370_v19  ;;  %v7728_v19 = vld [vmem:[#allocation6 + $0xe8] sm:$0xf] }
  0x7b   :  { %1171 = vmatpush.bf16.msrb.mxu1 %v7677_v26  ;;  %v10466_v26 = vld [vmem:[#allocation6 + $0xc] sm:$0xf]  ;;  %869 = vmatpush.bf16.msra.mxu2 %v7374_v24  ;;  %v7729_v24 = vor.u32 %v10496_v20, %v7728_v19  ;;  %v10555_v19 = vld [vmem:[#allocation8 + $0x1cc] sm:$0xf0]  ;;  %v10553_v20 = vld [vmem:[#allocation8 + $0x1c4] sm:$0xf] }
  0x7c   :  { %1197 = vmatpush.bf16.msrb.mxu3 %v7685_v30  ;;  %v7613_v30 = vor.u32 %v10465_v21, %v7610_v25  ;;  %v7621_v32 = vor.u32 %v10466_v26, %v7618_v27  ;;  %v7704_v25 = vld [vmem:[#allocation6 + $0xc0] sm:$0xf]  ;;  %v10491_v26 = vld [vmem:[#allocation6 + $0xcc] sm:$0xf0]  ;;  %v7712_v27 = vld [vmem:[#allocation6 + $0xc8] sm:$0xf] }
  0x7e   :  { %844 = vmatpush.bf16.msra.mxu0 %v7354_v39  ;;  %v7680_v39 = vld [vmem:[#allocation6 + $0x88] sm:$0xf] }
  0x7f   :  { %1172 = vmatpush.bf16.msrb.mxu1 %v7661_v41 }
  0x80   :  { %1198 = vmatpush.bf16.msrb.mxu3 %v7669_v45 }
  0x83   :  { %1173 = vmatpush.bf16.msrb.mxu1 %v7645_v58 }
  0x84   :  { %1199 = vmatpush.bf16.msrb.mxu3 %v7653_v63 }
  0x87   :  { %1174 = vmatpush.bf16.msrb.mxu1 %v7629_v8 }
  0x88   :  { %1200 = vmatpush.bf16.msrb.mxu3 %v7637_v13 }
  0x8b   :  { %1175 = vmatpush.bf16.msrb.mxu1 %v7613_v30 }
  0x8c   :  { %1201 = vmatpush.bf16.msrb.mxu3 %v7621_v32  ;;  %v10487_v32 = vld [vmem:[#allocation6 + $0xac] sm:$0xf0] }
  0xaa   :  { %v275_v44 = vpop.f32.mrf.mxu0 }
  0xab   :  { %v318_v46 = vadd.f32 %v275_v44, %v68_v29  ;;  %v288_v47 = vpop.f32.mrf.mxu1 }
  0xac   :  { %v319_v51 = vadd.f32 %v288_v47, %v69_v38  ;;  %v7355_v38 = vld [vmem:[#allocation8 + $0x18] sm:$0xf0] }
  0xad   :  { %v7340_v56 = vmul.f32 -1.442695, %v318_v46  ;;  %v7358_v41 = vor.u32 %v10402_v35, %v7355_v38  ;;  %v10483_v38 = vld [vmem:[#allocation6 + $0x8c] sm:$0xf0] }
  0xae   :  { %v7341_v61 = vmul.f32 -1.442695, %v319_v51 }
  0xaf   :  { %11141 = vpow2.f32 %v7340_v56  ;;  %870 = vmatpush.bf16.msra.mxu2 %v7358_v41  ;;  %v10484_v41 = vld [vmem:[#allocation6 + $0x94] sm:$0xf0] }
  0xb0   :  { %11143 = vpow2.f32 %v7341_v61 }
  0xb2   :  { %v314_v6 = vpop.f32.mrf.mxu3  ;;  %v277_v12 = vpop.f32.mrf.mxu0 }
  0xb3   :  { %v321_v11 = vadd.f32 %v314_v6, %v71_v62  ;;  %v290_v14 = vpop.f32.mrf.mxu1 }
  0xb4   :  { %v301_v23 = vpop.f32.mrf.mxu2 }
  0xb5   :  { %v7342_v18 = vmul.f32 -1.442695, %v321_v11  ;;  %v11142_v22 = vpop.eup %11141  ;;  %v320_v43 = vadd.f32 %v301_v23, %v70_v36  ;;  %v7697_v36 = vor.u32 %v10488_v34, %v7696_v33  ;;  %v7933_v34 = vld [vmem:[#allocation8 + $0x190] sm:$0xf0] }
  0xb6   :  { %v11144_v28 = vpop.eup %11143  ;;  %v326_v29 = vadd.f32 1.0, %v11142_v22 }
  0xb7   :  { %11145 = vpow2.f32 %v7342_v18  ;;  %v345_v31 = vadd.f32 1.0, %v11144_v28  ;;  %v10495_v18 = vld [vmem:[#allocation6 + $0xec] sm:$0xf0]  ;;  %v10492_v28 = vld [vmem:[#allocation6 + $0xd4] sm:$0xf0] }
  0xb8   :  { %11147 = vrcp.f32 %v326_v29  ;;  %v338_v52 = vand.u32 2147483648, %v326_v29  ;;  %v336_v55 = vand.u32 2147483647, %v326_v29  ;;  %vm332_vm2 = vweird.f32 %v326_v29 }
  0xb9   :  { %11149 = vrcp.f32 %v345_v31  ;;  %v357_v53 = vand.u32 2147483648, %v345_v31  ;;  %v355_v57 = vand.u32 2147483647, %v345_v31  ;;  %vm351_vm3 = vweird.f32 %v345_v31 }
  0xba   :  { %v316_v37 = vpop.f32.mrf.mxu3  ;;  %v339_v62 = vor.u32 1.1754944e-38, %v338_v52  ;;  %vm337_vm6 = vcmp.eq.f32.partialorder %v336_v55, 8.507059e+37  ;;  %v7721_v23 = vor.u32 %v10495_v18, %v7720_v15  ;;  %v7713_v30 = vor.u32 %v10492_v28, %v7712_v27  ;;  %v7648_v52 = vld [vmem:[#allocation6 + $0x48] sm:$0xf]  ;;  %v7963_v18 = vld [vmem:[#allocation8 + $0x1c0] sm:$0xf] }
  0xbb   :  { %v358_v40 = vor.u32 1.1754944e-38, %v357_v53  ;;  %vm356_vm7 = vcmp.eq.f32.partialorder %v355_v57, 8.507059e+37  ;;  %v7672_v37 = vld [vmem:[#allocation6 + $0x80] sm:$0xf]  ;;  %v10476_v53 = vld [vmem:[#allocation6 + $0x54] sm:$0xf0] }
  0xbc   :  { %v303_v45 = vpop.f32.mrf.mxu2  ;;  %v7649_v55 = vor.u32 %v10476_v53, %v7648_v52  ;;  %v10471_v57 = vld [vmem:[#allocation6 + $0x2c] sm:$0xf0]  ;;  %v7949_v28 = vld [vmem:[#allocation8 + $0x1b0] sm:$0xf0]  ;;  %v10537_v52 = vld [vmem:[#allocation8 + $0x144] sm:$0xf] }
  0xbd   :  { %v11146_v42 = vpop.eup %11145  ;;  %v10479_v45 = vld [vmem:[#allocation6 + $0x6c] sm:$0xf0]  ;;  %v7901_v53 = vld [vmem:[#allocation8 + $0x150] sm:$0xf0] }
  0xbe   :  { %v365_v44 = vadd.f32 1.0, %v11146_v42  ;;  %v11148_v46 = vpop.eup %11147  ;;  %v7673_v42 = vor.u32 %v10483_v38, %v7672_v37  ;;  %v10543_v37 = vld [vmem:[#allocation8 + $0x16c] sm:$0xf0]  ;;  %v10541_v38 = vld [vmem:[#allocation8 + $0x164] sm:$0xf] }
  0xbf   :  { %v11150_v47 = vpop.eup %11149  ;;  %v328_v48 = vmul.f32 %v11148_v46, %v326_v29  ;;  %vm333_vm0 = vweird.f32 %v11148_v46  ;;  %v7705_v29 = vor.u32 %v10491_v26, %v7704_v25  ;;  %v10551_v25 = vld [vmem:[#allocation8 + $0x1ac] sm:$0xf0]  ;;  %v10549_v26 = vld [vmem:[#allocation8 + $0x1a4] sm:$0xf] }
  0xc0   :  { %11151 = vrcp.f32 %v365_v44  ;;  %v347_v49 = vmul.f32 %v11150_v47, %v345_v31  ;;  %vm352_vm1 = vweird.f32 %v11150_v47  ;;  %vm334_vm4 = vmor %vm332_vm2, %vm333_vm0  ;;  %v377_v11 = vand.u32 2147483648, %v365_v44  ;;  %v7688_v31 = vld [vmem:[#allocation6 + $0xa0] sm:$0xf] }
  0xc1   :  { %11153 = vtanh.f32 %v320_v43  ;;  %v329_v50 = vsub.f32 1.0, %v328_v48  ;;  %vm353_vm5 = vmor %vm351_vm3, %vm352_vm1  ;;  %vm371_vm9 = vweird.f32 %v365_v44  ;;  %v375_v12 = vand.u32 2147483647, %v365_v44 }
  0xc2   :  { %v348_v51 = vsub.f32 1.0, %v347_v49  ;;  %v378_v14 = vor.u32 1.1754944e-38, %v377_v11  ;;  %v7689_v35 = vor.u32 %v10487_v32, %v7688_v31  ;;  %v7681_v43 = vor.u32 %v10484_v41, %v7680_v39  ;;  %v7979_v11 = vld [vmem:[#allocation8 + $0x1e0] sm:$0xf]  ;;  %v10547_v31 = vld [vmem:[#allocation8 + $0x18c] sm:$0xf0] }
  0xc3   :  { %v330_v54 = vmul.f32 %v11148_v46, %v329_v50  ;;  %vm376_vm11 = vcmp.eq.f32.partialorder %v375_v12, 8.507059e+37  ;;  %v7640_v50 = vld [vmem:[#allocation6 + $0x40] sm:$0xf]  ;;  %v10559_v12 = vld [vmem:[#allocation8 + $0x1ec] sm:$0xf0] }
  0xc4   :  { %v349_v56 = vmul.f32 %v11150_v47, %v348_v51  ;;  %v10475_v51 = vld [vmem:[#allocation6 + $0x4c] sm:$0xf0]  ;;  %v7980_v15 = vor.u32 %v10559_v12, %v7979_v11  ;;  %v10545_v32 = vld [vmem:[#allocation8 + $0x184] sm:$0xf]  ;;  %v7917_v41 = vld [vmem:[#allocation8 + $0x170] sm:$0xf0] }
  0xc5   :  { %v331_v59 = vadd.f32 %v11148_v46, %v330_v54  ;;  %v7641_v54 = vor.u32 %v10475_v51, %v7640_v50  ;;  %v10517_v11 = vld [vmem:[#allocation8 + $0xa4] sm:$0xf] }
  0xc6   :  { %v11152_v58 = vpop.eup %11151  ;;  %v350_v63 = vadd.f32 %v11150_v47, %v349_v56  ;;  %v7624_v56 = vld [vmem:[#allocation6 + $0x20] sm:$0xf]  ;;  %1687 = vmatpush.bf16.msra.mxu1 %v7980_v15  ;;  %v10531_v15 = vld [vmem:[#allocation8 + $0x10c] sm:$0xf0] }
  0xc7   :  { %v11154_v60 = vpop.eup %11153  ;;  %v367_v61 = vmul.f32 %v11152_v58, %v365_v44  ;;  %v335_v1 = vsel %vm334_vm4, %v11148_v46, %v331_v59  ;;  %vm372_vm8 = vweird.f32 %v11152_v58  ;;  %v7656_v44 = vld [vmem:[#allocation6 + $0x60] sm:$0xf]  ;;  %v7664_v46 = vld [vmem:[#allocation6 + $0x68] sm:$0xf]  ;;  %v10472_v59 = vld [vmem:[#allocation6 + $0x34] sm:$0xf0] }
  0xc8   :  { %v340_v3 = vsel %vm337_vm6, %v339_v62, %v335_v1  ;;  %v354_v4 = vsel %vm353_vm5, %v11150_v47, %v350_v63  ;;  %vm373_vm10 = vmor %vm371_vm9, %vm372_vm8  ;;  %v10480_v47 = vld [vmem:[#allocation6 + $0x74] sm:$0xf0]  ;;  %v7657_v48 = vor.u32 %v10479_v45, %v7656_v44  ;;  %v7608_v62 = vld [vmem:[#allocation6] sm:$0xf] }
  0xc9   :  { %v368_v2 = vsub.f32 1.0, %v367_v61  ;;  %v359_v5 = vsel %vm356_vm7, %v358_v40, %v354_v4  ;;  %v382_v6 = vmul.f32 %v11154_v60, %v340_v3  ;;  %v7665_v49 = vor.u32 %v10480_v47, %v7664_v46  ;;  %v10467_v63 = vld [vmem:[#allocation6 + $0xc] sm:$0xf0]  ;;  %v7616_v40 = vld [vmem:[#allocation6 + $0x8] sm:$0xf] }
  0xca   :  { %v381_v8 = vmul.f32 %v359_v5, %v60_v0  ;;  %v7625_v60 = vor.u32 %v10471_v57, %v7624_v56  ;;  %v10468_v0 = vld [vmem:[#allocation6 + $0x14] sm:$0xf0]  ;;  %v7609_v1 = vor.u32 %v10467_v63, %v7608_v62  ;;  %v10527_v44 = vld [vmem:[#allocation8 + $0xec] sm:$0xf0]  ;;  %v10525_v45 = vld [vmem:[#allocation8 + $0xe4] sm:$0xf] }
  0xcb   :  { %v369_v7 = vmul.f32 %v11152_v58, %v368_v2  ;;  %v7617_v2 = vor.u32 %v10468_v0, %v7616_v40  ;;  %v7853_v47 = vld [vmem:[#allocation8 + $0xf0] sm:$0xf0]  ;;  %v7835_v56 = vld [vmem:[#allocation8 + $0xc0] sm:$0xf]  ;;  %v10523_v57 = vld [vmem:[#allocation8 + $0xcc] sm:$0xf0] }
  0xcc   :  { %v11531_v9 = vadd.f32 %v382_v6, %v381_v8  ;;  %v7856_v50 = vor.u32 %v10525_v45, %v7853_v47  ;;  %v10535_v62 = vld [vmem:[#allocation8 + $0x12c] sm:$0xf0]  ;;  %v10533_v0 = vld [vmem:[#allocation8 + $0x124] sm:$0xf]  ;;  %v7787_v47 = vld [vmem:[#allocation8 + $0x60] sm:$0xf] }
  0xcd   :  { %v370_v10 = vadd.f32 %v11152_v58, %v369_v7 }
  0xce   :  { %11155 = vtanh.f32 %v11531_v9  ;;  %v11544_v3 = vpop.f32.mrf.mxu1 }
  0xcf   :  { %v374_v13 = vsel %vm373_vm10, %v11152_v58, %v370_v10  ;;  %v7632_v58 = vld [vmem:[#allocation6 + $0x28] sm:$0xf] }
  0xd0   :  { %v379_v17 = vsel %vm376_vm11, %v378_v14, %v374_v13  ;;  %v7633_v61 = vor.u32 %v10472_v59, %v7632_v58  ;;  %v10557_v13 = vld [vmem:[#allocation8 + $0x1e4] sm:$0xf]  ;;  %v7836_v59 = vor.u32 %v10523_v57, %v7835_v56  ;;  %v7955_v57 = vld [vmem:[#allocation8 + $0x1a8] sm:$0xf] }
  0xd1   :  { %v10521_v58 = vld [vmem:[#allocation8 + $0xc4] sm:$0xf] }
  0xd4   :  { %v11156_v16 = vpop.eup %11155  ;;  %v11546_v4 = vpop.f32.mrf.mxu3 }
  0xd5   :  { %v385_v21 = vmul.f32 %v11156_v16, %v379_v17  ;;  %v7981_v16 = vld [vmem:[#allocation8 + $0x1f0] sm:$0xf0] }
  0xd6   :  { %v809_v5 = vpop.f32.mrf.mxu1  ;;  %v7984_v17 = vor.u32 %v10557_v13, %v7981_v16  ;;  %v7821_v13 = vld [vmem:[#allocation8 + $0xb0] sm:$0xf0] }
  0xd7   :  { %v11534_v22 = vpack.c.bf16 %v385_v21, %v385_v21  ;;  %v7964_v21 = vor.u32 %v10555_v19, %v7963_v18  ;;  %v7824_v16 = vor.u32 %v10517_v11, %v7821_v13  ;;  %v10529_v18 = vld [vmem:[#allocation8 + $0x104] sm:$0xf]  ;;  %v7869_v19 = vld [vmem:[#allocation8 + $0x110] sm:$0xf0] }
  0xd8   :  { %1713 = vmatpush.bf16.msra.mxu3 %v7984_v17  ;;  %v7773_v11 = vld [vmem:[#allocation8 + $0x50] sm:$0xf0] }
  0xd9   :  { %793 = vmatmul.bf16.vlgmr.msrb.gmra.mxu0 %v11534_v22  ;;  %819 = vmatmul.bf16.vlgmr.msrb.gmra.mxu2 %v11534_v22 }
  0xda   :  { %1176 = vmatmul.bf16.vlgmr.msrb.gmra.mxu1 %v11534_v22  ;;  %1202 = vmatmul.bf16.vlgmr.msrb.gmra.mxu3 %v11534_v22 }
  0xdb   :  { %1155 = vmatpush.bf16.msrb.mxu0 %v7721_v23  ;;  %1181 = vmatpush.bf16.msrb.mxu2 %v7729_v24  ;;  %v7947_v24 = vld [vmem:[#allocation8 + $0x1a0] sm:$0xf] }
  0xdc   :  { %v835_v6 = vpop.f32.mrf.mxu3  ;;  %1688 = vmatpush.bf16.msra.mxu1 %v7964_v21  ;;  %v7948_v27 = vor.u32 %v10551_v25, %v7947_v24  ;;  %v10558_v24 = vld [vmem:[#allocation8 + $0x1ec] sm:$0xf]  ;;  %v7989_v25 = vld [vmem:[#allocation8 + $0x1f8] sm:$0xf0] }
  0xdd   :  { %v7819_v6 = vld [vmem:[#allocation8 + $0xa0] sm:$0xf] }
  0xdf   :  { %1156 = vmatpush.bf16.msrb.mxu0 %v7705_v29  ;;  %1182 = vmatpush.bf16.msrb.mxu2 %v7713_v30  ;;  %v7952_v29 = vor.u32 %v10549_v26, %v7949_v28  ;;  %v7931_v30 = vld [vmem:[#allocation8 + $0x180] sm:$0xf] }
  0xe0   :  { %1689 = vmatpush.bf16.msra.mxu1 %v7948_v27  ;;  %v7932_v33 = vor.u32 %v10547_v31, %v7931_v30  ;;  %v7803_v30 = vld [vmem:[#allocation8 + $0x80] sm:$0xf]  ;;  %v10515_v31 = vld [vmem:[#allocation8 + $0x8c] sm:$0xf0] }
  0xe3   :  { %1157 = vmatpush.bf16.msrb.mxu0 %v7689_v35  ;;  %1183 = vmatpush.bf16.msrb.mxu2 %v7697_v36  ;;  %v7936_v35 = vor.u32 %v10545_v32, %v7933_v34  ;;  %v7915_v36 = vld [vmem:[#allocation8 + $0x160] sm:$0xf]  ;;  %v10513_v32 = vld [vmem:[#allocation8 + $0x84] sm:$0xf]  ;;  %v7805_v34 = vld [vmem:[#allocation8 + $0x90] sm:$0xf0] }
  0xe4   :  { %1690 = vmatpush.bf16.msra.mxu1 %v7932_v33  ;;  %v7916_v39 = vor.u32 %v10543_v37, %v7915_v36  ;;  %v7804_v33 = vor.u32 %v10515_v31, %v7803_v30  ;;  %v7603_v36 = vld [vmem:[%s12711_s0 + $0x28] sm:$0xff] }
  0xe5   :  { %v7923_v30 = vld [vmem:[#allocation8 + $0x168] sm:$0xf] }
  0xe7   :  { %1158 = vmatpush.bf16.msrb.mxu0 %v7673_v42  ;;  %1184 = vmatpush.bf16.msrb.mxu2 %v7681_v43  ;;  %v7920_v42 = vor.u32 %v10541_v38, %v7917_v41  ;;  %v7851_v43 = vld [vmem:[#allocation8 + $0xe0] sm:$0xf]  ;;  %v7808_v38 = vor.u32 %v10513_v32, %v7805_v34  ;;  %v10556_v41 = vld [vmem:[#allocation8 + $0x1d4] sm:$0xf0] }
  0xe8   :  { %1691 = vmatpush.bf16.msra.mxu1 %v7916_v39  ;;  %v7852_v46 = vor.u32 %v10527_v44, %v7851_v43  ;;  %v7971_v39 = vld [vmem:[#allocation8 + $0x1c8] sm:$0xf]  ;;  %v10554_v43 = vld [vmem:[#allocation8 + $0x1cc] sm:$0xf]  ;;  %v7973_v44 = vld [vmem:[#allocation8 + $0x1d8] sm:$0xf0] }
  0xe9   :  { %845 = vmatmul.bf16.vlgmr.msra.gmra.mxu0 %v11534_v22  ;;  %871 = vmatmul.bf16.vlgmr.msra.gmra.mxu2 %v11534_v22  ;;  %v10544_v32 = vld [vmem:[#allocation8 + $0x174] sm:$0xf0] }
  0xeb   :  { %1159 = vmatpush.bf16.msrb.mxu0 %v7657_v48  ;;  %1185 = vmatpush.bf16.msrb.mxu2 %v7665_v49  ;;  %v11548_v7 = vpop.f32.mrf.mxu1  ;;  %v7899_v48 = vld [vmem:[#allocation8 + $0x140] sm:$0xf]  ;;  %v10539_v49 = vld [vmem:[#allocation8 + $0x14c] sm:$0xf0] }
  0xec   :  { %v7900_v51 = vor.u32 %v10539_v49, %v7899_v48  ;;  %v10511_v49 = vld [vmem:[#allocation8 + $0x6c] sm:$0xf0] }
  0xee   :  { %1692 = vmatpush.bf16.msra.mxu1 %v7900_v51  ;;  %v7789_v51 = vld [vmem:[#allocation8 + $0x70] sm:$0xf0] }
  0xef   :  { %1160 = vmatpush.bf16.msrb.mxu0 %v7641_v54  ;;  %1186 = vmatpush.bf16.msrb.mxu2 %v7649_v55  ;;  %v11555_v54 = vld [vmem:[%s12714_s3] sm:$0xf]  ;;  %v7904_v55 = vor.u32 %v10537_v52, %v7901_v53 }
  0xf0   :  { %v458_v37 = vperm.slane %v11555_v54, 1 }
  0xf2   :  { %v11550_v8 = vpop.f32.mrf.mxu3 }
  0xf3   :  { %1161 = vmatpush.bf16.msrb.mxu0 %v7625_v60  ;;  %1187 = vmatpush.bf16.msrb.mxu2 %v7633_v61  ;;  %v861_v10 = vpop.f32.mrf.mxu1  ;;  %v7837_v60 = vld [vmem:[#allocation8 + $0xd0] sm:$0xf0]  ;;  %v7883_v61 = vld [vmem:[#allocation8 + $0x120] sm:$0xf] }
  0xf4   :  { %v7840_v63 = vor.u32 %v10521_v58, %v7837_v60  ;;  %v7884_v40 = vor.u32 %v10535_v62, %v7883_v61  ;;  %v10519_v10 = vld [vmem:[#allocation8 + $0xac] sm:$0xf0]  ;;  %v10552_v58 = vld [vmem:[#allocation8 + $0x1b4] sm:$0xf0]  ;;  %v7957_v62 = vld [vmem:[#allocation8 + $0x1b8] sm:$0xf0] }
  0xf5   :  { %v7820_v12 = vor.u32 %v10519_v10, %v7819_v6  ;;  %v7956_v61 = vor.u32 %v10552_v58, %v7955_v57  ;;  %v10505_v10 = vld [vmem:[#allocation8 + $0x44] sm:$0xf]  ;;  %v10528_v57 = vld [vmem:[#allocation8 + $0xf4] sm:$0xf0]  ;;  %v10526_v58 = vld [vmem:[#allocation8 + $0xec] sm:$0xf] }
  0xf6   :  { %1693 = vmatpush.bf16.msra.mxu1 %v7884_v40  ;;  %v7776_v13 = vor.u32 %v10505_v10, %v7773_v11  ;;  %v10524_v10 = vld [vmem:[#allocation8 + $0xd4] sm:$0xf0] }
  0xf7   :  { %1162 = vmatpush.bf16.msrb.mxu0 %v7609_v1  ;;  %1188 = vmatpush.bf16.msrb.mxu2 %v7617_v2  ;;  %v7885_v1 = vld [vmem:[#allocation8 + $0x130] sm:$0xf0]  ;;  %v457_v2 = vperm.slane %v11555_v54, 0 }
  0xf8   :  { %v7888_v5 = vor.u32 %v10533_v0, %v7885_v1  ;;  %v7771_v1 = vld [vmem:[#allocation8 + $0x40] sm:$0xf] }
  0xfa   :  { %1163 = vmatmul.bf16.vlgmr.msrb.gmra.mxu0 %v11534_v22  ;;  %1189 = vmatmul.bf16.vlgmr.msrb.gmra.mxu2 %v11534_v22  ;;  %v887_v14 = vpop.f32.mrf.mxu3  ;;  %v7965_v22 = vld [vmem:[#allocation8 + $0x1d0] sm:$0xf0] }
  0xfb   :  { %v7968_v23 = vor.u32 %v10553_v20, %v7965_v22  ;;  %1674 = vmatpush.bf16.msra.mxu0 %v7852_v46  ;;  %1700 = vmatpush.bf16.msra.mxu2 %v7856_v50  ;;  %v7867_v14 = vld [vmem:[#allocation8 + $0x100] sm:$0xf]  ;;  %v7987_v20 = vld [vmem:[#allocation8 + $0x1e8] sm:$0xf]  ;;  %v7872_v22 = vor.u32 %v10529_v18, %v7869_v19  ;;  %v7976_v46 = vor.u32 %v10554_v43, %v7973_v44  ;;  %v10509_v50 = vld [vmem:[#allocation8 + $0x64] sm:$0xf] }
  0xfc   :  { %v7868_v17 = vor.u32 %v10531_v15, %v7867_v14  ;;  %v7792_v56 = vor.u32 %v10509_v50, %v7789_v51  ;;  %v7939_v14 = vld [vmem:[#allocation8 + $0x188] sm:$0xf]  ;;  %v10548_v15 = vld [vmem:[#allocation8 + $0x194] sm:$0xf0]  ;;  %v7941_v18 = vld [vmem:[#allocation8 + $0x198] sm:$0xf0] }
  0xfd   :  { %1714 = vmatpush.bf16.msra.mxu3 %v7968_v23  ;;  %v10560_v23 = vld [vmem:[#allocation8 + $0x1f4] sm:$0xf0]  ;;  %v460_v51 = vperm.slane %v11555_v54, 3 }
  0xfe   :  { %1694 = vmatpush.bf16.msra.mxu1 %v7868_v17  ;;  %v7988_v28 = vor.u32 %v10560_v23, %v7987_v20  ;;  %v10546_v17 = vld [vmem:[#allocation8 + $0x18c] sm:$0xf]  ;;  %v7605_v19 = vld [vmem:[%s12711_s0 + $0x38] sm:$0xff] }
  0xff   :  { %1675 = vmatpush.bf16.msra.mxu0 %v7836_v59  ;;  %1701 = vmatpush.bf16.msra.mxu2 %v7840_v63  ;;  %v10550_v59 = vld [vmem:[#allocation8 + $0x1ac] sm:$0xf]  ;;  %v7944_v20 = vor.u32 %v10546_v17, %v7941_v18 }
 0x100   :  { %v7960_v0 = vor.u32 %v10550_v59, %v7957_v62  ;;  %v10540_v62 = vld [vmem:[#allocation8 + $0x154] sm:$0xf0] }
 0x101   :  { %1715 = vmatpush.bf16.msra.mxu3 %v7952_v29  ;;  %v7992_v29 = vor.u32 %v10558_v24, %v7989_v25  ;;  %v459_v25 = vperm.slane %v11555_v54, 2 }
 0x102   :  { %1739 = vmatpush.bf16.msrb.mxu1 %v7988_v28  ;;  %v7757_v28 = vld [vmem:[#allocation8 + $0x30] sm:$0xf0] }
 0x103   :  { %1676 = vmatpush.bf16.msra.mxu0 %v7820_v12  ;;  %1702 = vmatpush.bf16.msra.mxu2 %v7824_v16  ;;  %v7940_v16 = vor.u32 %v10548_v15, %v7939_v14  ;;  %v7845_v14 = vld [vmem:[#allocation8 + $0xd8] sm:$0xf0] }
 0x105   :  { %1716 = vmatpush.bf16.msra.mxu3 %v7936_v35 }
 0x107   :  { %1677 = vmatpush.bf16.msra.mxu0 %v7804_v33  ;;  %1703 = vmatpush.bf16.msra.mxu2 %v7808_v38  ;;  %v7924_v38 = vor.u32 %v10544_v32, %v7923_v30  ;;  %v7602_v30 = vld [vmem:[%s12711_s0 + $0x20] sm:$0xff]  ;;  %v10518_v32 = vld [vmem:[#allocation8 + $0xac] sm:$0xf] }
 0x109   :  { %1717 = vmatpush.bf16.msra.mxu3 %v7920_v42  ;;  %v7972_v42 = vor.u32 %v10556_v41, %v7971_v39  ;;  %v7739_v41 = vld [vmem:[#allocation8] sm:$0xf] }
 0x10b   :  { %1740 = vmatpush.bf16.msrb.mxu1 %v7972_v42  ;;  %1704 = vmatpush.bf16.msra.mxu2 %v7792_v56  ;;  %v10499_v42 = vld [vmem:[#allocation8 + $0xc] sm:$0xf0]  ;;  %v7859_v56 = vld [vmem:[#allocation8 + $0xe8] sm:$0xf] }
 0x10c   :  { %v7740_v44 = vor.u32 %v10499_v42, %v7739_v41 }
 0x10d   :  { %1718 = vmatpush.bf16.msra.mxu3 %v7904_v55  ;;  %v7788_v55 = vor.u32 %v10511_v49, %v7787_v47 }
 0x10f   :  { %1678 = vmatpush.bf16.msra.mxu0 %v7788_v55  ;;  %1741 = vmatpush.bf16.msrb.mxu1 %v7956_v61  ;;  %v7907_v61 = vld [vmem:[#allocation8 + $0x148] sm:$0xf] }
 0x110   :  { %1705 = vmatpush.bf16.msra.mxu2 %v7776_v13  ;;  %v10522_v13 = vld [vmem:[#allocation8 + $0xcc] sm:$0xf] }
 0x111   :  { %1719 = vmatpush.bf16.msra.mxu3 %v7888_v5 }
 0x113   :  { %1742 = vmatpush.bf16.msrb.mxu1 %v7940_v16 }
 0x115   :  { %1720 = vmatpush.bf16.msra.mxu3 %v7872_v22  ;;  %v10503_v22 = vld [vmem:[#allocation8 + $0x2c] sm:$0xf0] }
 0x117   :  { %1743 = vmatpush.bf16.msrb.mxu1 %v7924_v38  ;;  %v10532_v38 = vld [vmem:[#allocation8 + $0x114] sm:$0xf0] }
 0x119   :  { %1765 = vmatpush.bf16.msrb.mxu3 %v7992_v29 }
 0x11d   :  { %1766 = vmatpush.bf16.msrb.mxu3 %v7976_v46  ;;  %v7741_v46 = vld [vmem:[#allocation8 + $0x10] sm:$0xf0] }
 0x121   :  { %1767 = vmatpush.bf16.msrb.mxu3 %v7960_v0  ;;  %v7909_v0 = vld [vmem:[#allocation8 + $0x158] sm:$0xf0] }
 0x125   :  { %1768 = vmatpush.bf16.msrb.mxu3 %v7944_v20  ;;  %v10534_v20 = vld [vmem:[#allocation8 + $0x12c] sm:$0xf] }
 0x156   :  { %v794_v21 = vpop.f32.mrf.mxu0 }
 0x157   :  { %v795_v26 = vadd.f32 %v794_v21, %v457_v2  ;;  %v1177_v27 = vpop.f32.mrf.mxu1  ;;  %v10507_v2 = vld [vmem:[#allocation8 + $0x4c] sm:$0xf0]  ;;  %v7755_v21 = vld [vmem:[#allocation8 + $0x20] sm:$0xf] }
 0x158   :  { %v7772_v6 = vor.u32 %v10507_v2, %v7771_v1 }
 0x159   :  { %v808_v35 = vadd.f32 %v11544_v3, %v795_v26  ;;  %v1208_v3 = vadd.f32 %v7603_v36, %v1177_v27  ;;  %v7756_v26 = vor.u32 %v10503_v22, %v7755_v21  ;;  %v10501_v27 = vld [vmem:[#allocation8 + $0x24] sm:$0xf]  ;;  %v7925_v36 = vld [vmem:[#allocation8 + $0x178] sm:$0xf0] }
 0x15a   :  { %1679 = vmatpush.bf16.msra.mxu0 %v7772_v6  ;;  %v7760_v34 = vor.u32 %v10501_v27, %v7757_v28  ;;  %v7843_v6 = vld [vmem:[#allocation8 + $0xc8] sm:$0xf] }
 0x15b   :  { %v7599_v45 = vmul.f32 -1.442695, %v808_v35  ;;  %v7735_v5 = vmul.f32 -1.442695, %v1208_v3  ;;  %v10542_v35 = vld [vmem:[#allocation8 + $0x16c] sm:$0xf]  ;;  %v7844_v18 = vor.u32 %v10524_v10, %v7843_v6 }
 0x15c   :  { %v820_v48 = vpop.f32.mrf.mxu2  ;;  %v7928_v39 = vor.u32 %v10542_v35, %v7925_v36  ;;  %1706 = vmatpush.bf16.msra.mxu2 %v7760_v34  ;;  %v7829_v36 = vld [vmem:[#allocation8 + $0xb8] sm:$0xf0] }
 0x15d   :  { %11157 = vpow2.f32 %v7599_v45  ;;  %v821_v52 = vadd.f32 %v820_v48, %v458_v37  ;;  %v1203_v53 = vpop.f32.mrf.mxu3  ;;  %v10497_v45 = vld [vmem:[#allocation8 + $0x4] sm:$0xf] }
 0x15e   :  { %v796_v60 = vpop.f32.mrf.mxu0  ;;  %v1210_v33 = vadd.f32 %v7605_v19, %v1203_v53  ;;  %1680 = vmatpush.bf16.msra.mxu0 %v7756_v26  ;;  %1769 = vmatpush.bf16.msrb.mxu3 %v7928_v39  ;;  %v7744_v3 = vor.u32 %v10497_v45, %v7741_v46  ;;  %v10536_v19 = vld [vmem:[#allocation8 + $0x134] sm:$0xf0]  ;;  %v7893_v26 = vld [vmem:[#allocation8 + $0x138] sm:$0xf0] }
 0x15f   :  { %v834_v63 = vadd.f32 %v11546_v4, %v821_v52  ;;  %v1179_v40 = vpop.f32.mrf.mxu1  ;;  %v7861_v60 = vld [vmem:[#allocation8 + $0xf8] sm:$0xf0]  ;;  %v7896_v35 = vor.u32 %v10534_v20, %v7893_v26  ;;  %v7779_v20 = vld [vmem:[#allocation8 + $0x48] sm:$0xf] }
 0x160   :  { %v7736_v49 = vmul.f32 -1.442695, %v1210_v33  ;;  %1707 = vmatpush.bf16.msra.mxu2 %v7744_v3  ;;  %v10538_v40 = vld [vmem:[#allocation8 + $0x14c] sm:$0xf]  ;;  %v7864_v11 = vor.u32 %v10526_v58, %v7861_v60  ;;  %v7813_v60 = vld [vmem:[#allocation8 + $0x98] sm:$0xf0] }
 0x161   :  { %v7600_v12 = vmul.f32 -1.442695, %v834_v63  ;;  %v7912_v17 = vor.u32 %v10538_v40, %v7909_v0  ;;  %v7781_v26 = vld [vmem:[#allocation8 + $0x58] sm:$0xf0] }
 0x162   :  { %1681 = vmatpush.bf16.msra.mxu0 %v7740_v44  ;;  %v7877_v44 = vld [vmem:[#allocation8 + $0x118] sm:$0xf0] }
 0x163   :  { %v11158_v4 = vpop.eup %11157  ;;  %11159 = vpow2.f32 %v7600_v12  ;;  %v7908_v12 = vor.u32 %v10540_v62, %v7907_v61  ;;  %1770 = vmatpush.bf16.msrb.mxu3 %v7912_v17 }
 0x164   :  { %v11567_v23 = vadd.f32 1.0, %v11158_v4  ;;  %v822_v24 = vpop.f32.mrf.mxu2  ;;  %11161 = vpow2.f32 %v7735_v5  ;;  %v7860_v5 = vor.u32 %v10528_v57, %v7859_v56  ;;  %v7891_v4 = vld [vmem:[#allocation8 + $0x128] sm:$0xf]  ;;  %1752 = vmatpush.bf16.msrb.mxu2 %v7864_v11  ;;  %v10510_v11 = vld [vmem:[#allocation8 + $0x6c] sm:$0xf] }
 0x165   :  { %v1205_v29 = vpop.f32.mrf.mxu3  ;;  %1744 = vmatpush.bf16.msrb.mxu1 %v7908_v12  ;;  %v7892_v34 = vor.u32 %v10536_v19, %v7891_v4  ;;  %v7797_v12 = vld [vmem:[#allocation8 + $0x78] sm:$0xf0] }
 0x166   :  { %11163 = vrcp.f32 %v11567_v23  ;;  %v846_v31 = vpop.f32.mrf.mxu0  ;;  %v903_v50 = vand.u32 2147483647, %v11567_v23  ;;  %v905_v54 = vand.u32 2147483648, %v11567_v23  ;;  %1726 = vmatpush.bf16.msrb.mxu0 %v7860_v5  ;;  %vm899_vm13 = vweird.f32 %v11567_v23  ;;  %v7795_v5 = vld [vmem:[#allocation8 + $0x68] sm:$0xf] }
 0x167   :  { %v847_v37 = vadd.f32 %v846_v31, %v459_v25  ;;  %v7848_v25 = vor.u32 %v10522_v13, %v7845_v14  ;;  %v10520_v31 = vld [vmem:[#allocation8 + $0xb4] sm:$0xf0]  ;;  %1771 = vmatpush.bf16.msrb.mxu3 %v7896_v35  ;;  %v7800_v19 = vor.u32 %v10510_v11, %v7797_v12 }
 0x168   :  { %vm11590_vm14 = vcmp.eq.f32.partialorder %v903_v50, 8.507059e+37  ;;  %v906_v24 = vor.u32 1.1754944e-38, %v905_v54  ;;  %v7211_v54 = vld [vmem:[%s12716_s5 + $0x8] sm:$0xff] }
 0x169   :  { %v11160_v43 = vpop.eup %11159  ;;  %v860_v53 = vadd.f32 %v11548_v7, %v847_v37  ;;  %v7875_v37 = vld [vmem:[#allocation8 + $0x108] sm:$0xf]  ;;  %1753 = vmatpush.bf16.msrb.mxu2 %v7848_v25  ;;  %1745 = vmatpush.bf16.msrb.mxu1 %v7892_v34  ;;  %v10506_v25 = vld [vmem:[#allocation8 + $0x4c] sm:$0xf] }
 0x16a   :  { %v11571_v47 = vadd.f32 1.0, %v11160_v43  ;;  %v11162_v48 = vpop.eup %11161  ;;  %1727 = vmatpush.bf16.msrb.mxu0 %v7844_v18  ;;  %v10530_v43 = vld [vmem:[#allocation8 + $0x10c] sm:$0xf]  ;;  %v7876_v57 = vor.u32 %v10532_v38, %v7875_v37 }
 0x16b   :  { %v11582_v2 = vadd.f32 1.0, %v11162_v48  ;;  %v7880_v58 = vor.u32 %v10530_v43, %v7877_v44 }
 0x16c   :  { %v11575_v52 = vpop.eup %11163  ;;  %11165 = vrcp.f32 %v11571_v47  ;;  %v872_v55 = vpop.f32.mrf.mxu2  ;;  %v924_v41 = vand.u32 2147483648, %v11571_v47  ;;  %v922_v3 = vand.u32 2147483647, %v11571_v47  ;;  %vm918_vm1 = vweird.f32 %v11571_v47 }
 0x16d   :  { %v895_v59 = vmul.f32 %v11575_v52, %v11567_v23  ;;  %v873_v7 = vadd.f32 %v872_v55, %v460_v51  ;;  %vm900_vm12 = vweird.f32 %v11575_v52  ;;  %11167 = vtanh.f32 %v860_v53  ;;  %v7811_v53 = vld [vmem:[#allocation8 + $0x88] sm:$0xf]  ;;  %v10516_v55 = vld [vmem:[#allocation8 + $0x94] sm:$0xf0]  ;;  %1746 = vmatpush.bf16.msrb.mxu1 %v7876_v57  ;;  %1772 = vmatpush.bf16.msrb.mxu3 %v7880_v58 }
 0x16e   :  { %v848_v63 = vpop.f32.mrf.mxu0  ;;  %11169 = vpow2.f32 %v7736_v49  ;;  %vm11599_vm15 = vmor %vm899_vm13, %vm900_vm12  ;;  %v925_v62 = vor.u32 1.1754944e-38, %v924_v41  ;;  %v7812_v40 = vor.u32 %v10516_v55, %v7811_v53  ;;  %vm923_vm3 = vcmp.eq.f32.partialorder %v922_v3, 8.507059e+37  ;;  %v7747_v41 = vld [vmem:[#allocation8 + $0x8] sm:$0xf] }
 0x16f   :  { %v896_v1 = vsub.f32 1.0, %v895_v59  ;;  %v886_v16 = vadd.f32 %v11550_v8, %v873_v7  ;;  %v7827_v8 = vld [vmem:[#allocation8 + $0xa8] sm:$0xf]  ;;  %11171 = vrcp.f32 %v11582_v2  ;;  %v10514_v59 = vld [vmem:[#allocation8 + $0x8c] sm:$0xf]  ;;  %v7784_v23 = vor.u32 %v10506_v25, %v7781_v26 }
 0x170   :  { %v7828_v51 = vor.u32 %v10520_v31, %v7827_v8  ;;  %v7816_v7 = vor.u32 %v10514_v59, %v7813_v60  ;;  %v1246_v3 = vand.u32 2147483648, %v11582_v2  ;;  %v1244_v59 = vand.u32 2147483647, %v11582_v2  ;;  %v8109_v25 = vld [vmem:[#allocation6 + $0xd8] sm:$0xf0] }
 0x171   :  { %v897_v15 = vmul.f32 %v11575_v52, %v896_v1  ;;  %v7601_v29 = vmul.f32 -1.442695, %v886_v16  ;;  %vm1240_vm7 = vweird.f32 %v11582_v2 }
 0x172   :  { %v11587_v21 = vpop.eup %11165  ;;  %1728 = vmatpush.bf16.msrb.mxu0 %v7828_v51  ;;  %vm1245_vm13 = vcmp.eq.f32.partialorder %v1244_v59, 8.507059e+37 }
 0x173   :  { %v914_v27 = vmul.f32 %v11587_v21, %v11571_v47  ;;  %v898_v28 = vadd.f32 %v11575_v52, %v897_v15  ;;  %11173 = vpow2.f32 %v7601_v29  ;;  %v11168_v45 = vpop.eup %11167  ;;  %vm919_vm0 = vweird.f32 %v11587_v21  ;;  %v10512_v47 = vld [vmem:[#allocation8 + $0x74] sm:$0xf0]  ;;  %v7763_v29 = vld [vmem:[#allocation8 + $0x28] sm:$0xf] }
 0x174   :  { %v874_v33 = vpop.f32.mrf.mxu2  ;;  %v11170_v61 = vpop.eup %11169  ;;  %vm920_vm2 = vmor %vm918_vm1, %vm919_vm0  ;;  %v7796_v18 = vor.u32 %v10512_v47, %v7795_v5  ;;  %v10590_v5 = vld [vmem:[#allocation6 + $0xec] sm:$0xf]  ;;  %v8125_v47 = vld [vmem:[#allocation6 + $0xf8] sm:$0xf0] }
 0x175   :  { %v915_v39 = vsub.f32 1.0, %v914_v27  ;;  %v902_v42 = vsel %vm11599_vm15, %v11575_v52, %v898_v28  ;;  %v7832_v52 = vor.u32 %v10518_v32, %v7829_v36  ;;  %v11621_v0 = vpop.eup %11171  ;;  %v11628_v15 = vadd.f32 1.0, %v11170_v61  ;;  %v10502_v32 = vld [vmem:[#allocation8 + $0x2c] sm:$0xf]  ;;  %v7765_v33 = vld [vmem:[#allocation8 + $0x38] sm:$0xf0] }
 0x176   :  { %v907_v46 = vsel %vm11590_vm14, %v906_v24, %v902_v42  ;;  %1729 = vmatpush.bf16.msrb.mxu0 %v7812_v40  ;;  %v1236_v4 = vmul.f32 %v11621_v0, %v11582_v2  ;;  %v10500_v42 = vld [vmem:[#allocation8 + $0x14] sm:$0xf0]  ;;  %vm1241_vm5 = vweird.f32 %v11621_v0  ;;  %v8117_v40 = vld [vmem:[#allocation6 + $0xf0] sm:$0xf0] }
 0x177   :  { %v916_v48 = vmul.f32 %v11587_v21, %v915_v39  ;;  %v949_v49 = vmul.f32 %v11168_v45, %v907_v46  ;;  %v1164_v50 = vpop.f32.mrf.mxu0  ;;  %1754 = vmatpush.bf16.msrb.mxu2 %v7832_v52  ;;  %v7768_v39 = vor.u32 %v10502_v32, %v7765_v33  ;;  %v10498_v45 = vld [vmem:[#allocation8 + $0xc] sm:$0xf]  ;;  %v7749_v46 = vld [vmem:[#allocation8 + $0x18] sm:$0xf0]  ;;  %v7748_v52 = vor.u32 %v10500_v42, %v7747_v41  ;;  %vm11665_vm9 = vmor %vm1240_vm7, %vm1241_vm5 }
 0x178   :  { %v1207_v56 = vadd.f32 %v7602_v30, %v1164_v50  ;;  %v1237_v28 = vsub.f32 1.0, %v1236_v4  ;;  %v10504_v30 = vld [vmem:[#allocation8 + $0x34] sm:$0xf0]  ;;  %vm1260_vm1 = vweird.f32 %v11628_v15 }
 0x179   :  { %v917_v63 = vadd.f32 %v11587_v21, %v916_v48  ;;  %v11174_v6 = vpop.eup %11173  ;;  %v7764_v37 = vor.u32 %v10504_v30, %v7763_v29  ;;  %v7604_v48 = vld [vmem:[%s12711_s0 + $0x30] sm:$0xff]  ;;  %v10581_v30 = vld [vmem:[#allocation6 + $0xa4] sm:$0xf] }
 0x17a   :  { %v7734_v1 = vmul.f32 -1.442695, %v1207_v56  ;;  %v11626_v14 = vadd.f32 1.0, %v11174_v6  ;;  %1730 = vmatpush.bf16.msrb.mxu0 %v7796_v18  ;;  %v1238_v38 = vmul.f32 %v11621_v0, %v1237_v28  ;;  %v7752_v56 = vor.u32 %v10498_v45, %v7749_v46  ;;  %v8069_v46 = vld [vmem:[#allocation6 + $0x90] sm:$0xf0] }
 0x17b   :  { %v921_v10 = vsel %vm920_vm2, %v11587_v21, %v917_v63  ;;  %1755 = vmatpush.bf16.msrb.mxu2 %v7816_v7  ;;  %v10508_v21 = vld [vmem:[#allocation8 + $0x54] sm:$0xf0]  ;;  %v10589_v63 = vld [vmem:[#allocation6 + $0xe4] sm:$0xf]  ;;  %v1247_v7 = vor.u32 1.1754944e-38, %v1246_v3 }
 0x17c   :  { %v926_v13 = vsel %vm923_vm3, %v925_v62, %v921_v10  ;;  %11175 = vpow2.f32 %v7734_v1  ;;  %v7780_v8 = vor.u32 %v10508_v21, %v7779_v20  ;;  %v942_v51 = vand.u32 2147483647, %v11626_v14  ;;  %v10585_v20 = vld [vmem:[#allocation6 + $0xc4] sm:$0xf]  ;;  %v10578_v3 = vld [vmem:[#allocation6 + $0x8c] sm:$0xf] }
 0x17d   :  { %v948_v16 = vmul.f32 %v7211_v54, %v926_v13  ;;  %v1190_v17 = vpop.f32.mrf.mxu2  ;;  %11177 = vrcp.f32 %v11626_v14  ;;  %v1239_v55 = vadd.f32 %v11621_v0, %v1238_v38  ;;  %vm938_vm6 = vweird.f32 %v11626_v14  ;;  %v10592_v62 = vld [vmem:[#allocation6 + $0xf4] sm:$0xf0] }
 0x17e   :  { %11179 = vrcp.f32 %v11628_v15  ;;  %1731 = vmatpush.bf16.msrb.mxu0 %v7780_v8  ;;  %v1209_v58 = vadd.f32 %v7604_v48, %v1190_v17  ;;  %vm943_vm10 = vcmp.eq.f32.partialorder %v942_v51, 8.507059e+37  ;;  %v8120_v17 = vor.u32 %v10589_v63, %v8117_v40  ;;  %v8077_v48 = vld [vmem:[#allocation6 + $0x98] sm:$0xf0] }
 0x17f   :  { %v11633_v22 = vadd.f32 %v949_v49, %v948_v16  ;;  %v1166_v24 = vpop.f32.mrf.mxu0  ;;  %1756 = vmatpush.bf16.msrb.mxu2 %v7800_v19  ;;  %v944_v49 = vand.u32 2147483648, %v11626_v14  ;;  %v1243_v12 = vsel %vm11665_vm9, %v11621_v0, %v1239_v55  ;;  %v8128_v19 = vor.u32 %v10590_v5, %v8125_v47  ;;  %v8101_v0 = vld [vmem:[#allocation6 + $0xd0] sm:$0xf0]  ;;  %v10570_v47 = vld [vmem:[#allocation6 + $0x4c] sm:$0xf] }
 0x180   :  { %v10586_v24 = vld [vmem:[#allocation6 + $0xcc] sm:$0xf]  ;;  %v8037_v5 = vld [vmem:[#allocation6 + $0x50] sm:$0xf0] }
 0x181   :  { %v945_v54 = vor.u32 1.1754944e-38, %v944_v49  ;;  %v8112_v29 = vor.u32 %v10586_v24, %v8109_v25  ;;  %v1264_v49 = vand.u32 2147483647, %v11628_v15 }
 0x182   :  { %v11176_v27 = vpop.eup %11175  ;;  %1732 = vmatpush.bf16.msrb.mxu0 %v7764_v37 }
 0x183   :  { %v11636_v31 = vadd.f32 1.0, %v11176_v27  ;;  %v11178_v34 = vpop.eup %11177  ;;  %1757 = vmatpush.bf16.msrb.mxu2 %v7784_v23  ;;  %v1248_v27 = vsel %vm1245_vm13, %v1247_v7, %v1243_v12  ;;  %v8104_v23 = vor.u32 %v10585_v20, %v8101_v0  ;;  %vm1265_vm3 = vcmp.eq.f32.partialorder %v1264_v49, 8.507059e+37  ;;  %v10569_v7 = vld [vmem:[#allocation6 + $0x44] sm:$0xf]  ;;  %v10566_v20 = vld [vmem:[#allocation6 + $0x2c] sm:$0xf] }
 0x184   :  { %v934_v35 = vmul.f32 %v11178_v34, %v11626_v14  ;;  %v11641_v43 = vpop.eup %11179  ;;  %vm939_vm4 = vweird.f32 %v11178_v34  ;;  %v1270_v37 = vmul.f32 %v1248_v27, %v11531_v9  ;;  %v8029_v0 = vld [vmem:[#allocation6 + $0x38] sm:$0xf0]  ;;  %v10584_v27 = vld [vmem:[#allocation6 + $0xb4] sm:$0xf0] }
 0x185   :  { %11181 = vrcp.f32 %v11636_v31  ;;  %v1192_v36 = vpop.f32.mrf.mxu2  ;;  %v1256_v53 = vmul.f32 %v11641_v43, %v11628_v15  ;;  %vm11659_vm8 = vmor %vm938_vm6, %vm939_vm4  ;;  %v1227_v14 = vand.u32 2147483648, %v11636_v31  ;;  %v1225_v4 = vand.u32 2147483647, %v11636_v31  ;;  %v10576_v49 = vld [vmem:[#allocation6 + $0x74] sm:$0xf0] }
 0x186   :  { %v935_v44 = vsub.f32 1.0, %v934_v35  ;;  %11183 = vtanh.f32 %v11633_v22  ;;  %1733 = vmatpush.bf16.msrb.mxu0 %v7748_v52  ;;  %vm1221_vm12 = vweird.f32 %v11636_v31  ;;  %v10582_v35 = vld [vmem:[#allocation6 + $0xac] sm:$0xf]  ;;  %v8093_v36 = vld [vmem:[#allocation6 + $0xb8] sm:$0xf0]  ;;  %vm1261_vm0 = vweird.f32 %v11641_v43 }
 0x187   :  { %1758 = vmatpush.bf16.msrb.mxu2 %v7768_v39  ;;  %v1257_v10 = vsub.f32 1.0, %v1256_v53  ;;  %11185 = vtanh.f32 %v1209_v58  ;;  %v1228_v8 = vor.u32 1.1754944e-38, %v1227_v14  ;;  %vm1226_vm15 = vcmp.eq.f32.partialorder %v1225_v4, 8.507059e+37  ;;  %vm11694_vm2 = vmor %vm1260_vm1, %vm1261_vm0  ;;  %v10573_v53 = vld [vmem:[#allocation6 + $0x64] sm:$0xf] }
 0x188   :  { %v936_v50 = vmul.f32 %v11178_v34, %v935_v44  ;;  %v8096_v42 = vor.u32 %v10582_v35, %v8093_v36  ;;  %v10577_v44 = vld [vmem:[#allocation6 + $0x84] sm:$0xf]  ;;  %v8080_v52 = vor.u32 %v10578_v3, %v8077_v48  ;;  %v8061_v58 = vld [vmem:[#allocation6 + $0x78] sm:$0xf0]  ;;  %v8107_v14 = vld [vmem:[#allocation6 + $0xc8] sm:$0xf] }
 0x189   :  { %v1258_v33 = vmul.f32 %v11641_v43, %v1257_v10  ;;  %v8072_v51 = vor.u32 %v10577_v44, %v8069_v46  ;;  %v10565_v4 = vld [vmem:[#allocation6 + $0x24] sm:$0xf]  ;;  %v8067_v35 = vld [vmem:[#allocation6 + $0x80] sm:$0xf]  ;;  %v10579_v36 = vld [vmem:[#allocation6 + $0x8c] sm:$0xf0] }
 0x18a   :  { %v937_v60 = vadd.f32 %v11178_v34, %v936_v50  ;;  %v1266_v50 = vand.u32 2147483648, %v11628_v15  ;;  %v10591_v15 = vld [vmem:[#allocation6 + $0xec] sm:$0xf0]  ;;  %v8068_v44 = vor.u32 %v10579_v36, %v8067_v35  ;;  %v8051_v46 = vld [vmem:[#allocation6 + $0x60] sm:$0xf] }
 0x18b   :  { %v11182_v57 = vpop.eup %11181  ;;  %1759 = vmatpush.bf16.msrb.mxu2 %v7752_v56  ;;  %v1259_v45 = vadd.f32 %v11641_v43, %v1258_v33  ;;  %v8053_v56 = vld [vmem:[#allocation6 + $0x70] sm:$0xf0]  ;;  %v8013_v33 = vld [vmem:[#allocation6 + $0x18] sm:$0xf0]  ;;  %v10575_v3 = vld [vmem:[#allocation6 + $0x6c] sm:$0xf0] }
 0x18c   :  { %v1217_v61 = vmul.f32 %v11182_v57, %v11636_v31  ;;  %v941_v2 = vsel %vm11659_vm8, %v11178_v34, %v937_v60  ;;  %v11184_v6 = vpop.eup %11183  ;;  %vm1222_vm11 = vweird.f32 %v11182_v57  ;;  %v8085_v31 = vld [vmem:[#allocation6 + $0xb0] sm:$0xf0]  ;;  %v1267_v59 = vor.u32 1.1754944e-38, %v1266_v50  ;;  %v8115_v60 = vld [vmem:[#allocation6 + $0xe0] sm:$0xf] }
 0x18d   :  { %v946_v13 = vsel %vm943_vm10, %v945_v54, %v941_v2  ;;  %vm1223_vm14 = vmor %vm1221_vm12, %vm1222_vm11  ;;  %v11186_v32 = vpop.eup %11185  ;;  %v8088_v41 = vor.u32 %v10581_v30, %v8085_v31  ;;  %v1263_v55 = vsel %vm11694_vm2, %v11641_v43, %v1259_v45  ;;  %v8056_v40 = vor.u32 %v10573_v53, %v8053_v56  ;;  %v8045_v43 = vld [vmem:[#allocation6 + $0x58] sm:$0xf0]  ;;  %v8005_v30 = vld [vmem:[#allocation6 + $0x10] sm:$0xf0] }
 0x18e   :  { %v1218_v11 = vsub.f32 1.0, %v1217_v61  ;;  %v952_v16 = vmul.f32 %v11184_v6, %v946_v13  ;;  %v8123_v61 = vld [vmem:[#allocation6 + $0xe8] sm:$0xf]  ;;  %v1268_v63 = vsel %vm1265_vm3, %v1267_v59, %v1263_v55  ;;  %v8116_v6 = vor.u32 %v10591_v15, %v8115_v60  ;;  %v10587_v13 = vld [vmem:[#allocation6 + $0xcc] sm:$0xf0] }
 0x18f   :  { %v8124_v10 = vor.u32 %v10592_v62, %v8123_v61  ;;  %v8059_v48 = vld [vmem:[#allocation6 + $0x68] sm:$0xf]  ;;  %v8052_v50 = vor.u32 %v10575_v3, %v8051_v46  ;;  %v10572_v55 = vld [vmem:[#allocation6 + $0x54] sm:$0xf0]  ;;  %v10567_v59 = vld [vmem:[#allocation6 + $0x2c] sm:$0xf0] }
 0x190   :  { %v1219_v18 = vmul.f32 %v11182_v57, %v1218_v11  ;;  %955 = vst [vmem:[%s12717_s6] sm:$0xff] %v952_v16  ;;  %v11679_v21 = vpack.c.bf16 %v952_v16, %v952_v16  ;;  %v8099_v11 = vld [vmem:[#allocation6 + $0xc0] sm:$0xf]  ;;  %v10588_v16 = vld [vmem:[#allocation6 + $0xd4] sm:$0xf0]  ;;  %v8060_v9 = vor.u32 %v10576_v49, %v8059_v48  ;;  %v8043_v53 = vld [vmem:[#allocation6 + $0x48] sm:$0xf] }
 0x191   :  { %v8100_v24 = vor.u32 %v10587_v13, %v8099_v11  ;;  %v8108_v25 = vor.u32 %v10588_v16, %v8107_v14  ;;  %v8027_v60 = vld [vmem:[#allocation6 + $0x28] sm:$0xf]  ;;  %v10568_v15 = vld [vmem:[#allocation6 + $0x34] sm:$0xf0]  ;;  %v8358_v13 = vld [vmem:[#allocation8 + $0x1c0] sm:$0xf] }
 0x192   :  { %v1220_v26 = vadd.f32 %v11182_v57, %v1219_v18  ;;  %1695 = vmatmul.bf16.vlgmr.msra.gmra.mxu1 %v11679_v21  ;;  %1721 = vmatmul.bf16.vlgmr.msra.gmra.mxu3 %v11679_v21  ;;  %v8048_v18 = vor.u32 %v10570_v47, %v8045_v43  ;;  %v8028_v62 = vor.u32 %v10568_v15, %v8027_v60  ;;  %v10655_v47 = vld [vmem:[#allocation8 + $0x1ec] sm:$0xf0]  ;;  %v10653_v43 = vld [vmem:[#allocation8 + $0x1e4] sm:$0xf] }
 0x193   :  { %2058 = vmatpush.bf16.msra.mxu1 %v8120_v17  ;;  %2084 = vmatpush.bf16.msra.mxu3 %v8128_v19  ;;  %v8040_v17 = vor.u32 %v10569_v7, %v8037_v5  ;;  %v8021_v19 = vld [vmem:[#allocation6 + $0x30] sm:$0xf0]  ;;  %v8374_v5 = vld [vmem:[#allocation8 + $0x1e0] sm:$0xf]  ;;  %v10651_v14 = vld [vmem:[#allocation8 + $0x1cc] sm:$0xf0] }
 0x194   :  { %v1224_v28 = vsel %vm1223_vm14, %v11182_v57, %v1220_v26  ;;  %v10574_v57 = vld [vmem:[#allocation6 + $0x6c] sm:$0xf]  ;;  %v10583_v26 = vld [vmem:[#allocation6 + $0xac] sm:$0xf0]  ;;  %v10649_v16 = vld [vmem:[#allocation8 + $0x1c4] sm:$0xf] }
 0x195   :  { %v1229_v34 = vsel %vm1226_vm15, %v1228_v8, %v1224_v28  ;;  %v8064_v1 = vor.u32 %v10574_v57, %v8061_v58  ;;  %v8091_v8 = vld [vmem:[#allocation6 + $0xa8] sm:$0xf]  ;;  %v8024_v28 = vor.u32 %v10565_v4, %v8021_v19  ;;  %v8044_v57 = vor.u32 %v10572_v55, %v8043_v53  ;;  %v8019_v58 = vld [vmem:[#allocation6 + $0x20] sm:$0xf]  ;;  %v10635_v48 = vld [vmem:[#allocation8 + $0x14c] sm:$0xf0] }
 0x196   :  { %v1271_v38 = vmul.f32 %v11186_v32, %v1229_v34  ;;  %v10562_v32 = vld [vmem:[#allocation6 + $0xc] sm:$0xf]  ;;  %v8092_v31 = vor.u32 %v10584_v27, %v8091_v8  ;;  %v8020_v61 = vor.u32 %v10567_v59, %v8019_v58  ;;  %v8342_v19 = vld [vmem:[#allocation8 + $0x1a0] sm:$0xf]  ;;  %v10641_v8 = vld [vmem:[#allocation8 + $0x184] sm:$0xf] }
 0x197   :  { %2059 = vmatpush.bf16.msra.mxu1 %v8104_v23  ;;  %2085 = vmatpush.bf16.msra.mxu3 %v8112_v29  ;;  %v8032_v23 = vor.u32 %v10566_v20, %v8029_v0  ;;  %v10561_v29 = vld [vmem:[#allocation6 + $0x4] sm:$0xf]  ;;  %v10647_v20 = vld [vmem:[#allocation8 + $0x1ac] sm:$0xf0]  ;;  %v8230_v53 = vld [vmem:[#allocation8 + $0xc0] sm:$0xf] }
 0x198   :  { %v11686_v39 = vadd.f32 %v1271_v38, %v1270_v37  ;;  %v8075_v37 = vld [vmem:[#allocation6 + $0x88] sm:$0xf]  ;;  %v10580_v38 = vld [vmem:[#allocation6 + $0x94] sm:$0xf0]  ;;  %v10645_v0 = vld [vmem:[#allocation8 + $0x1a4] sm:$0xf] }
 0x199   :  { %v8076_v45 = vor.u32 %v10580_v38, %v8075_v37  ;;  %v8246_v37 = vld [vmem:[#allocation8 + $0xe0] sm:$0xf]  ;;  %v10623_v38 = vld [vmem:[#allocation8 + $0xec] sm:$0xf0]  ;;  %v10633_v49 = vld [vmem:[#allocation8 + $0x144] sm:$0xf] }
 0x19a   :  { %11187 = vtanh.f32 %v11686_v39  ;;  %v10619_v55 = vld [vmem:[#allocation8 + $0xcc] sm:$0xf0]  ;;  %v8232_v58 = vld [vmem:[#allocation8 + $0xd0] sm:$0xf0]  ;;  %v8278_v59 = vld [vmem:[#allocation8 + $0x120] sm:$0xf] }
 0x19b   :  { %2060 = vmatpush.bf16.msra.mxu1 %v8088_v41  ;;  %2086 = vmatpush.bf16.msra.mxu3 %v8096_v42  ;;  %v8008_v41 = vor.u32 %v10561_v29, %v8005_v30  ;;  %v8016_v42 = vor.u32 %v10562_v32, %v8013_v33  ;;  %v8310_v30 = vld [vmem:[#allocation8 + $0x160] sm:$0xf]  ;;  %v10639_v32 = vld [vmem:[#allocation8 + $0x16c] sm:$0xf0] }
 0x19c   :  { %v8311_v33 = vor.u32 %v10639_v32, %v8310_v30  ;;  %v10631_v60 = vld [vmem:[#allocation8 + $0x12c] sm:$0xf0]  ;;  %v8366_v32 = vld [vmem:[#allocation8 + $0x1c8] sm:$0xf] }
 0x19f   :  { %2061 = vmatpush.bf16.msra.mxu1 %v8072_v51  ;;  %2087 = vmatpush.bf16.msra.mxu3 %v8080_v52  ;;  %v8035_v51 = vld [vmem:[#allocation6 + $0x40] sm:$0xf]  ;;  %v10571_v52 = vld [vmem:[#allocation6 + $0x4c] sm:$0xf0] }
 0x1a0   :  { %v11188_v54 = vpop.eup %11187  ;;  %v8036_v56 = vor.u32 %v10571_v52, %v8035_v51 }
 0x1a1   :  { %v1274_v2 = vmul.f32 %v11188_v54, %v1268_v63  ;;  %v8003_v54 = vld [vmem:[#allocation6] sm:$0xf]  ;;  %v10563_v63 = vld [vmem:[#allocation6 + $0xc] sm:$0xf0] }
 0x1a2   :  { %1747 = vmatmul.bf16.vlgmr.msrb.gmra.mxu1 %v11679_v21  ;;  %1773 = vmatmul.bf16.vlgmr.msrb.gmra.mxu3 %v11679_v21  ;;  %v8083_v21 = vld [vmem:[#allocation6 + $0xa0] sm:$0xf]  ;;  %v8004_v7 = vor.u32 %v10563_v63, %v8003_v54  ;;  %v8280_v54 = vld [vmem:[#allocation8 + $0x130] sm:$0xf0] }
 0x1a3   :  { %v11701_v12 = vpack.c.bf16 %v1274_v2, %v1274_v2  ;;  %2062 = vmatpush.bf16.msra.mxu1 %v8056_v40  ;;  %2088 = vmatpush.bf16.msra.mxu3 %v8064_v1  ;;  %v8084_v34 = vor.u32 %v10583_v26, %v8083_v21  ;;  %v8011_v40 = vld [vmem:[#allocation6 + $0x8] sm:$0xf]  ;;  %v10564_v1 = vld [vmem:[#allocation6 + $0x14] sm:$0xf0]  ;;  %v8326_v21 = vld [vmem:[#allocation8 + $0x180] sm:$0xf] }
 0x1a4   :  { %v8012_v2 = vor.u32 %v10564_v1, %v8011_v40  ;;  %v10643_v26 = vld [vmem:[#allocation8 + $0x18c] sm:$0xf0] }
 0x1a5   :  { %1682 = vmatmul.bf16.vlgmr.msra.gmra.mxu0 %v11701_v12  ;;  %1708 = vmatmul.bf16.vlgmr.msra.gmra.mxu2 %v11701_v12 }
 0x1a6   :  { %2045 = vmatpush.bf16.msra.mxu0 %v8116_v6  ;;  %2071 = vmatpush.bf16.msra.mxu2 %v8124_v10  ;;  %v8375_v6 = vor.u32 %v10655_v47, %v8374_v5  ;;  %v8376_v10 = vld [vmem:[#allocation8 + $0x1f0] sm:$0xf0]  ;;  %v10613_v5 = vld [vmem:[#allocation8 + $0xa4] sm:$0xf] }
 0x1a7   :  { %2063 = vmatpush.bf16.msra.mxu1 %v8040_v17  ;;  %2089 = vmatpush.bf16.msra.mxu3 %v8048_v18  ;;  %v8379_v11 = vor.u32 %v10653_v43, %v8376_v10  ;;  %v8359_v17 = vor.u32 %v10651_v14, %v8358_v13  ;;  %v8360_v18 = vld [vmem:[#allocation8 + $0x1d0] sm:$0xf0]  ;;  %v10627_v10 = vld [vmem:[#allocation8 + $0x10c] sm:$0xf0] }
 0x1a8   :  { %v8363_v4 = vor.u32 %v10649_v16, %v8360_v18  ;;  %v8216_v43 = vld [vmem:[#allocation8 + $0xb0] sm:$0xf0]  ;;  %v10625_v16 = vld [vmem:[#allocation8 + $0x104] sm:$0xf]  ;;  %v8382_v18 = vld [vmem:[#allocation8 + $0x1e8] sm:$0xf] }
 0x1a9   :  { %v8219_v13 = vor.u32 %v10613_v5, %v8216_v43  ;;  %v10642_v5 = vld [vmem:[#allocation8 + $0x18c] sm:$0xf] }
 0x1aa   :  { %2046 = vmatpush.bf16.msra.mxu0 %v8100_v24  ;;  %2072 = vmatpush.bf16.msra.mxu2 %v8108_v25  ;;  %v8344_v24 = vld [vmem:[#allocation8 + $0x1b0] sm:$0xf0]  ;;  %v7998_v43 = vld [vmem:[%s12711_s0 + $0x48] sm:$0xff] }
 0x1ab   :  { %2064 = vmatpush.bf16.msra.mxu1 %v8024_v28  ;;  %2090 = vmatpush.bf16.msra.mxu3 %v8032_v23  ;;  %v8347_v25 = vor.u32 %v10645_v0, %v8344_v24  ;;  %v8327_v28 = vor.u32 %v10643_v26, %v8326_v21  ;;  %v8328_v23 = vld [vmem:[#allocation8 + $0x190] sm:$0xf0]  ;;  %v8384_v0 = vld [vmem:[#allocation8 + $0x1f8] sm:$0xf0]  ;;  %v8198_v21 = vld [vmem:[#allocation8 + $0x80] sm:$0xf] }
 0x1ac   :  { %v8331_v29 = vor.u32 %v10641_v8, %v8328_v23  ;;  %v10611_v26 = vld [vmem:[#allocation8 + $0x8c] sm:$0xf0]  ;;  %v10609_v8 = vld [vmem:[#allocation8 + $0x84] sm:$0xf] }
 0x1ad   :  { %v8199_v23 = vor.u32 %v10611_v26, %v8198_v21  ;;  %v10640_v21 = vld [vmem:[#allocation8 + $0x174] sm:$0xf0] }
 0x1ae   :  { %2047 = vmatpush.bf16.msra.mxu0 %v8084_v34  ;;  %2073 = vmatpush.bf16.msra.mxu2 %v8092_v31  ;;  %v10637_v34 = vld [vmem:[#allocation8 + $0x164] sm:$0xf]  ;;  %v8312_v31 = vld [vmem:[#allocation8 + $0x170] sm:$0xf0] }
 0x1af   :  { %2065 = vmatpush.bf16.msra.mxu1 %v8008_v41  ;;  %2091 = vmatpush.bf16.msra.mxu3 %v8016_v42  ;;  %v8315_v35 = vor.u32 %v10637_v34, %v8312_v31  ;;  %v10621_v41 = vld [vmem:[#allocation8 + $0xe4] sm:$0xf]  ;;  %v8247_v42 = vor.u32 %v10623_v38, %v8246_v37  ;;  %v10650_v37 = vld [vmem:[#allocation8 + $0x1cc] sm:$0xf]  ;;  %v8368_v38 = vld [vmem:[#allocation8 + $0x1d8] sm:$0xf0] }
 0x1b2   :  { %2048 = vmatpush.bf16.msra.mxu0 %v8068_v44  ;;  %2074 = vmatpush.bf16.msra.mxu2 %v8076_v45  ;;  %v8248_v44 = vld [vmem:[#allocation8 + $0xf0] sm:$0xf0]  ;;  %v8294_v45 = vld [vmem:[#allocation8 + $0x140] sm:$0xf] }
 0x1b3   :  { %2066 = vmatmul.bf16.vlgmr.msra.gmra.mxu1 %v11701_v12  ;;  %2092 = vmatmul.bf16.vlgmr.msra.gmra.mxu3 %v11701_v12  ;;  %v8251_v3 = vor.u32 %v10621_v41, %v8248_v44  ;;  %v8295_v51 = vor.u32 %v10635_v48, %v8294_v45  ;;  %v8182_v44 = vld [vmem:[#allocation8 + $0x60] sm:$0xf]  ;;  %v10607_v45 = vld [vmem:[#allocation8 + $0x6c] sm:$0xf0] }
 0x1b4   :  { %2577 = vmatpush.bf16.msrb.mxu1 %v8375_v6  ;;  %2603 = vmatpush.bf16.msrb.mxu3 %v8379_v11  ;;  %v8262_v6 = vld [vmem:[#allocation8 + $0x100] sm:$0xf]  ;;  %v8183_v48 = vor.u32 %v10607_v45, %v8182_v44  ;;  %v8254_v44 = vld [vmem:[#allocation8 + $0xe8] sm:$0xf] }
 0x1b5   :  { %1734 = vmatmul.bf16.vlgmr.msrb.gmra.mxu0 %v11701_v12  ;;  %1760 = vmatmul.bf16.vlgmr.msrb.gmra.mxu2 %v11701_v12  ;;  %v8263_v14 = vor.u32 %v10627_v10, %v8262_v6  ;;  %v8336_v10 = vld [vmem:[#allocation8 + $0x198] sm:$0xf0] }
 0x1b6   :  { %2049 = vmatpush.bf16.msra.mxu0 %v8052_v50  ;;  %2075 = vmatpush.bf16.msra.mxu2 %v8060_v9  ;;  %v8296_v50 = vld [vmem:[#allocation8 + $0x150] sm:$0xf0]  ;;  %v11720_v9 = vld [vmem:[%s12714_s3] sm:$0xf] }
 0x1b7   :  { %v8299_v52 = vor.u32 %v10633_v49, %v8296_v50  ;;  %v1346_v63 = vperm.slane %v11720_v9, 0  ;;  %v1347_v31 = vperm.slane %v11720_v9, 1  ;;  %v8184_v49 = vld [vmem:[#allocation8 + $0x70] sm:$0xf0] }
 0x1b8   :  { %2578 = vmatpush.bf16.msrb.mxu1 %v8359_v17  ;;  %2604 = vmatpush.bf16.msrb.mxu3 %v8363_v4  ;;  %v8264_v17 = vld [vmem:[#allocation8 + $0x110] sm:$0xf0] }
 0x1b9   :  { %v8267_v4 = vor.u32 %v10625_v16, %v8264_v17  ;;  %v10599_v16 = vld [vmem:[#allocation8 + $0x2c] sm:$0xf0]  ;;  %v10597_v17 = vld [vmem:[#allocation8 + $0x24] sm:$0xf] }
 0x1ba   :  { %2050 = vmatpush.bf16.msra.mxu0 %v8036_v56  ;;  %2076 = vmatpush.bf16.msra.mxu2 %v8044_v57  ;;  %v10617_v56 = vld [vmem:[#allocation8 + $0xc4] sm:$0xf]  ;;  %v8231_v57 = vor.u32 %v10619_v55, %v8230_v53  ;;  %v10648_v53 = vld [vmem:[#allocation8 + $0x1b4] sm:$0xf0]  ;;  %v10646_v55 = vld [vmem:[#allocation8 + $0x1ac] sm:$0xf] }
 0x1bb   :  { %v8235_v15 = vor.u32 %v10617_v56, %v8232_v58  ;;  %v8352_v58 = vld [vmem:[#allocation8 + $0x1b8] sm:$0xf0] }
 0x1bc   :  { %2605 = vmatpush.bf16.msrb.mxu3 %v8347_v25 }
 0x1be   :  { %2051 = vmatpush.bf16.msra.mxu0 %v8020_v61  ;;  %2077 = vmatpush.bf16.msra.mxu2 %v8028_v62  ;;  %v8279_v61 = vor.u32 %v10631_v60, %v8278_v59  ;;  %v10629_v62 = vld [vmem:[#allocation8 + $0x124] sm:$0xf]  ;;  %v8355_v60 = vor.u32 %v10646_v55, %v8352_v58  ;;  %v10636_v55 = vld [vmem:[#allocation8 + $0x154] sm:$0xf0]  ;;  %v10634_v58 = vld [vmem:[#allocation8 + $0x14c] sm:$0xf] }
 0x1bf   :  { %v8283_v40 = vor.u32 %v10629_v62, %v8280_v54 }
 0x1c0   :  { %2606 = vmatpush.bf16.msrb.mxu3 %v8331_v29  ;;  %v8200_v29 = vld [vmem:[#allocation8 + $0x90] sm:$0xf0] }
 0x1c1   :  { %v8203_v30 = vor.u32 %v10609_v8, %v8200_v29 }
 0x1c2   :  { %2052 = vmatpush.bf16.msra.mxu0 %v8004_v7  ;;  %2078 = vmatpush.bf16.msra.mxu2 %v8012_v2  ;;  %v8214_v7 = vld [vmem:[#allocation8 + $0xa0] sm:$0xf]  ;;  %v10615_v2 = vld [vmem:[#allocation8 + $0xac] sm:$0xf0] }
 0x1c3   :  { %v8215_v47 = vor.u32 %v10615_v2, %v8214_v7  ;;  %v8334_v7 = vld [vmem:[#allocation8 + $0x188] sm:$0xf]  ;;  %v10644_v2 = vld [vmem:[#allocation8 + $0x194] sm:$0xf0] }
 0x1c4   :  { %2607 = vmatpush.bf16.msrb.mxu3 %v8315_v35  ;;  %v8335_v6 = vor.u32 %v10644_v2, %v8334_v7  ;;  %v10618_v7 = vld [vmem:[#allocation8 + $0xcc] sm:$0xf]  ;;  %v8240_v2 = vld [vmem:[#allocation8 + $0xd8] sm:$0xf0] }
 0x1c5   :  { %2053 = vmatmul.bf16.vlgmr.msra.gmra.mxu0 %v11701_v12  ;;  %2079 = vmatmul.bf16.vlgmr.msra.gmra.mxu2 %v11701_v12  ;;  %v8343_v12 = vor.u32 %v10647_v20, %v8342_v19  ;;  %v10656_v19 = vld [vmem:[#allocation8 + $0x1f4] sm:$0xf0]  ;;  %v10654_v20 = vld [vmem:[#allocation8 + $0x1ec] sm:$0xf] }
 0x1c6   :  { %2564 = vmatpush.bf16.msrb.mxu0 %v8247_v42  ;;  %2590 = vmatpush.bf16.msrb.mxu2 %v8251_v3  ;;  %v8383_v24 = vor.u32 %v10656_v19, %v8382_v18  ;;  %v8387_v25 = vor.u32 %v10654_v20, %v8384_v0  ;;  %v8371_v42 = vor.u32 %v10650_v37, %v8368_v38  ;;  %v8152_v19 = vld [vmem:[#allocation8 + $0x30] sm:$0xf0]  ;;  %v1349_v37 = vperm.slane %v11720_v9, 3 }
 0x1c7   :  { %2579 = vmatpush.bf16.msrb.mxu1 %v8343_v12 }
 0x1c8   :  { %2608 = vmatpush.bf16.msrb.mxu3 %v8299_v52  ;;  %v8350_v52 = vld [vmem:[#allocation8 + $0x1a8] sm:$0xf] }
 0x1ca   :  { %2565 = vmatpush.bf16.msrb.mxu0 %v8231_v57  ;;  %2591 = vmatpush.bf16.msrb.mxu2 %v8235_v15  ;;  %v8351_v57 = vor.u32 %v10648_v53, %v8350_v52  ;;  %v8166_v15 = vld [vmem:[#allocation8 + $0x40] sm:$0xf]  ;;  %v8302_v53 = vld [vmem:[#allocation8 + $0x148] sm:$0xf] }
 0x1cb   :  { %2580 = vmatpush.bf16.msrb.mxu1 %v8327_v28 }
 0x1cc   :  { %2609 = vmatpush.bf16.msrb.mxu3 %v8283_v40  ;;  %v8168_v40 = vld [vmem:[#allocation8 + $0x50] sm:$0xf0] }
 0x1ce   :  { %2566 = vmatpush.bf16.msrb.mxu0 %v8215_v47  ;;  %2592 = vmatpush.bf16.msrb.mxu2 %v8219_v13 }
 0x1cf   :  { %2581 = vmatpush.bf16.msrb.mxu1 %v8311_v33  ;;  %v10652_v33 = vld [vmem:[#allocation8 + $0x1d4] sm:$0xf0] }
 0x1d0   :  { %2610 = vmatpush.bf16.msrb.mxu3 %v8267_v4  ;;  %v8367_v35 = vor.u32 %v10652_v33, %v8366_v32 }
 0x1d2   :  { %2567 = vmatpush.bf16.msrb.mxu0 %v8199_v23  ;;  %2593 = vmatpush.bf16.msrb.mxu2 %v8203_v30  ;;  %v8320_v23 = vld [vmem:[#allocation8 + $0x178] sm:$0xf0]  ;;  %v8134_v30 = vld [vmem:[#allocation8] sm:$0xf] }
 0x1d3   :  { %2582 = vmatpush.bf16.msrb.mxu1 %v8295_v51 }
 0x1d4   :  { %2655 = vmatpush.bf16.msra.mxu3 %v8387_v25  ;;  %v8318_v25 = vld [vmem:[#allocation8 + $0x168] sm:$0xf] }
 0x1d5   :  { %v8319_v8 = vor.u32 %v10640_v21, %v8318_v25  ;;  %v10616_v25 = vld [vmem:[#allocation8 + $0xb4] sm:$0xf0] }
 0x1d6   :  { %2568 = vmatpush.bf16.msrb.mxu0 %v8183_v48  ;;  %v10622_v48 = vld [vmem:[#allocation8 + $0xec] sm:$0xf] }
 0x1d7   :  { %2583 = vmatpush.bf16.msrb.mxu1 %v8279_v61  ;;  %v10603_v61 = vld [vmem:[#allocation8 + $0x4c] sm:$0xf0] }
 0x1d8   :  { %2656 = vmatpush.bf16.msra.mxu3 %v8371_v42  ;;  %v8167_v54 = vor.u32 %v10603_v61, %v8166_v15  ;;  %v8136_v42 = vld [vmem:[#allocation8 + $0x10] sm:$0xf0]  ;;  %v1348_v61 = vperm.slane %v11720_v9, 2 }
 0x1da   :  { %2569 = vmatpush.bf16.msrb.mxu0 %v8167_v54 }
 0x1db   :  { %2584 = vmatpush.bf16.msrb.mxu1 %v8263_v14  ;;  %v8150_v14 = vld [vmem:[#allocation8 + $0x20] sm:$0xf] }
 0x1dc   :  { %2657 = vmatpush.bf16.msra.mxu3 %v8355_v60  ;;  %v8151_v4 = vor.u32 %v10599_v16, %v8150_v14  ;;  %v8238_v60 = vld [vmem:[#allocation8 + $0xc8] sm:$0xf]  ;;  %v8243_v16 = vor.u32 %v10618_v7, %v8240_v2 }
 0x1de   :  { %2570 = vmatpush.bf16.msrb.mxu0 %v8151_v4 }
 0x1df   :  { %2629 = vmatpush.bf16.msra.mxu1 %v8383_v24  ;;  %v8155_v24 = vor.u32 %v10597_v17, %v8152_v19  ;;  %v10630_v17 = vld [vmem:[#allocation8 + $0x12c] sm:$0xf] }
 0x1e3   :  { %2630 = vmatpush.bf16.msra.mxu1 %v8367_v35  ;;  %v8000_v35 = vld [vmem:[%s12711_s0 + $0x58] sm:$0xff] }
 0x1e7   :  { %2631 = vmatpush.bf16.msra.mxu1 %v8351_v57  ;;  %v8303_v57 = vor.u32 %v10636_v55, %v8302_v53 }
 0x1eb   :  { %2632 = vmatpush.bf16.msra.mxu1 %v8335_v6 }
 0x1ef   :  { %2633 = vmatpush.bf16.msra.mxu1 %v8319_v8  ;;  %v10614_v8 = vld [vmem:[#allocation8 + $0xac] sm:$0xf] }
 0x1f3   :  { %2634 = vmatpush.bf16.msra.mxu1 %v8303_v57  ;;  %v10610_v57 = vld [vmem:[#allocation8 + $0x8c] sm:$0xf] }
 0x20f   :  { %v11713_v27 = vpop.f32.mrf.mxu1 }
 0x215   :  { %v11715_v36 = vpop.f32.mrf.mxu3 }
 0x217   :  { %v1698_v46 = vpop.f32.mrf.mxu1 }
 0x218   :  { %v10605_v46 = vld [vmem:[#allocation8 + $0x64] sm:$0xf] }
 0x21d   :  { %v1724_v1 = vpop.f32.mrf.mxu3 }
 0x21f   :  { %v11723_v11 = vpop.f32.mrf.mxu1 }
 0x222   :  { %v1683_v12 = vpop.f32.mrf.mxu0 }
 0x223   :  { %v1684_v28 = vadd.f32 %v1683_v12, %v1346_v63  ;;  %v10601_v63 = vld [vmem:[#allocation8 + $0x44] sm:$0xf] }
 0x224   :  { %v8171_v1 = vor.u32 %v10601_v63, %v8168_v40  ;;  %v10620_v63 = vld [vmem:[#allocation8 + $0xd4] sm:$0xf0] }
 0x225   :  { %v1697_v34 = vadd.f32 %v11713_v27, %v1684_v28  ;;  %v11727_v41 = vpop.f32.mrf.mxu3  ;;  %v8187_v27 = vor.u32 %v10605_v46, %v8184_v49  ;;  %v10638_v28 = vld [vmem:[#allocation8 + $0x16c] sm:$0xf]  ;;  %v8256_v49 = vld [vmem:[#allocation8 + $0xf8] sm:$0xf0]  ;;  %v8239_v6 = vor.u32 %v10620_v63, %v8238_v60 }
 0x226   :  { %v8323_v33 = vor.u32 %v10638_v28, %v8320_v23  ;;  %v8259_v52 = vor.u32 %v10622_v48, %v8256_v49  ;;  %v8224_v28 = vld [vmem:[#allocation8 + $0xb8] sm:$0xf0] }
 0x227   :  { %v7993_v3 = vmul.f32 -1.442695, %v1697_v34  ;;  %v1750_v50 = vpop.f32.mrf.mxu1  ;;  %2594 = vmatpush.bf16.msrb.mxu2 %v8187_v27  ;;  %v10595_v34 = vld [vmem:[#allocation8 + $0xc] sm:$0xf0] }
 0x228   :  { %v1709_v51 = vpop.f32.mrf.mxu2  ;;  %v8135_v38 = vor.u32 %v10595_v34, %v8134_v30  ;;  %v10628_v34 = vld [vmem:[#allocation8 + $0x114] sm:$0xf0] }
 0x229   :  { %11189 = vpow2.f32 %v7993_v3  ;;  %v1710_v56 = vadd.f32 %v1709_v51, %v1347_v31  ;;  %v10593_v31 = vld [vmem:[#allocation8 + $0x4] sm:$0xf]  ;;  %v10624_v3 = vld [vmem:[#allocation8 + $0xf4] sm:$0xf0] }
 0x22a   :  { %v1685_v59 = vpop.f32.mrf.mxu0  ;;  %v8139_v46 = vor.u32 %v10593_v31, %v8136_v42  ;;  %2571 = vmatpush.bf16.msrb.mxu0 %v8135_v38  ;;  %v8255_v27 = vor.u32 %v10624_v3, %v8254_v44  ;;  %v10626_v31 = vld [vmem:[#allocation8 + $0x10c] sm:$0xf]  ;;  %v7997_v42 = vld [vmem:[%s12711_s0 + $0x40] sm:$0xff]  ;;  %v8227_v44 = vor.u32 %v10614_v8, %v8224_v28 }
 0x22b   :  { %v1723_v62 = vadd.f32 %v11715_v36, %v1710_v56  ;;  %2595 = vmatpush.bf16.msrb.mxu2 %v8171_v1  ;;  %v8339_v36 = vor.u32 %v10642_v5, %v8336_v10  ;;  %v8304_v59 = vld [vmem:[#allocation8 + $0x158] sm:$0xf0]  ;;  %v8286_v10 = vld [vmem:[#allocation8 + $0x128] sm:$0xf] }
 0x22d   :  { %v7994_v47 = vmul.f32 -1.442695, %v1723_v62  ;;  %v1776_v13 = vpop.f32.mrf.mxu3  ;;  %2658 = vmatpush.bf16.msra.mxu3 %v8339_v36 }
 0x22e   :  { %2616 = vmatpush.bf16.msra.mxu0 %v8255_v27  ;;  %v10632_v13 = vld [vmem:[#allocation8 + $0x134] sm:$0xf0]  ;;  %v8206_v27 = vld [vmem:[#allocation8 + $0x88] sm:$0xf] }
 0x22f   :  { %v11190_v18 = vpop.eup %11189  ;;  %11191 = vpow2.f32 %v7994_v47  ;;  %2596 = vmatpush.bf16.msrb.mxu2 %v8155_v24  ;;  %v8222_v24 = vld [vmem:[#allocation8 + $0xa8] sm:$0xf] }
 0x230   :  { %v11733_v20 = vadd.f32 1.0, %v11190_v18  ;;  %v2067_v0 = vpop.f32.mrf.mxu1  ;;  %v1711_v12 = vpop.f32.mrf.mxu2  ;;  %v8288_v18 = vld [vmem:[#allocation8 + $0x138] sm:$0xf0] }
 0x231   :  { %v2098_v26 = vadd.f32 %v7998_v43, %v2067_v0  ;;  %2659 = vmatpush.bf16.msra.mxu3 %v8323_v33  ;;  %v8307_v43 = vor.u32 %v10634_v58, %v8304_v59  ;;  %v8287_v0 = vor.u32 %v10632_v13, %v8286_v10  ;;  %v8291_v12 = vor.u32 %v10630_v17, %v8288_v18  ;;  %v8208_v58 = vld [vmem:[#allocation8 + $0x98] sm:$0xf0] }
 0x232   :  { %11193 = vrcp.f32 %v11733_v20  ;;  %v1735_v29 = vpop.f32.mrf.mxu0  ;;  %2617 = vmatpush.bf16.msra.mxu0 %v8239_v6  ;;  %v1794_v30 = vand.u32 2147483648, %v11733_v20  ;;  %vm1788_vm6 = vweird.f32 %v11733_v20  ;;  %v1792_v59 = vand.u32 2147483647, %v11733_v20  ;;  %v10606_v6 = vld [vmem:[#allocation8 + $0x6c] sm:$0xf] }
 0x233   :  { %v8130_v32 = vmul.f32 -1.442695, %v2098_v26  ;;  %2597 = vmatpush.bf16.msrb.mxu2 %v8139_v46  ;;  %v1736_v19 = vadd.f32 %v1735_v29, %v1348_v61  ;;  %v8223_v26 = vor.u32 %v10616_v25, %v8222_v24  ;;  %2635 = vmatpush.bf16.msra.mxu1 %v8287_v0  ;;  %v8270_v29 = vld [vmem:[#allocation8 + $0x108] sm:$0xf]  ;;  %v8211_v7 = vor.u32 %v10610_v57, %v8208_v58  ;;  %v10604_v24 = vld [vmem:[#allocation8 + $0x54] sm:$0xf0] }
 0x234   :  { %v1795_v60 = vor.u32 1.1754944e-38, %v1794_v30  ;;  %vm1793_vm11 = vcmp.eq.f32.partialorder %v1792_v59, 8.507059e+37  ;;  %v10602_v25 = vld [vmem:[#allocation8 + $0x4c] sm:$0xf] }
 0x235   :  { %v11192_v45 = vpop.eup %11191  ;;  %11195 = vpow2.f32 %v8130_v32  ;;  %2660 = vmatpush.bf16.msra.mxu3 %v8307_v43  ;;  %v10608_v43 = vld [vmem:[#allocation8 + $0x74] sm:$0xf0] }
 0x236   :  { %v11740_v50 = vadd.f32 1.0, %v11192_v45  ;;  %v2093_v51 = vpop.f32.mrf.mxu3  ;;  %2618 = vmatpush.bf16.msra.mxu0 %v8223_v26  ;;  %v8271_v45 = vor.u32 %v10628_v34, %v8270_v29 }
 0x237   :  { %v2100_v56 = vadd.f32 %v8000_v35, %v2093_v51  ;;  %2642 = vmatpush.bf16.msra.mxu2 %v8259_v52  ;;  %v8272_v35 = vld [vmem:[#allocation8 + $0x118] sm:$0xf0]  ;;  %v10612_v52 = vld [vmem:[#allocation8 + $0x94] sm:$0xf0] }
 0x238   :  { %v11742_v15 = vpop.eup %11193  ;;  %11197 = vrcp.f32 %v11740_v50  ;;  %v2069_v62 = vpop.f32.mrf.mxu1  ;;  %v1813_v3 = vand.u32 2147483648, %v11740_v50  ;;  %v8275_v48 = vor.u32 %v10626_v31, %v8272_v35  ;;  %2636 = vmatpush.bf16.msra.mxu1 %v8271_v45  ;;  %vm1807_vm7 = vweird.f32 %v11740_v50  ;;  %v10598_v31 = vld [vmem:[#allocation8 + $0x2c] sm:$0xf]  ;;  %v8160_v35 = vld [vmem:[#allocation8 + $0x38] sm:$0xf0]  ;;  %v7999_v45 = vld [vmem:[%s12711_s0 + $0x50] sm:$0xff] }
 0x239   :  { %v1761_v54 = vpop.f32.mrf.mxu2  ;;  %v1784_v40 = vmul.f32 %v11742_v15, %v11733_v20  ;;  %v8131_v5 = vmul.f32 -1.442695, %v2100_v56  ;;  %2661 = vmatpush.bf16.msra.mxu3 %v8291_v12  ;;  %vm1789_vm4 = vweird.f32 %v11742_v15  ;;  %v8207_v56 = vor.u32 %v10612_v52, %v8206_v27  ;;  %v8174_v12 = vld [vmem:[#allocation8 + $0x48] sm:$0xf]  ;;  %v10594_v27 = vld [vmem:[#allocation8 + $0xc] sm:$0xf] }
 0x23a   :  { %v1762_v1 = vadd.f32 %v1761_v54, %v1349_v37  ;;  %v1737_v47 = vpop.f32.mrf.mxu0  ;;  %v1749_v37 = vadd.f32 %v11723_v11, %v1736_v19  ;;  %v1811_v11 = vand.u32 2147483647, %v11740_v50  ;;  %v1814_v62 = vor.u32 1.1754944e-38, %v1813_v3  ;;  %vm11773_vm8 = vmor %vm1788_vm6, %vm1789_vm4  ;;  %v8144_v52 = vld [vmem:[#allocation8 + $0x18] sm:$0xf0] }
 0x23b   :  { %v11196_v36 = vpop.eup %11195  ;;  %v1785_v9 = vsub.f32 1.0, %v1784_v40  ;;  %2643 = vmatpush.bf16.msra.mxu2 %v8243_v16  ;;  %2619 = vmatpush.bf16.msra.mxu0 %v8207_v56  ;;  %v8190_v47 = vld [vmem:[#allocation8 + $0x68] sm:$0xf]  ;;  %v8175_v28 = vor.u32 %v10604_v24, %v8174_v12  ;;  %v8163_v3 = vor.u32 %v10598_v31, %v8160_v35  ;;  %v8512_v54 = vld [vmem:[#allocation6 + $0xf0] sm:$0xf0] }
 0x23c   :  { %v1775_v14 = vadd.f32 %v11727_v41, %v1762_v1  ;;  %v11749_v4 = vadd.f32 1.0, %v11196_v36  ;;  %vm1812_vm10 = vcmp.eq.f32.partialorder %v1811_v11, 8.507059e+37  ;;  %v8192_v36 = vld [vmem:[#allocation8 + $0x78] sm:$0xf0]  ;;  %v8191_v19 = vor.u32 %v10608_v43, %v8190_v47  ;;  %v10666_v43 = vld [vmem:[#allocation6 + $0x4c] sm:$0xf] }
 0x23d   :  { %v1786_v41 = vmul.f32 %v11742_v15, %v1785_v9  ;;  %2662 = vmatpush.bf16.msra.mxu3 %v8275_v48  ;;  %v8195_v0 = vor.u32 %v10606_v6, %v8192_v36  ;;  %v8142_v48 = vld [vmem:[#allocation8 + $0x8] sm:$0xf]  ;;  %v8504_v24 = vld [vmem:[#allocation6 + $0xd8] sm:$0xf0] }
 0x23e   :  { %v7995_v21 = vmul.f32 -1.442695, %v1775_v14  ;;  %v11751_v23 = vpop.eup %11197  ;;  %v2095_v32 = vpop.f32.mrf.mxu3  ;;  %vm2130_vm1 = vweird.f32 %v11749_v4 }
 0x23f   :  { %v1803_v33 = vmul.f32 %v11751_v23, %v11740_v50  ;;  %v1787_v49 = vadd.f32 %v11742_v15, %v1786_v41  ;;  %2644 = vmatpush.bf16.msra.mxu2 %v8227_v44  ;;  %vm1808_vm5 = vweird.f32 %v11751_v23  ;;  %2620 = vmatpush.bf16.msra.mxu0 %v8191_v19  ;;  %v10682_v19 = vld [vmem:[#allocation6 + $0xcc] sm:$0xf] }
 0x240   :  { %11199 = vpow2.f32 %v7995_v21  ;;  %vm1809_vm9 = vmor %vm1807_vm7, %vm1808_vm5  ;;  %v8176_v21 = vld [vmem:[#allocation8 + $0x58] sm:$0xf0] }
 0x241   :  { %11201 = vpow2.f32 %v8131_v5  ;;  %v1763_v38 = vpop.f32.mrf.mxu2  ;;  %v1804_v46 = vsub.f32 1.0, %v1803_v33  ;;  %v1791_v20 = vsel %vm11773_vm8, %v11742_v15, %v1787_v49  ;;  %v8179_v29 = vor.u32 %v10602_v25, %v8176_v21  ;;  %v10600_v33 = vld [vmem:[#allocation8 + $0x34] sm:$0xf0] }
 0x242   :  { %11203 = vrcp.f32 %v11749_v4  ;;  %v2054_v51 = vpop.f32.mrf.mxu0  ;;  %v1796_v15 = vsel %vm1793_vm11, %v1795_v60, %v1791_v20  ;;  %v10596_v49 = vld [vmem:[#allocation8 + $0x14] sm:$0xf0]  ;;  %v8520_v20 = vld [vmem:[#allocation6 + $0xf8] sm:$0xf0] }
 0x243   :  { %v1805_v53 = vmul.f32 %v11751_v23, %v1804_v46  ;;  %v2097_v55 = vadd.f32 %v7997_v42, %v2054_v51  ;;  %11205 = vtanh.f32 %v1749_v37  ;;  %2645 = vmatpush.bf16.msra.mxu2 %v8211_v7  ;;  %2621 = vmatpush.bf16.msra.mxu0 %v8175_v28 }
 0x245   :  { %v1806_v63 = vadd.f32 %v11751_v23, %v1805_v53  ;;  %v8129_v40 = vmul.f32 -1.442695, %v2097_v55  ;;  %v8143_v53 = vor.u32 %v10596_v49, %v8142_v48  ;;  %v8147_v55 = vor.u32 %v10594_v27, %v8144_v52  ;;  %v8464_v48 = vld [vmem:[#allocation6 + $0x90] sm:$0xf0]  ;;  %v10674_v49 = vld [vmem:[#allocation6 + $0x8c] sm:$0xf] }
 0x246   :  { %v11200_v61 = vpop.eup %11199 }
 0x247   :  { %v11202_v1 = vpop.eup %11201  ;;  %v11783_v50 = vadd.f32 1.0, %v11200_v61  ;;  %v1810_v5 = vsel %vm1809_vm9, %v11751_v23, %v1806_v63  ;;  %11207 = vpow2.f32 %v8129_v40  ;;  %2646 = vmatpush.bf16.msra.mxu2 %v8195_v0 }
 0x248   :  { %v11785_v2 = vpop.eup %11203  ;;  %v1815_v10 = vsel %vm1812_vm10, %v1814_v62, %v1810_v5  ;;  %v11789_v9 = vadd.f32 1.0, %v11202_v1  ;;  %v10685_v62 = vld [vmem:[#allocation6 + $0xe4] sm:$0xf]  ;;  %v10686_v1 = vld [vmem:[#allocation6 + $0xec] sm:$0xf] }
 0x249   :  { %11209 = vrcp.f32 %v11783_v50  ;;  %v2080_v13 = vpop.f32.mrf.mxu2  ;;  %v11206_v14 = vpop.eup %11205  ;;  %v2126_v16 = vmul.f32 %v11785_v2, %v11749_v4  ;;  %v1837_v17 = vmul.f32 %v1815_v10, %v11633_v22  ;;  %v8158_v22 = vld [vmem:[#allocation8 + $0x28] sm:$0xf]  ;;  %v1833_v46 = vand.u32 2147483648, %v11783_v50 }
 0x24a   :  { %v2056_v18 = vpop.f32.mrf.mxu0  ;;  %v1838_v26 = vmul.f32 %v11206_v14, %v1796_v15  ;;  %11211 = vrcp.f32 %v11789_v9  ;;  %v8159_v42 = vor.u32 %v10600_v33, %v8158_v22  ;;  %v1831_v51 = vand.u32 2147483647, %v11783_v50  ;;  %v10681_v15 = vld [vmem:[#allocation6 + $0xc4] sm:$0xf]  ;;  %v8480_v22 = vld [vmem:[#allocation6 + $0xb0] sm:$0xf0] }
 0x24b   :  { %v2127_v41 = vsub.f32 1.0, %v2126_v16  ;;  %2647 = vmatpush.bf16.msra.mxu2 %v8179_v29  ;;  %vm1827_vm13 = vweird.f32 %v11783_v50  ;;  %vm2131_vm14 = vweird.f32 %v11785_v2  ;;  %v2099_v59 = vadd.f32 %v7999_v45, %v2080_v13  ;;  %v8496_v18 = vld [vmem:[#allocation6 + $0xd0] sm:$0xf0]  ;;  %v10677_v29 = vld [vmem:[#allocation6 + $0xa4] sm:$0xf] }
 0x24c   :  { %v11794_v30 = vadd.f32 %v1838_v26, %v1837_v17  ;;  %2622 = vmatpush.bf16.msra.mxu0 %v8159_v42  ;;  %v1834_v61 = vor.u32 1.1754944e-38, %v1833_v46  ;;  %vm1832_vm0 = vcmp.eq.f32.partialorder %v1831_v51, 8.507059e+37  ;;  %vm11821_vm2 = vmor %vm2130_vm1, %vm2131_vm14  ;;  %v2134_v10 = vand.u32 2147483647, %v11749_v4  ;;  %v10678_v33 = vld [vmem:[#allocation6 + $0xac] sm:$0xf] }
 0x24d   :  { %v11208_v8 = vpop.eup %11207  ;;  %v2128_v44 = vmul.f32 %v11785_v2, %v2127_v41  ;;  %v8515_v36 = vor.u32 %v10685_v62, %v8512_v54  ;;  %v8523_v17 = vor.u32 %v10686_v1, %v8520_v20  ;;  %v8507_v41 = vor.u32 %v10682_v19, %v8504_v24  ;;  %v10673_v46 = vld [vmem:[#allocation6 + $0x84] sm:$0xf]  ;;  %v8510_v62 = vld [vmem:[#allocation6 + $0xe0] sm:$0xf]  ;;  %v10687_v54 = vld [vmem:[#allocation6 + $0xec] sm:$0xf0] }
 0x24e   :  { %v11796_v32 = vadd.f32 1.0, %v11208_v8  ;;  %vm2135_vm5 = vcmp.eq.f32.partialorder %v2134_v10, 8.507059e+37  ;;  %vm2150_vm9 = vweird.f32 %v11789_v9  ;;  %v2154_v27 = vand.u32 2147483647, %v11789_v9  ;;  %v8518_v1 = vld [vmem:[#allocation6 + $0xe8] sm:$0xf] }
 0x24f   :  { %v11210_v23 = vpop.eup %11209  ;;  %2648 = vmatpush.bf16.msra.mxu2 %v8163_v3  ;;  %v2129_v60 = vadd.f32 %v11785_v2, %v2128_v44  ;;  %v8483_v44 = vor.u32 %v10677_v29, %v8480_v22  ;;  %v10688_v20 = vld [vmem:[#allocation6 + $0xf4] sm:$0xf0]  ;;  %v10662_v24 = vld [vmem:[#allocation6 + $0x2c] sm:$0xf]  ;;  %v10657_v29 = vld [vmem:[#allocation6 + $0x4] sm:$0xf] }
 0x250   :  { %v1823_v34 = vmul.f32 %v11210_v23, %v11783_v50  ;;  %11213 = vrcp.f32 %v11796_v32  ;;  %vm1828_vm12 = vweird.f32 %v11210_v23  ;;  %v11808_v56 = vpop.eup %11211  ;;  %v2136_v50 = vand.u32 2147483648, %v11749_v4  ;;  %2623 = vmatpush.bf16.msra.mxu0 %v8143_v53  ;;  %v10684_v19 = vld [vmem:[#allocation6 + $0xd4] sm:$0xf0]  ;;  %v8400_v22 = vld [vmem:[#allocation6 + $0x10] sm:$0xf0] }
 0x251   :  { %v2082_v37 = vpop.f32.mrf.mxu2  ;;  %11215 = vtanh.f32 %v11794_v30  ;;  %vm1829_vm15 = vmor %vm1827_vm13, %vm1828_vm12  ;;  %v2146_v5 = vmul.f32 %v11808_v56, %v11789_v9  ;;  %v2117_v14 = vand.u32 2147483648, %v11796_v32  ;;  %v2133_v16 = vsel %vm11821_vm2, %v11785_v2, %v2129_v60  ;;  %v8456_v60 = vld [vmem:[#allocation6 + $0x78] sm:$0xf0]  ;;  %v10679_v2 = vld [vmem:[#allocation6 + $0xac] sm:$0xf0] }
 0x252   :  { %v1824_v38 = vsub.f32 1.0, %v1823_v34  ;;  %11217 = vtanh.f32 %v2099_v59  ;;  %v2115_v12 = vand.u32 2147483647, %v11796_v32  ;;  %v2137_v25 = vor.u32 1.1754944e-38, %v2136_v50  ;;  %v8488_v34 = vld [vmem:[#allocation6 + $0xb8] sm:$0xf0] }
 0x253   :  { %2649 = vmatpush.bf16.msra.mxu2 %v8147_v55  ;;  %v2147_v21 = vsub.f32 1.0, %v2146_v5  ;;  %vm2111_vm4 = vweird.f32 %v11796_v32  ;;  %v2118_v8 = vor.u32 1.1754944e-38, %v2117_v14  ;;  %v8491_v45 = vor.u32 %v10678_v33, %v8488_v34  ;;  %v10670_v59 = vld [vmem:[#allocation6 + $0x6c] sm:$0xf]  ;;  %v8408_v33 = vld [vmem:[#allocation6 + $0x18] sm:$0xf0] }
 0x254   :  { %v1825_v11 = vmul.f32 %v11210_v23, %v1824_v38  ;;  %v2138_v28 = vsel %vm2135_vm5, %v2137_v25, %v2133_v16  ;;  %vm2116_vm7 = vcmp.eq.f32.partialorder %v2115_v12, 8.507059e+37  ;;  %vm2151_vm8 = vweird.f32 %v11808_v56  ;;  %v8416_v12 = vld [vmem:[#allocation6 + $0x30] sm:$0xf0]  ;;  %v8424_v25 = vld [vmem:[#allocation6 + $0x38] sm:$0xf0] }
 0x255   :  { %v2148_v35 = vmul.f32 %v11808_v56, %v2147_v21  ;;  %v2160_v38 = vmul.f32 %v2138_v28, %v11686_v39  ;;  %v2156_v39 = vand.u32 2147483648, %v11789_v9  ;;  %vm11855_vm10 = vmor %vm2150_vm9, %vm2151_vm8  ;;  %v8467_v53 = vor.u32 %v10673_v46, %v8464_v48 }
 0x256   :  { %v1826_v57 = vadd.f32 %v11210_v23, %v1825_v11  ;;  %v11214_v58 = vpop.eup %11213  ;;  %v8472_v11 = vld [vmem:[#allocation6 + $0x98] sm:$0xf0]  ;;  %vm2155_vm11 = vcmp.eq.f32.partialorder %v2154_v27, 8.507059e+37  ;;  %v8427_v28 = vor.u32 %v10662_v24, %v8424_v25  ;;  %v10672_v27 = vld [vmem:[#allocation6 + $0x74] sm:$0xf0] }
 0x257   :  { %v2107_v63 = vmul.f32 %v11214_v58, %v11796_v32  ;;  %v11216_v7 = vpop.eup %11215  ;;  %vm2112_vm3 = vweird.f32 %v11214_v58  ;;  %v2149_v51 = vadd.f32 %v11808_v56, %v2148_v35  ;;  %v8475_v55 = vor.u32 %v10674_v49, %v8472_v11  ;;  %v8446_v49 = vld [vmem:[#allocation6 + $0x60] sm:$0xf]  ;;  %v10671_v11 = vld [vmem:[#allocation6 + $0x6c] sm:$0xf0]  ;;  %v10741_v25 = vld [vmem:[#allocation8 + $0x1a4] sm:$0xf] }
 0x258   :  { %v1830_v40 = vsel %vm1829_vm15, %v11210_v23, %v1826_v57  ;;  %vm11839_vm6 = vmor %vm2111_vm4, %vm2112_vm3  ;;  %v8499_v23 = vor.u32 %v10681_v15, %v8496_v18  ;;  %v11218_v31 = vpop.eup %11217  ;;  %v10669_v57 = vld [vmem:[#allocation6 + $0x64] sm:$0xf]  ;;  %v2157_v9 = vor.u32 1.1754944e-38, %v2156_v39  ;;  %v10683_v15 = vld [vmem:[#allocation6 + $0xcc] sm:$0xf0]  ;;  %v8403_v35 = vor.u32 %v10657_v29, %v8400_v22 }
 0x259   :  { %v1835_v47 = vsel %vm1832_vm0, %v1834_v61, %v1830_v40  ;;  %v2108_v6 = vsub.f32 1.0, %v2107_v63  ;;  %v2153_v61 = vsel %vm11855_vm10, %v11808_v56, %v2149_v51  ;;  %v8459_v40 = vor.u32 %v10670_v59, %v8456_v60  ;;  %v8502_v18 = vld [vmem:[#allocation6 + $0xc8] sm:$0xf]  ;;  %v10743_v24 = vld [vmem:[#allocation8 + $0x1ac] sm:$0xf0] }
 0x25a   :  { %v1841_v13 = vmul.f32 %v11216_v7, %v1835_v47  ;;  %v10665_v7 = vld [vmem:[#allocation6 + $0x44] sm:$0xf]  ;;  %v2158_v5 = vsel %vm2155_vm11, %v2157_v9, %v2153_v61  ;;  %v8432_v47 = vld [vmem:[#allocation6 + $0x50] sm:$0xf0]  ;;  %v8511_v56 = vor.u32 %v10687_v54, %v8510_v62  ;;  %v8503_v21 = vor.u32 %v10684_v19, %v8502_v18  ;;  %v8454_v51 = vld [vmem:[#allocation6 + $0x68] sm:$0xf] }
 0x25b   :  { %v2109_v0 = vmul.f32 %v11214_v58, %v2108_v6  ;;  %v8440_v6 = vld [vmem:[#allocation6 + $0x58] sm:$0xf0]  ;;  %v8435_v16 = vor.u32 %v10665_v7, %v8432_v47  ;;  %v8447_v39 = vor.u32 %v10671_v11, %v8446_v49  ;;  %v8455_v52 = vor.u32 %v10672_v27, %v8454_v51  ;;  %v8414_v61 = vld [vmem:[#allocation6 + $0x20] sm:$0xf]  ;;  %v10663_v9 = vld [vmem:[#allocation6 + $0x2c] sm:$0xf0] }
 0x25c   :  { %7996 = vst [vmem:[%s12717_s6 + $0x8] sm:$0xff] %v1841_v13  ;;  %v11834_v4 = vpack.c.bf16 %v1841_v13, %v1841_v13  ;;  %v8519_v13 = vor.u32 %v10688_v20, %v8518_v1  ;;  %v8422_v62 = vld [vmem:[#allocation6 + $0x28] sm:$0xf]  ;;  %v10664_v54 = vld [vmem:[#allocation6 + $0x34] sm:$0xf0] }
 0x25d   :  { %v2110_v26 = vadd.f32 %v11214_v58, %v2109_v0  ;;  %v10661_v0 = vld [vmem:[#allocation6 + $0x24] sm:$0xf]  ;;  %v8398_v1 = vld [vmem:[#allocation6] sm:$0xf]  ;;  %v10659_v20 = vld [vmem:[#allocation6 + $0xc] sm:$0xf0] }
 0x25e   :  { %2585 = vmatmul.bf16.vlgmr.msrb.gmra.mxu1 %v11834_v4  ;;  %2611 = vmatmul.bf16.vlgmr.msrb.gmra.mxu3 %v11834_v4  ;;  %v8406_v7 = vld [vmem:[#allocation6 + $0x8] sm:$0xf]  ;;  %v8755_v19 = vld [vmem:[#allocation8 + $0x1d0] sm:$0xf0]  ;;  %v8705_v22 = vld [vmem:[#allocation8 + $0x160] sm:$0xf] }
 0x25f   :  { %2948 = vmatpush.bf16.msrb.mxu1 %v8515_v36  ;;  %2974 = vmatpush.bf16.msrb.mxu3 %v8523_v17  ;;  %v2114_v32 = vsel %vm11839_vm6, %v11214_v58, %v2110_v26  ;;  %v8448_v58 = vld [vmem:[#allocation6 + $0x70] sm:$0xf0]  ;;  %v8494_v36 = vld [vmem:[#allocation6 + $0xc0] sm:$0xf]  ;;  %v8443_v17 = vor.u32 %v10666_v43, %v8440_v6  ;;  %v10751_v6 = vld [vmem:[#allocation8 + $0x1ec] sm:$0xf0] }
 0x260   :  { %v2119_v37 = vsel %vm2116_vm7, %v2118_v8, %v2114_v32  ;;  %v8451_v63 = vor.u32 %v10669_v57, %v8448_v58  ;;  %v8478_v26 = vld [vmem:[#allocation6 + $0xa0] sm:$0xf]  ;;  %v8419_v8 = vor.u32 %v10661_v0, %v8416_v12  ;;  %v10658_v32 = vld [vmem:[#allocation6 + $0xc] sm:$0xf]  ;;  %v8438_v57 = vld [vmem:[#allocation6 + $0x48] sm:$0xf] }
 0x261   :  { %v2161_v42 = vmul.f32 %v11218_v31, %v2119_v37  ;;  %v8479_v34 = vor.u32 %v10679_v2, %v8478_v26  ;;  %v8411_v37 = vor.u32 %v10658_v32, %v8408_v33  ;;  %v10668_v58 = vld [vmem:[#allocation6 + $0x54] sm:$0xf0]  ;;  %v8769_v43 = vld [vmem:[#allocation8 + $0x1e0] sm:$0xf]  ;;  %v10735_v32 = vld [vmem:[#allocation8 + $0x16c] sm:$0xf0] }
 0x262   :  { %v8439_v60 = vor.u32 %v10668_v58, %v8438_v57  ;;  %v8737_v12 = vld [vmem:[#allocation8 + $0x1a0] sm:$0xf]  ;;  %v8706_v33 = vor.u32 %v10735_v32, %v8705_v22  ;;  %v10731_v51 = vld [vmem:[#allocation8 + $0x14c] sm:$0xf0]  ;;  %v10729_v27 = vld [vmem:[#allocation8 + $0x144] sm:$0xf] }
 0x263   :  { %2949 = vmatpush.bf16.msrb.mxu1 %v8499_v23  ;;  %2975 = vmatpush.bf16.msrb.mxu3 %v8507_v41  ;;  %v11848_v3 = vadd.f32 %v2161_v42, %v2160_v38  ;;  %v8486_v23 = vld [vmem:[#allocation6 + $0xa8] sm:$0xf]  ;;  %v10680_v41 = vld [vmem:[#allocation6 + $0xb4] sm:$0xf0]  ;;  %v8462_v38 = vld [vmem:[#allocation6 + $0x80] sm:$0xf] }
 0x264   :  { %v8487_v31 = vor.u32 %v10680_v41, %v8486_v23  ;;  %v10675_v42 = vld [vmem:[#allocation6 + $0x8c] sm:$0xf0]  ;;  %v8721_v2 = vld [vmem:[#allocation8 + $0x180] sm:$0xf]  ;;  %v8723_v41 = vld [vmem:[#allocation8 + $0x190] sm:$0xf0] }
 0x265   :  { %11219 = vtanh.f32 %v11848_v3  ;;  %v8463_v46 = vor.u32 %v10675_v42, %v8462_v38  ;;  %v8641_v38 = vld [vmem:[#allocation8 + $0xe0] sm:$0xf]  ;;  %v10719_v42 = vld [vmem:[#allocation8 + $0xec] sm:$0xf0]  ;;  %v8761_v32 = vld [vmem:[#allocation8 + $0x1c8] sm:$0xf] }
 0x266   :  { %v8689_v49 = vld [vmem:[#allocation8 + $0x140] sm:$0xf]  ;;  %v10715_v58 = vld [vmem:[#allocation8 + $0xcc] sm:$0xf0] }
 0x267   :  { %2950 = vmatpush.bf16.msrb.mxu1 %v8483_v44  ;;  %2976 = vmatpush.bf16.msrb.mxu3 %v8491_v45  ;;  %v8470_v44 = vld [vmem:[#allocation6 + $0x88] sm:$0xf]  ;;  %v10676_v45 = vld [vmem:[#allocation6 + $0x94] sm:$0xf0]  ;;  %v8625_v57 = vld [vmem:[#allocation8 + $0xc0] sm:$0xf] }
 0x268   :  { %v8471_v48 = vor.u32 %v10676_v45, %v8470_v44  ;;  %v10717_v44 = vld [vmem:[#allocation8 + $0xe4] sm:$0xf] }
 0x26b   :  { %2951 = vmatpush.bf16.msrb.mxu1 %v8467_v53  ;;  %2977 = vmatpush.bf16.msrb.mxu3 %v8475_v55  ;;  %v11220_v50 = vpop.eup %11219  ;;  %v8430_v53 = vld [vmem:[#allocation6 + $0x40] sm:$0xf]  ;;  %v10667_v55 = vld [vmem:[#allocation6 + $0x4c] sm:$0xf0] }
 0x26c   :  { %v2164_v10 = vmul.f32 %v11220_v50, %v2158_v5  ;;  %v8431_v59 = vor.u32 %v10667_v55, %v8430_v53  ;;  %v10660_v50 = vld [vmem:[#allocation6 + $0x14] sm:$0xf0]  ;;  %v8399_v5 = vor.u32 %v10659_v20, %v8398_v1  ;;  %v8690_v53 = vor.u32 %v10731_v51, %v8689_v49  ;;  %v8675_v1 = vld [vmem:[#allocation8 + $0x130] sm:$0xf0]  ;;  %v10701_v49 = vld [vmem:[#allocation8 + $0x64] sm:$0xf] }
 0x26d   :  { %v8407_v47 = vor.u32 %v10660_v50, %v8406_v7 }
 0x26e   :  { %2637 = vmatmul.bf16.vlgmr.msra.gmra.mxu1 %v11834_v4  ;;  %2663 = vmatmul.bf16.vlgmr.msra.gmra.mxu3 %v11834_v4  ;;  %v11864_v14 = vpack.c.bf16 %v2164_v10, %v2164_v10  ;;  %v8495_v4 = vor.u32 %v10683_v15, %v8494_v36  ;;  %v10749_v10 = vld [vmem:[#allocation8 + $0x1e4] sm:$0xf]  ;;  %v8753_v15 = vld [vmem:[#allocation8 + $0x1c0] sm:$0xf] }
 0x26f   :  { %2952 = vmatpush.bf16.msrb.mxu1 %v8451_v63  ;;  %2978 = vmatpush.bf16.msrb.mxu3 %v8459_v40  ;;  %v8415_v63 = vor.u32 %v10663_v9, %v8414_v61  ;;  %v8423_v40 = vor.u32 %v10664_v54, %v8422_v62  ;;  %v8627_v61 = vld [vmem:[#allocation8 + $0xd0] sm:$0xf0]  ;;  %v8673_v9 = vld [vmem:[#allocation8 + $0x120] sm:$0xf]  ;;  %v10727_v62 = vld [vmem:[#allocation8 + $0x12c] sm:$0xf0] }
 0x270   :  { %2572 = vmatmul.bf16.vlgmr.msrb.gmra.mxu0 %v11864_v14  ;;  %2598 = vmatmul.bf16.vlgmr.msrb.gmra.mxu2 %v11864_v14 }
 0x271   :  { %2935 = vmatpush.bf16.msrb.mxu0 %v8511_v56  ;;  %2961 = vmatpush.bf16.msrb.mxu2 %v8519_v13  ;;  %v8770_v56 = vor.u32 %v10751_v6, %v8769_v43  ;;  %v8771_v13 = vld [vmem:[#allocation8 + $0x1f0] sm:$0xf0]  ;;  %v10709_v43 = vld [vmem:[#allocation8 + $0xa4] sm:$0xf] }
 0x272   :  { %v8774_v36 = vor.u32 %v10749_v10, %v8771_v13  ;;  %v8657_v13 = vld [vmem:[#allocation8 + $0x100] sm:$0xf] }
 0x273   :  { %2953 = vmatpush.bf16.msrb.mxu1 %v8435_v16  ;;  %2979 = vmatpush.bf16.msrb.mxu3 %v8443_v17  ;;  %v10747_v16 = vld [vmem:[#allocation8 + $0x1cc] sm:$0xf0]  ;;  %v10745_v17 = vld [vmem:[#allocation8 + $0x1c4] sm:$0xf] }
 0x274   :  { %v8754_v18 = vor.u32 %v10747_v16, %v8753_v15  ;;  %v8758_v0 = vor.u32 %v10745_v17, %v8755_v19  ;;  %v10721_v17 = vld [vmem:[#allocation8 + $0x104] sm:$0xf]  ;;  %v8777_v19 = vld [vmem:[#allocation8 + $0x1e8] sm:$0xf] }
 0x275   :  { %2936 = vmatpush.bf16.msrb.mxu0 %v8495_v4  ;;  %2962 = vmatpush.bf16.msrb.mxu2 %v8503_v21  ;;  %v8739_v4 = vld [vmem:[#allocation8 + $0x1b0] sm:$0xf0] }
 0x276   :  { %v8742_v21 = vor.u32 %v10741_v25, %v8739_v4  ;;  %v8779_v25 = vld [vmem:[#allocation8 + $0x1f8] sm:$0xf0] }
 0x277   :  { %2954 = vmatpush.bf16.msrb.mxu1 %v8419_v8  ;;  %2980 = vmatpush.bf16.msrb.mxu3 %v8427_v28  ;;  %v10739_v8 = vld [vmem:[#allocation8 + $0x18c] sm:$0xf0]  ;;  %v10737_v28 = vld [vmem:[#allocation8 + $0x184] sm:$0xf] }
 0x278   :  { %v8722_v23 = vor.u32 %v10739_v8, %v8721_v2  ;;  %v8726_v29 = vor.u32 %v10737_v28, %v8723_v41  ;;  %v8593_v2 = vld [vmem:[#allocation8 + $0x80] sm:$0xf]  ;;  %v10707_v8 = vld [vmem:[#allocation8 + $0x8c] sm:$0xf0]  ;;  %v10705_v28 = vld [vmem:[#allocation8 + $0x84] sm:$0xf] }
 0x279   :  { %2937 = vmatpush.bf16.msrb.mxu0 %v8479_v34  ;;  %2963 = vmatpush.bf16.msrb.mxu2 %v8487_v31  ;;  %v10733_v34 = vld [vmem:[#allocation8 + $0x164] sm:$0xf]  ;;  %v8707_v31 = vld [vmem:[#allocation8 + $0x170] sm:$0xf0]  ;;  %v8594_v41 = vor.u32 %v10707_v8, %v8593_v2  ;;  %v8713_v2 = vld [vmem:[#allocation8 + $0x168] sm:$0xf] }
 0x27a   :  { %v10736_v8 = vld [vmem:[#allocation8 + $0x174] sm:$0xf0] }
 0x27b   :  { %2955 = vmatpush.bf16.msrb.mxu1 %v8403_v35  ;;  %2981 = vmatpush.bf16.msrb.mxu3 %v8411_v37  ;;  %v8710_v37 = vor.u32 %v10733_v34, %v8707_v31 }
 0x27d   :  { %2938 = vmatpush.bf16.msrb.mxu0 %v8463_v46  ;;  %2964 = vmatpush.bf16.msrb.mxu2 %v8471_v48  ;;  %v8642_v46 = vor.u32 %v10719_v42, %v8641_v38  ;;  %v8643_v48 = vld [vmem:[#allocation8 + $0xf0] sm:$0xf0]  ;;  %v10746_v42 = vld [vmem:[#allocation8 + $0x1cc] sm:$0xf] }
 0x27e   :  { %2956 = vmatmul.bf16.vlgmr.msrb.gmra.mxu1 %v11864_v14  ;;  %2982 = vmatmul.bf16.vlgmr.msrb.gmra.mxu3 %v11864_v14  ;;  %v8646_v11 = vor.u32 %v10717_v44, %v8643_v48  ;;  %v8763_v44 = vld [vmem:[#allocation8 + $0x1d8] sm:$0xf0]  ;;  %v10703_v48 = vld [vmem:[#allocation8 + $0x6c] sm:$0xf0] }
 0x27f   :  { %3467 = vmatpush.bf16.msra.mxu1 %v8770_v56  ;;  %3493 = vmatpush.bf16.msra.mxu3 %v8774_v36  ;;  %v8611_v56 = vld [vmem:[#allocation8 + $0xb0] sm:$0xf0]  ;;  %v10723_v36 = vld [vmem:[#allocation8 + $0x10c] sm:$0xf0] }
 0x280   :  { %2624 = vmatmul.bf16.vlgmr.msra.gmra.mxu0 %v11864_v14  ;;  %2650 = vmatmul.bf16.vlgmr.msra.gmra.mxu2 %v11864_v14  ;;  %v8614_v15 = vor.u32 %v10709_v43, %v8611_v56  ;;  %v8658_v16 = vor.u32 %v10723_v36, %v8657_v13  ;;  %v10738_v43 = vld [vmem:[#allocation8 + $0x18c] sm:$0xf] }
 0x281   :  { %2939 = vmatpush.bf16.msrb.mxu0 %v8447_v39  ;;  %2965 = vmatpush.bf16.msrb.mxu2 %v8455_v52  ;;  %v8691_v39 = vld [vmem:[#allocation8 + $0x150] sm:$0xf0]  ;;  %v11881_v52 = vld [vmem:[%s12714_s3] sm:$0xf]  ;;  %v8393_v13 = vld [vmem:[%s12711_s0 + $0x68] sm:$0xff] }
 0x282   :  { %v8694_v55 = vor.u32 %v10729_v27, %v8691_v39  ;;  %v2236_v7 = vperm.slane %v11881_v52, 0  ;;  %v8579_v39 = vld [vmem:[#allocation8 + $0x70] sm:$0xf0] }
 0x283   :  { %3468 = vmatpush.bf16.msra.mxu1 %v8754_v18  ;;  %3494 = vmatpush.bf16.msra.mxu3 %v8758_v0  ;;  %v8659_v18 = vld [vmem:[#allocation8 + $0x110] sm:$0xf0] }
 0x284   :  { %v8662_v0 = vor.u32 %v10721_v17, %v8659_v18  ;;  %v10695_v17 = vld [vmem:[#allocation8 + $0x2c] sm:$0xf0]  ;;  %v10693_v18 = vld [vmem:[#allocation8 + $0x24] sm:$0xf] }
 0x285   :  { %2940 = vmatpush.bf16.msrb.mxu0 %v8431_v59  ;;  %2966 = vmatpush.bf16.msrb.mxu2 %v8439_v60  ;;  %v10713_v59 = vld [vmem:[#allocation8 + $0xc4] sm:$0xf]  ;;  %v8626_v60 = vor.u32 %v10715_v58, %v8625_v57  ;;  %v10744_v57 = vld [vmem:[#allocation8 + $0x1b4] sm:$0xf0]  ;;  %v10742_v58 = vld [vmem:[#allocation8 + $0x1ac] sm:$0xf] }
 0x286   :  { %v8630_v54 = vor.u32 %v10713_v59, %v8627_v61  ;;  %v8747_v61 = vld [vmem:[#allocation8 + $0x1b8] sm:$0xf0] }
 0x287   :  { %3495 = vmatpush.bf16.msra.mxu3 %v8742_v21 }
 0x289   :  { %2941 = vmatpush.bf16.msrb.mxu0 %v8415_v63  ;;  %2967 = vmatpush.bf16.msrb.mxu2 %v8423_v40  ;;  %v8674_v63 = vor.u32 %v10727_v62, %v8673_v9  ;;  %v10725_v40 = vld [vmem:[#allocation8 + $0x124] sm:$0xf]  ;;  %v8750_v62 = vor.u32 %v10742_v58, %v8747_v61  ;;  %v8699_v61 = vld [vmem:[#allocation8 + $0x158] sm:$0xf0] }
 0x28a   :  { %v8678_v50 = vor.u32 %v10725_v40, %v8675_v1 }
 0x28b   :  { %3496 = vmatpush.bf16.msra.mxu3 %v8726_v29  ;;  %v8595_v29 = vld [vmem:[#allocation8 + $0x90] sm:$0xf0] }
 0x28c   :  { %v8598_v22 = vor.u32 %v10705_v28, %v8595_v29  ;;  %v8714_v28 = vor.u32 %v10736_v8, %v8713_v2 }
 0x28d   :  { %2942 = vmatpush.bf16.msrb.mxu0 %v8399_v5  ;;  %2968 = vmatpush.bf16.msrb.mxu2 %v8407_v47  ;;  %v8609_v5 = vld [vmem:[#allocation8 + $0xa0] sm:$0xf]  ;;  %v10711_v47 = vld [vmem:[#allocation8 + $0xac] sm:$0xf0] }
 0x28e   :  { %v8610_v10 = vor.u32 %v10711_v47, %v8609_v5  ;;  %v8729_v5 = vld [vmem:[#allocation8 + $0x188] sm:$0xf]  ;;  %v10740_v47 = vld [vmem:[#allocation8 + $0x194] sm:$0xf0] }
 0x28f   :  { %3497 = vmatpush.bf16.msra.mxu3 %v8710_v37  ;;  %v2237_v37 = vperm.slane %v11881_v52, 1  ;;  %v8730_v36 = vor.u32 %v10740_v47, %v8729_v5 }
 0x290   :  { %2943 = vmatmul.bf16.vlgmr.msrb.gmra.mxu0 %v11864_v14  ;;  %2969 = vmatmul.bf16.vlgmr.msrb.gmra.mxu2 %v11864_v14  ;;  %v8738_v14 = vor.u32 %v10743_v24, %v8737_v12  ;;  %v10752_v12 = vld [vmem:[#allocation8 + $0x1f4] sm:$0xf0]  ;;  %v10750_v24 = vld [vmem:[#allocation8 + $0x1ec] sm:$0xf] }
 0x291   :  { %3454 = vmatpush.bf16.msra.mxu0 %v8642_v46  ;;  %3480 = vmatpush.bf16.msra.mxu2 %v8646_v11  ;;  %v8778_v4 = vor.u32 %v10752_v12, %v8777_v19  ;;  %v8782_v21 = vor.u32 %v10750_v24, %v8779_v25  ;;  %v8577_v46 = vld [vmem:[#allocation8 + $0x60] sm:$0xf]  ;;  %v8547_v24 = vld [vmem:[#allocation8 + $0x30] sm:$0xf0] }
 0x292   :  { %3469 = vmatpush.bf16.msra.mxu1 %v8738_v14  ;;  %v8578_v27 = vor.u32 %v10703_v48, %v8577_v46  ;;  %v2239_v46 = vperm.slane %v11881_v52, 3 }
 0x293   :  { %3498 = vmatpush.bf16.msra.mxu3 %v8694_v55  ;;  %v8745_v55 = vld [vmem:[#allocation8 + $0x1a8] sm:$0xf] }
 0x295   :  { %3455 = vmatpush.bf16.msra.mxu0 %v8626_v60  ;;  %3481 = vmatpush.bf16.msra.mxu2 %v8630_v54  ;;  %v8746_v60 = vor.u32 %v10744_v57, %v8745_v55  ;;  %v8561_v54 = vld [vmem:[#allocation8 + $0x40] sm:$0xf]  ;;  %v8697_v55 = vld [vmem:[#allocation8 + $0x148] sm:$0xf] }
 0x296   :  { %3470 = vmatpush.bf16.msra.mxu1 %v8722_v23 }
 0x297   :  { %3499 = vmatpush.bf16.msra.mxu3 %v8678_v50 }
 0x299   :  { %3456 = vmatpush.bf16.msra.mxu0 %v8610_v10  ;;  %3482 = vmatpush.bf16.msra.mxu2 %v8614_v15  ;;  %v8731_v15 = vld [vmem:[#allocation8 + $0x198] sm:$0xf0] }
 0x29a   :  { %3471 = vmatpush.bf16.msra.mxu1 %v8706_v33  ;;  %v10748_v33 = vld [vmem:[#allocation8 + $0x1d4] sm:$0xf0] }
 0x29b   :  { %3500 = vmatpush.bf16.msra.mxu3 %v8662_v0  ;;  %v8762_v38 = vor.u32 %v10748_v33, %v8761_v32  ;;  %v8529_v32 = vld [vmem:[#allocation8] sm:$0xf] }
 0x29d   :  { %3457 = vmatpush.bf16.msra.mxu0 %v8594_v41  ;;  %3483 = vmatpush.bf16.msra.mxu2 %v8598_v22  ;;  %v8715_v41 = vld [vmem:[#allocation8 + $0x178] sm:$0xf0] }
 0x29e   :  { %3472 = vmatpush.bf16.msra.mxu1 %v8690_v53 }
 0x29f   :  { %3545 = vmatpush.bf16.msrb.mxu3 %v8782_v21  ;;  %v8550_v21 = vor.u32 %v10693_v18, %v8547_v24 }
 0x2a1   :  { %3458 = vmatpush.bf16.msra.mxu0 %v8578_v27  ;;  %v8395_v27 = vld [vmem:[%s12711_s0 + $0x78] sm:$0xff] }
 0x2a2   :  { %3473 = vmatpush.bf16.msra.mxu1 %v8674_v63  ;;  %v10699_v63 = vld [vmem:[#allocation8 + $0x4c] sm:$0xf0] }
 0x2a3   :  { %v8562_v1 = vor.u32 %v10699_v63, %v8561_v54 }
 0x2a5   :  { %3459 = vmatpush.bf16.msra.mxu0 %v8562_v1 }
 0x2a6   :  { %3474 = vmatpush.bf16.msra.mxu1 %v8658_v16  ;;  %v8545_v16 = vld [vmem:[#allocation8 + $0x20] sm:$0xf] }
 0x2a7   :  { %v8546_v12 = vor.u32 %v10695_v17, %v8545_v16 }
 0x2a9   :  { %3460 = vmatpush.bf16.msra.mxu0 %v8546_v12  ;;  %v10712_v12 = vld [vmem:[#allocation8 + $0xb4] sm:$0xf0] }
 0x2aa   :  { %3519 = vmatpush.bf16.msrb.mxu1 %v8778_v4 }
 0x2ae   :  { %3520 = vmatpush.bf16.msrb.mxu1 %v8762_v38 }
 0x2b2   :  { %3521 = vmatpush.bf16.msrb.mxu1 %v8746_v60  ;;  %v10730_v60 = vld [vmem:[#allocation8 + $0x14c] sm:$0xf] }
 0x2b6   :  { %3522 = vmatpush.bf16.msrb.mxu1 %v8730_v36 }
 0x2ba   :  { %3523 = vmatpush.bf16.msrb.mxu1 %v8714_v28 }
 0x2db   :  { %v11874_v26 = vpop.f32.mrf.mxu1 }
 0x2e1   :  { %v11876_v35 = vpop.f32.mrf.mxu3 }
 0x2e3   :  { %v2588_v45 = vpop.f32.mrf.mxu1 }
 0x2e4   :  { %v8766_v45 = vor.u32 %v10746_v42, %v8763_v44  ;;  %v8531_v42 = vld [vmem:[#allocation8 + $0x10] sm:$0xf0]  ;;  %v8649_v44 = vld [vmem:[#allocation8 + $0xe8] sm:$0xf] }
 0x2e6   :  { %3546 = vmatpush.bf16.msrb.mxu3 %v8766_v45 }
 0x2e9   :  { %v2614_v20 = vpop.f32.mrf.mxu3 }
 0x2ea   :  { %v10697_v20 = vld [vmem:[#allocation8 + $0x44] sm:$0xf]  ;;  %3547 = vmatpush.bf16.msrb.mxu3 %v8750_v62  ;;  %v2238_v62 = vperm.slane %v11881_v52, 2 }
 0x2eb   :  { %v11884_v6 = vpop.f32.mrf.mxu1 }
 0x2ed   :  { %v2573_v14 = vpop.f32.mrf.mxu0 }
 0x2ee   :  { %v2574_v23 = vadd.f32 %v2573_v14, %v2236_v7  ;;  %v8563_v7 = vld [vmem:[#allocation8 + $0x50] sm:$0xf0] }
 0x2ef   :  { %v8566_v50 = vor.u32 %v10697_v20, %v8563_v7  ;;  %v8633_v20 = vld [vmem:[#allocation8 + $0xc8] sm:$0xf]  ;;  %v10716_v7 = vld [vmem:[#allocation8 + $0xd4] sm:$0xf0] }
 0x2f0   :  { %v2587_v34 = vadd.f32 %v11874_v26, %v2574_v23  ;;  %v8582_v26 = vor.u32 %v10701_v49, %v8579_v39  ;;  %v10734_v23 = vld [vmem:[#allocation8 + $0x16c] sm:$0xf]  ;;  %v10720_v49 = vld [vmem:[#allocation8 + $0xf4] sm:$0xf0]  ;;  %v8634_v16 = vor.u32 %v10716_v7, %v8633_v20 }
 0x2f1   :  { %v11887_v31 = vpop.f32.mrf.mxu3  ;;  %v8718_v33 = vor.u32 %v10734_v23, %v8715_v41 }
 0x2f2   :  { %v8388_v11 = vmul.f32 -1.442695, %v2587_v34  ;;  %3484 = vmatpush.bf16.msra.mxu2 %v8582_v26  ;;  %v10691_v34 = vld [vmem:[#allocation8 + $0xc] sm:$0xf0]  ;;  %v8651_v26 = vld [vmem:[#allocation8 + $0xf8] sm:$0xf0] }
 0x2f3   :  { %v2640_v51 = vpop.f32.mrf.mxu1  ;;  %v2599_v53 = vpop.f32.mrf.mxu2  ;;  %v8530_v38 = vor.u32 %v10691_v34, %v8529_v32  ;;  %v10722_v34 = vld [vmem:[#allocation8 + $0x10c] sm:$0xf] }
 0x2f4   :  { %11221 = vpow2.f32 %v8388_v11  ;;  %v2600_v59 = vadd.f32 %v2599_v53, %v2237_v37  ;;  %v10689_v37 = vld [vmem:[#allocation8 + $0x4] sm:$0xf]  ;;  %v10718_v11 = vld [vmem:[#allocation8 + $0xec] sm:$0xf]  ;;  %v8650_v53 = vor.u32 %v10720_v49, %v8649_v44 }
 0x2f5   :  { %v2575_v9 = vpop.f32.mrf.mxu0  ;;  %v8534_v48 = vor.u32 %v10689_v37, %v8531_v42  ;;  %3461 = vmatpush.bf16.msra.mxu0 %v8530_v38  ;;  %v8654_v58 = vor.u32 %v10718_v11, %v8651_v26  ;;  %v8392_v38 = vld [vmem:[%s12711_s0 + $0x60] sm:$0xff] }
 0x2f6   :  { %v2613_v40 = vadd.f32 %v11876_v35, %v2600_v59  ;;  %3485 = vmatpush.bf16.msra.mxu2 %v8566_v50  ;;  %v8734_v35 = vor.u32 %v10738_v43, %v8731_v15  ;;  %v10732_v59 = vld [vmem:[#allocation8 + $0x154] sm:$0xf0]  ;;  %v10714_v50 = vld [vmem:[#allocation8 + $0xcc] sm:$0xf]  ;;  %v8702_v43 = vor.u32 %v10730_v60, %v8699_v61 }
 0x2f7   :  { %v8698_v47 = vor.u32 %v10732_v59, %v8697_v55  ;;  %v10728_v15 = vld [vmem:[#allocation8 + $0x134] sm:$0xf0]  ;;  %v8603_v59 = vld [vmem:[#allocation8 + $0x98] sm:$0xf0] }
 0x2f8   :  { %v8389_v10 = vmul.f32 -1.442695, %v2613_v40  ;;  %3548 = vmatpush.bf16.msrb.mxu3 %v8734_v35  ;;  %v10726_v35 = vld [vmem:[#allocation8 + $0x12c] sm:$0xf] }
 0x2f9   :  { %v2666_v56 = vpop.f32.mrf.mxu3  ;;  %3506 = vmatpush.bf16.msrb.mxu0 %v8650_v53  ;;  %3524 = vmatpush.bf16.msrb.mxu1 %v8698_v47  ;;  %v8601_v53 = vld [vmem:[#allocation8 + $0x88] sm:$0xf] }
 0x2fa   :  { %v11222_v19 = vpop.eup %11221  ;;  %11223 = vpow2.f32 %v8389_v10  ;;  %3486 = vmatpush.bf16.msra.mxu2 %v8550_v21  ;;  %v8635_v10 = vld [vmem:[#allocation8 + $0xd8] sm:$0xf0]  ;;  %v8681_v56 = vld [vmem:[#allocation8 + $0x128] sm:$0xf] }
 0x2fb   :  { %v2957_v0 = vpop.f32.mrf.mxu1  ;;  %v11894_v25 = vadd.f32 1.0, %v11222_v19  ;;  %v2601_v4 = vpop.f32.mrf.mxu2  ;;  %v8638_v17 = vor.u32 %v10714_v50, %v8635_v10  ;;  %v8682_v18 = vor.u32 %v10728_v15, %v8681_v56  ;;  %v8683_v19 = vld [vmem:[#allocation8 + $0x138] sm:$0xf0]  ;;  %v8585_v47 = vld [vmem:[#allocation8 + $0x68] sm:$0xf] }
 0x2fc   :  { %v2988_v14 = vadd.f32 %v8393_v13, %v2957_v0  ;;  %3549 = vmatpush.bf16.msrb.mxu3 %v8718_v33  ;;  %v8617_v0 = vld [vmem:[#allocation8 + $0xa8] sm:$0xf]  ;;  %v10710_v4 = vld [vmem:[#allocation8 + $0xac] sm:$0xf]  ;;  %v8619_v21 = vld [vmem:[#allocation8 + $0xb8] sm:$0xf0]  ;;  %v8686_v23 = vor.u32 %v10726_v35, %v8683_v19 }
 0x2fd   :  { %11225 = vrcp.f32 %v11894_v25  ;;  %v2625_v22 = vpop.f32.mrf.mxu0  ;;  %3507 = vmatpush.bf16.msrb.mxu0 %v8634_v16  ;;  %v8618_v41 = vor.u32 %v10712_v12, %v8617_v0  ;;  %3525 = vmatpush.bf16.msrb.mxu1 %v8682_v18  ;;  %v8622_v42 = vor.u32 %v10710_v4, %v8619_v21  ;;  %vm2678_vm14 = vweird.f32 %v11894_v25  ;;  %v8569_v19 = vld [vmem:[#allocation8 + $0x48] sm:$0xf]  ;;  %v10700_v0 = vld [vmem:[#allocation8 + $0x54] sm:$0xf0]  ;;  %v10698_v12 = vld [vmem:[#allocation8 + $0x4c] sm:$0xf] }
 0x2fe   :  { %v8525_v29 = vmul.f32 -1.442695, %v2988_v14  ;;  %3487 = vmatpush.bf16.msra.mxu2 %v8534_v48  ;;  %v2626_v24 = vadd.f32 %v2625_v22, %v2238_v62  ;;  %v10724_v22 = vld [vmem:[#allocation8 + $0x114] sm:$0xf0]  ;;  %v2684_v60 = vand.u32 2147483648, %v11894_v25 }
 0x2ff   :  { %v2682_v62 = vand.u32 2147483647, %v11894_v25  ;;  %v8571_v21 = vld [vmem:[#allocation8 + $0x58] sm:$0xf0] }
 0x300   :  { %v11224_v45 = vpop.eup %11223  ;;  %11227 = vpow2.f32 %v8525_v29  ;;  %3550 = vmatpush.bf16.msrb.mxu3 %v8702_v43  ;;  %v8665_v29 = vld [vmem:[#allocation8 + $0x108] sm:$0xf]  ;;  %v2639_v48 = vadd.f32 %v11884_v6, %v2626_v24  ;;  %v10704_v43 = vld [vmem:[#allocation8 + $0x74] sm:$0xf0]  ;;  %v2685_v56 = vor.u32 1.1754944e-38, %v2684_v60 }
 0x301   :  { %v11898_v51 = vadd.f32 1.0, %v11224_v45  ;;  %v2983_v39 = vpop.f32.mrf.mxu3  ;;  %v8666_v44 = vor.u32 %v10724_v22, %v8665_v29  ;;  %v8667_v45 = vld [vmem:[#allocation8 + $0x118] sm:$0xf0]  ;;  %3508 = vmatpush.bf16.msrb.mxu0 %v8618_v41  ;;  %vm2683_vm3 = vcmp.eq.f32.partialorder %v2682_v62, 8.507059e+37  ;;  %v8586_v16 = vor.u32 %v10704_v43, %v8585_v47  ;;  %v8553_v41 = vld [vmem:[#allocation8 + $0x28] sm:$0xf] }
 0x302   :  { %v2990_v40 = vadd.f32 %v8395_v27, %v2983_v39  ;;  %3532 = vmatpush.bf16.msrb.mxu2 %v8654_v58  ;;  %v8670_v49 = vor.u32 %v10722_v34, %v8667_v45  ;;  %v10706_v58 = vld [vmem:[#allocation8 + $0x8c] sm:$0xf]  ;;  %v10696_v29 = vld [vmem:[#allocation8 + $0x34] sm:$0xf0]  ;;  %v8537_v45 = vld [vmem:[#allocation8 + $0x8] sm:$0xf] }
 0x303   :  { %v2959_v57 = vpop.f32.mrf.mxu1  ;;  %v11903_v9 = vpop.eup %11225  ;;  %11229 = vrcp.f32 %v11898_v51  ;;  %v2703_v11 = vand.u32 2147483648, %v11898_v51  ;;  %v2701_v27 = vand.u32 2147483647, %v11898_v51  ;;  %3526 = vmatpush.bf16.msrb.mxu1 %v8666_v44  ;;  %vm2697_vm15 = vweird.f32 %v11898_v51  ;;  %v10694_v34 = vld [vmem:[#allocation8 + $0x2c] sm:$0xf] }
 0x304   :  { %v2651_v54 = vpop.f32.mrf.mxu2  ;;  %v2674_v63 = vmul.f32 %v11903_v9, %v11894_v25  ;;  %v8526_v14 = vmul.f32 -1.442695, %v2990_v40  ;;  %3551 = vmatpush.bf16.msrb.mxu3 %v8686_v23  ;;  %vm2679_vm12 = vweird.f32 %v11903_v9  ;;  %v10708_v57 = vld [vmem:[#allocation8 + $0x94] sm:$0xf0]  ;;  %v8606_v7 = vor.u32 %v10706_v58, %v8603_v59 }
 0x305   :  { %v2652_v1 = vadd.f32 %v2651_v54, %v2239_v46  ;;  %v2627_v5 = vpop.f32.mrf.mxu0  ;;  %vm11933_vm0 = vmor %vm2678_vm14, %vm2679_vm12  ;;  %v8602_v20 = vor.u32 %v10708_v57, %v8601_v53  ;;  %vm2702_vm2 = vcmp.eq.f32.partialorder %v2701_v27, 8.507059e+37  ;;  %v8574_v23 = vor.u32 %v10698_v12, %v8571_v21  ;;  %v8539_v53 = vld [vmem:[#allocation8 + $0x18] sm:$0xf0] }
 0x306   :  { %v11228_v13 = vpop.eup %11227  ;;  %v2675_v36 = vsub.f32 1.0, %v2674_v63  ;;  %3533 = vmatpush.bf16.msrb.mxu2 %v8638_v17 }
 0x307   :  { %v2665_v52 = vadd.f32 %v11887_v31, %v2652_v1  ;;  %v11912_v8 = vadd.f32 1.0, %v11228_v13  ;;  %v2704_v1 = vor.u32 1.1754944e-38, %v2703_v11  ;;  %3509 = vmatpush.bf16.msrb.mxu0 %v8602_v20 }
 0x308   :  { %v2676_v33 = vmul.f32 %v11903_v9, %v2675_v36  ;;  %3552 = vmatpush.bf16.msrb.mxu3 %v8670_v49  ;;  %v10692_v49 = vld [vmem:[#allocation8 + $0x14] sm:$0xf0] }
 0x309   :  { %v11910_v2 = vpop.eup %11229  ;;  %v8390_v28 = vmul.f32 -1.442695, %v2665_v52  ;;  %v2985_v31 = vpop.f32.mrf.mxu3  ;;  %v10702_v52 = vld [vmem:[#allocation8 + $0x6c] sm:$0xf]  ;;  %v8538_v57 = vor.u32 %v10692_v49, %v8537_v45  ;;  %vm3020_vm9 = vweird.f32 %v11912_v8  ;;  %v10769_v49 = vld [vmem:[#allocation6 + $0x84] sm:$0xf] }
 0x30a   :  { %v2693_v32 = vmul.f32 %v11910_v2, %v11898_v51  ;;  %3534 = vmatpush.bf16.msrb.mxu2 %v8622_v42  ;;  %vm2698_vm13 = vweird.f32 %v11910_v2  ;;  %v2677_v6 = vadd.f32 %v11903_v9, %v2676_v33  ;;  %v8570_v31 = vor.u32 %v10700_v0, %v8569_v19  ;;  %v10778_v19 = vld [vmem:[#allocation6 + $0xcc] sm:$0xf] }
 0x30b   :  { %11231 = vpow2.f32 %v8390_v28  ;;  %vm2699_vm1 = vmor %vm2697_vm15, %vm2698_vm13  ;;  %3510 = vmatpush.bf16.msrb.mxu0 %v8586_v16  ;;  %v8554_v42 = vor.u32 %v10696_v29, %v8553_v41  ;;  %v10773_v29 = vld [vmem:[#allocation6 + $0xa4] sm:$0xf] }
 0x30c   :  { %v2653_v37 = vpop.f32.mrf.mxu2  ;;  %v2694_v46 = vsub.f32 1.0, %v2693_v32  ;;  %11233 = vpow2.f32 %v8526_v14  ;;  %v2681_v50 = vsel %vm11933_vm0, %v11903_v9, %v2677_v6  ;;  %v8587_v9 = vld [vmem:[#allocation8 + $0x78] sm:$0xf0] }
 0x30d   :  { %11235 = vrcp.f32 %v11912_v8  ;;  %v2944_v39 = vpop.f32.mrf.mxu0  ;;  %v2686_v15 = vsel %vm2683_vm3, %v2685_v56, %v2681_v50  ;;  %v8590_v4 = vor.u32 %v10702_v52, %v8587_v9  ;;  %v8555_v37 = vld [vmem:[#allocation8 + $0x38] sm:$0xf0]  ;;  %v10762_v56 = vld [vmem:[#allocation6 + $0x4c] sm:$0xf] }
 0x30e   :  { %v2695_v26 = vmul.f32 %v11910_v2, %v2694_v46  ;;  %v2987_v55 = vadd.f32 %v8392_v38, %v2944_v39  ;;  %11237 = vtanh.f32 %v2639_v48  ;;  %3535 = vmatpush.bf16.msrb.mxu2 %v8606_v7  ;;  %v8558_v48 = vor.u32 %v10694_v34, %v8555_v37  ;;  %v10690_v39 = vld [vmem:[#allocation8 + $0xc] sm:$0xf]  ;;  %v8915_v50 = vld [vmem:[#allocation6 + $0xf8] sm:$0xf0] }
 0x30f   :  { %3511 = vmatpush.bf16.msrb.mxu0 %v8570_v31  ;;  %v8542_v60 = vor.u32 %v10690_v39, %v8539_v53  ;;  %v8883_v34 = vld [vmem:[#allocation6 + $0xb8] sm:$0xf0]  ;;  %v10770_v39 = vld [vmem:[#allocation6 + $0x8c] sm:$0xf] }
 0x310   :  { %v2696_v54 = vadd.f32 %v11910_v2, %v2695_v26  ;;  %v8524_v63 = vmul.f32 -1.442695, %v2987_v55  ;;  %v8394_v26 = vld [vmem:[%s12711_s0 + $0x70] sm:$0xff]  ;;  %v8867_v53 = vld [vmem:[#allocation6 + $0x98] sm:$0xf0] }
 0x311   :  { %v11232_v40 = vpop.eup %11231 }
 0x312   :  { %v11234_v51 = vpop.eup %11233  ;;  %v2700_v5 = vsel %vm2699_vm1, %v11910_v2, %v2696_v54  ;;  %v11945_v25 = vadd.f32 1.0, %v11232_v40  ;;  %11239 = vpow2.f32 %v8524_v63  ;;  %3536 = vmatpush.bf16.msrb.mxu2 %v8590_v4  ;;  %v10781_v40 = vld [vmem:[#allocation6 + $0xe4] sm:$0xf] }
 0x313   :  { %v11947_v10 = vpop.eup %11235  ;;  %v2705_v13 = vsel %vm2702_vm2, %v2704_v1, %v2700_v5  ;;  %v11953_v14 = vadd.f32 1.0, %v11234_v51  ;;  %3512 = vmatpush.bf16.msrb.mxu0 %v8554_v42  ;;  %v8907_v1 = vld [vmem:[#allocation6 + $0xf0] sm:$0xf0]  ;;  %v10782_v51 = vld [vmem:[#allocation6 + $0xec] sm:$0xf] }
 0x314   :  { %11241 = vrcp.f32 %v11945_v25  ;;  %v2970_v36 = vpop.f32.mrf.mxu2  ;;  %v3016_v17 = vmul.f32 %v11947_v10, %v11912_v8  ;;  %v2727_v18 = vmul.f32 %v2705_v13, %v11794_v30  ;;  %v11238_v24 = vpop.eup %11237  ;;  %v2723_v27 = vand.u32 2147483648, %v11945_v25 }
 0x315   :  { %v2946_v35 = vpop.f32.mrf.mxu0  ;;  %v2728_v2 = vmul.f32 %v11238_v24, %v2686_v15  ;;  %11243 = vrcp.f32 %v11953_v14  ;;  %v2721_v55 = vand.u32 2147483647, %v11945_v25  ;;  %vm2717_vm5 = vweird.f32 %v11945_v25  ;;  %v10777_v15 = vld [vmem:[#allocation6 + $0xc4] sm:$0xf]  ;;  %v8899_v24 = vld [vmem:[#allocation6 + $0xd8] sm:$0xf0] }
 0x316   :  { %v3017_v33 = vsub.f32 1.0, %v3016_v17  ;;  %3537 = vmatpush.bf16.msrb.mxu2 %v8574_v23  ;;  %vm3021_vm6 = vweird.f32 %v11947_v10  ;;  %v2989_v62 = vadd.f32 %v8394_v26, %v2970_v36  ;;  %v2724_v63 = vor.u32 1.1754944e-38, %v2723_v27  ;;  %v8859_v27 = vld [vmem:[#allocation6 + $0x90] sm:$0xf0] }
 0x317   :  { %v11955_v22 = vadd.f32 %v2728_v2, %v2727_v18  ;;  %vm2722_vm8 = vcmp.eq.f32.partialorder %v2721_v55, 8.507059e+37  ;;  %3513 = vmatpush.bf16.msrb.mxu0 %v8538_v57  ;;  %vm11981_vm10 = vmor %vm3020_vm9, %vm3021_vm6  ;;  %v3024_v36 = vand.u32 2147483647, %v11912_v8  ;;  %v8910_v9 = vor.u32 %v10781_v40, %v8907_v1  ;;  %v8891_v18 = vld [vmem:[#allocation6 + $0xd0] sm:$0xf0] }
 0x318   :  { %v11240_v28 = vpop.eup %11239  ;;  %v3018_v11 = vmul.f32 %v11947_v10, %v3017_v33  ;;  %v8918_v17 = vor.u32 %v10782_v51, %v8915_v50  ;;  %v8894_v23 = vor.u32 %v10777_v15, %v8891_v18  ;;  %v8902_v41 = vor.u32 %v10778_v19, %v8899_v24  ;;  %v8905_v40 = vld [vmem:[#allocation6 + $0xe0] sm:$0xf]  ;;  %v10783_v1 = vld [vmem:[#allocation6 + $0xec] sm:$0xf0]  ;;  %v8913_v51 = vld [vmem:[#allocation6 + $0xe8] sm:$0xf] }
 0x319   :  { %v11957_v30 = vadd.f32 1.0, %v11240_v28  ;;  %vm3025_vm13 = vcmp.eq.f32.partialorder %v3024_v36, 8.507059e+37  ;;  %vm3040_vm1 = vweird.f32 %v11953_v14  ;;  %v8862_v57 = vor.u32 %v10769_v49, %v8859_v27  ;;  %v10784_v50 = vld [vmem:[#allocation6 + $0xf4] sm:$0xf0]  ;;  %v10779_v15 = vld [vmem:[#allocation6 + $0xcc] sm:$0xf0] }
 0x31a   :  { %v11242_v32 = vpop.eup %11241  ;;  %3538 = vmatpush.bf16.msrb.mxu2 %v8558_v48  ;;  %v3019_v54 = vadd.f32 %v11947_v10, %v3018_v11  ;;  %v8897_v18 = vld [vmem:[#allocation6 + $0xc8] sm:$0xf]  ;;  %v10780_v19 = vld [vmem:[#allocation6 + $0xd4] sm:$0xf0]  ;;  %v10758_v24 = vld [vmem:[#allocation6 + $0x2c] sm:$0xf] }
 0x31b   :  { %v2713_v38 = vmul.f32 %v11242_v32, %v11945_v25  ;;  %11245 = vrcp.f32 %v11957_v30  ;;  %vm2718_vm4 = vweird.f32 %v11242_v32  ;;  %v11969_v58 = vpop.eup %11243  ;;  %v3026_v25 = vand.u32 2147483648, %v11912_v8 }
 0x31c   :  { %v2972_v44 = vpop.f32.mrf.mxu2  ;;  %11247 = vtanh.f32 %v11955_v22  ;;  %vm2719_vm7 = vmor %vm2717_vm5, %vm2718_vm4  ;;  %v3036_v47 = vmul.f32 %v11969_v58, %v11953_v14  ;;  %v3007_v35 = vand.u32 2147483648, %v11957_v30  ;;  %v3023_v16 = vsel %vm11981_vm10, %v11947_v10, %v3019_v54  ;;  %v8851_v54 = vld [vmem:[#allocation6 + $0x78] sm:$0xf0]  ;;  %v10775_v10 = vld [vmem:[#allocation6 + $0xac] sm:$0xf0] }
 0x31d   :  { %v2714_v46 = vsub.f32 1.0, %v2713_v38  ;;  %11249 = vtanh.f32 %v2989_v62  ;;  %v3005_v12 = vand.u32 2147483647, %v11957_v30  ;;  %v3027_v4 = vor.u32 1.1754944e-38, %v3026_v25  ;;  %v10766_v62 = vld [vmem:[#allocation6 + $0x6c] sm:$0xf] }
 0x31e   :  { %3539 = vmatpush.bf16.msrb.mxu2 %v8542_v60  ;;  %v3037_v21 = vsub.f32 1.0, %v3036_v47  ;;  %vm3001_vm12 = vweird.f32 %v11957_v30  ;;  %v3008_v28 = vor.u32 1.1754944e-38, %v3007_v35  ;;  %vm3041_vm0 = vweird.f32 %v11969_v58  ;;  %v10765_v60 = vld [vmem:[#allocation6 + $0x64] sm:$0xf] }
 0x31f   :  { %v2715_v6 = vmul.f32 %v11242_v32, %v2714_v46  ;;  %v3028_v31 = vsel %vm3025_vm13, %v3027_v4, %v3023_v16  ;;  %vm3006_vm15 = vcmp.eq.f32.partialorder %v3005_v12, 8.507059e+37  ;;  %vm12015_vm2 = vmor %vm3040_vm1, %vm3041_vm0  ;;  %v8811_v12 = vld [vmem:[#allocation6 + $0x30] sm:$0xf0]  ;;  %v8819_v4 = vld [vmem:[#allocation6 + $0x38] sm:$0xf0] }
 0x320   :  { %v3038_v38 = vmul.f32 %v11969_v58, %v3037_v21  ;;  %v3050_v44 = vmul.f32 %v3028_v31, %v11848_v3  ;;  %v3046_v3 = vand.u32 2147483648, %v11953_v14  ;;  %v8898_v21 = vor.u32 %v10780_v19, %v8897_v18  ;;  %v9150_v19 = vld [vmem:[#allocation8 + $0x1d0] sm:$0xf0] }
 0x321   :  { %v2716_v59 = vadd.f32 %v11242_v32, %v2715_v6  ;;  %v11246_v61 = vpop.eup %11245  ;;  %v3044_v6 = vand.u32 2147483647, %v11953_v14  ;;  %v8822_v31 = vor.u32 %v10758_v24, %v8819_v4  ;;  %v10839_v24 = vld [vmem:[#allocation8 + $0x1ac] sm:$0xf0]  ;;  %v10837_v4 = vld [vmem:[#allocation8 + $0x1a4] sm:$0xf] }
 0x322   :  { %v2997_v20 = vmul.f32 %v11246_v61, %v11957_v30  ;;  %v11248_v5 = vpop.eup %11247  ;;  %vm3002_vm11 = vweird.f32 %v11246_v61  ;;  %v10774_v30 = vld [vmem:[#allocation6 + $0xac] sm:$0xf]  ;;  %v3039_v26 = vadd.f32 %v11969_v58, %v3038_v38  ;;  %v3047_v14 = vor.u32 1.1754944e-38, %v3046_v3 }
 0x323   :  { %v2720_v7 = vsel %vm2719_vm7, %v11242_v32, %v2716_v59  ;;  %vm11999_vm14 = vmor %vm3001_vm12, %vm3002_vm11  ;;  %v8875_v32 = vld [vmem:[#allocation6 + $0xb0] sm:$0xf0]  ;;  %v11250_v37 = vpop.eup %11249  ;;  %v8886_v48 = vor.u32 %v10774_v30, %v8883_v34  ;;  %v8870_v59 = vor.u32 %v10770_v39, %v8867_v53  ;;  %vm3045_vm3 = vcmp.eq.f32.partialorder %v3044_v6, 8.507059e+37  ;;  %v8803_v30 = vld [vmem:[#allocation6 + $0x18] sm:$0xf0] }
 0x324   :  { %v2725_v43 = vsel %vm2722_vm8, %v2724_v63, %v2720_v7  ;;  %v2998_v13 = vsub.f32 1.0, %v2997_v20  ;;  %v8878_v46 = vor.u32 %v10773_v29, %v8875_v32  ;;  %v3043_v63 = vsel %vm12015_vm2, %v11969_v58, %v3039_v26  ;;  %v10753_v29 = vld [vmem:[#allocation6 + $0x4] sm:$0xf]  ;;  %v8795_v32 = vld [vmem:[#allocation6 + $0x10] sm:$0xf0] }
 0x325   :  { %v2731_v52 = vmul.f32 %v11248_v5, %v2725_v43  ;;  %v8854_v7 = vor.u32 %v10766_v62, %v8851_v54  ;;  %v10761_v5 = vld [vmem:[#allocation6 + $0x44] sm:$0xf]  ;;  %v3048_v47 = vsel %vm3045_vm3, %v3047_v14, %v3043_v63  ;;  %v8827_v43 = vld [vmem:[#allocation6 + $0x50] sm:$0xf0]  ;;  %v8906_v58 = vor.u32 %v10783_v1, %v8905_v40  ;;  %v8841_v39 = vld [vmem:[#allocation6 + $0x60] sm:$0xf] }
 0x326   :  { %v2999_v0 = vmul.f32 %v11246_v61, %v2998_v13  ;;  %v8835_v13 = vld [vmem:[#allocation6 + $0x58] sm:$0xf0]  ;;  %v8830_v16 = vor.u32 %v10761_v5, %v8827_v43  ;;  %v8798_v38 = vor.u32 %v10753_v29, %v8795_v32  ;;  %v10767_v53 = vld [vmem:[#allocation6 + $0x6c] sm:$0xf0]  ;;  %v8849_v26 = vld [vmem:[#allocation6 + $0x68] sm:$0xf] }
 0x327   :  { %8391 = vst [vmem:[%s12717_s6 + $0x10] sm:$0xff] %v2731_v52  ;;  %v11994_v8 = vpack.c.bf16 %v2731_v52, %v2731_v52  ;;  %v8914_v52 = vor.u32 %v10784_v50, %v8913_v51  ;;  %v10768_v6 = vld [vmem:[#allocation6 + $0x74] sm:$0xf0]  ;;  %v8842_v3 = vor.u32 %v10767_v53, %v8841_v39  ;;  %v8809_v63 = vld [vmem:[#allocation6 + $0x20] sm:$0xf] }
 0x328   :  { %v3000_v2 = vadd.f32 %v11246_v61, %v2999_v0  ;;  %v10757_v0 = vld [vmem:[#allocation6 + $0x24] sm:$0xf]  ;;  %v8850_v55 = vor.u32 %v10768_v6, %v8849_v26  ;;  %v10759_v14 = vld [vmem:[#allocation6 + $0x2c] sm:$0xf0]  ;;  %v8817_v40 = vld [vmem:[#allocation6 + $0x28] sm:$0xf] }
 0x329   :  { %3475 = vmatmul.bf16.vlgmr.msra.gmra.mxu1 %v11994_v8  ;;  %3501 = vmatmul.bf16.vlgmr.msra.gmra.mxu3 %v11994_v8  ;;  %v10760_v1 = vld [vmem:[#allocation6 + $0x34] sm:$0xf0]  ;;  %v8793_v51 = vld [vmem:[#allocation6] sm:$0xf]  ;;  %v10755_v50 = vld [vmem:[#allocation6 + $0xc] sm:$0xf0] }
 0x32a   :  { %3838 = vmatpush.bf16.msra.mxu1 %v8910_v9  ;;  %3864 = vmatpush.bf16.msra.mxu3 %v8918_v17  ;;  %v3004_v33 = vsel %vm11999_vm14, %v11246_v61, %v3000_v2  ;;  %v8843_v61 = vld [vmem:[#allocation6 + $0x70] sm:$0xf0]  ;;  %v8889_v9 = vld [vmem:[#allocation6 + $0xc0] sm:$0xf]  ;;  %v8838_v17 = vor.u32 %v10762_v56, %v8835_v13  ;;  %v8801_v5 = vld [vmem:[#allocation6 + $0x8] sm:$0xf] }
 0x32b   :  { %v3009_v42 = vsel %vm3006_vm15, %v3008_v28, %v3004_v33  ;;  %v8846_v20 = vor.u32 %v10765_v60, %v8843_v61  ;;  %v8873_v2 = vld [vmem:[#allocation6 + $0xa0] sm:$0xf]  ;;  %v8814_v28 = vor.u32 %v10757_v0, %v8811_v12  ;;  %v10754_v33 = vld [vmem:[#allocation6 + $0xc] sm:$0xf]  ;;  %v8833_v60 = vld [vmem:[#allocation6 + $0x48] sm:$0xf] }
 0x32c   :  { %v3051_v45 = vmul.f32 %v11250_v37, %v3009_v42  ;;  %v8874_v34 = vor.u32 %v10775_v10, %v8873_v2  ;;  %v8806_v42 = vor.u32 %v10754_v33, %v8803_v30  ;;  %v10764_v61 = vld [vmem:[#allocation6 + $0x54] sm:$0xf0]  ;;  %v9164_v56 = vld [vmem:[#allocation8 + $0x1e0] sm:$0xf]  ;;  %v10847_v13 = vld [vmem:[#allocation8 + $0x1ec] sm:$0xf0] }
 0x32d   :  { %v8834_v54 = vor.u32 %v10764_v61, %v8833_v60  ;;  %v9132_v12 = vld [vmem:[#allocation8 + $0x1a0] sm:$0xf]  ;;  %v10835_v10 = vld [vmem:[#allocation8 + $0x18c] sm:$0xf0]  ;;  %v10825_v6 = vld [vmem:[#allocation8 + $0x144] sm:$0xf] }
 0x32e   :  { %3839 = vmatpush.bf16.msra.mxu1 %v8894_v23  ;;  %3865 = vmatpush.bf16.msra.mxu3 %v8902_v41  ;;  %v12008_v11 = vadd.f32 %v3051_v45, %v3050_v44  ;;  %v8881_v23 = vld [vmem:[#allocation6 + $0xa8] sm:$0xf]  ;;  %v10776_v41 = vld [vmem:[#allocation6 + $0xb4] sm:$0xf0]  ;;  %v8857_v44 = vld [vmem:[#allocation6 + $0x80] sm:$0xf] }
 0x32f   :  { %v8882_v37 = vor.u32 %v10776_v41, %v8881_v23  ;;  %v10771_v45 = vld [vmem:[#allocation6 + $0x8c] sm:$0xf0]  ;;  %v9116_v2 = vld [vmem:[#allocation8 + $0x180] sm:$0xf]  ;;  %v9118_v41 = vld [vmem:[#allocation8 + $0x190] sm:$0xf0] }
 0x330   :  { %11251 = vtanh.f32 %v12008_v11  ;;  %v8858_v49 = vor.u32 %v10771_v45, %v8857_v44  ;;  %v9117_v23 = vor.u32 %v10835_v10, %v9116_v2  ;;  %v9100_v32 = vld [vmem:[#allocation8 + $0x160] sm:$0xf]  ;;  %v10831_v33 = vld [vmem:[#allocation8 + $0x16c] sm:$0xf0] }
 0x331   :  { %v9101_v30 = vor.u32 %v10831_v33, %v9100_v32  ;;  %v9036_v44 = vld [vmem:[#allocation8 + $0xe0] sm:$0xf]  ;;  %v10815_v45 = vld [vmem:[#allocation8 + $0xec] sm:$0xf0]  ;;  %v9156_v33 = vld [vmem:[#allocation8 + $0x1c8] sm:$0xf] }
 0x332   :  { %3840 = vmatpush.bf16.msra.mxu1 %v8878_v46  ;;  %3866 = vmatpush.bf16.msra.mxu3 %v8886_v48  ;;  %v8865_v46 = vld [vmem:[#allocation6 + $0x88] sm:$0xf]  ;;  %v10772_v48 = vld [vmem:[#allocation6 + $0x94] sm:$0xf0]  ;;  %v9084_v39 = vld [vmem:[#allocation8 + $0x140] sm:$0xf] }
 0x333   :  { %v8866_v27 = vor.u32 %v10772_v48, %v8865_v46  ;;  %v9037_v48 = vor.u32 %v10815_v45, %v9036_v44  ;;  %v10827_v26 = vld [vmem:[#allocation8 + $0x14c] sm:$0xf0]  ;;  %v9020_v60 = vld [vmem:[#allocation8 + $0xc0] sm:$0xf]  ;;  %v10842_v45 = vld [vmem:[#allocation8 + $0x1cc] sm:$0xf] }
 0x334   :  { %v10811_v61 = vld [vmem:[#allocation8 + $0xcc] sm:$0xf0]  ;;  %v8988_v2 = vld [vmem:[#allocation8 + $0x80] sm:$0xf] }
 0x335   :  { %v10803_v10 = vld [vmem:[#allocation8 + $0x8c] sm:$0xf0] }
 0x336   :  { %3841 = vmatpush.bf16.msra.mxu1 %v8862_v57  ;;  %3867 = vmatpush.bf16.msra.mxu3 %v8870_v59  ;;  %v11252_v25 = vpop.eup %11251  ;;  %v8825_v57 = vld [vmem:[#allocation6 + $0x40] sm:$0xf]  ;;  %v10763_v59 = vld [vmem:[#allocation6 + $0x4c] sm:$0xf0] }
 0x337   :  { %v3054_v36 = vmul.f32 %v11252_v25, %v3048_v47  ;;  %v8826_v62 = vor.u32 %v10763_v59, %v8825_v57  ;;  %v10756_v25 = vld [vmem:[#allocation6 + $0x14] sm:$0xf0]  ;;  %v8794_v47 = vor.u32 %v10755_v50, %v8793_v51  ;;  %v9085_v57 = vor.u32 %v10827_v26, %v9084_v39  ;;  %v9070_v51 = vld [vmem:[#allocation8 + $0x130] sm:$0xf0]  ;;  %v10797_v39 = vld [vmem:[#allocation8 + $0x64] sm:$0xf] }
 0x338   :  { %v8802_v43 = vor.u32 %v10756_v25, %v8801_v5 }
 0x339   :  { %3527 = vmatmul.bf16.vlgmr.msrb.gmra.mxu1 %v11994_v8  ;;  %3553 = vmatmul.bf16.vlgmr.msrb.gmra.mxu3 %v11994_v8  ;;  %v12024_v35 = vpack.c.bf16 %v3054_v36, %v3054_v36  ;;  %v8890_v8 = vor.u32 %v10779_v15, %v8889_v9  ;;  %v10845_v36 = vld [vmem:[#allocation8 + $0x1e4] sm:$0xf]  ;;  %v9148_v15 = vld [vmem:[#allocation8 + $0x1c0] sm:$0xf] }
 0x33a   :  { %3842 = vmatpush.bf16.msra.mxu1 %v8846_v20  ;;  %3868 = vmatpush.bf16.msra.mxu3 %v8854_v7  ;;  %v8810_v20 = vor.u32 %v10759_v14, %v8809_v63  ;;  %v8818_v7 = vor.u32 %v10760_v1, %v8817_v40  ;;  %v9022_v63 = vld [vmem:[#allocation8 + $0xd0] sm:$0xf0]  ;;  %v9068_v14 = vld [vmem:[#allocation8 + $0x120] sm:$0xf]  ;;  %v10823_v40 = vld [vmem:[#allocation8 + $0x12c] sm:$0xf0] }
 0x33b   :  { %3462 = vmatmul.bf16.vlgmr.msra.gmra.mxu0 %v12024_v35  ;;  %3488 = vmatmul.bf16.vlgmr.msra.gmra.mxu2 %v12024_v35 }
 0x33c   :  { %3825 = vmatpush.bf16.msra.mxu0 %v8906_v58  ;;  %3851 = vmatpush.bf16.msra.mxu2 %v8914_v52  ;;  %v9165_v58 = vor.u32 %v10847_v13, %v9164_v56  ;;  %v9166_v52 = vld [vmem:[#allocation8 + $0x1f0] sm:$0xf0]  ;;  %v10805_v56 = vld [vmem:[#allocation8 + $0xa4] sm:$0xf] }
 0x33d   :  { %v9169_v9 = vor.u32 %v10845_v36, %v9166_v52  ;;  %v9052_v52 = vld [vmem:[#allocation8 + $0x100] sm:$0xf] }
 0x33e   :  { %3843 = vmatpush.bf16.msra.mxu1 %v8830_v16  ;;  %3869 = vmatpush.bf16.msra.mxu3 %v8838_v17  ;;  %v10843_v16 = vld [vmem:[#allocation8 + $0x1cc] sm:$0xf0]  ;;  %v10841_v17 = vld [vmem:[#allocation8 + $0x1c4] sm:$0xf] }
 0x33f   :  { %v9149_v18 = vor.u32 %v10843_v16, %v9148_v15  ;;  %v9153_v0 = vor.u32 %v10841_v17, %v9150_v19  ;;  %v10817_v17 = vld [vmem:[#allocation8 + $0x104] sm:$0xf]  ;;  %v9172_v19 = vld [vmem:[#allocation8 + $0x1e8] sm:$0xf] }
 0x340   :  { %3826 = vmatpush.bf16.msra.mxu0 %v8890_v8  ;;  %3852 = vmatpush.bf16.msra.mxu2 %v8898_v21  ;;  %v9134_v8 = vld [vmem:[#allocation8 + $0x1b0] sm:$0xf0] }
 0x341   :  { %v9137_v21 = vor.u32 %v10837_v4, %v9134_v8  ;;  %v9174_v4 = vld [vmem:[#allocation8 + $0x1f8] sm:$0xf0] }
 0x342   :  { %3844 = vmatpush.bf16.msra.mxu1 %v8814_v28  ;;  %3870 = vmatpush.bf16.msra.mxu3 %v8822_v31  ;;  %v10833_v28 = vld [vmem:[#allocation8 + $0x184] sm:$0xf] }
 0x343   :  { %v9121_v29 = vor.u32 %v10833_v28, %v9118_v41  ;;  %v10801_v28 = vld [vmem:[#allocation8 + $0x84] sm:$0xf]  ;;  %v8989_v41 = vor.u32 %v10803_v10, %v8988_v2  ;;  %v9108_v2 = vld [vmem:[#allocation8 + $0x168] sm:$0xf]  ;;  %v10832_v10 = vld [vmem:[#allocation8 + $0x174] sm:$0xf0] }
 0x344   :  { %3827 = vmatpush.bf16.msra.mxu0 %v8874_v34  ;;  %3853 = vmatpush.bf16.msra.mxu2 %v8882_v37  ;;  %v10829_v34 = vld [vmem:[#allocation8 + $0x164] sm:$0xf]  ;;  %v9102_v37 = vld [vmem:[#allocation8 + $0x170] sm:$0xf0] }
 0x346   :  { %3845 = vmatpush.bf16.msra.mxu1 %v8798_v38  ;;  %3871 = vmatpush.bf16.msra.mxu3 %v8806_v42  ;;  %v9105_v38 = vor.u32 %v10829_v34, %v9102_v37 }
 0x348   :  { %3828 = vmatpush.bf16.msra.mxu0 %v8858_v49  ;;  %3854 = vmatpush.bf16.msra.mxu2 %v8866_v27  ;;  %v10813_v49 = vld [vmem:[#allocation8 + $0xe4] sm:$0xf]  ;;  %v9038_v27 = vld [vmem:[#allocation8 + $0xf0] sm:$0xf0] }
 0x349   :  { %3846 = vmatmul.bf16.vlgmr.msra.gmra.mxu1 %v12024_v35  ;;  %3872 = vmatmul.bf16.vlgmr.msra.gmra.mxu3 %v12024_v35  ;;  %v9041_v53 = vor.u32 %v10813_v49, %v9038_v27  ;;  %v8972_v49 = vld [vmem:[#allocation8 + $0x60] sm:$0xf]  ;;  %v10799_v27 = vld [vmem:[#allocation8 + $0x6c] sm:$0xf0] }
 0x34a   :  { %4357 = vmatpush.bf16.msrb.mxu1 %v9165_v58  ;;  %4383 = vmatpush.bf16.msrb.mxu3 %v9169_v9  ;;  %v9006_v58 = vld [vmem:[#allocation8 + $0xb0] sm:$0xf0]  ;;  %v10819_v9 = vld [vmem:[#allocation8 + $0x10c] sm:$0xf0] }
 0x34b   :  { %3514 = vmatmul.bf16.vlgmr.msrb.gmra.mxu0 %v12024_v35  ;;  %3540 = vmatmul.bf16.vlgmr.msrb.gmra.mxu2 %v12024_v35  ;;  %v9009_v15 = vor.u32 %v10805_v56, %v9006_v58  ;;  %v9053_v16 = vor.u32 %v10819_v9, %v9052_v52  ;;  %v10834_v56 = vld [vmem:[#allocation8 + $0x18c] sm:$0xf] }
 0x34c   :  { %3829 = vmatpush.bf16.msra.mxu0 %v8842_v3  ;;  %3855 = vmatpush.bf16.msra.mxu2 %v8850_v55  ;;  %v9086_v3 = vld [vmem:[#allocation8 + $0x150] sm:$0xf0]  ;;  %v12041_v55 = vld [vmem:[%s12714_s3] sm:$0xf]  ;;  %v8788_v52 = vld [vmem:[%s12711_s0 + $0x88] sm:$0xff] }
 0x34d   :  { %v9089_v59 = vor.u32 %v10825_v6, %v9086_v3  ;;  %v3126_v5 = vperm.slane %v12041_v55, 0  ;;  %v8973_v6 = vor.u32 %v10799_v27, %v8972_v49  ;;  %v8974_v3 = vld [vmem:[#allocation8 + $0x70] sm:$0xf0]  ;;  %v3129_v49 = vperm.slane %v12041_v55, 3 }
 0x34e   :  { %4358 = vmatpush.bf16.msrb.mxu1 %v9149_v18  ;;  %4384 = vmatpush.bf16.msrb.mxu3 %v9153_v0  ;;  %v9054_v18 = vld [vmem:[#allocation8 + $0x110] sm:$0xf0] }
 0x34f   :  { %v9057_v0 = vor.u32 %v10817_v17, %v9054_v18  ;;  %v10791_v17 = vld [vmem:[#allocation8 + $0x2c] sm:$0xf0]  ;;  %v10789_v18 = vld [vmem:[#allocation8 + $0x24] sm:$0xf] }
 0x350   :  { %3830 = vmatpush.bf16.msra.mxu0 %v8826_v62  ;;  %3856 = vmatpush.bf16.msra.mxu2 %v8834_v54  ;;  %v10809_v62 = vld [vmem:[#allocation8 + $0xc4] sm:$0xf]  ;;  %v9021_v54 = vor.u32 %v10811_v61, %v9020_v60  ;;  %v10840_v60 = vld [vmem:[#allocation8 + $0x1b4] sm:$0xf0]  ;;  %v10838_v61 = vld [vmem:[#allocation8 + $0x1ac] sm:$0xf] }
 0x351   :  { %v9025_v1 = vor.u32 %v10809_v62, %v9022_v63  ;;  %v9142_v63 = vld [vmem:[#allocation8 + $0x1b8] sm:$0xf0] }
 0x352   :  { %4385 = vmatpush.bf16.msrb.mxu3 %v9137_v21 }
 0x354   :  { %3831 = vmatpush.bf16.msra.mxu0 %v8810_v20  ;;  %3857 = vmatpush.bf16.msra.mxu2 %v8818_v7  ;;  %v9069_v20 = vor.u32 %v10823_v40, %v9068_v14  ;;  %v10821_v7 = vld [vmem:[#allocation8 + $0x124] sm:$0xf]  ;;  %v9145_v40 = vor.u32 %v10838_v61, %v9142_v63  ;;  %v9094_v63 = vld [vmem:[#allocation8 + $0x158] sm:$0xf0] }
 0x355   :  { %v9073_v25 = vor.u32 %v10821_v7, %v9070_v51 }
 0x356   :  { %4386 = vmatpush.bf16.msrb.mxu3 %v9121_v29  ;;  %v8990_v29 = vld [vmem:[#allocation8 + $0x90] sm:$0xf0] }
 0x357   :  { %v8993_v32 = vor.u32 %v10801_v28, %v8990_v29  ;;  %v9109_v28 = vor.u32 %v10832_v10, %v9108_v2 }
 0x358   :  { %3832 = vmatpush.bf16.msra.mxu0 %v8794_v47  ;;  %3858 = vmatpush.bf16.msra.mxu2 %v8802_v43  ;;  %v9004_v47 = vld [vmem:[#allocation8 + $0xa0] sm:$0xf]  ;;  %v10807_v43 = vld [vmem:[#allocation8 + $0xac] sm:$0xf0] }
 0x359   :  { %v9005_v36 = vor.u32 %v10807_v43, %v9004_v47  ;;  %v9124_v47 = vld [vmem:[#allocation8 + $0x188] sm:$0xf]  ;;  %v10836_v43 = vld [vmem:[#allocation8 + $0x194] sm:$0xf0] }
 0x35a   :  { %4387 = vmatpush.bf16.msrb.mxu3 %v9105_v38  ;;  %v3127_v38 = vperm.slane %v12041_v55, 1  ;;  %v9125_v9 = vor.u32 %v10836_v43, %v9124_v47 }
 0x35b   :  { %3833 = vmatmul.bf16.vlgmr.msra.gmra.mxu0 %v12024_v35  ;;  %3859 = vmatmul.bf16.vlgmr.msra.gmra.mxu2 %v12024_v35  ;;  %v9133_v35 = vor.u32 %v10839_v24, %v9132_v12  ;;  %v10848_v12 = vld [vmem:[#allocation8 + $0x1f4] sm:$0xf0]  ;;  %v10846_v24 = vld [vmem:[#allocation8 + $0x1ec] sm:$0xf] }
 0x35c   :  { %4344 = vmatpush.bf16.msrb.mxu0 %v9037_v48  ;;  %4370 = vmatpush.bf16.msrb.mxu2 %v9041_v53  ;;  %v9173_v8 = vor.u32 %v10848_v12, %v9172_v19  ;;  %v9177_v21 = vor.u32 %v10846_v24, %v9174_v4  ;;  %v8942_v24 = vld [vmem:[#allocation8 + $0x30] sm:$0xf0] }
 0x35d   :  { %4359 = vmatpush.bf16.msrb.mxu1 %v9133_v35 }
 0x35e   :  { %4388 = vmatpush.bf16.msrb.mxu3 %v9089_v59  ;;  %v9140_v59 = vld [vmem:[#allocation8 + $0x1a8] sm:$0xf] }
 0x360   :  { %4345 = vmatpush.bf16.msrb.mxu0 %v9021_v54  ;;  %4371 = vmatpush.bf16.msrb.mxu2 %v9025_v1  ;;  %v9141_v54 = vor.u32 %v10840_v60, %v9140_v59  ;;  %v8956_v1 = vld [vmem:[#allocation8 + $0x40] sm:$0xf]  ;;  %v9092_v59 = vld [vmem:[#allocation8 + $0x148] sm:$0xf] }
 0x361   :  { %4360 = vmatpush.bf16.msrb.mxu1 %v9117_v23 }
 0x362   :  { %4389 = vmatpush.bf16.msrb.mxu3 %v9073_v25 }
 0x364   :  { %4346 = vmatpush.bf16.msrb.mxu0 %v9005_v36  ;;  %4372 = vmatpush.bf16.msrb.mxu2 %v9009_v15  ;;  %v9126_v15 = vld [vmem:[#allocation8 + $0x198] sm:$0xf0] }
 0x365   :  { %4361 = vmatpush.bf16.msrb.mxu1 %v9101_v30  ;;  %v10844_v30 = vld [vmem:[#allocation8 + $0x1d4] sm:$0xf0] }
 0x366   :  { %4390 = vmatpush.bf16.msrb.mxu3 %v9057_v0  ;;  %v9157_v44 = vor.u32 %v10844_v30, %v9156_v33  ;;  %v8924_v33 = vld [vmem:[#allocation8] sm:$0xf] }
 0x368   :  { %4347 = vmatpush.bf16.msrb.mxu0 %v8989_v41  ;;  %4373 = vmatpush.bf16.msrb.mxu2 %v8993_v32  ;;  %v9110_v41 = vld [vmem:[#allocation8 + $0x178] sm:$0xf0] }
 0x369   :  { %4362 = vmatpush.bf16.msrb.mxu1 %v9085_v57 }
 0x36a   :  { %4435 = vmatpush.bf16.msra.mxu3 %v9177_v21  ;;  %v8945_v21 = vor.u32 %v10789_v18, %v8942_v24 }
 0x36c   :  { %4348 = vmatpush.bf16.msrb.mxu0 %v8973_v6  ;;  %v8790_v6 = vld [vmem:[%s12711_s0 + $0x98] sm:$0xff] }
 0x36d   :  { %4363 = vmatpush.bf16.msrb.mxu1 %v9069_v20  ;;  %v10795_v20 = vld [vmem:[#allocation8 + $0x4c] sm:$0xf0] }
 0x36e   :  { %v8957_v51 = vor.u32 %v10795_v20, %v8956_v1 }
 0x370   :  { %4349 = vmatpush.bf16.msrb.mxu0 %v8957_v51 }
 0x371   :  { %4364 = vmatpush.bf16.msrb.mxu1 %v9053_v16  ;;  %v8940_v16 = vld [vmem:[#allocation8 + $0x20] sm:$0xf] }
 0x372   :  { %v8941_v12 = vor.u32 %v10791_v17, %v8940_v16 }
 0x374   :  { %4350 = vmatpush.bf16.msrb.mxu0 %v8941_v12  ;;  %v10808_v12 = vld [vmem:[#allocation8 + $0xb4] sm:$0xf0] }
 0x375   :  { %4409 = vmatpush.bf16.msra.mxu1 %v9173_v8 }
 0x379   :  { %4410 = vmatpush.bf16.msra.mxu1 %v9157_v44 }
 0x37d   :  { %4411 = vmatpush.bf16.msra.mxu1 %v9141_v54  ;;  %v10826_v54 = vld [vmem:[#allocation8 + $0x14c] sm:$0xf] }
 0x381   :  { %4412 = vmatpush.bf16.msra.mxu1 %v9125_v9 }
 0x385   :  { %4413 = vmatpush.bf16.msra.mxu1 %v9109_v28 }
 0x3a6   :  { %v12034_v31 = vpop.f32.mrf.mxu1 }
 0x3ac   :  { %v12036_v42 = vpop.f32.mrf.mxu3 }
 0x3ae   :  { %v3478_v46 = vpop.f32.mrf.mxu1 }
 0x3af   :  { %v9158_v46 = vld [vmem:[#allocation8 + $0x1d8] sm:$0xf0] }
 0x3b0   :  { %v9161_v48 = vor.u32 %v10842_v45, %v9158_v46  ;;  %v8926_v45 = vld [vmem:[#allocation8 + $0x10] sm:$0xf0]  ;;  %v9044_v46 = vld [vmem:[#allocation8 + $0xe8] sm:$0xf] }
 0x3b2   :  { %4436 = vmatpush.bf16.msra.mxu3 %v9161_v48 }
 0x3b4   :  { %v3504_v50 = vpop.f32.mrf.mxu3 }
 0x3b5   :  { %v10793_v50 = vld [vmem:[#allocation8 + $0x44] sm:$0xf] }
 0x3b6   :  { %v12044_v13 = vpop.f32.mrf.mxu1  ;;  %4437 = vmatpush.bf16.msra.mxu3 %v9145_v40  ;;  %v3128_v40 = vperm.slane %v12041_v55, 2 }
 0x3b8   :  { %v3463_v35 = vpop.f32.mrf.mxu0 }
 0x3b9   :  { %v3464_v23 = vadd.f32 %v3463_v35, %v3126_v5  ;;  %v8958_v5 = vld [vmem:[#allocation8 + $0x50] sm:$0xf0] }
 0x3ba   :  { %v8961_v25 = vor.u32 %v10793_v50, %v8958_v5  ;;  %v9028_v50 = vld [vmem:[#allocation8 + $0xc8] sm:$0xf]  ;;  %v10812_v5 = vld [vmem:[#allocation8 + $0xd4] sm:$0xf0] }
 0x3bb   :  { %v3477_v34 = vadd.f32 %v12034_v31, %v3464_v23  ;;  %v8977_v31 = vor.u32 %v10797_v39, %v8974_v3  ;;  %v10830_v23 = vld [vmem:[#allocation8 + $0x16c] sm:$0xf]  ;;  %v10816_v39 = vld [vmem:[#allocation8 + $0xf4] sm:$0xf0]  ;;  %v9029_v16 = vor.u32 %v10812_v5, %v9028_v50 }
 0x3bc   :  { %v12047_v37 = vpop.f32.mrf.mxu3  ;;  %v9113_v30 = vor.u32 %v10830_v23, %v9110_v41 }
 0x3bd   :  { %v8783_v53 = vmul.f32 -1.442695, %v3477_v34  ;;  %4374 = vmatpush.bf16.msrb.mxu2 %v8977_v31  ;;  %v10787_v34 = vld [vmem:[#allocation8 + $0xc] sm:$0xf0]  ;;  %v9046_v31 = vld [vmem:[#allocation8 + $0xf8] sm:$0xf0] }
 0x3be   :  { %v3530_v26 = vpop.f32.mrf.mxu1  ;;  %v3489_v57 = vpop.f32.mrf.mxu2  ;;  %v8925_v44 = vor.u32 %v10787_v34, %v8924_v33  ;;  %v10818_v34 = vld [vmem:[#allocation8 + $0x10c] sm:$0xf] }
 0x3bf   :  { %11253 = vpow2.f32 %v8783_v53  ;;  %v3490_v62 = vadd.f32 %v3489_v57, %v3127_v38  ;;  %v10785_v38 = vld [vmem:[#allocation8 + $0x4] sm:$0xf]  ;;  %v10814_v53 = vld [vmem:[#allocation8 + $0xec] sm:$0xf]  ;;  %v9045_v57 = vor.u32 %v10816_v39, %v9044_v46 }
 0x3c0   :  { %v3465_v14 = vpop.f32.mrf.mxu0  ;;  %v8929_v27 = vor.u32 %v10785_v38, %v8926_v45  ;;  %4351 = vmatpush.bf16.msrb.mxu0 %v8925_v44  ;;  %v9049_v61 = vor.u32 %v10814_v53, %v9046_v31  ;;  %v8787_v44 = vld [vmem:[%s12711_s0 + $0x80] sm:$0xff] }
 0x3c1   :  { %v3503_v7 = vadd.f32 %v12036_v42, %v3490_v62  ;;  %4375 = vmatpush.bf16.msrb.mxu2 %v8961_v25  ;;  %v9129_v42 = vor.u32 %v10834_v56, %v9126_v15  ;;  %v10828_v62 = vld [vmem:[#allocation8 + $0x154] sm:$0xf0]  ;;  %v10810_v25 = vld [vmem:[#allocation8 + $0xcc] sm:$0xf]  ;;  %v9097_v56 = vor.u32 %v10826_v54, %v9094_v63 }
 0x3c2   :  { %v9093_v43 = vor.u32 %v10828_v62, %v9092_v59  ;;  %v10824_v15 = vld [vmem:[#allocation8 + $0x134] sm:$0xf0]  ;;  %v8998_v62 = vld [vmem:[#allocation8 + $0x98] sm:$0xf0] }
 0x3c3   :  { %v8784_v36 = vmul.f32 -1.442695, %v3503_v7  ;;  %4438 = vmatpush.bf16.msra.mxu3 %v9129_v42  ;;  %v10822_v42 = vld [vmem:[#allocation8 + $0x12c] sm:$0xf] }
 0x3c4   :  { %v3556_v58 = vpop.f32.mrf.mxu3  ;;  %4396 = vmatpush.bf16.msra.mxu0 %v9045_v57  ;;  %4414 = vmatpush.bf16.msra.mxu1 %v9093_v43  ;;  %v8996_v57 = vld [vmem:[#allocation8 + $0x88] sm:$0xf] }
 0x3c5   :  { %v11254_v19 = vpop.eup %11253  ;;  %11255 = vpow2.f32 %v8784_v36  ;;  %4376 = vmatpush.bf16.msrb.mxu2 %v8945_v21  ;;  %v9030_v36 = vld [vmem:[#allocation8 + $0xd8] sm:$0xf0]  ;;  %v9076_v58 = vld [vmem:[#allocation8 + $0x128] sm:$0xf] }
 0x3c6   :  { %v3847_v0 = vpop.f32.mrf.mxu1  ;;  %v12054_v4 = vadd.f32 1.0, %v11254_v19  ;;  %v3491_v8 = vpop.f32.mrf.mxu2  ;;  %v9033_v17 = vor.u32 %v10810_v25, %v9030_v36  ;;  %v9077_v18 = vor.u32 %v10824_v15, %v9076_v58  ;;  %v9078_v19 = vld [vmem:[#allocation8 + $0x138] sm:$0xf0]  ;;  %v8980_v43 = vld [vmem:[#allocation8 + $0x68] sm:$0xf] }
 0x3c7   :  { %v3878_v35 = vadd.f32 %v8788_v52, %v3847_v0  ;;  %4439 = vmatpush.bf16.msra.mxu3 %v9113_v30  ;;  %v9012_v0 = vld [vmem:[#allocation8 + $0xa8] sm:$0xf]  ;;  %v10806_v8 = vld [vmem:[#allocation8 + $0xac] sm:$0xf]  ;;  %v9014_v21 = vld [vmem:[#allocation8 + $0xb8] sm:$0xf0]  ;;  %v9081_v23 = vor.u32 %v10822_v42, %v9078_v19 }
 0x3c8   :  { %11257 = vrcp.f32 %v12054_v4  ;;  %v3515_v32 = vpop.f32.mrf.mxu0  ;;  %4397 = vmatpush.bf16.msra.mxu0 %v9029_v16  ;;  %v9013_v41 = vor.u32 %v10808_v12, %v9012_v0  ;;  %4415 = vmatpush.bf16.msra.mxu1 %v9077_v18  ;;  %v9017_v45 = vor.u32 %v10806_v8, %v9014_v21  ;;  %vm3568_vm6 = vweird.f32 %v12054_v4  ;;  %v8964_v19 = vld [vmem:[#allocation8 + $0x48] sm:$0xf]  ;;  %v10796_v0 = vld [vmem:[#allocation8 + $0x54] sm:$0xf0]  ;;  %v10794_v12 = vld [vmem:[#allocation8 + $0x4c] sm:$0xf] }
 0x3c9   :  { %v8920_v29 = vmul.f32 -1.442695, %v3878_v35  ;;  %4377 = vmatpush.bf16.msrb.mxu2 %v8929_v27  ;;  %v3516_v24 = vadd.f32 %v3515_v32, %v3128_v40  ;;  %v10820_v32 = vld [vmem:[#allocation8 + $0x114] sm:$0xf0]  ;;  %v3574_v54 = vand.u32 2147483648, %v12054_v4 }
 0x3ca   :  { %v3572_v40 = vand.u32 2147483647, %v12054_v4  ;;  %v8966_v21 = vld [vmem:[#allocation8 + $0x58] sm:$0xf0] }
 0x3cb   :  { %v11256_v48 = vpop.eup %11255  ;;  %11259 = vpow2.f32 %v8920_v29  ;;  %4440 = vmatpush.bf16.msra.mxu3 %v9097_v56  ;;  %v9060_v29 = vld [vmem:[#allocation8 + $0x108] sm:$0xf]  ;;  %v3529_v27 = vadd.f32 %v12044_v13, %v3516_v24  ;;  %v10800_v56 = vld [vmem:[#allocation8 + $0x74] sm:$0xf0]  ;;  %v3575_v58 = vor.u32 1.1754944e-38, %v3574_v54 }
 0x3cc   :  { %v12058_v26 = vadd.f32 1.0, %v11256_v48  ;;  %v3873_v3 = vpop.f32.mrf.mxu3  ;;  %v9061_v46 = vor.u32 %v10820_v32, %v9060_v29  ;;  %v9062_v48 = vld [vmem:[#allocation8 + $0x118] sm:$0xf0]  ;;  %4398 = vmatpush.bf16.msra.mxu0 %v9013_v41  ;;  %vm3573_vm11 = vcmp.eq.f32.partialorder %v3572_v40, 8.507059e+37  ;;  %v8981_v16 = vor.u32 %v10800_v56, %v8980_v43  ;;  %v8948_v41 = vld [vmem:[#allocation8 + $0x28] sm:$0xf] }
 0x3cd   :  { %v3880_v7 = vadd.f32 %v8790_v6, %v3873_v3  ;;  %4422 = vmatpush.bf16.msra.mxu2 %v9049_v61  ;;  %v9065_v39 = vor.u32 %v10818_v34, %v9062_v48  ;;  %v10802_v61 = vld [vmem:[#allocation8 + $0x8c] sm:$0xf]  ;;  %v10792_v29 = vld [vmem:[#allocation8 + $0x34] sm:$0xf0]  ;;  %v8932_v48 = vld [vmem:[#allocation8 + $0x8] sm:$0xf] }
 0x3ce   :  { %v3849_v60 = vpop.f32.mrf.mxu1  ;;  %v12063_v14 = vpop.eup %11257  ;;  %11261 = vrcp.f32 %v12058_v26  ;;  %v3593_v53 = vand.u32 2147483648, %v12058_v26  ;;  %v3591_v6 = vand.u32 2147483647, %v12058_v26  ;;  %4416 = vmatpush.bf16.msra.mxu1 %v9061_v46  ;;  %vm3587_vm7 = vweird.f32 %v12058_v26  ;;  %v10790_v34 = vld [vmem:[#allocation8 + $0x2c] sm:$0xf] }
 0x3cf   :  { %v3541_v1 = vpop.f32.mrf.mxu2  ;;  %v3564_v20 = vmul.f32 %v12063_v14, %v12054_v4  ;;  %v8921_v35 = vmul.f32 -1.442695, %v3880_v7  ;;  %4441 = vmatpush.bf16.msra.mxu3 %v9081_v23  ;;  %vm3569_vm4 = vweird.f32 %v12063_v14  ;;  %v10804_v60 = vld [vmem:[#allocation8 + $0x94] sm:$0xf0]  ;;  %v9001_v5 = vor.u32 %v10802_v61, %v8998_v62  ;;  %v9238_v40 = vld [vmem:[#allocation6 + $0x70] sm:$0xf0] }
 0x3d0   :  { %v3542_v51 = vadd.f32 %v3541_v1, %v3129_v49  ;;  %v3517_v47 = vpop.f32.mrf.mxu0  ;;  %vm12093_vm8 = vmor %vm3568_vm6, %vm3569_vm4  ;;  %v8997_v50 = vor.u32 %v10804_v60, %v8996_v57  ;;  %vm3592_vm10 = vcmp.eq.f32.partialorder %v3591_v6, 8.507059e+37  ;;  %v8969_v23 = vor.u32 %v10794_v12, %v8966_v21  ;;  %v8934_v57 = vld [vmem:[#allocation8 + $0x18] sm:$0xf0] }
 0x3d1   :  { %v11260_v52 = vpop.eup %11259  ;;  %v3565_v9 = vsub.f32 1.0, %v3564_v20  ;;  %4423 = vmatpush.bf16.msra.mxu2 %v9033_v17 }
 0x3d2   :  { %v3555_v55 = vadd.f32 %v12047_v37, %v3542_v51  ;;  %v12072_v10 = vadd.f32 1.0, %v11260_v52  ;;  %v3594_v51 = vor.u32 1.1754944e-38, %v3593_v53  ;;  %4399 = vmatpush.bf16.msra.mxu0 %v8997_v50  ;;  %v9302_v50 = vld [vmem:[#allocation6 + $0xf0] sm:$0xf0] }
 0x3d3   :  { %v3566_v30 = vmul.f32 %v12063_v14, %v3565_v9  ;;  %4442 = vmatpush.bf16.msra.mxu3 %v9065_v39  ;;  %v10788_v39 = vld [vmem:[#allocation8 + $0x14] sm:$0xf0] }
 0x3d4   :  { %v12070_v2 = vpop.eup %11261  ;;  %v8785_v28 = vmul.f32 -1.442695, %v3555_v55  ;;  %v3875_v37 = vpop.f32.mrf.mxu3  ;;  %v10798_v55 = vld [vmem:[#allocation8 + $0x6c] sm:$0xf]  ;;  %v8933_v60 = vor.u32 %v10788_v39, %v8932_v48  ;;  %vm3910_vm1 = vweird.f32 %v12072_v10  ;;  %v3916_v43 = vand.u32 2147483648, %v12072_v10 }
 0x3d5   :  { %v3583_v33 = vmul.f32 %v12070_v2, %v12058_v26  ;;  %4424 = vmatpush.bf16.msra.mxu2 %v9017_v45  ;;  %vm3588_vm5 = vweird.f32 %v12070_v2  ;;  %v3567_v13 = vadd.f32 %v12063_v14, %v3566_v30  ;;  %v8965_v37 = vor.u32 %v10796_v0, %v8964_v19  ;;  %v9286_v19 = vld [vmem:[#allocation6 + $0xd0] sm:$0xf0]  ;;  %v10874_v0 = vld [vmem:[#allocation6 + $0xcc] sm:$0xf] }
 0x3d6   :  { %11263 = vpow2.f32 %v8785_v28  ;;  %vm3589_vm9 = vmor %vm3587_vm7, %vm3588_vm5  ;;  %4400 = vmatpush.bf16.msra.mxu0 %v8981_v16  ;;  %v8949_v45 = vor.u32 %v10792_v29, %v8948_v41  ;;  %v3917_v21 = vor.u32 1.1754944e-38, %v3916_v43 }
 0x3d7   :  { %v3543_v38 = vpop.f32.mrf.mxu2  ;;  %v3584_v49 = vsub.f32 1.0, %v3583_v33  ;;  %11265 = vpow2.f32 %v8921_v35  ;;  %v3571_v25 = vsel %vm12093_vm8, %v12063_v14, %v3567_v13  ;;  %v8982_v14 = vld [vmem:[#allocation8 + $0x78] sm:$0xf0]  ;;  %v8789_v13 = vld [vmem:[%s12711_s0 + $0x90] sm:$0xff] }
 0x3d8   :  { %11267 = vrcp.f32 %v12072_v10  ;;  %v3834_v3 = vpop.f32.mrf.mxu0  ;;  %v3576_v15 = vsel %vm3573_vm11, %v3575_v58, %v3571_v25  ;;  %v8985_v8 = vor.u32 %v10798_v55, %v8982_v14  ;;  %v8950_v38 = vld [vmem:[#allocation8 + $0x38] sm:$0xf0]  ;;  %v10878_v25 = vld [vmem:[#allocation6 + $0xec] sm:$0xf]  ;;  %v3914_v55 = vand.u32 2147483647, %v12072_v10 }
 0x3d9   :  { %v3585_v31 = vmul.f32 %v12070_v2, %v3584_v49  ;;  %v3877_v59 = vadd.f32 %v8787_v44, %v3834_v3  ;;  %11269 = vtanh.f32 %v3529_v27  ;;  %4425 = vmatpush.bf16.msra.mxu2 %v9001_v5  ;;  %v8953_v27 = vor.u32 %v10790_v34, %v8950_v38  ;;  %v10786_v3 = vld [vmem:[#allocation8 + $0xc] sm:$0xf]  ;;  %v9278_v38 = vld [vmem:[#allocation6 + $0xb8] sm:$0xf0] }
 0x3da   :  { %4401 = vmatpush.bf16.msra.mxu0 %v8965_v37  ;;  %v8937_v54 = vor.u32 %v10786_v3, %v8934_v57  ;;  %vm3915_vm5 = vcmp.eq.f32.partialorder %v3914_v55, 8.507059e+37  ;;  %v10870_v34 = vld [vmem:[#allocation6 + $0xac] sm:$0xf]  ;;  %v9254_v3 = vld [vmem:[#allocation6 + $0x90] sm:$0xf0] }
 0x3db   :  { %v3586_v1 = vadd.f32 %v12070_v2, %v3585_v31  ;;  %v8919_v20 = vmul.f32 -1.442695, %v3877_v59  ;;  %v9281_v39 = vor.u32 %v10870_v34, %v9278_v38  ;;  %v10866_v57 = vld [vmem:[#allocation6 + $0x8c] sm:$0xf]  ;;  %v9198_v34 = vld [vmem:[#allocation6 + $0x18] sm:$0xf0] }
 0x3dc   :  { %v11264_v7 = vpop.eup %11263 }
 0x3dd   :  { %v11266_v26 = vpop.eup %11265  ;;  %v3590_v47 = vsel %vm3589_vm9, %v12070_v2, %v3586_v1  ;;  %v12105_v4 = vadd.f32 1.0, %v11264_v7  ;;  %11271 = vpow2.f32 %v8919_v20  ;;  %4426 = vmatpush.bf16.msra.mxu2 %v8985_v8  ;;  %v9294_v8 = vld [vmem:[#allocation6 + $0xd8] sm:$0xf0] }
 0x3de   :  { %v12107_v36 = vpop.eup %11267  ;;  %v3595_v52 = vsel %vm3592_vm10, %v3594_v51, %v3590_v47  ;;  %v12113_v35 = vadd.f32 1.0, %v11266_v26  ;;  %4402 = vmatpush.bf16.msra.mxu0 %v8949_v45  ;;  %v10877_v51 = vld [vmem:[#allocation6 + $0xe4] sm:$0xf]  ;;  %v9310_v47 = vld [vmem:[#allocation6 + $0xf8] sm:$0xf0]  ;;  %v9297_v29 = vor.u32 %v10874_v0, %v9294_v8 }
 0x3df   :  { %11273 = vrcp.f32 %v12105_v4  ;;  %v3860_v9 = vpop.f32.mrf.mxu2  ;;  %v3906_v17 = vmul.f32 %v12107_v36, %v12072_v10  ;;  %v3617_v18 = vmul.f32 %v3595_v52, %v11955_v22  ;;  %v11270_v24 = vpop.eup %11269  ;;  %v3613_v6 = vand.u32 2147483648, %v12105_v4  ;;  %v10858_v52 = vld [vmem:[#allocation6 + $0x4c] sm:$0xf]  ;;  %v10876_v0 = vld [vmem:[#allocation6 + $0xd4] sm:$0xf0] }
 0x3e0   :  { %v3836_v42 = vpop.f32.mrf.mxu0  ;;  %v3618_v2 = vmul.f32 %v11270_v24, %v3576_v15  ;;  %11275 = vrcp.f32 %v12113_v35  ;;  %v3611_v59 = vand.u32 2147483647, %v12105_v4  ;;  %vm3607_vm13 = vweird.f32 %v12105_v4  ;;  %v10854_v8 = vld [vmem:[#allocation6 + $0x2c] sm:$0xf] }
 0x3e1   :  { %v3907_v30 = vsub.f32 1.0, %v3906_v17  ;;  %4427 = vmatpush.bf16.msra.mxu2 %v8969_v23  ;;  %vm3911_vm14 = vweird.f32 %v12107_v36  ;;  %v3614_v1 = vor.u32 1.1754944e-38, %v3613_v6  ;;  %v3879_v20 = vadd.f32 %v8789_v13, %v3860_v9  ;;  %v10873_v42 = vld [vmem:[#allocation6 + $0xc4] sm:$0xf] }
 0x3e2   :  { %v12115_v32 = vadd.f32 %v3618_v2, %v3617_v18  ;;  %vm3612_vm0 = vcmp.eq.f32.partialorder %v3611_v59, 8.507059e+37  ;;  %4403 = vmatpush.bf16.msra.mxu0 %v8933_v60  ;;  %vm12147_vm2 = vmor %vm3910_vm1, %vm3911_vm14  ;;  %v9305_v15 = vor.u32 %v10877_v51, %v9302_v50  ;;  %v9313_v18 = vor.u32 %v10878_v25, %v9310_v47  ;;  %v9300_v51 = vld [vmem:[#allocation6 + $0xe0] sm:$0xf]  ;;  %v10879_v50 = vld [vmem:[#allocation6 + $0xec] sm:$0xf0] }
 0x3e3   :  { %v11272_v28 = vpop.eup %11271  ;;  %v3908_v53 = vmul.f32 %v12107_v36, %v3907_v30  ;;  %v9289_v41 = vor.u32 %v10873_v42, %v9286_v19  ;;  %v9270_v30 = vld [vmem:[#allocation6 + $0xb0] sm:$0xf0]  ;;  %vm3930_vm9 = vweird.f32 %v12113_v35  ;;  %v3934_v59 = vand.u32 2147483647, %v12113_v35  ;;  %v9308_v25 = vld [vmem:[#allocation6 + $0xe8] sm:$0xf] }
 0x3e4   :  { %v12117_v22 = vadd.f32 1.0, %v11272_v28  ;;  %v10880_v47 = vld [vmem:[#allocation6 + $0xf4] sm:$0xf0]  ;;  %v10875_v42 = vld [vmem:[#allocation6 + $0xcc] sm:$0xf0] }
 0x3e5   :  { %v11274_v33 = vpop.eup %11273  ;;  %4428 = vmatpush.bf16.msra.mxu2 %v8953_v27  ;;  %v3909_v7 = vadd.f32 %v12107_v36, %v3908_v53  ;;  %v10865_v53 = vld [vmem:[#allocation6 + $0x84] sm:$0xf]  ;;  %vm3935_vm11 = vcmp.eq.f32.partialorder %v3934_v59, 8.507059e+37  ;;  %v9292_v19 = vld [vmem:[#allocation6 + $0xc8] sm:$0xf] }
 0x3e6   :  { %v3603_v44 = vmul.f32 %v11274_v33, %v12105_v4  ;;  %11277 = vrcp.f32 %v12117_v22  ;;  %vm3608_vm12 = vweird.f32 %v11274_v33  ;;  %v12129_v61 = vpop.eup %11275  ;;  %v3897_v16 = vand.u32 2147483648, %v12117_v22  ;;  %v10864_v59 = vld [vmem:[#allocation6 + $0x74] sm:$0xf0] }
 0x3e7   :  { %v3862_v46 = vpop.f32.mrf.mxu2  ;;  %11279 = vtanh.f32 %v12115_v32  ;;  %vm12133_vm15 = vmor %vm3607_vm13, %vm3608_vm12  ;;  %v3926_v56 = vmul.f32 %v12129_v61, %v12113_v35  ;;  %v3913_v17 = vsel %vm12147_vm2, %v12107_v36, %v3909_v7  ;;  %v3895_v24 = vand.u32 2147483647, %v12117_v22  ;;  %v10871_v36 = vld [vmem:[#allocation6 + $0xac] sm:$0xf0] }
 0x3e8   :  { %v3604_v49 = vsub.f32 1.0, %v3603_v44  ;;  %11281 = vtanh.f32 %v3879_v20  ;;  %vm3891_vm4 = vweird.f32 %v12117_v22  ;;  %v3898_v37 = vor.u32 1.1754944e-38, %v3897_v16  ;;  %v9246_v20 = vld [vmem:[#allocation6 + $0x78] sm:$0xf0] }
 0x3e9   :  { %4429 = vmatpush.bf16.msra.mxu2 %v8937_v54  ;;  %v3927_v2 = vsub.f32 1.0, %v3926_v56  ;;  %v3918_v23 = vsel %vm3915_vm5, %v3917_v21, %v3913_v17  ;;  %vm3896_vm7 = vcmp.eq.f32.partialorder %v3895_v24, 8.507059e+37  ;;  %vm3931_vm8 = vweird.f32 %v12129_v61  ;;  %v9206_v24 = vld [vmem:[#allocation6 + $0x30] sm:$0xf0]  ;;  %v9214_v21 = vld [vmem:[#allocation6 + $0x38] sm:$0xf0] }
 0x3ea   :  { %v3605_v31 = vmul.f32 %v11274_v33, %v3604_v49  ;;  %v3940_v48 = vmul.f32 %v3918_v23, %v12008_v11  ;;  %v3936_v11 = vand.u32 2147483648, %v12113_v35  ;;  %vm12181_vm10 = vmor %vm3930_vm9, %vm3931_vm8  ;;  %v9217_v23 = vor.u32 %v10854_v8, %v9214_v21  ;;  %v10935_v8 = vld [vmem:[#allocation8 + $0x1ac] sm:$0xf0]  ;;  %v10933_v21 = vld [vmem:[#allocation8 + $0x1a4] sm:$0xf] }
 0x3eb   :  { %v3928_v45 = vmul.f32 %v12129_v61, %v3927_v2  ;;  %v9293_v2 = vor.u32 %v10876_v0, %v9292_v19  ;;  %v9545_v0 = vld [vmem:[#allocation8 + $0x1d0] sm:$0xf0] }
 0x3ec   :  { %v3606_v62 = vadd.f32 %v11274_v33, %v3605_v31  ;;  %v11278_v63 = vpop.eup %11277  ;;  %v9262_v31 = vld [vmem:[#allocation6 + $0x98] sm:$0xf0]  ;;  %v3937_v35 = vor.u32 1.1754944e-38, %v3936_v11 }
 0x3ed   :  { %v3887_v5 = vmul.f32 %v11278_v63, %v12117_v22  ;;  %v11280_v4 = vpop.eup %11279  ;;  %vm3892_vm3 = vweird.f32 %v11278_v63  ;;  %v3929_v13 = vadd.f32 %v12129_v61, %v3928_v45  ;;  %v9265_v54 = vor.u32 %v10866_v57, %v9262_v31  ;;  %v9236_v57 = vld [vmem:[#allocation6 + $0x60] sm:$0xf]  ;;  %v10863_v31 = vld [vmem:[#allocation6 + $0x6c] sm:$0xf0] }
 0x3ee   :  { %v3610_v26 = vsel %vm12133_vm15, %v11274_v33, %v3606_v62  ;;  %vm12165_vm6 = vmor %vm3891_vm4, %vm3892_vm3  ;;  %v10869_v33 = vld [vmem:[#allocation6 + $0xa4] sm:$0xf]  ;;  %v11282_v44 = vpop.eup %11281  ;;  %v9257_v62 = vor.u32 %v10865_v53, %v9254_v3  ;;  %v9237_v11 = vor.u32 %v10863_v31, %v9236_v57  ;;  %v9479_v57 = vld [vmem:[#allocation8 + $0x140] sm:$0xf] }
 0x3ef   :  { %v3615_v58 = vsel %vm3612_vm0, %v3614_v1, %v3610_v26  ;;  %v3888_v9 = vsub.f32 1.0, %v3887_v5  ;;  %v9273_v27 = vor.u32 %v10869_v33, %v9270_v30  ;;  %v10862_v1 = vld [vmem:[#allocation6 + $0x6c] sm:$0xf]  ;;  %v3933_v7 = vsel %vm12181_vm10, %v12129_v61, %v3929_v13  ;;  %v10849_v33 = vld [vmem:[#allocation6 + $0x4] sm:$0xf] }
 0x3f0   :  { %v3621_v14 = vmul.f32 %v11280_v4, %v3615_v58  ;;  %v9249_v26 = vor.u32 %v10862_v1, %v9246_v20  ;;  %v10857_v4 = vld [vmem:[#allocation6 + $0x44] sm:$0xf]  ;;  %v3938_v56 = vsel %vm3935_vm11, %v3937_v35, %v3933_v7  ;;  %v9222_v58 = vld [vmem:[#allocation6 + $0x50] sm:$0xf0]  ;;  %v9301_v61 = vor.u32 %v10879_v50, %v9300_v51  ;;  %v9244_v13 = vld [vmem:[#allocation6 + $0x68] sm:$0xf] }
 0x3f1   :  { %v3889_v12 = vmul.f32 %v11278_v63, %v3888_v9  ;;  %v9230_v9 = vld [vmem:[#allocation6 + $0x58] sm:$0xf0]  ;;  %v9225_v17 = vor.u32 %v10857_v4, %v9222_v58  ;;  %v9190_v30 = vld [vmem:[#allocation6 + $0x10] sm:$0xf0]  ;;  %v9245_v60 = vor.u32 %v10864_v59, %v9244_v13  ;;  %v9204_v7 = vld [vmem:[#allocation6 + $0x20] sm:$0xf] }
 0x3f2   :  { %8786 = vst [vmem:[%s12717_s6 + $0x18] sm:$0xff] %v3621_v14  ;;  %v12160_v10 = vpack.c.bf16 %v3621_v14, %v3621_v14  ;;  %v9309_v14 = vor.u32 %v10880_v47, %v9308_v25  ;;  %v9193_v45 = vor.u32 %v10849_v33, %v9190_v30  ;;  %v10855_v35 = vld [vmem:[#allocation6 + $0x2c] sm:$0xf0]  ;;  %v9212_v51 = vld [vmem:[#allocation6 + $0x28] sm:$0xf] }
 0x3f3   :  { %v3890_v28 = vadd.f32 %v11278_v63, %v3889_v12  ;;  %v10853_v12 = vld [vmem:[#allocation6 + $0x24] sm:$0xf]  ;;  %v10856_v50 = vld [vmem:[#allocation6 + $0x34] sm:$0xf0]  ;;  %v9188_v25 = vld [vmem:[#allocation6] sm:$0xf] }
 0x3f4   :  { %4365 = vmatmul.bf16.vlgmr.msrb.gmra.mxu1 %v12160_v10  ;;  %4391 = vmatmul.bf16.vlgmr.msrb.gmra.mxu3 %v12160_v10  ;;  %v10851_v47 = vld [vmem:[#allocation6 + $0xc] sm:$0xf0]  ;;  %v9196_v4 = vld [vmem:[#allocation6 + $0x8] sm:$0xf]  ;;  %v9495_v30 = vld [vmem:[#allocation8 + $0x160] sm:$0xf] }
 0x3f5   :  { %4728 = vmatpush.bf16.msrb.mxu1 %v9305_v15  ;;  %4754 = vmatpush.bf16.msrb.mxu3 %v9313_v18  ;;  %v3894_v22 = vsel %vm12165_vm6, %v11278_v63, %v3890_v28  ;;  %v10861_v63 = vld [vmem:[#allocation6 + $0x64] sm:$0xf]  ;;  %v9284_v15 = vld [vmem:[#allocation6 + $0xc0] sm:$0xf]  ;;  %v9233_v18 = vor.u32 %v10858_v52, %v9230_v9  ;;  %v10943_v9 = vld [vmem:[#allocation8 + $0x1ec] sm:$0xf0] }
 0x3f6   :  { %v3899_v46 = vsel %vm3896_vm7, %v3898_v37, %v3894_v22  ;;  %v9241_v5 = vor.u32 %v10861_v63, %v9238_v40  ;;  %v9268_v28 = vld [vmem:[#allocation6 + $0xa0] sm:$0xf]  ;;  %v9209_v37 = vor.u32 %v10853_v12, %v9206_v24  ;;  %v10850_v22 = vld [vmem:[#allocation6 + $0xc] sm:$0xf]  ;;  %v9228_v63 = vld [vmem:[#allocation6 + $0x48] sm:$0xf] }
 0x3f7   :  { %v3941_v49 = vmul.f32 %v11282_v44, %v3899_v46  ;;  %v9269_v38 = vor.u32 %v10871_v36, %v9268_v28  ;;  %v9201_v46 = vor.u32 %v10850_v22, %v9198_v34  ;;  %v10860_v40 = vld [vmem:[#allocation6 + $0x54] sm:$0xf0]  ;;  %v9559_v52 = vld [vmem:[#allocation8 + $0x1e0] sm:$0xf]  ;;  %v10931_v36 = vld [vmem:[#allocation8 + $0x18c] sm:$0xf0] }
 0x3f8   :  { %v9229_v20 = vor.u32 %v10860_v40, %v9228_v63  ;;  %v9527_v24 = vld [vmem:[#allocation8 + $0x1a0] sm:$0xf]  ;;  %v10927_v22 = vld [vmem:[#allocation8 + $0x16c] sm:$0xf0]  ;;  %v10921_v59 = vld [vmem:[#allocation8 + $0x144] sm:$0xf] }
 0x3f9   :  { %4729 = vmatpush.bf16.msrb.mxu1 %v9289_v41  ;;  %4755 = vmatpush.bf16.msrb.mxu3 %v9297_v29  ;;  %v12174_v6 = vadd.f32 %v3941_v49, %v3940_v48  ;;  %v9276_v41 = vld [vmem:[#allocation6 + $0xa8] sm:$0xf]  ;;  %v10872_v29 = vld [vmem:[#allocation6 + $0xb4] sm:$0xf0]  ;;  %v9252_v48 = vld [vmem:[#allocation6 + $0x80] sm:$0xf]  ;;  %v9496_v34 = vor.u32 %v10927_v22, %v9495_v30 }
 0x3fa   :  { %v9277_v44 = vor.u32 %v10872_v29, %v9276_v41  ;;  %v10867_v49 = vld [vmem:[#allocation6 + $0x8c] sm:$0xf0]  ;;  %v9511_v28 = vld [vmem:[#allocation8 + $0x180] sm:$0xf]  ;;  %v9513_v29 = vld [vmem:[#allocation8 + $0x190] sm:$0xf0] }
 0x3fb   :  { %11283 = vtanh.f32 %v12174_v6  ;;  %v9253_v53 = vor.u32 %v10867_v49, %v9252_v48  ;;  %v9512_v41 = vor.u32 %v10931_v36, %v9511_v28  ;;  %v9431_v48 = vld [vmem:[#allocation8 + $0xe0] sm:$0xf]  ;;  %v10911_v49 = vld [vmem:[#allocation8 + $0xec] sm:$0xf0]  ;;  %v9551_v22 = vld [vmem:[#allocation8 + $0x1c8] sm:$0xf] }
 0x3fc   :  { %v10923_v13 = vld [vmem:[#allocation8 + $0x14c] sm:$0xf0]  ;;  %v9415_v63 = vld [vmem:[#allocation8 + $0xc0] sm:$0xf] }
 0x3fd   :  { %4730 = vmatpush.bf16.msrb.mxu1 %v9273_v27  ;;  %4756 = vmatpush.bf16.msrb.mxu3 %v9281_v39  ;;  %v9260_v27 = vld [vmem:[#allocation6 + $0x88] sm:$0xf]  ;;  %v10868_v39 = vld [vmem:[#allocation6 + $0x94] sm:$0xf0]  ;;  %v10907_v40 = vld [vmem:[#allocation8 + $0xcc] sm:$0xf0] }
 0x3fe   :  { %v9261_v3 = vor.u32 %v10868_v39, %v9260_v27  ;;  %v9432_v39 = vor.u32 %v10911_v49, %v9431_v48  ;;  %v9383_v28 = vld [vmem:[#allocation8 + $0x80] sm:$0xf]  ;;  %v10899_v36 = vld [vmem:[#allocation8 + $0x8c] sm:$0xf0]  ;;  %v10938_v49 = vld [vmem:[#allocation8 + $0x1cc] sm:$0xf] }
 0x401   :  { %4731 = vmatpush.bf16.msrb.mxu1 %v9257_v62  ;;  %4757 = vmatpush.bf16.msrb.mxu3 %v9265_v54  ;;  %v11284_v43 = vpop.eup %11283  ;;  %v9220_v62 = vld [vmem:[#allocation6 + $0x40] sm:$0xf]  ;;  %v10859_v54 = vld [vmem:[#allocation6 + $0x4c] sm:$0xf0] }
 0x402   :  { %v3944_v55 = vmul.f32 %v11284_v43, %v3938_v56  ;;  %v9221_v1 = vor.u32 %v10859_v54, %v9220_v62  ;;  %v10852_v43 = vld [vmem:[#allocation6 + $0x14] sm:$0xf0]  ;;  %v9189_v56 = vor.u32 %v10851_v47, %v9188_v25  ;;  %v9480_v62 = vor.u32 %v10923_v13, %v9479_v57  ;;  %v9465_v25 = vld [vmem:[#allocation8 + $0x130] sm:$0xf0]  ;;  %v10893_v57 = vld [vmem:[#allocation8 + $0x64] sm:$0xf] }
 0x403   :  { %v9197_v58 = vor.u32 %v10852_v43, %v9196_v4 }
 0x404   :  { %4417 = vmatmul.bf16.vlgmr.msra.gmra.mxu1 %v12160_v10  ;;  %4443 = vmatmul.bf16.vlgmr.msra.gmra.mxu3 %v12160_v10  ;;  %v12190_v16 = vpack.c.bf16 %v3944_v55, %v3944_v55  ;;  %v9285_v10 = vor.u32 %v10875_v42, %v9284_v15  ;;  %v10941_v55 = vld [vmem:[#allocation8 + $0x1e4] sm:$0xf]  ;;  %v9543_v42 = vld [vmem:[#allocation8 + $0x1c0] sm:$0xf] }
 0x405   :  { %4732 = vmatpush.bf16.msrb.mxu1 %v9241_v5  ;;  %4758 = vmatpush.bf16.msrb.mxu3 %v9249_v26  ;;  %v9205_v5 = vor.u32 %v10855_v35, %v9204_v7  ;;  %v9213_v26 = vor.u32 %v10856_v50, %v9212_v51  ;;  %v9417_v7 = vld [vmem:[#allocation8 + $0xd0] sm:$0xf0]  ;;  %v9463_v35 = vld [vmem:[#allocation8 + $0x120] sm:$0xf]  ;;  %v10919_v51 = vld [vmem:[#allocation8 + $0x12c] sm:$0xf0] }
 0x406   :  { %4352 = vmatmul.bf16.vlgmr.msrb.gmra.mxu0 %v12190_v16  ;;  %4378 = vmatmul.bf16.vlgmr.msrb.gmra.mxu2 %v12190_v16 }
 0x407   :  { %4715 = vmatpush.bf16.msrb.mxu0 %v9301_v61  ;;  %4741 = vmatpush.bf16.msrb.mxu2 %v9309_v14  ;;  %v9560_v61 = vor.u32 %v10943_v9, %v9559_v52  ;;  %v9561_v14 = vld [vmem:[#allocation8 + $0x1f0] sm:$0xf0]  ;;  %v10901_v52 = vld [vmem:[#allocation8 + $0xa4] sm:$0xf] }
 0x408   :  { %v9564_v15 = vor.u32 %v10941_v55, %v9561_v14  ;;  %v9447_v14 = vld [vmem:[#allocation8 + $0x100] sm:$0xf] }
 0x409   :  { %4733 = vmatpush.bf16.msrb.mxu1 %v9225_v17  ;;  %4759 = vmatpush.bf16.msrb.mxu3 %v9233_v18  ;;  %v10939_v17 = vld [vmem:[#allocation8 + $0x1cc] sm:$0xf0]  ;;  %v10937_v18 = vld [vmem:[#allocation8 + $0x1c4] sm:$0xf] }
 0x40a   :  { %v9544_v19 = vor.u32 %v10939_v17, %v9543_v42  ;;  %v9548_v12 = vor.u32 %v10937_v18, %v9545_v0  ;;  %v10913_v18 = vld [vmem:[#allocation8 + $0x104] sm:$0xf]  ;;  %v9567_v0 = vld [vmem:[#allocation8 + $0x1e8] sm:$0xf] }
 0x40b   :  { %4716 = vmatpush.bf16.msrb.mxu0 %v9285_v10  ;;  %4742 = vmatpush.bf16.msrb.mxu2 %v9293_v2  ;;  %v9529_v10 = vld [vmem:[#allocation8 + $0x1b0] sm:$0xf0] }
 0x40c   :  { %v9532_v2 = vor.u32 %v10933_v21, %v9529_v10  ;;  %v9569_v21 = vld [vmem:[#allocation8 + $0x1f8] sm:$0xf0] }
 0x40d   :  { %4734 = vmatpush.bf16.msrb.mxu1 %v9209_v37  ;;  %4760 = vmatpush.bf16.msrb.mxu3 %v9217_v23  ;;  %v10929_v37 = vld [vmem:[#allocation8 + $0x184] sm:$0xf] }
 0x40e   :  { %v9516_v33 = vor.u32 %v10929_v37, %v9513_v29  ;;  %v10897_v37 = vld [vmem:[#allocation8 + $0x84] sm:$0xf]  ;;  %v9384_v29 = vor.u32 %v10899_v36, %v9383_v28  ;;  %v9503_v28 = vld [vmem:[#allocation8 + $0x168] sm:$0xf]  ;;  %v10928_v36 = vld [vmem:[#allocation8 + $0x174] sm:$0xf0] }
 0x40f   :  { %4717 = vmatpush.bf16.msrb.mxu0 %v9269_v38  ;;  %4743 = vmatpush.bf16.msrb.mxu2 %v9277_v44  ;;  %v10925_v38 = vld [vmem:[#allocation8 + $0x164] sm:$0xf]  ;;  %v9497_v44 = vld [vmem:[#allocation8 + $0x170] sm:$0xf0] }
 0x411   :  { %4735 = vmatpush.bf16.msrb.mxu1 %v9193_v45  ;;  %4761 = vmatpush.bf16.msrb.mxu3 %v9201_v46  ;;  %v9500_v45 = vor.u32 %v10925_v38, %v9497_v44 }
 0x413   :  { %4718 = vmatpush.bf16.msrb.mxu0 %v9253_v53  ;;  %4744 = vmatpush.bf16.msrb.mxu2 %v9261_v3  ;;  %v10909_v53 = vld [vmem:[#allocation8 + $0xe4] sm:$0xf]  ;;  %v9433_v3 = vld [vmem:[#allocation8 + $0xf0] sm:$0xf0] }
 0x414   :  { %4736 = vmatmul.bf16.vlgmr.msrb.gmra.mxu1 %v12190_v16  ;;  %4762 = vmatmul.bf16.vlgmr.msrb.gmra.mxu3 %v12190_v16  ;;  %v9436_v31 = vor.u32 %v10909_v53, %v9433_v3  ;;  %v9367_v53 = vld [vmem:[#allocation8 + $0x60] sm:$0xf]  ;;  %v10895_v3 = vld [vmem:[#allocation8 + $0x6c] sm:$0xf0] }
 0x415   :  { %5247 = vmatpush.bf16.msra.mxu1 %v9560_v61  ;;  %5273 = vmatpush.bf16.msra.mxu3 %v9564_v15  ;;  %v9401_v61 = vld [vmem:[#allocation8 + $0xb0] sm:$0xf0]  ;;  %v10915_v15 = vld [vmem:[#allocation8 + $0x10c] sm:$0xf0] }
 0x416   :  { %4404 = vmatmul.bf16.vlgmr.msra.gmra.mxu0 %v12190_v16  ;;  %4430 = vmatmul.bf16.vlgmr.msra.gmra.mxu2 %v12190_v16  ;;  %v9404_v42 = vor.u32 %v10901_v52, %v9401_v61  ;;  %v9448_v17 = vor.u32 %v10915_v15, %v9447_v14  ;;  %v10930_v52 = vld [vmem:[#allocation8 + $0x18c] sm:$0xf] }
 0x417   :  { %4719 = vmatpush.bf16.msrb.mxu0 %v9237_v11  ;;  %4745 = vmatpush.bf16.msrb.mxu2 %v9245_v60  ;;  %v9481_v11 = vld [vmem:[#allocation8 + $0x150] sm:$0xf0]  ;;  %v12207_v60 = vld [vmem:[%s12714_s3] sm:$0xf]  ;;  %v9183_v14 = vld [vmem:[%s12711_s0 + $0xa8] sm:$0xff] }
 0x418   :  { %v9484_v54 = vor.u32 %v10921_v59, %v9481_v11  ;;  %v4016_v4 = vperm.slane %v12207_v60, 0  ;;  %v9368_v59 = vor.u32 %v10895_v3, %v9367_v53  ;;  %v9369_v11 = vld [vmem:[#allocation8 + $0x70] sm:$0xf0]  ;;  %v4019_v53 = vperm.slane %v12207_v60, 3 }
 0x419   :  { %5248 = vmatpush.bf16.msra.mxu1 %v9544_v19  ;;  %5274 = vmatpush.bf16.msra.mxu3 %v9548_v12  ;;  %v9449_v19 = vld [vmem:[#allocation8 + $0x110] sm:$0xf0] }
 0x41a   :  { %v9452_v12 = vor.u32 %v10913_v18, %v9449_v19  ;;  %v10887_v18 = vld [vmem:[#allocation8 + $0x2c] sm:$0xf0]  ;;  %v10885_v19 = vld [vmem:[#allocation8 + $0x24] sm:$0xf] }
 0x41b   :  { %4720 = vmatpush.bf16.msrb.mxu0 %v9221_v1  ;;  %4746 = vmatpush.bf16.msrb.mxu2 %v9229_v20  ;;  %v10905_v1 = vld [vmem:[#allocation8 + $0xc4] sm:$0xf]  ;;  %v9416_v20 = vor.u32 %v10907_v40, %v9415_v63  ;;  %v10936_v63 = vld [vmem:[#allocation8 + $0x1b4] sm:$0xf0]  ;;  %v10934_v40 = vld [vmem:[#allocation8 + $0x1ac] sm:$0xf] }
 0x41c   :  { %v9420_v50 = vor.u32 %v10905_v1, %v9417_v7  ;;  %v9537_v7 = vld [vmem:[#allocation8 + $0x1b8] sm:$0xf0] }
 0x41d   :  { %5275 = vmatpush.bf16.msra.mxu3 %v9532_v2 }
 0x41f   :  { %4721 = vmatpush.bf16.msrb.mxu0 %v9205_v5  ;;  %4747 = vmatpush.bf16.msrb.mxu2 %v9213_v26  ;;  %v9464_v5 = vor.u32 %v10919_v51, %v9463_v35  ;;  %v10917_v26 = vld [vmem:[#allocation8 + $0x124] sm:$0xf]  ;;  %v9540_v51 = vor.u32 %v10934_v40, %v9537_v7  ;;  %v9489_v7 = vld [vmem:[#allocation8 + $0x158] sm:$0xf0] }
 0x420   :  { %v9468_v43 = vor.u32 %v10917_v26, %v9465_v25 }
 0x421   :  { %5276 = vmatpush.bf16.msra.mxu3 %v9516_v33  ;;  %v9385_v33 = vld [vmem:[#allocation8 + $0x90] sm:$0xf0] }
 0x422   :  { %v9388_v30 = vor.u32 %v10897_v37, %v9385_v33  ;;  %v9504_v37 = vor.u32 %v10928_v36, %v9503_v28 }
 0x423   :  { %4722 = vmatpush.bf16.msrb.mxu0 %v9189_v56  ;;  %4748 = vmatpush.bf16.msrb.mxu2 %v9197_v58  ;;  %v9399_v56 = vld [vmem:[#allocation8 + $0xa0] sm:$0xf]  ;;  %v10903_v58 = vld [vmem:[#allocation8 + $0xac] sm:$0xf0] }
 0x424   :  { %v9400_v55 = vor.u32 %v10903_v58, %v9399_v56  ;;  %v9519_v56 = vld [vmem:[#allocation8 + $0x188] sm:$0xf]  ;;  %v10932_v58 = vld [vmem:[#allocation8 + $0x194] sm:$0xf0] }
 0x425   :  { %5277 = vmatpush.bf16.msra.mxu3 %v9500_v45  ;;  %v4017_v45 = vperm.slane %v12207_v60, 1  ;;  %v9520_v15 = vor.u32 %v10932_v58, %v9519_v56 }
 0x426   :  { %4723 = vmatmul.bf16.vlgmr.msrb.gmra.mxu0 %v12190_v16  ;;  %4749 = vmatmul.bf16.vlgmr.msrb.gmra.mxu2 %v12190_v16  ;;  %v9528_v16 = vor.u32 %v10935_v8, %v9527_v24  ;;  %v10944_v24 = vld [vmem:[#allocation8 + $0x1f4] sm:$0xf0]  ;;  %v10942_v8 = vld [vmem:[#allocation8 + $0x1ec] sm:$0xf] }
 0x427   :  { %5234 = vmatpush.bf16.msra.mxu0 %v9432_v39  ;;  %5260 = vmatpush.bf16.msra.mxu2 %v9436_v31  ;;  %v9568_v10 = vor.u32 %v10944_v24, %v9567_v0  ;;  %v9572_v2 = vor.u32 %v10942_v8, %v9569_v21  ;;  %v9337_v8 = vld [vmem:[#allocation8 + $0x30] sm:$0xf0] }
 0x428   :  { %5249 = vmatpush.bf16.msra.mxu1 %v9528_v16 }
 0x429   :  { %5278 = vmatpush.bf16.msra.mxu3 %v9484_v54  ;;  %v9535_v54 = vld [vmem:[#allocation8 + $0x1a8] sm:$0xf] }
 0x42b   :  { %5235 = vmatpush.bf16.msra.mxu0 %v9416_v20  ;;  %5261 = vmatpush.bf16.msra.mxu2 %v9420_v50  ;;  %v9536_v20 = vor.u32 %v10936_v63, %v9535_v54  ;;  %v9351_v50 = vld [vmem:[#allocation8 + $0x40] sm:$0xf]  ;;  %v9487_v54 = vld [vmem:[#allocation8 + $0x148] sm:$0xf] }
 0x42c   :  { %5250 = vmatpush.bf16.msra.mxu1 %v9512_v41 }
 0x42d   :  { %5279 = vmatpush.bf16.msra.mxu3 %v9468_v43 }
 0x42f   :  { %5236 = vmatpush.bf16.msra.mxu0 %v9400_v55  ;;  %5262 = vmatpush.bf16.msra.mxu2 %v9404_v42  ;;  %v9521_v42 = vld [vmem:[#allocation8 + $0x198] sm:$0xf0] }
 0x430   :  { %5251 = vmatpush.bf16.msra.mxu1 %v9496_v34  ;;  %v10940_v34 = vld [vmem:[#allocation8 + $0x1d4] sm:$0xf0] }
 0x431   :  { %5280 = vmatpush.bf16.msra.mxu3 %v9452_v12  ;;  %v9552_v48 = vor.u32 %v10940_v34, %v9551_v22  ;;  %v9319_v22 = vld [vmem:[#allocation8] sm:$0xf] }
 0x433   :  { %5237 = vmatpush.bf16.msra.mxu0 %v9384_v29  ;;  %5263 = vmatpush.bf16.msra.mxu2 %v9388_v30  ;;  %v9505_v29 = vld [vmem:[#allocation8 + $0x178] sm:$0xf0] }
 0x434   :  { %5252 = vmatpush.bf16.msra.mxu1 %v9480_v62 }
 0x435   :  { %5325 = vmatpush.bf16.msrb.mxu3 %v9572_v2  ;;  %v9340_v2 = vor.u32 %v10885_v19, %v9337_v8 }
 0x437   :  { %5238 = vmatpush.bf16.msra.mxu0 %v9368_v59  ;;  %v9185_v59 = vld [vmem:[%s12711_s0 + $0xb8] sm:$0xff] }
 0x438   :  { %5253 = vmatpush.bf16.msra.mxu1 %v9464_v5  ;;  %v10891_v5 = vld [vmem:[#allocation8 + $0x4c] sm:$0xf0] }
 0x439   :  { %v9352_v25 = vor.u32 %v10891_v5, %v9351_v50 }
 0x43b   :  { %5239 = vmatpush.bf16.msra.mxu0 %v9352_v25 }
 0x43c   :  { %5254 = vmatpush.bf16.msra.mxu1 %v9448_v17  ;;  %v9335_v17 = vld [vmem:[#allocation8 + $0x20] sm:$0xf] }
 0x43d   :  { %v9336_v24 = vor.u32 %v10887_v18, %v9335_v17 }
 0x43f   :  { %5240 = vmatpush.bf16.msra.mxu0 %v9336_v24  ;;  %v10904_v24 = vld [vmem:[#allocation8 + $0xb4] sm:$0xf0] }
 0x440   :  { %5299 = vmatpush.bf16.msrb.mxu1 %v9568_v10 }
 0x444   :  { %5300 = vmatpush.bf16.msrb.mxu1 %v9552_v48 }
 0x448   :  { %5301 = vmatpush.bf16.msrb.mxu1 %v9536_v20  ;;  %v10922_v20 = vld [vmem:[#allocation8 + $0x14c] sm:$0xf] }
 0x44c   :  { %5302 = vmatpush.bf16.msrb.mxu1 %v9520_v15 }
 0x450   :  { %5303 = vmatpush.bf16.msrb.mxu1 %v9504_v37 }
 0x471   :  { %v12200_v23 = vpop.f32.mrf.mxu1 }
 0x477   :  { %v12202_v46 = vpop.f32.mrf.mxu3 }
 0x479   :  { %v4368_v27 = vpop.f32.mrf.mxu1 }
 0x47a   :  { %v9553_v27 = vld [vmem:[#allocation8 + $0x1d8] sm:$0xf0] }
 0x47b   :  { %v9556_v39 = vor.u32 %v10938_v49, %v9553_v27  ;;  %v9321_v49 = vld [vmem:[#allocation8 + $0x10] sm:$0xf0]  ;;  %v9439_v27 = vld [vmem:[#allocation8 + $0xe8] sm:$0xf] }
 0x47d   :  { %5326 = vmatpush.bf16.msrb.mxu3 %v9556_v39 }
 0x47f   :  { %v4394_v47 = vpop.f32.mrf.mxu3 }
 0x480   :  { %v10889_v47 = vld [vmem:[#allocation8 + $0x44] sm:$0xf] }
 0x481   :  { %v12210_v9 = vpop.f32.mrf.mxu1  ;;  %5327 = vmatpush.bf16.msrb.mxu3 %v9540_v51  ;;  %v4018_v51 = vperm.slane %v12207_v60, 2 }
 0x483   :  { %v4353_v16 = vpop.f32.mrf.mxu0 }
 0x484   :  { %v4354_v41 = vadd.f32 %v4353_v16, %v4016_v4  ;;  %v9353_v4 = vld [vmem:[#allocation8 + $0x50] sm:$0xf0] }
 0x485   :  { %v9356_v43 = vor.u32 %v10889_v47, %v9353_v4  ;;  %v9423_v47 = vld [vmem:[#allocation8 + $0xc8] sm:$0xf]  ;;  %v10908_v4 = vld [vmem:[#allocation8 + $0xd4] sm:$0xf0] }
 0x486   :  { %v4367_v38 = vadd.f32 %v12200_v23, %v4354_v41  ;;  %v9372_v23 = vor.u32 %v10893_v57, %v9369_v11  ;;  %v10926_v41 = vld [vmem:[#allocation8 + $0x16c] sm:$0xf]  ;;  %v10912_v57 = vld [vmem:[#allocation8 + $0xf4] sm:$0xf0]  ;;  %v9424_v17 = vor.u32 %v10908_v4, %v9423_v47 }
 0x487   :  { %v12213_v44 = vpop.f32.mrf.mxu3  ;;  %v9508_v34 = vor.u32 %v10926_v41, %v9505_v29 }
 0x488   :  { %v9178_v31 = vmul.f32 -1.442695, %v4367_v38  ;;  %5264 = vmatpush.bf16.msra.mxu2 %v9372_v23  ;;  %v10883_v38 = vld [vmem:[#allocation8 + $0xc] sm:$0xf0]  ;;  %v9441_v23 = vld [vmem:[#allocation8 + $0xf8] sm:$0xf0] }
 0x489   :  { %v4420_v13 = vpop.f32.mrf.mxu1  ;;  %v4379_v62 = vpop.f32.mrf.mxu2  ;;  %v9320_v48 = vor.u32 %v10883_v38, %v9319_v22  ;;  %v10914_v38 = vld [vmem:[#allocation8 + $0x10c] sm:$0xf] }
 0x48a   :  { %11285 = vpow2.f32 %v9178_v31  ;;  %v4380_v1 = vadd.f32 %v4379_v62, %v4017_v45  ;;  %v10881_v45 = vld [vmem:[#allocation8 + $0x4] sm:$0xf]  ;;  %v10910_v31 = vld [vmem:[#allocation8 + $0xec] sm:$0xf]  ;;  %v9440_v62 = vor.u32 %v10912_v57, %v9439_v27 }
 0x48b   :  { %v4355_v35 = vpop.f32.mrf.mxu0  ;;  %v9324_v3 = vor.u32 %v10881_v45, %v9321_v49  ;;  %5241 = vmatpush.bf16.msra.mxu0 %v9320_v48  ;;  %v9444_v40 = vor.u32 %v10910_v31, %v9441_v23  ;;  %v9182_v48 = vld [vmem:[%s12711_s0 + $0xa0] sm:$0xff] }
 0x48c   :  { %v4393_v26 = vadd.f32 %v12202_v46, %v4380_v1  ;;  %5265 = vmatpush.bf16.msra.mxu2 %v9356_v43  ;;  %v9524_v46 = vor.u32 %v10930_v52, %v9521_v42  ;;  %v10924_v1 = vld [vmem:[#allocation8 + $0x154] sm:$0xf0]  ;;  %v10906_v43 = vld [vmem:[#allocation8 + $0xcc] sm:$0xf]  ;;  %v9492_v52 = vor.u32 %v10922_v20, %v9489_v7 }
 0x48d   :  { %v9488_v58 = vor.u32 %v10924_v1, %v9487_v54  ;;  %v10920_v42 = vld [vmem:[#allocation8 + $0x134] sm:$0xf0]  ;;  %v9393_v1 = vld [vmem:[#allocation8 + $0x98] sm:$0xf0] }
 0x48e   :  { %v9179_v55 = vmul.f32 -1.442695, %v4393_v26  ;;  %5328 = vmatpush.bf16.msrb.mxu3 %v9524_v46  ;;  %v10918_v46 = vld [vmem:[#allocation8 + $0x12c] sm:$0xf] }
 0x48f   :  { %v4446_v61 = vpop.f32.mrf.mxu3  ;;  %5286 = vmatpush.bf16.msrb.mxu0 %v9440_v62  ;;  %5304 = vmatpush.bf16.msrb.mxu1 %v9488_v58  ;;  %v9391_v62 = vld [vmem:[#allocation8 + $0x88] sm:$0xf] }
 0x490   :  { %v11286_v0 = vpop.eup %11285  ;;  %11287 = vpow2.f32 %v9179_v55  ;;  %5266 = vmatpush.bf16.msra.mxu2 %v9340_v2  ;;  %v9425_v55 = vld [vmem:[#allocation8 + $0xd8] sm:$0xf0]  ;;  %v9471_v61 = vld [vmem:[#allocation8 + $0x128] sm:$0xf] }
 0x491   :  { %v4737_v12 = vpop.f32.mrf.mxu1  ;;  %v12220_v21 = vadd.f32 1.0, %v11286_v0  ;;  %v4381_v10 = vpop.f32.mrf.mxu2  ;;  %v9428_v18 = vor.u32 %v10906_v43, %v9425_v55  ;;  %v9472_v19 = vor.u32 %v10920_v42, %v9471_v61  ;;  %v9473_v0 = vld [vmem:[#allocation8 + $0x138] sm:$0xf0]  ;;  %v9375_v58 = vld [vmem:[#allocation8 + $0x68] sm:$0xf] }
 0x492   :  { %v4768_v16 = vadd.f32 %v9183_v14, %v4737_v12  ;;  %5329 = vmatpush.bf16.msrb.mxu3 %v9508_v34  ;;  %v9407_v12 = vld [vmem:[#allocation8 + $0xa8] sm:$0xf]  ;;  %v10902_v10 = vld [vmem:[#allocation8 + $0xac] sm:$0xf]  ;;  %v9409_v2 = vld [vmem:[#allocation8 + $0xb8] sm:$0xf0]  ;;  %v9476_v41 = vor.u32 %v10918_v46, %v9473_v0 }
 0x493   :  { %11289 = vrcp.f32 %v12220_v21  ;;  %v4405_v30 = vpop.f32.mrf.mxu0  ;;  %5287 = vmatpush.bf16.msrb.mxu0 %v9424_v17  ;;  %v9408_v29 = vor.u32 %v10904_v24, %v9407_v12  ;;  %5305 = vmatpush.bf16.msrb.mxu1 %v9472_v19  ;;  %v9412_v49 = vor.u32 %v10902_v10, %v9409_v2  ;;  %vm4458_vm14 = vweird.f32 %v12220_v21  ;;  %v9359_v0 = vld [vmem:[#allocation8 + $0x48] sm:$0xf]  ;;  %v10892_v12 = vld [vmem:[#allocation8 + $0x54] sm:$0xf0]  ;;  %v10890_v24 = vld [vmem:[#allocation8 + $0x4c] sm:$0xf] }
 0x494   :  { %v9315_v33 = vmul.f32 -1.442695, %v4768_v16  ;;  %5267 = vmatpush.bf16.msra.mxu2 %v9324_v3  ;;  %v4406_v8 = vadd.f32 %v4405_v30, %v4018_v51  ;;  %v10916_v30 = vld [vmem:[#allocation8 + $0x114] sm:$0xf0]  ;;  %v4464_v20 = vand.u32 2147483648, %v12220_v21 }
 0x495   :  { %v4462_v51 = vand.u32 2147483647, %v12220_v21  ;;  %v9361_v2 = vld [vmem:[#allocation8 + $0x58] sm:$0xf0] }
 0x496   :  { %v11288_v39 = vpop.eup %11287  ;;  %11291 = vpow2.f32 %v9315_v33  ;;  %5330 = vmatpush.bf16.msrb.mxu3 %v9492_v52  ;;  %v9455_v33 = vld [vmem:[#allocation8 + $0x108] sm:$0xf]  ;;  %v4419_v3 = vadd.f32 %v12210_v9, %v4406_v8  ;;  %v10896_v52 = vld [vmem:[#allocation8 + $0x74] sm:$0xf0]  ;;  %v4465_v61 = vor.u32 1.1754944e-38, %v4464_v20 }
 0x497   :  { %v12224_v13 = vadd.f32 1.0, %v11288_v39  ;;  %v4763_v11 = vpop.f32.mrf.mxu3  ;;  %v9456_v27 = vor.u32 %v10916_v30, %v9455_v33  ;;  %v9457_v39 = vld [vmem:[#allocation8 + $0x118] sm:$0xf0]  ;;  %5288 = vmatpush.bf16.msrb.mxu0 %v9408_v29  ;;  %vm4463_vm3 = vcmp.eq.f32.partialorder %v4462_v51, 8.507059e+37  ;;  %v9376_v17 = vor.u32 %v10896_v52, %v9375_v58  ;;  %v9343_v29 = vld [vmem:[#allocation8 + $0x28] sm:$0xf] }
 0x498   :  { %v4770_v26 = vadd.f32 %v9185_v59, %v4763_v11  ;;  %5312 = vmatpush.bf16.msrb.mxu2 %v9444_v40  ;;  %v9460_v57 = vor.u32 %v10914_v38, %v9457_v39  ;;  %v10898_v40 = vld [vmem:[#allocation8 + $0x8c] sm:$0xf]  ;;  %v10888_v33 = vld [vmem:[#allocation8 + $0x34] sm:$0xf0]  ;;  %v9327_v39 = vld [vmem:[#allocation8 + $0x8] sm:$0xf] }
 0x499   :  { %v4739_v63 = vpop.f32.mrf.mxu1  ;;  %v12229_v35 = vpop.eup %11289  ;;  %11293 = vrcp.f32 %v12224_v13  ;;  %v4483_v31 = vand.u32 2147483648, %v12224_v13  ;;  %v4481_v59 = vand.u32 2147483647, %v12224_v13  ;;  %5306 = vmatpush.bf16.msrb.mxu1 %v9456_v27  ;;  %vm4477_vm15 = vweird.f32 %v12224_v13  ;;  %v10886_v38 = vld [vmem:[#allocation8 + $0x2c] sm:$0xf] }
 0x49a   :  { %v4431_v50 = vpop.f32.mrf.mxu2  ;;  %v4454_v5 = vmul.f32 %v12229_v35, %v12220_v21  ;;  %v9316_v16 = vmul.f32 -1.442695, %v4770_v26  ;;  %5331 = vmatpush.bf16.msrb.mxu3 %v9476_v41  ;;  %vm4459_vm12 = vweird.f32 %v12229_v35  ;;  %v10900_v63 = vld [vmem:[#allocation8 + $0x94] sm:$0xf0]  ;;  %v9396_v4 = vor.u32 %v10898_v40, %v9393_v1  ;;  %v9633_v51 = vld [vmem:[#allocation6 + $0x70] sm:$0xf0] }
 0x49b   :  { %v4432_v25 = vadd.f32 %v4431_v50, %v4019_v53  ;;  %v4407_v56 = vpop.f32.mrf.mxu0  ;;  %vm12259_vm0 = vmor %vm4458_vm14, %vm4459_vm12  ;;  %v9392_v47 = vor.u32 %v10900_v63, %v9391_v62  ;;  %vm4482_vm2 = vcmp.eq.f32.partialorder %v4481_v59, 8.507059e+37  ;;  %v9364_v41 = vor.u32 %v10890_v24, %v9361_v2  ;;  %v9329_v62 = vld [vmem:[#allocation8 + $0x18] sm:$0xf0] }
 0x49c   :  { %v11292_v14 = vpop.eup %11291  ;;  %v4455_v15 = vsub.f32 1.0, %v4454_v5  ;;  %5313 = vmatpush.bf16.msrb.mxu2 %v9428_v18 }
 0x49d   :  { %v4445_v60 = vadd.f32 %v12213_v44, %v4432_v25  ;;  %v12238_v36 = vadd.f32 1.0, %v11292_v14  ;;  %v4484_v25 = vor.u32 1.1754944e-38, %v4483_v31  ;;  %5289 = vmatpush.bf16.msrb.mxu0 %v9392_v47  ;;  %v9697_v47 = vld [vmem:[#allocation6 + $0xf0] sm:$0xf0] }
 0x49e   :  { %v4456_v34 = vmul.f32 %v12229_v35, %v4455_v15  ;;  %5332 = vmatpush.bf16.msrb.mxu3 %v9460_v57  ;;  %v10884_v57 = vld [vmem:[#allocation8 + $0x14] sm:$0xf0] }
 0x49f   :  { %v12236_v28 = vpop.eup %11293  ;;  %v9180_v37 = vmul.f32 -1.442695, %v4445_v60  ;;  %v4765_v44 = vpop.f32.mrf.mxu3  ;;  %v10894_v60 = vld [vmem:[#allocation8 + $0x6c] sm:$0xf]  ;;  %v9328_v63 = vor.u32 %v10884_v57, %v9327_v39  ;;  %vm4800_vm9 = vweird.f32 %v12238_v36  ;;  %v4806_v58 = vand.u32 2147483648, %v12238_v36 }
 0x4a0   :  { %v4473_v22 = vmul.f32 %v12236_v28, %v12224_v13  ;;  %5314 = vmatpush.bf16.msrb.mxu2 %v9412_v49  ;;  %vm4478_vm13 = vweird.f32 %v12236_v28  ;;  %v4457_v9 = vadd.f32 %v12229_v35, %v4456_v34  ;;  %v9360_v44 = vor.u32 %v10892_v12, %v9359_v0  ;;  %v9681_v0 = vld [vmem:[#allocation6 + $0xd0] sm:$0xf0]  ;;  %v10970_v12 = vld [vmem:[#allocation6 + $0xcc] sm:$0xf] }
 0x4a1   :  { %11295 = vpow2.f32 %v9180_v37  ;;  %vm4479_vm1 = vmor %vm4477_vm15, %vm4478_vm13  ;;  %5290 = vmatpush.bf16.msrb.mxu0 %v9376_v17  ;;  %v9344_v49 = vor.u32 %v10888_v33, %v9343_v29  ;;  %v4807_v2 = vor.u32 1.1754944e-38, %v4806_v58 }
 0x4a2   :  { %v4433_v45 = vpop.f32.mrf.mxu2  ;;  %v4474_v53 = vsub.f32 1.0, %v4473_v22  ;;  %11297 = vpow2.f32 %v9316_v16  ;;  %v4461_v43 = vsel %vm12259_vm0, %v12229_v35, %v4457_v9  ;;  %v9377_v35 = vld [vmem:[#allocation8 + $0x78] sm:$0xf0]  ;;  %v9184_v9 = vld [vmem:[%s12711_s0 + $0xb0] sm:$0xff] }
 0x4a3   :  { %11299 = vrcp.f32 %v12238_v36  ;;  %v4724_v11 = vpop.f32.mrf.mxu0  ;;  %v4466_v42 = vsel %vm4463_vm3, %v4465_v61, %v4461_v43  ;;  %v9380_v10 = vor.u32 %v10894_v60, %v9377_v35  ;;  %v9345_v45 = vld [vmem:[#allocation8 + $0x38] sm:$0xf0]  ;;  %v10974_v43 = vld [vmem:[#allocation6 + $0xec] sm:$0xf]  ;;  %v4804_v60 = vand.u32 2147483647, %v12238_v36 }
 0x4a4   :  { %v4475_v23 = vmul.f32 %v12236_v28, %v4474_v53  ;;  %v4767_v54 = vadd.f32 %v9182_v48, %v4724_v11  ;;  %11301 = vtanh.f32 %v4419_v3  ;;  %5315 = vmatpush.bf16.msrb.mxu2 %v9396_v4  ;;  %v9348_v3 = vor.u32 %v10886_v38, %v9345_v45  ;;  %v10882_v11 = vld [vmem:[#allocation8 + $0xc] sm:$0xf]  ;;  %v9673_v45 = vld [vmem:[#allocation6 + $0xb8] sm:$0xf0] }
 0x4a5   :  { %5291 = vmatpush.bf16.msrb.mxu0 %v9360_v44  ;;  %v9332_v20 = vor.u32 %v10882_v11, %v9329_v62  ;;  %vm4805_vm13 = vcmp.eq.f32.partialorder %v4804_v60, 8.507059e+37  ;;  %v10966_v38 = vld [vmem:[#allocation6 + $0xac] sm:$0xf]  ;;  %v9649_v11 = vld [vmem:[#allocation6 + $0x90] sm:$0xf0] }
 0x4a6   :  { %v4476_v50 = vadd.f32 %v12236_v28, %v4475_v23  ;;  %v9314_v5 = vmul.f32 -1.442695, %v4767_v54  ;;  %v9676_v57 = vor.u32 %v10966_v38, %v9673_v45  ;;  %v10962_v62 = vld [vmem:[#allocation6 + $0x8c] sm:$0xf]  ;;  %v9593_v38 = vld [vmem:[#allocation6 + $0x18] sm:$0xf0] }
 0x4a7   :  { %v11296_v26 = vpop.eup %11295 }
 0x4a8   :  { %v11298_v13 = vpop.eup %11297  ;;  %v4480_v56 = vsel %vm4479_vm1, %v12236_v28, %v4476_v50  ;;  %v12271_v21 = vadd.f32 1.0, %v11296_v26  ;;  %11303 = vpow2.f32 %v9314_v5  ;;  %5316 = vmatpush.bf16.msrb.mxu2 %v9380_v10  ;;  %v9689_v10 = vld [vmem:[#allocation6 + $0xd8] sm:$0xf0] }
 0x4a9   :  { %v12273_v55 = vpop.eup %11299  ;;  %v4485_v14 = vsel %vm4482_vm2, %v4484_v25, %v4480_v56  ;;  %v12279_v16 = vadd.f32 1.0, %v11298_v13  ;;  %5292 = vmatpush.bf16.msrb.mxu0 %v9344_v49  ;;  %v10973_v25 = vld [vmem:[#allocation6 + $0xe4] sm:$0xf]  ;;  %v9705_v56 = vld [vmem:[#allocation6 + $0xf8] sm:$0xf0]  ;;  %v9692_v33 = vor.u32 %v10970_v12, %v9689_v10 }
 0x4aa   :  { %11305 = vrcp.f32 %v12271_v21  ;;  %v4750_v15 = vpop.f32.mrf.mxu2  ;;  %v4796_v18 = vmul.f32 %v12273_v55, %v12238_v36  ;;  %v4507_v19 = vmul.f32 %v4485_v14, %v12115_v32  ;;  %v11302_v8 = vpop.eup %11301  ;;  %v4503_v59 = vand.u32 2147483648, %v12271_v21  ;;  %v10954_v14 = vld [vmem:[#allocation6 + $0x4c] sm:$0xf]  ;;  %v10972_v12 = vld [vmem:[#allocation6 + $0xd4] sm:$0xf0] }
 0x4ab   :  { %v4726_v46 = vpop.f32.mrf.mxu0  ;;  %v4508_v28 = vmul.f32 %v11302_v8, %v4466_v42  ;;  %11307 = vrcp.f32 %v12279_v16  ;;  %v4501_v54 = vand.u32 2147483647, %v12271_v21  ;;  %vm4497_vm5 = vweird.f32 %v12271_v21  ;;  %v10950_v10 = vld [vmem:[#allocation6 + $0x2c] sm:$0xf] }
 0x4ac   :  { %v4797_v34 = vsub.f32 1.0, %v4796_v18  ;;  %5317 = vmatpush.bf16.msrb.mxu2 %v9364_v41  ;;  %vm4801_vm6 = vweird.f32 %v12273_v55  ;;  %v4504_v50 = vor.u32 1.1754944e-38, %v4503_v59  ;;  %v4769_v5 = vadd.f32 %v9184_v9, %v4750_v15  ;;  %v10969_v46 = vld [vmem:[#allocation6 + $0xc4] sm:$0xf] }
 0x4ad   :  { %v12281_v30 = vadd.f32 %v4508_v28, %v4507_v19  ;;  %vm4502_vm8 = vcmp.eq.f32.partialorder %v4501_v54, 8.507059e+37  ;;  %5293 = vmatpush.bf16.msrb.mxu0 %v9328_v63  ;;  %vm12313_vm10 = vmor %vm4800_vm9, %vm4801_vm6  ;;  %v9700_v42 = vor.u32 %v10973_v25, %v9697_v47  ;;  %v9708_v19 = vor.u32 %v10974_v43, %v9705_v56  ;;  %v9695_v25 = vld [vmem:[#allocation6 + $0xe0] sm:$0xf]  ;;  %v10975_v47 = vld [vmem:[#allocation6 + $0xec] sm:$0xf0] }
 0x4ae   :  { %v11304_v37 = vpop.eup %11303  ;;  %v4798_v31 = vmul.f32 %v12273_v55, %v4797_v34  ;;  %v9684_v29 = vor.u32 %v10969_v46, %v9681_v0  ;;  %v9665_v34 = vld [vmem:[#allocation6 + $0xb0] sm:$0xf0]  ;;  %vm4820_vm1 = vweird.f32 %v12279_v16  ;;  %v4824_v54 = vand.u32 2147483647, %v12279_v16  ;;  %v9703_v43 = vld [vmem:[#allocation6 + $0xe8] sm:$0xf] }
 0x4af   :  { %v12283_v32 = vadd.f32 1.0, %v11304_v37  ;;  %v10976_v56 = vld [vmem:[#allocation6 + $0xf4] sm:$0xf0]  ;;  %v10971_v46 = vld [vmem:[#allocation6 + $0xcc] sm:$0xf0] }
 0x4b0   :  { %v11306_v22 = vpop.eup %11305  ;;  %5318 = vmatpush.bf16.msrb.mxu2 %v9348_v3  ;;  %v4799_v26 = vadd.f32 %v12273_v55, %v4798_v31  ;;  %v10961_v31 = vld [vmem:[#allocation6 + $0x84] sm:$0xf]  ;;  %vm4825_vm3 = vcmp.eq.f32.partialorder %v4824_v54, 8.507059e+37  ;;  %v9687_v0 = vld [vmem:[#allocation6 + $0xc8] sm:$0xf] }
 0x4b1   :  { %v4493_v48 = vmul.f32 %v11306_v22, %v12271_v21  ;;  %11309 = vrcp.f32 %v12283_v32  ;;  %vm4498_vm4 = vweird.f32 %v11306_v22  ;;  %v12295_v40 = vpop.eup %11307  ;;  %v4787_v17 = vand.u32 2147483648, %v12283_v32  ;;  %v10960_v54 = vld [vmem:[#allocation6 + $0x74] sm:$0xf0] }
 0x4b2   :  { %v4752_v27 = vpop.f32.mrf.mxu2  ;;  %11311 = vtanh.f32 %v12281_v30  ;;  %vm12299_vm7 = vmor %vm4497_vm5, %vm4498_vm4  ;;  %v4816_v52 = vmul.f32 %v12295_v40, %v12279_v16  ;;  %v4803_v18 = vsel %vm12313_vm10, %v12273_v55, %v4799_v26  ;;  %v4785_v8 = vand.u32 2147483647, %v12283_v32  ;;  %v10967_v55 = vld [vmem:[#allocation6 + $0xac] sm:$0xf0] }
 0x4b3   :  { %v4494_v53 = vsub.f32 1.0, %v4493_v48  ;;  %11313 = vtanh.f32 %v4769_v5  ;;  %vm4781_vm12 = vweird.f32 %v12283_v32  ;;  %v4788_v44 = vor.u32 1.1754944e-38, %v4787_v17  ;;  %v9641_v5 = vld [vmem:[#allocation6 + $0x78] sm:$0xf0] }
 0x4b4   :  { %5319 = vmatpush.bf16.msrb.mxu2 %v9332_v20  ;;  %v4817_v28 = vsub.f32 1.0, %v4816_v52  ;;  %v4808_v41 = vsel %vm4805_vm13, %v4807_v2, %v4803_v18  ;;  %vm4786_vm15 = vcmp.eq.f32.partialorder %v4785_v8, 8.507059e+37  ;;  %vm4821_vm0 = vweird.f32 %v12295_v40  ;;  %v9601_v8 = vld [vmem:[#allocation6 + $0x30] sm:$0xf0]  ;;  %v9609_v2 = vld [vmem:[#allocation6 + $0x38] sm:$0xf0] }
 0x4b5   :  { %v4495_v23 = vmul.f32 %v11306_v22, %v4494_v53  ;;  %v4830_v39 = vmul.f32 %v4808_v41, %v12174_v6  ;;  %v4826_v6 = vand.u32 2147483648, %v12279_v16  ;;  %vm12347_vm2 = vmor %vm4820_vm1, %vm4821_vm0  ;;  %v9612_v41 = vor.u32 %v10950_v10, %v9609_v2  ;;  %v11031_v10 = vld [vmem:[#allocation8 + $0x1ac] sm:$0xf0]  ;;  %v11029_v2 = vld [vmem:[#allocation8 + $0x1a4] sm:$0xf] }
 0x4b6   :  { %v4818_v49 = vmul.f32 %v12295_v40, %v4817_v28  ;;  %v9688_v28 = vor.u32 %v10972_v12, %v9687_v0  ;;  %v9940_v12 = vld [vmem:[#allocation8 + $0x1d0] sm:$0xf0] }
 0x4b7   :  { %v4496_v1 = vadd.f32 %v11306_v22, %v4495_v23  ;;  %v11310_v7 = vpop.eup %11309  ;;  %v9657_v23 = vld [vmem:[#allocation6 + $0x98] sm:$0xf0]  ;;  %v4827_v16 = vor.u32 1.1754944e-38, %v4826_v6 }
 0x4b8   :  { %v4777_v4 = vmul.f32 %v11310_v7, %v12283_v32  ;;  %v11312_v21 = vpop.eup %11311  ;;  %vm4782_vm11 = vweird.f32 %v11310_v7  ;;  %v4819_v9 = vadd.f32 %v12295_v40, %v4818_v49  ;;  %v9660_v20 = vor.u32 %v10962_v62, %v9657_v23  ;;  %v9631_v62 = vld [vmem:[#allocation6 + $0x60] sm:$0xf]  ;;  %v10959_v23 = vld [vmem:[#allocation6 + $0x6c] sm:$0xf0] }
 0x4b9   :  { %v4500_v13 = vsel %vm12299_vm7, %v11306_v22, %v4496_v1  ;;  %vm12331_vm14 = vmor %vm4781_vm12, %vm4782_vm11  ;;  %v10965_v22 = vld [vmem:[#allocation6 + $0xa4] sm:$0xf]  ;;  %v11314_v48 = vpop.eup %11313  ;;  %v9652_v1 = vor.u32 %v10961_v31, %v9649_v11  ;;  %v9632_v6 = vor.u32 %v10959_v23, %v9631_v62  ;;  %v9874_v62 = vld [vmem:[#allocation8 + $0x140] sm:$0xf] }
 0x4ba   :  { %v4505_v61 = vsel %vm4502_vm8, %v4504_v50, %v4500_v13  ;;  %v4778_v15 = vsub.f32 1.0, %v4777_v4  ;;  %v9668_v3 = vor.u32 %v10965_v22, %v9665_v34  ;;  %v10958_v50 = vld [vmem:[#allocation6 + $0x6c] sm:$0xf]  ;;  %v4823_v26 = vsel %vm12347_vm2, %v12295_v40, %v4819_v9  ;;  %v10945_v22 = vld [vmem:[#allocation6 + $0x4] sm:$0xf] }
 0x4bb   :  { %v4511_v35 = vmul.f32 %v11312_v21, %v4505_v61  ;;  %v9644_v13 = vor.u32 %v10958_v50, %v9641_v5  ;;  %v10953_v21 = vld [vmem:[#allocation6 + $0x44] sm:$0xf]  ;;  %v4828_v52 = vsel %vm4825_vm3, %v4827_v16, %v4823_v26  ;;  %v9617_v61 = vld [vmem:[#allocation6 + $0x50] sm:$0xf0]  ;;  %v9696_v40 = vor.u32 %v10975_v47, %v9695_v25  ;;  %v9639_v9 = vld [vmem:[#allocation6 + $0x68] sm:$0xf] }
 0x4bc   :  { %v4779_v24 = vmul.f32 %v11310_v7, %v4778_v15  ;;  %v9625_v15 = vld [vmem:[#allocation6 + $0x58] sm:$0xf0]  ;;  %v9620_v18 = vor.u32 %v10953_v21, %v9617_v61  ;;  %v9585_v34 = vld [vmem:[#allocation6 + $0x10] sm:$0xf0]  ;;  %v9640_v63 = vor.u32 %v10960_v54, %v9639_v9  ;;  %v9599_v26 = vld [vmem:[#allocation6 + $0x20] sm:$0xf] }
 0x4bd   :  { %9181 = vst [vmem:[%s12717_s6 + $0x20] sm:$0xff] %v4511_v35  ;;  %v12326_v36 = vpack.c.bf16 %v4511_v35, %v4511_v35  ;;  %v9704_v35 = vor.u32 %v10976_v56, %v9703_v43  ;;  %v9588_v49 = vor.u32 %v10945_v22, %v9585_v34  ;;  %v10951_v16 = vld [vmem:[#allocation6 + $0x2c] sm:$0xf0]  ;;  %v9607_v25 = vld [vmem:[#allocation6 + $0x28] sm:$0xf] }
 0x4be   :  { %v4780_v37 = vadd.f32 %v11310_v7, %v4779_v24  ;;  %v10949_v24 = vld [vmem:[#allocation6 + $0x24] sm:$0xf]  ;;  %v10952_v47 = vld [vmem:[#allocation6 + $0x34] sm:$0xf0]  ;;  %v9583_v43 = vld [vmem:[#allocation6] sm:$0xf] }
 0x4bf   :  { %5255 = vmatmul.bf16.vlgmr.msra.gmra.mxu1 %v12326_v36  ;;  %5281 = vmatmul.bf16.vlgmr.msra.gmra.mxu3 %v12326_v36  ;;  %v10947_v56 = vld [vmem:[#allocation6 + $0xc] sm:$0xf0]  ;;  %v9591_v21 = vld [vmem:[#allocation6 + $0x8] sm:$0xf]  ;;  %v9890_v34 = vld [vmem:[#allocation8 + $0x160] sm:$0xf] }
 0x4c0   :  { %5618 = vmatpush.bf16.msra.mxu1 %v9700_v42  ;;  %5644 = vmatpush.bf16.msra.mxu3 %v9708_v19  ;;  %v4784_v32 = vsel %vm12331_vm14, %v11310_v7, %v4780_v37  ;;  %v10957_v7 = vld [vmem:[#allocation6 + $0x64] sm:$0xf]  ;;  %v9679_v42 = vld [vmem:[#allocation6 + $0xc0] sm:$0xf]  ;;  %v9628_v19 = vor.u32 %v10954_v14, %v9625_v15  ;;  %v11039_v15 = vld [vmem:[#allocation8 + $0x1ec] sm:$0xf0] }
 0x4c1   :  { %v4789_v27 = vsel %vm4786_vm15, %v4788_v44, %v4784_v32  ;;  %v9636_v4 = vor.u32 %v10957_v7, %v9633_v51  ;;  %v9663_v37 = vld [vmem:[#allocation6 + $0xa0] sm:$0xf]  ;;  %v9604_v44 = vor.u32 %v10949_v24, %v9601_v8  ;;  %v10946_v32 = vld [vmem:[#allocation6 + $0xc] sm:$0xf]  ;;  %v9623_v7 = vld [vmem:[#allocation6 + $0x48] sm:$0xf] }
 0x4c2   :  { %v4831_v53 = vmul.f32 %v11314_v48, %v4789_v27  ;;  %v9664_v45 = vor.u32 %v10967_v55, %v9663_v37  ;;  %v9596_v27 = vor.u32 %v10946_v32, %v9593_v38  ;;  %v10956_v51 = vld [vmem:[#allocation6 + $0x54] sm:$0xf0]  ;;  %v9954_v14 = vld [vmem:[#allocation8 + $0x1e0] sm:$0xf]  ;;  %v11027_v55 = vld [vmem:[#allocation8 + $0x18c] sm:$0xf0] }
 0x4c3   :  { %v9624_v5 = vor.u32 %v10956_v51, %v9623_v7  ;;  %v9922_v8 = vld [vmem:[#allocation8 + $0x1a0] sm:$0xf]  ;;  %v11023_v32 = vld [vmem:[#allocation8 + $0x16c] sm:$0xf0]  ;;  %v11017_v54 = vld [vmem:[#allocation8 + $0x144] sm:$0xf] }
 0x4c4   :  { %5619 = vmatpush.bf16.msra.mxu1 %v9684_v29  ;;  %5645 = vmatpush.bf16.msra.mxu3 %v9692_v33  ;;  %v12340_v59 = vadd.f32 %v4831_v53, %v4830_v39  ;;  %v9671_v29 = vld [vmem:[#allocation6 + $0xa8] sm:$0xf]  ;;  %v10968_v33 = vld [vmem:[#allocation6 + $0xb4] sm:$0xf0]  ;;  %v9647_v39 = vld [vmem:[#allocation6 + $0x80] sm:$0xf]  ;;  %v9891_v38 = vor.u32 %v11023_v32, %v9890_v34 }
 0x4c5   :  { %v9672_v48 = vor.u32 %v10968_v33, %v9671_v29  ;;  %v10963_v53 = vld [vmem:[#allocation6 + $0x8c] sm:$0xf0]  ;;  %v9906_v37 = vld [vmem:[#allocation8 + $0x180] sm:$0xf]  ;;  %v9908_v33 = vld [vmem:[#allocation8 + $0x190] sm:$0xf0] }
 0x4c6   :  { %11315 = vtanh.f32 %v12340_v59  ;;  %v9648_v31 = vor.u32 %v10963_v53, %v9647_v39  ;;  %v9907_v29 = vor.u32 %v11027_v55, %v9906_v37  ;;  %v9826_v39 = vld [vmem:[#allocation8 + $0xe0] sm:$0xf]  ;;  %v11007_v53 = vld [vmem:[#allocation8 + $0xec] sm:$0xf0]  ;;  %v9946_v32 = vld [vmem:[#allocation8 + $0x1c8] sm:$0xf] }
 0x4c7   :  { %v11019_v9 = vld [vmem:[#allocation8 + $0x14c] sm:$0xf0]  ;;  %v9810_v7 = vld [vmem:[#allocation8 + $0xc0] sm:$0xf] }
 0x4c8   :  { %5620 = vmatpush.bf16.msra.mxu1 %v9668_v3  ;;  %5646 = vmatpush.bf16.msra.mxu3 %v9676_v57  ;;  %v9655_v3 = vld [vmem:[#allocation6 + $0x88] sm:$0xf]  ;;  %v10964_v57 = vld [vmem:[#allocation6 + $0x94] sm:$0xf0]  ;;  %v11003_v51 = vld [vmem:[#allocation8 + $0xcc] sm:$0xf0] }
 0x4c9   :  { %v9656_v11 = vor.u32 %v10964_v57, %v9655_v3  ;;  %v9827_v57 = vor.u32 %v11007_v53, %v9826_v39  ;;  %v9778_v37 = vld [vmem:[#allocation8 + $0x80] sm:$0xf]  ;;  %v10995_v55 = vld [vmem:[#allocation8 + $0x8c] sm:$0xf0]  ;;  %v11034_v53 = vld [vmem:[#allocation8 + $0x1cc] sm:$0xf] }
 0x4cc   :  { %5621 = vmatpush.bf16.msra.mxu1 %v9652_v1  ;;  %5647 = vmatpush.bf16.msra.mxu3 %v9660_v20  ;;  %v11316_v58 = vpop.eup %11315  ;;  %v9615_v1 = vld [vmem:[#allocation6 + $0x40] sm:$0xf]  ;;  %v10955_v20 = vld [vmem:[#allocation6 + $0x4c] sm:$0xf0] }
 0x4cd   :  { %v4834_v60 = vmul.f32 %v11316_v58, %v4828_v52  ;;  %v9616_v50 = vor.u32 %v10955_v20, %v9615_v1  ;;  %v10948_v58 = vld [vmem:[#allocation6 + $0x14] sm:$0xf0]  ;;  %v9584_v52 = vor.u32 %v10947_v56, %v9583_v43  ;;  %v9875_v1 = vor.u32 %v11019_v9, %v9874_v62  ;;  %v9860_v43 = vld [vmem:[#allocation8 + $0x130] sm:$0xf0]  ;;  %v10989_v62 = vld [vmem:[#allocation8 + $0x64] sm:$0xf] }
 0x4ce   :  { %v9592_v61 = vor.u32 %v10948_v58, %v9591_v21 }
 0x4cf   :  { %5307 = vmatmul.bf16.vlgmr.msrb.gmra.mxu1 %v12326_v36  ;;  %5333 = vmatmul.bf16.vlgmr.msrb.gmra.mxu3 %v12326_v36  ;;  %v12356_v17 = vpack.c.bf16 %v4834_v60, %v4834_v60  ;;  %v9680_v36 = vor.u32 %v10971_v46, %v9679_v42  ;;  %v11037_v60 = vld [vmem:[#allocation8 + $0x1e4] sm:$0xf]  ;;  %v9938_v46 = vld [vmem:[#allocation8 + $0x1c0] sm:$0xf] }
 0x4d0   :  { %5622 = vmatpush.bf16.msra.mxu1 %v9636_v4  ;;  %5648 = vmatpush.bf16.msra.mxu3 %v9644_v13  ;;  %v9600_v4 = vor.u32 %v10951_v16, %v9599_v26  ;;  %v9608_v13 = vor.u32 %v10952_v47, %v9607_v25  ;;  %v9812_v26 = vld [vmem:[#allocation8 + $0xd0] sm:$0xf0]  ;;  %v9858_v16 = vld [vmem:[#allocation8 + $0x120] sm:$0xf]  ;;  %v11015_v25 = vld [vmem:[#allocation8 + $0x12c] sm:$0xf0] }
 0x4d1   :  { %5242 = vmatmul.bf16.vlgmr.msra.gmra.mxu0 %v12356_v17  ;;  %5268 = vmatmul.bf16.vlgmr.msra.gmra.mxu2 %v12356_v17 }
 0x4d2   :  { %5605 = vmatpush.bf16.msra.mxu0 %v9696_v40  ;;  %5631 = vmatpush.bf16.msra.mxu2 %v9704_v35  ;;  %v9955_v40 = vor.u32 %v11039_v15, %v9954_v14  ;;  %v9956_v35 = vld [vmem:[#allocation8 + $0x1f0] sm:$0xf0]  ;;  %v10997_v14 = vld [vmem:[#allocation8 + $0xa4] sm:$0xf] }
 0x4d3   :  { %v9959_v42 = vor.u32 %v11037_v60, %v9956_v35  ;;  %v9842_v35 = vld [vmem:[#allocation8 + $0x100] sm:$0xf] }
 0x4d4   :  { %5623 = vmatpush.bf16.msra.mxu1 %v9620_v18  ;;  %5649 = vmatpush.bf16.msra.mxu3 %v9628_v19  ;;  %v11035_v18 = vld [vmem:[#allocation8 + $0x1cc] sm:$0xf0]  ;;  %v11033_v19 = vld [vmem:[#allocation8 + $0x1c4] sm:$0xf] }
 0x4d5   :  { %v9939_v0 = vor.u32 %v11035_v18, %v9938_v46  ;;  %v9943_v24 = vor.u32 %v11033_v19, %v9940_v12  ;;  %v11009_v19 = vld [vmem:[#allocation8 + $0x104] sm:$0xf]  ;;  %v9962_v12 = vld [vmem:[#allocation8 + $0x1e8] sm:$0xf] }
 0x4d6   :  { %5606 = vmatpush.bf16.msra.mxu0 %v9680_v36  ;;  %5632 = vmatpush.bf16.msra.mxu2 %v9688_v28  ;;  %v9924_v36 = vld [vmem:[#allocation8 + $0x1b0] sm:$0xf0] }
 0x4d7   :  { %v9927_v28 = vor.u32 %v11029_v2, %v9924_v36  ;;  %v9964_v2 = vld [vmem:[#allocation8 + $0x1f8] sm:$0xf0] }
 0x4d8   :  { %5624 = vmatpush.bf16.msra.mxu1 %v9604_v44  ;;  %5650 = vmatpush.bf16.msra.mxu3 %v9612_v41  ;;  %v11025_v44 = vld [vmem:[#allocation8 + $0x184] sm:$0xf] }
 0x4d9   :  { %v9911_v22 = vor.u32 %v11025_v44, %v9908_v33  ;;  %v10993_v44 = vld [vmem:[#allocation8 + $0x84] sm:$0xf]  ;;  %v9779_v33 = vor.u32 %v10995_v55, %v9778_v37  ;;  %v9898_v37 = vld [vmem:[#allocation8 + $0x168] sm:$0xf]  ;;  %v11024_v55 = vld [vmem:[#allocation8 + $0x174] sm:$0xf0] }
 0x4da   :  { %5607 = vmatpush.bf16.msra.mxu0 %v9664_v45  ;;  %5633 = vmatpush.bf16.msra.mxu2 %v9672_v48  ;;  %v11021_v45 = vld [vmem:[#allocation8 + $0x164] sm:$0xf]  ;;  %v9892_v48 = vld [vmem:[#allocation8 + $0x170] sm:$0xf0] }
 0x4dc   :  { %5625 = vmatpush.bf16.msra.mxu1 %v9588_v49  ;;  %5651 = vmatpush.bf16.msra.mxu3 %v9596_v27  ;;  %v9895_v49 = vor.u32 %v11021_v45, %v9892_v48 }
 0x4de   :  { %5608 = vmatpush.bf16.msra.mxu0 %v9648_v31  ;;  %5634 = vmatpush.bf16.msra.mxu2 %v9656_v11  ;;  %v11005_v31 = vld [vmem:[#allocation8 + $0xe4] sm:$0xf]  ;;  %v9828_v11 = vld [vmem:[#allocation8 + $0xf0] sm:$0xf0] }
 0x4df   :  { %5626 = vmatmul.bf16.vlgmr.msra.gmra.mxu1 %v12356_v17  ;;  %5652 = vmatmul.bf16.vlgmr.msra.gmra.mxu3 %v12356_v17  ;;  %v9831_v23 = vor.u32 %v11005_v31, %v9828_v11  ;;  %v9762_v31 = vld [vmem:[#allocation8 + $0x60] sm:$0xf]  ;;  %v10991_v11 = vld [vmem:[#allocation8 + $0x6c] sm:$0xf0] }
 0x4e0   :  { %6137 = vmatpush.bf16.msrb.mxu1 %v9955_v40  ;;  %6163 = vmatpush.bf16.msrb.mxu3 %v9959_v42  ;;  %v9796_v40 = vld [vmem:[#allocation8 + $0xb0] sm:$0xf0]  ;;  %v11011_v42 = vld [vmem:[#allocation8 + $0x10c] sm:$0xf0] }
 0x4e1   :  { %5294 = vmatmul.bf16.vlgmr.msrb.gmra.mxu0 %v12356_v17  ;;  %5320 = vmatmul.bf16.vlgmr.msrb.gmra.mxu2 %v12356_v17  ;;  %v9799_v46 = vor.u32 %v10997_v14, %v9796_v40  ;;  %v9843_v18 = vor.u32 %v11011_v42, %v9842_v35  ;;  %v11026_v14 = vld [vmem:[#allocation8 + $0x18c] sm:$0xf] }
 0x4e2   :  { %5609 = vmatpush.bf16.msra.mxu0 %v9632_v6  ;;  %5635 = vmatpush.bf16.msra.mxu2 %v9640_v63  ;;  %v9876_v6 = vld [vmem:[#allocation8 + $0x150] sm:$0xf0]  ;;  %v12373_v63 = vld [vmem:[%s12714_s3] sm:$0xf]  ;;  %v9578_v35 = vld [vmem:[%s12711_s0 + $0xc8] sm:$0xff] }
 0x4e3   :  { %v9879_v20 = vor.u32 %v11017_v54, %v9876_v6  ;;  %v4906_v21 = vperm.slane %v12373_v63, 0  ;;  %v9763_v54 = vor.u32 %v10991_v11, %v9762_v31  ;;  %v9764_v6 = vld [vmem:[#allocation8 + $0x70] sm:$0xf0]  ;;  %v4909_v31 = vperm.slane %v12373_v63, 3 }
 0x4e4   :  { %6138 = vmatpush.bf16.msrb.mxu1 %v9939_v0  ;;  %6164 = vmatpush.bf16.msrb.mxu3 %v9943_v24  ;;  %v9844_v0 = vld [vmem:[#allocation8 + $0x110] sm:$0xf0] }
 0x4e5   :  { %v9847_v24 = vor.u32 %v11009_v19, %v9844_v0  ;;  %v10983_v19 = vld [vmem:[#allocation8 + $0x2c] sm:$0xf0]  ;;  %v10981_v0 = vld [vmem:[#allocation8 + $0x24] sm:$0xf] }
 0x4e6   :  { %5610 = vmatpush.bf16.msra.mxu0 %v9616_v50  ;;  %5636 = vmatpush.bf16.msra.mxu2 %v9624_v5  ;;  %v11001_v50 = vld [vmem:[#allocation8 + $0xc4] sm:$0xf]  ;;  %v9811_v5 = vor.u32 %v11003_v51, %v9810_v7  ;;  %v11032_v7 = vld [vmem:[#allocation8 + $0x1b4] sm:$0xf0]  ;;  %v11030_v51 = vld [vmem:[#allocation8 + $0x1ac] sm:$0xf] }
 0x4e7   :  { %v9815_v47 = vor.u32 %v11001_v50, %v9812_v26  ;;  %v9932_v26 = vld [vmem:[#allocation8 + $0x1b8] sm:$0xf0] }
 0x4e8   :  { %6165 = vmatpush.bf16.msrb.mxu3 %v9927_v28 }
 0x4ea   :  { %5611 = vmatpush.bf16.msra.mxu0 %v9600_v4  ;;  %5637 = vmatpush.bf16.msra.mxu2 %v9608_v13  ;;  %v9859_v4 = vor.u32 %v11015_v25, %v9858_v16  ;;  %v11013_v13 = vld [vmem:[#allocation8 + $0x124] sm:$0xf]  ;;  %v9935_v25 = vor.u32 %v11030_v51, %v9932_v26  ;;  %v9884_v26 = vld [vmem:[#allocation8 + $0x158] sm:$0xf0] }
 0x4eb   :  { %v9863_v58 = vor.u32 %v11013_v13, %v9860_v43 }
 0x4ec   :  { %6166 = vmatpush.bf16.msrb.mxu3 %v9911_v22  ;;  %v9780_v22 = vld [vmem:[#allocation8 + $0x90] sm:$0xf0] }
 0x4ed   :  { %v9783_v34 = vor.u32 %v10993_v44, %v9780_v22  ;;  %v9899_v44 = vor.u32 %v11024_v55, %v9898_v37 }
 0x4ee   :  { %5612 = vmatpush.bf16.msra.mxu0 %v9584_v52  ;;  %5638 = vmatpush.bf16.msra.mxu2 %v9592_v61  ;;  %v9794_v52 = vld [vmem:[#allocation8 + $0xa0] sm:$0xf]  ;;  %v10999_v61 = vld [vmem:[#allocation8 + $0xac] sm:$0xf0] }
 0x4ef   :  { %v9795_v60 = vor.u32 %v10999_v61, %v9794_v52  ;;  %v9914_v52 = vld [vmem:[#allocation8 + $0x188] sm:$0xf]  ;;  %v11028_v61 = vld [vmem:[#allocation8 + $0x194] sm:$0xf0] }
 0x4f0   :  { %6167 = vmatpush.bf16.msrb.mxu3 %v9895_v49  ;;  %v4907_v49 = vperm.slane %v12373_v63, 1  ;;  %v9915_v42 = vor.u32 %v11028_v61, %v9914_v52 }
 0x4f1   :  { %5613 = vmatmul.bf16.vlgmr.msra.gmra.mxu0 %v12356_v17  ;;  %5639 = vmatmul.bf16.vlgmr.msra.gmra.mxu2 %v12356_v17  ;;  %v9923_v17 = vor.u32 %v11031_v10, %v9922_v8  ;;  %v11040_v8 = vld [vmem:[#allocation8 + $0x1f4] sm:$0xf0]  ;;  %v11038_v10 = vld [vmem:[#allocation8 + $0x1ec] sm:$0xf] }
 0x4f2   :  { %6124 = vmatpush.bf16.msrb.mxu0 %v9827_v57  ;;  %6150 = vmatpush.bf16.msrb.mxu2 %v9831_v23  ;;  %v9963_v36 = vor.u32 %v11040_v8, %v9962_v12  ;;  %v9967_v28 = vor.u32 %v11038_v10, %v9964_v2  ;;  %v9732_v10 = vld [vmem:[#allocation8 + $0x30] sm:$0xf0] }
 0x4f3   :  { %6139 = vmatpush.bf16.msrb.mxu1 %v9923_v17 }
 0x4f4   :  { %6168 = vmatpush.bf16.msrb.mxu3 %v9879_v20  ;;  %v9930_v20 = vld [vmem:[#allocation8 + $0x1a8] sm:$0xf] }
 0x4f6   :  { %6125 = vmatpush.bf16.msrb.mxu0 %v9811_v5  ;;  %6151 = vmatpush.bf16.msrb.mxu2 %v9815_v47  ;;  %v9931_v5 = vor.u32 %v11032_v7, %v9930_v20  ;;  %v9746_v47 = vld [vmem:[#allocation8 + $0x40] sm:$0xf]  ;;  %v9882_v20 = vld [vmem:[#allocation8 + $0x148] sm:$0xf] }
 0x4f7   :  { %6140 = vmatpush.bf16.msrb.mxu1 %v9907_v29 }
 0x4f8   :  { %6169 = vmatpush.bf16.msrb.mxu3 %v9863_v58 }
 0x4fa   :  { %6126 = vmatpush.bf16.msrb.mxu0 %v9795_v60  ;;  %6152 = vmatpush.bf16.msrb.mxu2 %v9799_v46  ;;  %v9916_v46 = vld [vmem:[#allocation8 + $0x198] sm:$0xf0] }
 0x4fb   :  { %6141 = vmatpush.bf16.msrb.mxu1 %v9891_v38  ;;  %v11036_v38 = vld [vmem:[#allocation8 + $0x1d4] sm:$0xf0] }
 0x4fc   :  { %6170 = vmatpush.bf16.msrb.mxu3 %v9847_v24  ;;  %v9947_v39 = vor.u32 %v11036_v38, %v9946_v32  ;;  %v9714_v32 = vld [vmem:[#allocation8] sm:$0xf] }
 0x4fe   :  { %6127 = vmatpush.bf16.msrb.mxu0 %v9779_v33  ;;  %6153 = vmatpush.bf16.msrb.mxu2 %v9783_v34  ;;  %v9900_v33 = vld [vmem:[#allocation8 + $0x178] sm:$0xf0] }
 0x4ff   :  { %6142 = vmatpush.bf16.msrb.mxu1 %v9875_v1 }
 0x500   :  { %6215 = vmatpush.bf16.msra.mxu3 %v9967_v28  ;;  %v9735_v28 = vor.u32 %v10981_v0, %v9732_v10 }
 0x502   :  { %6128 = vmatpush.bf16.msrb.mxu0 %v9763_v54  ;;  %v9580_v54 = vld [vmem:[%s12711_s0 + $0xd8] sm:$0xff] }
 0x503   :  { %6143 = vmatpush.bf16.msrb.mxu1 %v9859_v4  ;;  %v10987_v4 = vld [vmem:[#allocation8 + $0x4c] sm:$0xf0] }
 0x504   :  { %v9747_v43 = vor.u32 %v10987_v4, %v9746_v47 }
 0x506   :  { %6129 = vmatpush.bf16.msrb.mxu0 %v9747_v43 }
 0x507   :  { %6144 = vmatpush.bf16.msrb.mxu1 %v9843_v18  ;;  %v9730_v18 = vld [vmem:[#allocation8 + $0x20] sm:$0xf] }
 0x508   :  { %v9731_v8 = vor.u32 %v10983_v19, %v9730_v18 }
 0x50a   :  { %6130 = vmatpush.bf16.msrb.mxu0 %v9731_v8  ;;  %v11000_v8 = vld [vmem:[#allocation8 + $0xb4] sm:$0xf0] }
 0x50b   :  { %6189 = vmatpush.bf16.msra.mxu1 %v9963_v36 }
 0x50f   :  { %6190 = vmatpush.bf16.msra.mxu1 %v9947_v39 }
 0x513   :  { %6191 = vmatpush.bf16.msra.mxu1 %v9931_v5  ;;  %v11018_v5 = vld [vmem:[#allocation8 + $0x14c] sm:$0xf] }
 0x517   :  { %6192 = vmatpush.bf16.msra.mxu1 %v9915_v42 }
 0x51b   :  { %6193 = vmatpush.bf16.msra.mxu1 %v9899_v44 }
 0x53c   :  { %v12366_v41 = vpop.f32.mrf.mxu1 }
 0x542   :  { %v12368_v27 = vpop.f32.mrf.mxu3 }
 0x544   :  { %v5258_v3 = vpop.f32.mrf.mxu1 }
 0x545   :  { %v9948_v3 = vld [vmem:[#allocation8 + $0x1d8] sm:$0xf0] }
 0x546   :  { %v9951_v57 = vor.u32 %v11034_v53, %v9948_v3  ;;  %v9716_v53 = vld [vmem:[#allocation8 + $0x10] sm:$0xf0]  ;;  %v9834_v3 = vld [vmem:[#allocation8 + $0xe8] sm:$0xf] }
 0x548   :  { %6216 = vmatpush.bf16.msra.mxu3 %v9951_v57 }
 0x54a   :  { %v5284_v56 = vpop.f32.mrf.mxu3 }
 0x54b   :  { %v10985_v56 = vld [vmem:[#allocation8 + $0x44] sm:$0xf] }
 0x54c   :  { %v12376_v15 = vpop.f32.mrf.mxu1  ;;  %6217 = vmatpush.bf16.msra.mxu3 %v9935_v25  ;;  %v4908_v25 = vperm.slane %v12373_v63, 2 }
 0x54e   :  { %v5243_v17 = vpop.f32.mrf.mxu0 }
 0x54f   :  { %v5244_v29 = vadd.f32 %v5243_v17, %v4906_v21  ;;  %v9748_v21 = vld [vmem:[#allocation8 + $0x50] sm:$0xf0] }
 0x550   :  { %v9751_v58 = vor.u32 %v10985_v56, %v9748_v21  ;;  %v9818_v56 = vld [vmem:[#allocation8 + $0xc8] sm:$0xf]  ;;  %v11004_v21 = vld [vmem:[#allocation8 + $0xd4] sm:$0xf0] }
 0x551   :  { %v5257_v45 = vadd.f32 %v12366_v41, %v5244_v29  ;;  %v9767_v41 = vor.u32 %v10989_v62, %v9764_v6  ;;  %v11022_v29 = vld [vmem:[#allocation8 + $0x16c] sm:$0xf]  ;;  %v11008_v62 = vld [vmem:[#allocation8 + $0xf4] sm:$0xf0]  ;;  %v9819_v18 = vor.u32 %v11004_v21, %v9818_v56 }
 0x552   :  { %v12379_v48 = vpop.f32.mrf.mxu3  ;;  %v9903_v38 = vor.u32 %v11022_v29, %v9900_v33 }
 0x553   :  { %v9573_v23 = vmul.f32 -1.442695, %v5257_v45  ;;  %6154 = vmatpush.bf16.msrb.mxu2 %v9767_v41  ;;  %v10979_v45 = vld [vmem:[#allocation8 + $0xc] sm:$0xf0]  ;;  %v9836_v41 = vld [vmem:[#allocation8 + $0xf8] sm:$0xf0] }
 0x554   :  { %v5310_v9 = vpop.f32.mrf.mxu1  ;;  %v5269_v1 = vpop.f32.mrf.mxu2  ;;  %v9715_v39 = vor.u32 %v10979_v45, %v9714_v32  ;;  %v11010_v45 = vld [vmem:[#allocation8 + $0x10c] sm:$0xf] }
 0x555   :  { %11317 = vpow2.f32 %v9573_v23  ;;  %v5270_v50 = vadd.f32 %v5269_v1, %v4907_v49  ;;  %v10977_v49 = vld [vmem:[#allocation8 + $0x4] sm:$0xf]  ;;  %v11006_v23 = vld [vmem:[#allocation8 + $0xec] sm:$0xf]  ;;  %v9835_v1 = vor.u32 %v11008_v62, %v9834_v3 }
 0x556   :  { %v5245_v16 = vpop.f32.mrf.mxu0  ;;  %v9719_v11 = vor.u32 %v10977_v49, %v9716_v53  ;;  %6131 = vmatpush.bf16.msrb.mxu0 %v9715_v39  ;;  %v9839_v51 = vor.u32 %v11006_v23, %v9836_v41  ;;  %v9577_v39 = vld [vmem:[%s12711_s0 + $0xc0] sm:$0xff] }
 0x557   :  { %v5283_v13 = vadd.f32 %v12368_v27, %v5270_v50  ;;  %6155 = vmatpush.bf16.msrb.mxu2 %v9751_v58  ;;  %v9919_v27 = vor.u32 %v11026_v14, %v9916_v46  ;;  %v11020_v50 = vld [vmem:[#allocation8 + $0x154] sm:$0xf0]  ;;  %v11002_v58 = vld [vmem:[#allocation8 + $0xcc] sm:$0xf]  ;;  %v9887_v14 = vor.u32 %v11018_v5, %v9884_v26 }
 0x558   :  { %v9883_v61 = vor.u32 %v11020_v50, %v9882_v20  ;;  %v11016_v46 = vld [vmem:[#allocation8 + $0x134] sm:$0xf0]  ;;  %v9788_v50 = vld [vmem:[#allocation8 + $0x98] sm:$0xf0] }
 0x559   :  { %v9574_v60 = vmul.f32 -1.442695, %v5283_v13  ;;  %6218 = vmatpush.bf16.msra.mxu3 %v9919_v27  ;;  %v11014_v27 = vld [vmem:[#allocation8 + $0x12c] sm:$0xf] }
 0x55a   :  { %v5336_v40 = vpop.f32.mrf.mxu3  ;;  %6176 = vmatpush.bf16.msra.mxu0 %v9835_v1  ;;  %6194 = vmatpush.bf16.msra.mxu1 %v9883_v61  ;;  %v9786_v1 = vld [vmem:[#allocation8 + $0x88] sm:$0xf] }
 0x55b   :  { %v11318_v12 = vpop.eup %11317  ;;  %11319 = vpow2.f32 %v9574_v60  ;;  %6156 = vmatpush.bf16.msrb.mxu2 %v9735_v28  ;;  %v9820_v60 = vld [vmem:[#allocation8 + $0xd8] sm:$0xf0]  ;;  %v9866_v40 = vld [vmem:[#allocation8 + $0x128] sm:$0xf] }
 0x55c   :  { %v5627_v24 = vpop.f32.mrf.mxu1  ;;  %v12386_v2 = vadd.f32 1.0, %v11318_v12  ;;  %v5271_v36 = vpop.f32.mrf.mxu2  ;;  %v9823_v19 = vor.u32 %v11002_v58, %v9820_v60  ;;  %v9867_v0 = vor.u32 %v11016_v46, %v9866_v40  ;;  %v9868_v12 = vld [vmem:[#allocation8 + $0x138] sm:$0xf0]  ;;  %v9770_v61 = vld [vmem:[#allocation8 + $0x68] sm:$0xf] }
 0x55d   :  { %v5658_v17 = vadd.f32 %v9578_v35, %v5627_v24  ;;  %6219 = vmatpush.bf16.msra.mxu3 %v9903_v38  ;;  %v9802_v24 = vld [vmem:[#allocation8 + $0xa8] sm:$0xf]  ;;  %v10998_v36 = vld [vmem:[#allocation8 + $0xac] sm:$0xf]  ;;  %v9804_v28 = vld [vmem:[#allocation8 + $0xb8] sm:$0xf0]  ;;  %v9871_v29 = vor.u32 %v11014_v27, %v9868_v12 }
 0x55e   :  { %11321 = vrcp.f32 %v12386_v2  ;;  %v5295_v34 = vpop.f32.mrf.mxu0  ;;  %6177 = vmatpush.bf16.msra.mxu0 %v9819_v18  ;;  %v9803_v33 = vor.u32 %v11000_v8, %v9802_v24  ;;  %6195 = vmatpush.bf16.msra.mxu1 %v9867_v0  ;;  %v9807_v53 = vor.u32 %v10998_v36, %v9804_v28  ;;  %vm5348_vm6 = vweird.f32 %v12386_v2  ;;  %v9754_v12 = vld [vmem:[#allocation8 + $0x48] sm:$0xf]  ;;  %v10988_v24 = vld [vmem:[#allocation8 + $0x54] sm:$0xf0]  ;;  %v10986_v8 = vld [vmem:[#allocation8 + $0x4c] sm:$0xf] }
 0x55f   :  { %v9710_v22 = vmul.f32 -1.442695, %v5658_v17  ;;  %6157 = vmatpush.bf16.msrb.mxu2 %v9719_v11  ;;  %v5296_v10 = vadd.f32 %v5295_v34, %v4908_v25  ;;  %v11012_v34 = vld [vmem:[#allocation8 + $0x114] sm:$0xf0]  ;;  %v5354_v5 = vand.u32 2147483648, %v12386_v2 }
 0x560   :  { %v5352_v25 = vand.u32 2147483647, %v12386_v2  ;;  %v9756_v28 = vld [vmem:[#allocation8 + $0x58] sm:$0xf0] }
 0x561   :  { %v11320_v57 = vpop.eup %11319  ;;  %11323 = vpow2.f32 %v9710_v22  ;;  %6220 = vmatpush.bf16.msra.mxu3 %v9887_v14  ;;  %v9850_v22 = vld [vmem:[#allocation8 + $0x108] sm:$0xf]  ;;  %v5309_v11 = vadd.f32 %v12376_v15, %v5296_v10  ;;  %v10992_v14 = vld [vmem:[#allocation8 + $0x74] sm:$0xf0]  ;;  %v5355_v40 = vor.u32 1.1754944e-38, %v5354_v5 }
 0x562   :  { %v12390_v9 = vadd.f32 1.0, %v11320_v57  ;;  %v5653_v6 = vpop.f32.mrf.mxu3  ;;  %v9851_v3 = vor.u32 %v11012_v34, %v9850_v22  ;;  %v9852_v57 = vld [vmem:[#allocation8 + $0x118] sm:$0xf0]  ;;  %6178 = vmatpush.bf16.msra.mxu0 %v9803_v33  ;;  %vm5353_vm11 = vcmp.eq.f32.partialorder %v5352_v25, 8.507059e+37  ;;  %v9771_v18 = vor.u32 %v10992_v14, %v9770_v61  ;;  %v9738_v33 = vld [vmem:[#allocation8 + $0x28] sm:$0xf] }
 0x563   :  { %v5660_v13 = vadd.f32 %v9580_v54, %v5653_v6  ;;  %6202 = vmatpush.bf16.msra.mxu2 %v9839_v51  ;;  %v9855_v62 = vor.u32 %v11010_v45, %v9852_v57  ;;  %v10994_v51 = vld [vmem:[#allocation8 + $0x8c] sm:$0xf]  ;;  %v10984_v22 = vld [vmem:[#allocation8 + $0x34] sm:$0xf0]  ;;  %v9722_v57 = vld [vmem:[#allocation8 + $0x8] sm:$0xf] }
 0x564   :  { %v5629_v7 = vpop.f32.mrf.mxu1  ;;  %v12395_v16 = vpop.eup %11321  ;;  %11325 = vrcp.f32 %v12390_v9  ;;  %v5373_v23 = vand.u32 2147483648, %v12390_v9  ;;  %v5371_v54 = vand.u32 2147483647, %v12390_v9  ;;  %6196 = vmatpush.bf16.msra.mxu1 %v9851_v3  ;;  %vm5367_vm7 = vweird.f32 %v12390_v9  ;;  %v10982_v45 = vld [vmem:[#allocation8 + $0x2c] sm:$0xf] }
 0x565   :  { %v5321_v47 = vpop.f32.mrf.mxu2  ;;  %v5344_v4 = vmul.f32 %v12395_v16, %v12386_v2  ;;  %v9711_v17 = vmul.f32 -1.442695, %v5660_v13  ;;  %6221 = vmatpush.bf16.msra.mxu3 %v9871_v29  ;;  %vm5349_vm4 = vweird.f32 %v12395_v16  ;;  %v10996_v7 = vld [vmem:[#allocation8 + $0x94] sm:$0xf0]  ;;  %v9791_v21 = vor.u32 %v10994_v51, %v9788_v50  ;;  %v10028_v25 = vld [vmem:[#allocation6 + $0x70] sm:$0xf0] }
 0x566   :  { %v5322_v43 = vadd.f32 %v5321_v47, %v4909_v31  ;;  %v5297_v52 = vpop.f32.mrf.mxu0  ;;  %vm12425_vm8 = vmor %vm5348_vm6, %vm5349_vm4  ;;  %v9787_v56 = vor.u32 %v10996_v7, %v9786_v1  ;;  %vm5372_vm10 = vcmp.eq.f32.partialorder %v5371_v54, 8.507059e+37  ;;  %v9759_v29 = vor.u32 %v10986_v8, %v9756_v28  ;;  %v9724_v1 = vld [vmem:[#allocation8 + $0x18] sm:$0xf0] }
 0x567   :  { %v11324_v35 = vpop.eup %11323  ;;  %v5345_v42 = vsub.f32 1.0, %v5344_v4  ;;  %6203 = vmatpush.bf16.msra.mxu2 %v9823_v19 }
 0x568   :  { %v5335_v63 = vadd.f32 %v12379_v48, %v5322_v43  ;;  %v12404_v55 = vadd.f32 1.0, %v11324_v35  ;;  %v5374_v43 = vor.u32 1.1754944e-38, %v5373_v23  ;;  %6179 = vmatpush.bf16.msra.mxu0 %v9787_v56  ;;  %v10092_v56 = vld [vmem:[#allocation6 + $0xf0] sm:$0xf0] }
 0x569   :  { %v5346_v38 = vmul.f32 %v12395_v16, %v5345_v42  ;;  %6222 = vmatpush.bf16.msra.mxu3 %v9855_v62  ;;  %v10980_v62 = vld [vmem:[#allocation8 + $0x14] sm:$0xf0] }
 0x56a   :  { %v12402_v37 = vpop.eup %11325  ;;  %v9575_v44 = vmul.f32 -1.442695, %v5335_v63  ;;  %v5655_v48 = vpop.f32.mrf.mxu3  ;;  %v10990_v63 = vld [vmem:[#allocation8 + $0x6c] sm:$0xf]  ;;  %v9723_v7 = vor.u32 %v10980_v62, %v9722_v57  ;;  %vm5690_vm1 = vweird.f32 %v12404_v55  ;;  %v5696_v61 = vand.u32 2147483648, %v12404_v55 }
 0x56b   :  { %v5363_v32 = vmul.f32 %v12402_v37, %v12390_v9  ;;  %6204 = vmatpush.bf16.msra.mxu2 %v9807_v53  ;;  %vm5368_vm5 = vweird.f32 %v12402_v37  ;;  %v5347_v15 = vadd.f32 %v12395_v16, %v5346_v38  ;;  %v9755_v48 = vor.u32 %v10988_v24, %v9754_v12  ;;  %v10076_v12 = vld [vmem:[#allocation6 + $0xd0] sm:$0xf0]  ;;  %v11066_v24 = vld [vmem:[#allocation6 + $0xcc] sm:$0xf] }
 0x56c   :  { %11327 = vpow2.f32 %v9575_v44  ;;  %vm5369_vm9 = vmor %vm5367_vm7, %vm5368_vm5  ;;  %6180 = vmatpush.bf16.msra.mxu0 %v9771_v18  ;;  %v9739_v53 = vor.u32 %v10984_v22, %v9738_v33  ;;  %v5697_v28 = vor.u32 1.1754944e-38, %v5696_v61 }
 0x56d   :  { %v5323_v49 = vpop.f32.mrf.mxu2  ;;  %v5364_v31 = vsub.f32 1.0, %v5363_v32  ;;  %11329 = vpow2.f32 %v9711_v17  ;;  %v5351_v58 = vsel %vm12425_vm8, %v12395_v16, %v5347_v15  ;;  %v9772_v16 = vld [vmem:[#allocation8 + $0x78] sm:$0xf0]  ;;  %v9579_v15 = vld [vmem:[%s12711_s0 + $0xd0] sm:$0xff] }
 0x56e   :  { %11331 = vrcp.f32 %v12404_v55  ;;  %v5614_v6 = vpop.f32.mrf.mxu0  ;;  %v5356_v46 = vsel %vm5353_vm11, %v5355_v40, %v5351_v58  ;;  %v9775_v36 = vor.u32 %v10990_v63, %v9772_v16  ;;  %v9740_v49 = vld [vmem:[#allocation8 + $0x38] sm:$0xf0]  ;;  %v11070_v58 = vld [vmem:[#allocation6 + $0xec] sm:$0xf]  ;;  %v5694_v63 = vand.u32 2147483647, %v12404_v55 }
 0x56f   :  { %v5365_v41 = vmul.f32 %v12402_v37, %v5364_v31  ;;  %v5657_v20 = vadd.f32 %v9577_v39, %v5614_v6  ;;  %11333 = vtanh.f32 %v5309_v11  ;;  %6205 = vmatpush.bf16.msra.mxu2 %v9791_v21  ;;  %v9743_v11 = vor.u32 %v10982_v45, %v9740_v49  ;;  %v10978_v6 = vld [vmem:[#allocation8 + $0xc] sm:$0xf]  ;;  %v10068_v49 = vld [vmem:[#allocation6 + $0xb8] sm:$0xf0] }
 0x570   :  { %6181 = vmatpush.bf16.msra.mxu0 %v9755_v48  ;;  %v9727_v5 = vor.u32 %v10978_v6, %v9724_v1  ;;  %vm5695_vm5 = vcmp.eq.f32.partialorder %v5694_v63, 8.507059e+37  ;;  %v11062_v45 = vld [vmem:[#allocation6 + $0xac] sm:$0xf]  ;;  %v10044_v6 = vld [vmem:[#allocation6 + $0x90] sm:$0xf0] }
 0x571   :  { %v5366_v47 = vadd.f32 %v12402_v37, %v5365_v41  ;;  %v9709_v4 = vmul.f32 -1.442695, %v5657_v20  ;;  %v10071_v62 = vor.u32 %v11062_v45, %v10068_v49  ;;  %v11058_v1 = vld [vmem:[#allocation6 + $0x8c] sm:$0xf]  ;;  %v9988_v45 = vld [vmem:[#allocation6 + $0x18] sm:$0xf0] }
 0x572   :  { %v11328_v13 = vpop.eup %11327 }
 0x573   :  { %v11330_v9 = vpop.eup %11329  ;;  %v5370_v52 = vsel %vm5369_vm9, %v12402_v37, %v5366_v47  ;;  %v12437_v2 = vadd.f32 1.0, %v11328_v13  ;;  %11335 = vpow2.f32 %v9709_v4  ;;  %6206 = vmatpush.bf16.msra.mxu2 %v9775_v36  ;;  %v10084_v36 = vld [vmem:[#allocation6 + $0xd8] sm:$0xf0] }
 0x574   :  { %v12439_v60 = vpop.eup %11331  ;;  %v5375_v35 = vsel %vm5372_vm10, %v5374_v43, %v5370_v52  ;;  %v12445_v17 = vadd.f32 1.0, %v11330_v9  ;;  %6182 = vmatpush.bf16.msra.mxu0 %v9739_v53  ;;  %v11069_v43 = vld [vmem:[#allocation6 + $0xe4] sm:$0xf]  ;;  %v10100_v52 = vld [vmem:[#allocation6 + $0xf8] sm:$0xf0]  ;;  %v10087_v22 = vor.u32 %v11066_v24, %v10084_v36 }
 0x575   :  { %11337 = vrcp.f32 %v12437_v2  ;;  %v5640_v42 = vpop.f32.mrf.mxu2  ;;  %v5686_v19 = vmul.f32 %v12439_v60, %v12404_v55  ;;  %v5397_v0 = vmul.f32 %v5375_v35, %v12281_v30  ;;  %v11334_v10 = vpop.eup %11333  ;;  %v5393_v54 = vand.u32 2147483648, %v12437_v2  ;;  %v11050_v35 = vld [vmem:[#allocation6 + $0x4c] sm:$0xf]  ;;  %v11068_v24 = vld [vmem:[#allocation6 + $0xd4] sm:$0xf0] }
 0x576   :  { %v5616_v27 = vpop.f32.mrf.mxu0  ;;  %v5398_v37 = vmul.f32 %v11334_v10, %v5356_v46  ;;  %11339 = vrcp.f32 %v12445_v17  ;;  %v5391_v20 = vand.u32 2147483647, %v12437_v2  ;;  %vm5387_vm13 = vweird.f32 %v12437_v2  ;;  %v11046_v36 = vld [vmem:[#allocation6 + $0x2c] sm:$0xf] }
 0x577   :  { %v5687_v38 = vsub.f32 1.0, %v5686_v19  ;;  %6207 = vmatpush.bf16.msra.mxu2 %v9759_v29  ;;  %vm5691_vm14 = vweird.f32 %v12439_v60  ;;  %v5394_v47 = vor.u32 1.1754944e-38, %v5393_v54  ;;  %v5659_v4 = vadd.f32 %v9579_v15, %v5640_v42  ;;  %v11065_v27 = vld [vmem:[#allocation6 + $0xc4] sm:$0xf] }
 0x578   :  { %v12447_v34 = vadd.f32 %v5398_v37, %v5397_v0  ;;  %vm5392_vm0 = vcmp.eq.f32.partialorder %v5391_v20, 8.507059e+37  ;;  %6183 = vmatpush.bf16.msra.mxu0 %v9723_v7  ;;  %vm12479_vm2 = vmor %vm5690_vm1, %vm5691_vm14  ;;  %v10095_v46 = vor.u32 %v11069_v43, %v10092_v56  ;;  %v10103_v0 = vor.u32 %v11070_v58, %v10100_v52  ;;  %v10090_v43 = vld [vmem:[#allocation6 + $0xe0] sm:$0xf]  ;;  %v11071_v56 = vld [vmem:[#allocation6 + $0xec] sm:$0xf0] }
 0x579   :  { %v11336_v44 = vpop.eup %11335  ;;  %v5688_v23 = vmul.f32 %v12439_v60, %v5687_v38  ;;  %v10079_v33 = vor.u32 %v11065_v27, %v10076_v12  ;;  %v10060_v38 = vld [vmem:[#allocation6 + $0xb0] sm:$0xf0]  ;;  %vm5710_vm9 = vweird.f32 %v12445_v17  ;;  %v5714_v20 = vand.u32 2147483647, %v12445_v17  ;;  %v10098_v58 = vld [vmem:[#allocation6 + $0xe8] sm:$0xf] }
 0x57a   :  { %v12449_v30 = vadd.f32 1.0, %v11336_v44  ;;  %v11072_v52 = vld [vmem:[#allocation6 + $0xf4] sm:$0xf0]  ;;  %v11067_v27 = vld [vmem:[#allocation6 + $0xcc] sm:$0xf0] }
 0x57b   :  { %v11338_v32 = vpop.eup %11337  ;;  %6208 = vmatpush.bf16.msra.mxu2 %v9743_v11  ;;  %v5689_v13 = vadd.f32 %v12439_v60, %v5688_v23  ;;  %v11057_v23 = vld [vmem:[#allocation6 + $0x84] sm:$0xf]  ;;  %vm5715_vm11 = vcmp.eq.f32.partialorder %v5714_v20, 8.507059e+37  ;;  %v10082_v12 = vld [vmem:[#allocation6 + $0xc8] sm:$0xf] }
 0x57c   :  { %v5383_v39 = vmul.f32 %v11338_v32, %v12437_v2  ;;  %11341 = vrcp.f32 %v12449_v30  ;;  %vm5388_vm12 = vweird.f32 %v11338_v32  ;;  %v12461_v51 = vpop.eup %11339  ;;  %v5677_v18 = vand.u32 2147483648, %v12449_v30  ;;  %v11056_v20 = vld [vmem:[#allocation6 + $0x74] sm:$0xf0] }
 0x57d   :  { %v5642_v3 = vpop.f32.mrf.mxu2  ;;  %11343 = vtanh.f32 %v12447_v34  ;;  %vm12465_vm15 = vmor %vm5387_vm13, %vm5388_vm12  ;;  %v5706_v14 = vmul.f32 %v12461_v51, %v12445_v17  ;;  %v5693_v19 = vsel %vm12479_vm2, %v12439_v60, %v5689_v13  ;;  %v5675_v10 = vand.u32 2147483647, %v12449_v30  ;;  %v11063_v60 = vld [vmem:[#allocation6 + $0xac] sm:$0xf0] }
 0x57e   :  { %v5384_v31 = vsub.f32 1.0, %v5383_v39  ;;  %11345 = vtanh.f32 %v5659_v4  ;;  %vm5671_vm4 = vweird.f32 %v12449_v30  ;;  %v5678_v48 = vor.u32 1.1754944e-38, %v5677_v18  ;;  %v10036_v4 = vld [vmem:[#allocation6 + $0x78] sm:$0xf0] }
 0x57f   :  { %6209 = vmatpush.bf16.msra.mxu2 %v9727_v5  ;;  %v5707_v37 = vsub.f32 1.0, %v5706_v14  ;;  %v5698_v29 = vsel %vm5695_vm5, %v5697_v28, %v5693_v19  ;;  %vm5676_vm7 = vcmp.eq.f32.partialorder %v5675_v10, 8.507059e+37  ;;  %vm5711_vm8 = vweird.f32 %v12461_v51  ;;  %v9996_v10 = vld [vmem:[#allocation6 + $0x30] sm:$0xf0]  ;;  %v10004_v28 = vld [vmem:[#allocation6 + $0x38] sm:$0xf0] }
 0x580   :  { %v5385_v41 = vmul.f32 %v11338_v32, %v5384_v31  ;;  %v5720_v57 = vmul.f32 %v5698_v29, %v12340_v59  ;;  %v5716_v59 = vand.u32 2147483648, %v12445_v17  ;;  %vm12513_vm10 = vmor %vm5710_vm9, %vm5711_vm8  ;;  %v10007_v29 = vor.u32 %v11046_v36, %v10004_v28 }
 0x581   :  { %v5708_v53 = vmul.f32 %v12461_v51, %v5707_v37  ;;  %v10083_v37 = vor.u32 %v11068_v24, %v10082_v12  ;;  %v11129_v12 = vld [vmem:[#allocation8 + $0x1c4] sm:$0xf] }
 0x582   :  { %v5386_v50 = vadd.f32 %v11338_v32, %v5385_v41  ;;  %v11342_v26 = vpop.eup %11341  ;;  %v10052_v41 = vld [vmem:[#allocation6 + $0x98] sm:$0xf0]  ;;  %v5717_v17 = vor.u32 1.1754944e-38, %v5716_v59 }
 0x583   :  { %v5667_v21 = vmul.f32 %v11342_v26, %v12449_v30  ;;  %v11344_v2 = vpop.eup %11343  ;;  %vm5672_vm3 = vweird.f32 %v11342_v26  ;;  %v5709_v15 = vadd.f32 %v12461_v51, %v5708_v53  ;;  %v10055_v5 = vor.u32 %v11058_v1, %v10052_v41  ;;  %v10026_v1 = vld [vmem:[#allocation6 + $0x60] sm:$0xf]  ;;  %v11055_v41 = vld [vmem:[#allocation6 + $0x6c] sm:$0xf0] }
 0x584   :  { %v5390_v9 = vsel %vm12465_vm15, %v11338_v32, %v5386_v50  ;;  %vm12497_vm6 = vmor %vm5671_vm4, %vm5672_vm3  ;;  %v11061_v32 = vld [vmem:[#allocation6 + $0xa4] sm:$0xf]  ;;  %v11346_v39 = vpop.eup %11345  ;;  %v10047_v50 = vor.u32 %v11057_v23, %v10044_v6  ;;  %v10027_v59 = vor.u32 %v11055_v41, %v10026_v1  ;;  %v10221_v41 = vld [vmem:[#allocation8 + $0xe0] sm:$0xf] }
 0x585   :  { %v5395_v40 = vsel %vm5392_vm0, %v5394_v47, %v5390_v9  ;;  %v5668_v42 = vsub.f32 1.0, %v5667_v21  ;;  %v10063_v11 = vor.u32 %v11061_v32, %v10060_v38  ;;  %v11054_v47 = vld [vmem:[#allocation6 + $0x6c] sm:$0xf]  ;;  %v5713_v13 = vsel %vm12513_vm10, %v12461_v51, %v5709_v15  ;;  %v11041_v32 = vld [vmem:[#allocation6 + $0x4] sm:$0xf] }
 0x586   :  { %v5401_v16 = vmul.f32 %v11344_v2, %v5395_v40  ;;  %v10039_v9 = vor.u32 %v11054_v47, %v10036_v4  ;;  %v11049_v2 = vld [vmem:[#allocation6 + $0x44] sm:$0xf]  ;;  %v5718_v14 = vsel %vm5715_vm11, %v5717_v17, %v5713_v13  ;;  %v10012_v40 = vld [vmem:[#allocation6 + $0x50] sm:$0xf0]  ;;  %v10091_v51 = vor.u32 %v11071_v56, %v10090_v43  ;;  %v10034_v15 = vld [vmem:[#allocation6 + $0x68] sm:$0xf] }
 0x587   :  { %v5669_v8 = vmul.f32 %v11342_v26, %v5668_v42  ;;  %v10020_v42 = vld [vmem:[#allocation6 + $0x58] sm:$0xf0]  ;;  %v10015_v19 = vor.u32 %v11049_v2, %v10012_v40  ;;  %v9980_v38 = vld [vmem:[#allocation6 + $0x10] sm:$0xf0]  ;;  %v10035_v7 = vor.u32 %v11056_v20, %v10034_v15  ;;  %v9994_v13 = vld [vmem:[#allocation6 + $0x20] sm:$0xf] }
 0x588   :  { %9576 = vst [vmem:[%s12717_s6 + $0x28] sm:$0xff] %v5401_v16  ;;  %v12492_v55 = vpack.c.bf16 %v5401_v16, %v5401_v16  ;;  %v10099_v16 = vor.u32 %v11072_v52, %v10098_v58  ;;  %v9983_v53 = vor.u32 %v11041_v32, %v9980_v38  ;;  %v11047_v17 = vld [vmem:[#allocation6 + $0x2c] sm:$0xf0]  ;;  %v10002_v43 = vld [vmem:[#allocation6 + $0x28] sm:$0xf] }
 0x589   :  { %v5670_v44 = vadd.f32 %v11342_v26, %v5669_v8  ;;  %v11045_v8 = vld [vmem:[#allocation6 + $0x24] sm:$0xf]  ;;  %v11048_v56 = vld [vmem:[#allocation6 + $0x34] sm:$0xf0]  ;;  %v9978_v58 = vld [vmem:[#allocation6] sm:$0xf] }
 0x58a   :  { %6145 = vmatmul.bf16.vlgmr.msrb.gmra.mxu1 %v12492_v55  ;;  %6171 = vmatmul.bf16.vlgmr.msrb.gmra.mxu3 %v12492_v55  ;;  %v11043_v52 = vld [vmem:[#allocation6 + $0xc] sm:$0xf0]  ;;  %v9986_v2 = vld [vmem:[#allocation6 + $0x8] sm:$0xf]  ;;  %v11121_v32 = vld [vmem:[#allocation8 + $0x184] sm:$0xf] }
 0x58b   :  { %6508 = vmatpush.bf16.msrb.mxu1 %v10095_v46  ;;  %6534 = vmatpush.bf16.msrb.mxu3 %v10103_v0  ;;  %v5674_v30 = vsel %vm12497_vm6, %v11342_v26, %v5670_v44  ;;  %v11053_v26 = vld [vmem:[#allocation6 + $0x64] sm:$0xf]  ;;  %v10074_v46 = vld [vmem:[#allocation6 + $0xc0] sm:$0xf]  ;;  %v10023_v0 = vor.u32 %v11050_v35, %v10020_v42  ;;  %v11103_v15 = vld [vmem:[#allocation8 + $0xec] sm:$0xf0] }
 0x58c   :  { %v5679_v3 = vsel %vm5676_vm7, %v5678_v48, %v5674_v30  ;;  %v10031_v21 = vor.u32 %v11053_v26, %v10028_v25  ;;  %v10058_v44 = vld [vmem:[#allocation6 + $0xa0] sm:$0xf]  ;;  %v9999_v48 = vor.u32 %v11045_v8, %v9996_v10  ;;  %v11042_v30 = vld [vmem:[#allocation6 + $0xc] sm:$0xf]  ;;  %v10018_v26 = vld [vmem:[#allocation6 + $0x48] sm:$0xf] }
 0x58d   :  { %v5721_v31 = vmul.f32 %v11346_v39, %v5679_v3  ;;  %v10059_v49 = vor.u32 %v11063_v60, %v10058_v44  ;;  %v9991_v3 = vor.u32 %v11042_v30, %v9988_v45  ;;  %v11052_v25 = vld [vmem:[#allocation6 + $0x54] sm:$0xf0]  ;;  %v10349_v42 = vld [vmem:[#allocation8 + $0x1e0] sm:$0xf]  ;;  %v10335_v10 = vld [vmem:[#allocation8 + $0x1d0] sm:$0xf0] }
 0x58e   :  { %v10019_v4 = vor.u32 %v11052_v25, %v10018_v26  ;;  %v10338_v36 = vor.u32 %v11129_v12, %v10335_v10  ;;  %v10319_v60 = vld [vmem:[#allocation8 + $0x1b0] sm:$0xf0]  ;;  %v11101_v20 = vld [vmem:[#allocation8 + $0xe4] sm:$0xf]  ;;  %v10189_v10 = vld [vmem:[#allocation8 + $0xa0] sm:$0xf] }
 0x58f   :  { %6509 = vmatpush.bf16.msrb.mxu1 %v10079_v33  ;;  %6535 = vmatpush.bf16.msrb.mxu3 %v10087_v22  ;;  %v12506_v54 = vadd.f32 %v5721_v31, %v5720_v57  ;;  %v10066_v33 = vld [vmem:[#allocation6 + $0xa8] sm:$0xf]  ;;  %v11064_v22 = vld [vmem:[#allocation6 + $0xb4] sm:$0xf0]  ;;  %v10042_v57 = vld [vmem:[#allocation6 + $0x80] sm:$0xf] }
 0x590   :  { %v10067_v39 = vor.u32 %v11064_v22, %v10066_v33  ;;  %v11059_v31 = vld [vmem:[#allocation6 + $0x8c] sm:$0xf0]  ;;  %v10301_v33 = vld [vmem:[#allocation8 + $0x180] sm:$0xf]  ;;  %v10303_v45 = vld [vmem:[#allocation8 + $0x190] sm:$0xf0] }
 0x591   :  { %11347 = vtanh.f32 %v12506_v54  ;;  %v10043_v23 = vor.u32 %v11059_v31, %v10042_v57  ;;  %v11123_v22 = vld [vmem:[#allocation8 + $0x18c] sm:$0xf0]  ;;  %v11117_v31 = vld [vmem:[#allocation8 + $0x164] sm:$0xf] }
 0x592   :  { %v10302_v30 = vor.u32 %v11123_v22, %v10301_v33  ;;  %v11119_v57 = vld [vmem:[#allocation8 + $0x16c] sm:$0xf0] }
 0x593   :  { %6510 = vmatpush.bf16.msrb.mxu1 %v10063_v11  ;;  %6536 = vmatpush.bf16.msrb.mxu3 %v10071_v62  ;;  %v10050_v11 = vld [vmem:[#allocation6 + $0x88] sm:$0xf]  ;;  %v11060_v62 = vld [vmem:[#allocation6 + $0x94] sm:$0xf0] }
 0x594   :  { %v10051_v6 = vor.u32 %v11060_v62, %v10050_v11  ;;  %v10287_v62 = vld [vmem:[#allocation8 + $0x170] sm:$0xf0] }
 0x597   :  { %6511 = vmatpush.bf16.msrb.mxu1 %v10047_v50  ;;  %6537 = vmatpush.bf16.msrb.mxu3 %v10055_v5  ;;  %v11348_v61 = vpop.eup %11347  ;;  %v10010_v50 = vld [vmem:[#allocation6 + $0x40] sm:$0xf]  ;;  %v11051_v5 = vld [vmem:[#allocation6 + $0x4c] sm:$0xf0] }
 0x598   :  { %v5724_v63 = vmul.f32 %v11348_v61, %v5718_v14  ;;  %v10011_v47 = vor.u32 %v11051_v5, %v10010_v50  ;;  %v11044_v61 = vld [vmem:[#allocation6 + $0x14] sm:$0xf0]  ;;  %v9979_v14 = vor.u32 %v11043_v52, %v9978_v58  ;;  %v10223_v50 = vld [vmem:[#allocation8 + $0xf0] sm:$0xf0]  ;;  %v10269_v5 = vld [vmem:[#allocation8 + $0x140] sm:$0xf] }
 0x599   :  { %v9987_v40 = vor.u32 %v11044_v61, %v9986_v2  ;;  %v10205_v58 = vld [vmem:[#allocation8 + $0xc0] sm:$0xf]  ;;  %v11099_v52 = vld [vmem:[#allocation8 + $0xcc] sm:$0xf0] }
 0x59a   :  { %6197 = vmatmul.bf16.vlgmr.msra.gmra.mxu1 %v12492_v55  ;;  %6223 = vmatmul.bf16.vlgmr.msra.gmra.mxu3 %v12492_v55  ;;  %v12522_v18 = vpack.c.bf16 %v5724_v63, %v5724_v63  ;;  %v10075_v55 = vor.u32 %v11067_v27, %v10074_v46  ;;  %v11135_v63 = vld [vmem:[#allocation8 + $0x1ec] sm:$0xf0]  ;;  %v10351_v46 = vld [vmem:[#allocation8 + $0x1f0] sm:$0xf0]  ;;  %v10206_v61 = vor.u32 %v11099_v52, %v10205_v58  ;;  %v11085_v52 = vld [vmem:[#allocation8 + $0x64] sm:$0xf] }
 0x59b   :  { %6512 = vmatpush.bf16.msrb.mxu1 %v10031_v21  ;;  %6538 = vmatpush.bf16.msrb.mxu3 %v10039_v9  ;;  %v9995_v21 = vor.u32 %v11047_v17, %v9994_v13  ;;  %v10003_v9 = vor.u32 %v11048_v56, %v10002_v43  ;;  %v11113_v13 = vld [vmem:[#allocation8 + $0x144] sm:$0xf]  ;;  %v10271_v17 = vld [vmem:[#allocation8 + $0x150] sm:$0xf0] }
 0x59c   :  { %6132 = vmatmul.bf16.vlgmr.msrb.gmra.mxu0 %v12522_v18  ;;  %6158 = vmatmul.bf16.vlgmr.msrb.gmra.mxu2 %v12522_v18  ;;  %v10274_v56 = vor.u32 %v11113_v13, %v10271_v17  ;;  %v10343_v13 = vld [vmem:[#allocation8 + $0x1d8] sm:$0xf0] }
 0x59d   :  { %6495 = vmatpush.bf16.msrb.mxu0 %v10091_v51  ;;  %6521 = vmatpush.bf16.msrb.mxu2 %v10099_v16  ;;  %v11133_v51 = vld [vmem:[#allocation8 + $0x1e4] sm:$0xf]  ;;  %v10350_v16 = vor.u32 %v11135_v63, %v10349_v42 }
 0x59e   :  { %v10354_v27 = vor.u32 %v11133_v51, %v10351_v46  ;;  %v11111_v51 = vld [vmem:[#allocation8 + $0x12c] sm:$0xf0]  ;;  %v10255_v46 = vld [vmem:[#allocation8 + $0x130] sm:$0xf0] }
 0x59f   :  { %6513 = vmatpush.bf16.msrb.mxu1 %v10015_v19  ;;  %6539 = vmatpush.bf16.msrb.mxu3 %v10023_v0  ;;  %v10333_v19 = vld [vmem:[#allocation8 + $0x1c0] sm:$0xf]  ;;  %v11131_v0 = vld [vmem:[#allocation8 + $0x1cc] sm:$0xf0] }
 0x5a0   :  { %v10334_v8 = vor.u32 %v11131_v0, %v10333_v19 }
 0x5a1   :  { %6496 = vmatpush.bf16.msrb.mxu0 %v10075_v55  ;;  %6522 = vmatpush.bf16.msrb.mxu2 %v10083_v37  ;;  %v11127_v55 = vld [vmem:[#allocation8 + $0x1ac] sm:$0xf0]  ;;  %v11125_v37 = vld [vmem:[#allocation8 + $0x1a4] sm:$0xf] }
 0x5a3   :  { %6514 = vmatpush.bf16.msrb.mxu1 %v9999_v48  ;;  %6540 = vmatpush.bf16.msrb.mxu3 %v10007_v29  ;;  %v10322_v48 = vor.u32 %v11125_v37, %v10319_v60  ;;  %v12537_v29 = vld [vmem:[%s12714_s3] sm:$0xf] }
 0x5a4   :  { %v10237_v37 = vld [vmem:[#allocation8 + $0x100] sm:$0xf] }
 0x5a5   :  { %6497 = vmatpush.bf16.msrb.mxu0 %v10059_v49  ;;  %6523 = vmatpush.bf16.msrb.mxu2 %v10067_v39  ;;  %v10306_v49 = vor.u32 %v11121_v32, %v10303_v45  ;;  %v11105_v32 = vld [vmem:[#allocation8 + $0x104] sm:$0xf]  ;;  %v11136_v45 = vld [vmem:[#allocation8 + $0x1f4] sm:$0xf0] }
 0x5a7   :  { %6515 = vmatpush.bf16.msrb.mxu1 %v9983_v53  ;;  %6541 = vmatpush.bf16.msrb.mxu3 %v9991_v3  ;;  %v5796_v53 = vperm.slane %v12537_v29, 0  ;;  %v10285_v3 = vld [vmem:[#allocation8 + $0x160] sm:$0xf] }
 0x5a8   :  { %v10286_v11 = vor.u32 %v11119_v57, %v10285_v3 }
 0x5a9   :  { %6498 = vmatpush.bf16.msrb.mxu0 %v10043_v23  ;;  %6524 = vmatpush.bf16.msrb.mxu2 %v10051_v6  ;;  %v10290_v6 = vor.u32 %v11117_v31, %v10287_v62  ;;  %v10359_v31 = vld [vmem:[#allocation8 + $0x1f8] sm:$0xf0]  ;;  %v11091_v62 = vld [vmem:[#allocation8 + $0x8c] sm:$0xf0] }
 0x5aa   :  { %6516 = vmatmul.bf16.vlgmr.msrb.gmra.mxu1 %v12522_v18  ;;  %6542 = vmatmul.bf16.vlgmr.msrb.gmra.mxu3 %v12522_v18 }
 0x5ab   :  { %7027 = vmatpush.bf16.msra.mxu1 %v10350_v16  ;;  %7053 = vmatpush.bf16.msra.mxu3 %v10354_v27  ;;  %v11109_v16 = vld [vmem:[#allocation8 + $0x124] sm:$0xf] }
 0x5ac   :  { %6184 = vmatmul.bf16.vlgmr.msra.gmra.mxu0 %v12522_v18  ;;  %6210 = vmatmul.bf16.vlgmr.msra.gmra.mxu2 %v12522_v18  ;;  %v10258_v0 = vor.u32 %v11109_v16, %v10255_v46  ;;  %v11126_v46 = vld [vmem:[#allocation8 + $0x1ac] sm:$0xf] }
 0x5ad   :  { %6499 = vmatpush.bf16.msrb.mxu0 %v10027_v59  ;;  %6525 = vmatpush.bf16.msrb.mxu2 %v10035_v7  ;;  %v5797_v59 = vperm.slane %v12537_v29, 1  ;;  %v10222_v7 = vor.u32 %v11103_v15, %v10221_v41 }
 0x5af   :  { %7028 = vmatpush.bf16.msra.mxu1 %v10334_v8  ;;  %7054 = vmatpush.bf16.msra.mxu3 %v10338_v36  ;;  %v9973_v8 = vld [vmem:[%s12711_s0 + $0xe8] sm:$0xff]  ;;  %v11095_v36 = vld [vmem:[#allocation8 + $0xac] sm:$0xf0] }
 0x5b1   :  { %6500 = vmatpush.bf16.msrb.mxu0 %v10011_v47  ;;  %6526 = vmatpush.bf16.msrb.mxu2 %v10019_v4  ;;  %v10226_v47 = vor.u32 %v11101_v20, %v10223_v50  ;;  %v11115_v4 = vld [vmem:[#allocation8 + $0x14c] sm:$0xf0]  ;;  %v11089_v20 = vld [vmem:[#allocation8 + $0x84] sm:$0xf]  ;;  %v10341_v50 = vld [vmem:[#allocation8 + $0x1c8] sm:$0xf] }
 0x5b2   :  { %v10270_v43 = vor.u32 %v11115_v4, %v10269_v5  ;;  %v11132_v5 = vld [vmem:[#allocation8 + $0x1d4] sm:$0xf0] }
 0x5b3   :  { %7055 = vmatpush.bf16.msra.mxu3 %v10322_v48  ;;  %v10342_v17 = vor.u32 %v11132_v5, %v10341_v50 }
 0x5b5   :  { %6501 = vmatpush.bf16.msrb.mxu0 %v9995_v21  ;;  %6527 = vmatpush.bf16.msrb.mxu2 %v10003_v9 }
 0x5b7   :  { %7056 = vmatpush.bf16.msra.mxu3 %v10306_v49  ;;  %v11134_v49 = vld [vmem:[#allocation8 + $0x1ec] sm:$0xf] }
 0x5b8   :  { %v10362_v41 = vor.u32 %v11134_v49, %v10359_v31  ;;  %v10311_v49 = vld [vmem:[#allocation8 + $0x198] sm:$0xf0]  ;;  %v10125_v31 = vld [vmem:[#allocation8 + $0x20] sm:$0xf] }
 0x5b9   :  { %6502 = vmatpush.bf16.msrb.mxu0 %v9979_v14  ;;  %6528 = vmatpush.bf16.msrb.mxu2 %v9987_v40  ;;  %v11097_v14 = vld [vmem:[#allocation8 + $0xc4] sm:$0xf]  ;;  %v10207_v40 = vld [vmem:[#allocation8 + $0xd0] sm:$0xf0] }
 0x5ba   :  { %v10210_v63 = vor.u32 %v11097_v14, %v10207_v40  ;;  %v5799_v14 = vperm.slane %v12537_v29, 3 }
 0x5bb   :  { %7057 = vmatpush.bf16.msra.mxu3 %v10290_v6 }
 0x5bc   :  { %6503 = vmatmul.bf16.vlgmr.msrb.gmra.mxu0 %v12522_v18  ;;  %6529 = vmatmul.bf16.vlgmr.msrb.gmra.mxu2 %v12522_v18  ;;  %v10317_v18 = vld [vmem:[#allocation8 + $0x1a0] sm:$0xf] }
 0x5bd   :  { %v10318_v44 = vor.u32 %v11127_v55, %v10317_v18  ;;  %7014 = vmatpush.bf16.msra.mxu0 %v10222_v7  ;;  %7040 = vmatpush.bf16.msra.mxu2 %v10226_v47  ;;  %v10190_v18 = vor.u32 %v11095_v36, %v10189_v10  ;;  %v10191_v55 = vld [vmem:[#allocation8 + $0xb0] sm:$0xf0]  ;;  %v11083_v10 = vld [vmem:[#allocation8 + $0x4c] sm:$0xf0]  ;;  %v11081_v36 = vld [vmem:[#allocation8 + $0x44] sm:$0xf] }
 0x5bf   :  { %7029 = vmatpush.bf16.msra.mxu1 %v10318_v44  ;;  %7058 = vmatpush.bf16.msra.mxu3 %v10274_v56  ;;  %v11107_v44 = vld [vmem:[#allocation8 + $0x10c] sm:$0xf0]  ;;  %v10157_v56 = vld [vmem:[#allocation8 + $0x60] sm:$0xf] }
 0x5c0   :  { %v10238_v22 = vor.u32 %v11107_v44, %v10237_v37  ;;  %v5798_v44 = vperm.slane %v12537_v29, 2 }
 0x5c1   :  { %7015 = vmatpush.bf16.msra.mxu0 %v10206_v61  ;;  %7041 = vmatpush.bf16.msra.mxu2 %v10210_v63 }
 0x5c3   :  { %7030 = vmatpush.bf16.msra.mxu1 %v10302_v30  ;;  %7059 = vmatpush.bf16.msra.mxu3 %v10258_v0  ;;  %v10357_v30 = vld [vmem:[#allocation8 + $0x1e8] sm:$0xf] }
 0x5c4   :  { %v10358_v57 = vor.u32 %v11136_v45, %v10357_v30  ;;  %v11122_v45 = vld [vmem:[#allocation8 + $0x18c] sm:$0xf] }
 0x5c5   :  { %7016 = vmatpush.bf16.msra.mxu0 %v10190_v18 }
 0x5c7   :  { %7031 = vmatpush.bf16.msra.mxu1 %v10286_v11  ;;  %v10173_v11 = vld [vmem:[#allocation8 + $0x80] sm:$0xf] }
 0x5c8   :  { %v10174_v15 = vor.u32 %v11091_v62, %v10173_v11  ;;  %v11079_v11 = vld [vmem:[#allocation8 + $0x2c] sm:$0xf0]  ;;  %v10314_v62 = vor.u32 %v11122_v45, %v10311_v49 }
 0x5ca   :  { %7017 = vmatpush.bf16.msra.mxu0 %v10174_v15 }
 0x5cb   :  { %7032 = vmatpush.bf16.msra.mxu1 %v10270_v43 }
 0x607   :  { %v6146_v35 = vpop.f32.mrf.mxu1 }
 0x60d   :  { %v12532_v24 = vpop.f32.mrf.mxu3 }
 0x60f   :  { %v6148_v28 = vpop.f32.mrf.mxu1 }
 0x610   :  { %v11093_v28 = vld [vmem:[#allocation8 + $0xa4] sm:$0xf] }
 0x611   :  { %v10194_v33 = vor.u32 %v11093_v28, %v10191_v55  ;;  %v10143_v55 = vld [vmem:[#allocation8 + $0x50] sm:$0xf0] }
 0x612   :  { %v10146_v30 = vor.u32 %v11081_v36, %v10143_v55  ;;  %v10277_v55 = vld [vmem:[#allocation8 + $0x148] sm:$0xf] }
 0x613   :  { %7042 = vmatpush.bf16.msra.mxu2 %v10194_v33  ;;  %v11124_v33 = vld [vmem:[#allocation8 + $0x194] sm:$0xf0] }
 0x615   :  { %v6174_v38 = vpop.f32.mrf.mxu3 }
 0x617   :  { %v12539_v39 = vpop.f32.mrf.mxu1 }
 0x619   :  { %v6133_v23 = vpop.f32.mrf.mxu0 }
 0x61a   :  { %v6134_v1 = vadd.f32 %v6133_v23, %v5796_v53 }
 0x61c   :  { %v6147_v26 = vadd.f32 %v6146_v35, %v6134_v1  ;;  %v10253_v35 = vld [vmem:[#allocation8 + $0x120] sm:$0xf] }
 0x61d   :  { %v12543_v25 = vpop.f32.mrf.mxu3  ;;  %v10254_v19 = vor.u32 %v11111_v51, %v10253_v35  ;;  %v10325_v35 = vld [vmem:[#allocation8 + $0x1a8] sm:$0xf] }
 0x61e   :  { %v9968_v21 = vmul.f32 -1.442695, %v6147_v26  ;;  %v11130_v26 = vld [vmem:[#allocation8 + $0x1cc] sm:$0xf] }
 0x61f   :  { %v6200_v9 = vpop.f32.mrf.mxu1  ;;  %v6159_v2 = vpop.f32.mrf.mxu2  ;;  %7033 = vmatpush.bf16.msra.mxu1 %v10254_v19  ;;  %v10346_v43 = vor.u32 %v11130_v26, %v10343_v13 }
 0x620   :  { %11349 = vpow2.f32 %v9968_v21  ;;  %v6160_v42 = vadd.f32 %v6159_v2, %v5797_v59  ;;  %v10175_v59 = vld [vmem:[#allocation8 + $0x90] sm:$0xf0]  ;;  %v11087_v21 = vld [vmem:[#allocation8 + $0x6c] sm:$0xf0]  ;;  %v9975_v9 = vld [vmem:[%s12711_s0 + $0xf8] sm:$0xff] }
 0x621   :  { %v6135_v27 = vpop.f32.mrf.mxu0  ;;  %v10178_v7 = vor.u32 %v11089_v20, %v10175_v59  ;;  %v10158_v58 = vor.u32 %v11087_v21, %v10157_v56  ;;  %v10159_v2 = vld [vmem:[#allocation8 + $0x70] sm:$0xf0]  ;;  %v10293_v20 = vld [vmem:[#allocation8 + $0x168] sm:$0xf]  ;;  %v11120_v59 = vld [vmem:[#allocation8 + $0x174] sm:$0xf0] }
 0x622   :  { %v6173_v12 = vadd.f32 %v12532_v24, %v6160_v42  ;;  %v10239_v24 = vld [vmem:[#allocation8 + $0x110] sm:$0xf0]  ;;  %v10162_v40 = vor.u32 %v11085_v52, %v10159_v2  ;;  %v11128_v42 = vld [vmem:[#allocation8 + $0x1b4] sm:$0xf0]  ;;  %v10327_v27 = vld [vmem:[#allocation8 + $0x1b8] sm:$0xf0]  ;;  %v10294_v26 = vor.u32 %v11120_v59, %v10293_v20 }
 0x623   :  { %v10242_v38 = vor.u32 %v11105_v32, %v10239_v24  ;;  %7034 = vmatpush.bf16.msra.mxu1 %v10238_v22  ;;  %7043 = vmatpush.bf16.msra.mxu2 %v10178_v7  ;;  %v10326_v16 = vor.u32 %v11128_v42, %v10325_v35  ;;  %v10109_v56 = vld [vmem:[#allocation8] sm:$0xf]  ;;  %v11075_v2 = vld [vmem:[#allocation8 + $0xc] sm:$0xf0] }
 0x624   :  { %v9969_v60 = vmul.f32 -1.442695, %v6173_v12  ;;  %7018 = vmatpush.bf16.msra.mxu0 %v10158_v58  ;;  %v10330_v12 = vor.u32 %v11126_v46, %v10327_v27  ;;  %v9972_v58 = vld [vmem:[%s12711_s0 + $0xe0] sm:$0xff]  ;;  %v10110_v42 = vor.u32 %v11075_v2, %v10109_v56  ;;  %v11108_v2 = vld [vmem:[#allocation8 + $0x114] sm:$0xf0] }
 0x625   :  { %v6226_v48 = vpop.f32.mrf.mxu3  ;;  %7060 = vmatpush.bf16.msra.mxu3 %v10242_v38 }
 0x626   :  { %v11350_v53 = vpop.eup %11349  ;;  %11351 = vpow2.f32 %v9969_v60  ;;  %v10309_v48 = vld [vmem:[#allocation8 + $0x188] sm:$0xf] }
 0x627   :  { %v6517_v3 = vpop.f32.mrf.mxu1  ;;  %v12549_v23 = vadd.f32 1.0, %v11350_v53  ;;  %v6161_v1 = vpop.f32.mrf.mxu2  ;;  %7079 = vmatpush.bf16.msrb.mxu1 %v10358_v57  ;;  %7044 = vmatpush.bf16.msra.mxu2 %v10162_v40  ;;  %v10310_v29 = vor.u32 %v11124_v33, %v10309_v48  ;;  %v11114_v33 = vld [vmem:[#allocation8 + $0x14c] sm:$0xf] }
 0x628   :  { %v6548_v6 = vadd.f32 %v9973_v8, %v6517_v3  ;;  %v10141_v8 = vld [vmem:[#allocation8 + $0x40] sm:$0xf]  ;;  %v11077_v1 = vld [vmem:[#allocation8 + $0x24] sm:$0xf] }
 0x629   :  { %11353 = vrcp.f32 %v12549_v23  ;;  %v12552_v4 = vpop.f32.mrf.mxu0  ;;  %7105 = vmatpush.bf16.msrb.mxu3 %v10362_v41  ;;  %v10142_v38 = vor.u32 %v11083_v10, %v10141_v8  ;;  %v10127_v41 = vld [vmem:[#allocation8 + $0x30] sm:$0xf0]  ;;  %v6244_v21 = vand.u32 2147483648, %v12549_v23  ;;  %vm6238_vm14 = vweird.f32 %v12549_v23 }
 0x62a   :  { %v10105_v47 = vmul.f32 -1.442695, %v6548_v6  ;;  %v10126_v6 = vor.u32 %v11079_v11, %v10125_v31  ;;  %v6186_v15 = vadd.f32 %v12552_v4, %v5798_v44  ;;  %v6242_v4 = vand.u32 2147483647, %v12549_v23  ;;  %v11100_v31 = vld [vmem:[#allocation8 + $0xd4] sm:$0xf0] }
 0x62b   :  { %7080 = vmatpush.bf16.msrb.mxu1 %v10342_v17  ;;  %7019 = vmatpush.bf16.msra.mxu0 %v10142_v38  ;;  %v6245_v48 = vor.u32 1.1754944e-38, %v6244_v21  ;;  %v11094_v21 = vld [vmem:[#allocation8 + $0xac] sm:$0xf] }
 0x62c   :  { %11355 = vpow2.f32 %v10105_v47  ;;  %v11352_v61 = vpop.eup %11351  ;;  %7045 = vmatpush.bf16.msra.mxu2 %v10146_v30  ;;  %v11118_v47 = vld [vmem:[#allocation8 + $0x16c] sm:$0xf]  ;;  %v6199_v35 = vadd.f32 %v12539_v39, %v6186_v15  ;;  %vm12589_vm15 = vcmp.eq.f32.partialorder %v6242_v4, 8.507059e+37  ;;  %v10213_v30 = vld [vmem:[#allocation8 + $0xc8] sm:$0xf] }
 0x62d   :  { %v12558_v63 = vadd.f32 1.0, %v11352_v61  ;;  %v6543_v51 = vpop.f32.mrf.mxu3  ;;  %7106 = vmatpush.bf16.msrb.mxu3 %v10346_v43  ;;  %v10295_v43 = vld [vmem:[#allocation8 + $0x178] sm:$0xf0]  ;;  %v11073_v61 = vld [vmem:[#allocation8 + $0x4] sm:$0xf]  ;;  %v10214_v20 = vor.u32 %v11100_v31, %v10213_v30  ;;  %v9974_v30 = vld [vmem:[%s12711_s0 + $0xf0] sm:$0xff] }
 0x62e   :  { %v6550_v19 = vadd.f32 %v9975_v9, %v6543_v51  ;;  %v10298_v52 = vor.u32 %v11118_v47, %v10295_v43  ;;  %v10111_v51 = vld [vmem:[#allocation8 + $0x10] sm:$0xf0]  ;;  %v11096_v4 = vld [vmem:[#allocation8 + $0xb4] sm:$0xf0]  ;;  %v10149_v31 = vld [vmem:[#allocation8 + $0x48] sm:$0xf] }
 0x62f   :  { %v6519_v0 = vpop.f32.mrf.mxu1  ;;  %v12560_v28 = vpop.eup %11353  ;;  %11357 = vrcp.f32 %v12558_v63  ;;  %7081 = vmatpush.bf16.msrb.mxu1 %v10326_v16  ;;  %7020 = vmatpush.bf16.msra.mxu0 %v10126_v6  ;;  %v6263_v40 = vand.u32 2147483648, %v12558_v63  ;;  %v10229_v16 = vld [vmem:[#allocation8 + $0xe8] sm:$0xf]  ;;  %v6261_v46 = vand.u32 2147483647, %v12558_v63  ;;  %vm6257_vm0 = vweird.f32 %v12558_v63 }
 0x630   :  { %v6211_v18 = vpop.f32.mrf.mxu2  ;;  %v6234_v37 = vmul.f32 %v12560_v28, %v12549_v23  ;;  %v10106_v32 = vmul.f32 -1.442695, %v6550_v19  ;;  %vm6239_vm13 = vweird.f32 %v12560_v28  ;;  %v10114_v19 = vor.u32 %v11073_v61, %v10111_v51  ;;  %v11104_v0 = vld [vmem:[#allocation8 + $0xf4] sm:$0xf0]  ;;  %v11098_v6 = vld [vmem:[#allocation8 + $0xcc] sm:$0xf] }
 0x631   :  { %v6212_v60 = vadd.f32 %v6211_v18, %v5799_v14  ;;  %v6187_v24 = vpop.f32.mrf.mxu0  ;;  %7107 = vmatpush.bf16.msrb.mxu3 %v10330_v12  ;;  %v11102_v12 = vld [vmem:[#allocation8 + $0xec] sm:$0xf]  ;;  %v10230_v36 = vor.u32 %v11104_v0, %v10229_v16  ;;  %v10231_v18 = vld [vmem:[#allocation8 + $0xf8] sm:$0xf0]  ;;  %vm12598_vm1 = vmor %vm6238_vm14, %vm6239_vm13  ;;  %v6264_v49 = vor.u32 1.1754944e-38, %v6263_v40  ;;  %vm6262_vm3 = vcmp.eq.f32.partialorder %v6261_v46, 8.507059e+37 }
 0x632   :  { %v11356_v22 = vpop.eup %11355  ;;  %v6235_v53 = vsub.f32 1.0, %v6234_v37  ;;  %11359 = vpow2.f32 %v10106_v32  ;;  %v11116_v37 = vld [vmem:[#allocation8 + $0x154] sm:$0xf0]  ;;  %v11106_v61 = vld [vmem:[#allocation8 + $0x10c] sm:$0xf] }
 0x633   :  { %v12566_v3 = vadd.f32 1.0, %v11356_v22  ;;  %v6225_v57 = vadd.f32 %v12543_v25, %v6212_v60  ;;  %7082 = vmatpush.bf16.msrb.mxu1 %v10310_v29  ;;  %v10130_v25 = vor.u32 %v11077_v1, %v10127_v41  ;;  %7021 = vmatpush.bf16.msra.mxu0 %v10110_v42  ;;  %v10279_v22 = vld [vmem:[#allocation8 + $0x158] sm:$0xf0]  ;;  %v10181_v51 = vld [vmem:[#allocation8 + $0x88] sm:$0xf] }
 0x634   :  { %v6236_v17 = vmul.f32 %v12560_v28, %v6235_v53  ;;  %v10234_v53 = vor.u32 %v11102_v12, %v10231_v18  ;;  %v10215_v1 = vld [vmem:[#allocation8 + $0xd8] sm:$0xf0]  ;;  %v11090_v0 = vld [vmem:[#allocation8 + $0x8c] sm:$0xf] }
 0x635   :  { %v12570_v7 = vpop.eup %11357  ;;  %v9970_v50 = vmul.f32 -1.442695, %v6225_v57  ;;  %v6545_v5 = vpop.f32.mrf.mxu3  ;;  %7108 = vmatpush.bf16.msrb.mxu3 %v10314_v62  ;;  %11361 = vrcp.f32 %v12566_v3  ;;  %7046 = vmatpush.bf16.msra.mxu2 %v10130_v25  ;;  %v10278_v57 = vor.u32 %v11116_v37, %v10277_v55  ;;  %v10218_v47 = vor.u32 %v11098_v6, %v10215_v1  ;;  %v10247_v42 = vld [vmem:[#allocation8 + $0x118] sm:$0xf0]  ;;  %v11082_v6 = vld [vmem:[#allocation8 + $0x4c] sm:$0xf] }
 0x636   :  { %v6253_v13 = vmul.f32 %v12570_v7, %v12558_v63  ;;  %vm6258_vm12 = vweird.f32 %v12570_v7  ;;  %v6237_v10 = vadd.f32 %v12560_v28, %v6236_v17  ;;  %v10282_v63 = vor.u32 %v11114_v33, %v10279_v22  ;;  %v11110_v5 = vld [vmem:[#allocation8 + $0x12c] sm:$0xf]  ;;  %v10197_v17 = vld [vmem:[#allocation8 + $0xa8] sm:$0xf]  ;;  %v10183_v12 = vld [vmem:[#allocation8 + $0x98] sm:$0xf0] }
 0x637   :  { %11363 = vpow2.f32 %v9970_v50  ;;  %7083 = vmatpush.bf16.msrb.mxu1 %v10294_v26  ;;  %7066 = vmatpush.bf16.msrb.mxu0 %v10230_v36  ;;  %vm6259_vm2 = vmor %vm6257_vm0, %vm6258_vm12  ;;  %v11112_v50 = vld [vmem:[#allocation8 + $0x134] sm:$0xf0]  ;;  %v10198_v46 = vor.u32 %v11096_v4, %v10197_v17  ;;  %v10250_v36 = vor.u32 %v11106_v61, %v10247_v42  ;;  %v10186_v37 = vor.u32 %v11090_v0, %v10183_v12  ;;  %v11086_v33 = vld [vmem:[#allocation8 + $0x6c] sm:$0xf] }
 0x638   :  { %v6213_v9 = vpop.f32.mrf.mxu2  ;;  %v6254_v14 = vsub.f32 1.0, %v6253_v13  ;;  %v11360_v44 = vpop.eup %11359  ;;  %11365 = vtanh.f32 %v6199_v35  ;;  %v6241_v11 = vsel %vm12598_vm1, %v12560_v28, %v6237_v10  ;;  %v10263_v13 = vld [vmem:[#allocation8 + $0x138] sm:$0xf0]  ;;  %vm6580_vm9 = vweird.f32 %v12566_v3  ;;  %v11080_v4 = vld [vmem:[#allocation8 + $0x34] sm:$0xf0] }
 0x639   :  { %v6504_v27 = vpop.f32.mrf.mxu0  ;;  %7109 = vmatpush.bf16.msrb.mxu3 %v10298_v52  ;;  %7047 = vmatpush.bf16.msra.mxu2 %v10114_v19  ;;  %v12611_v15 = vadd.f32 1.0, %v11360_v44  ;;  %v6246_v25 = vsel %vm12589_vm15, %v6245_v48, %v6241_v11  ;;  %v10199_v9 = vld [vmem:[#allocation8 + $0xb8] sm:$0xf0]  ;;  %v10266_v35 = vor.u32 %v11110_v5, %v10263_v13  ;;  %v10165_v44 = vld [vmem:[#allocation8 + $0x68] sm:$0xf] }
 0x63a   :  { %v6255_v8 = vmul.f32 %v12570_v7, %v6254_v14  ;;  %v6547_v39 = vadd.f32 %v9972_v58, %v6504_v27  ;;  %v10245_v58 = vld [vmem:[#allocation8 + $0x108] sm:$0xf]  ;;  %v10202_v27 = vor.u32 %v11094_v21, %v10199_v9  ;;  %v11088_v48 = vld [vmem:[#allocation8 + $0x74] sm:$0xf0]  ;;  %v10167_v22 = vld [vmem:[#allocation8 + $0x78] sm:$0xf0] }
 0x63b   :  { %v12593_v32 = vpop.eup %11361  ;;  %7084 = vmatpush.bf16.msrb.mxu1 %v10278_v57  ;;  %7067 = vmatpush.bf16.msrb.mxu0 %v10214_v20  ;;  %v10246_v19 = vor.u32 %v11108_v2, %v10245_v58  ;;  %v10166_v57 = vor.u32 %v11088_v48, %v10165_v44  ;;  %v11084_v11 = vld [vmem:[#allocation8 + $0x54] sm:$0xf0]  ;;  %v10151_v1 = vld [vmem:[#allocation8 + $0x58] sm:$0xf0]  ;;  %vm6600_vm1 = vweird.f32 %v12611_v15 }
 0x63c   :  { %v6256_v23 = vadd.f32 %v12570_v7, %v6255_v8  ;;  %v10104_v38 = vmul.f32 -1.442695, %v6547_v39  ;;  %v6576_v59 = vmul.f32 %v12593_v32, %v12566_v3  ;;  %vm6581_vm5 = vweird.f32 %v12593_v32  ;;  %v10119_v0 = vld [vmem:[#allocation8 + $0x18] sm:$0xf0] }
 0x63d   :  { %v11364_v45 = vpop.eup %11363  ;;  %7092 = vmatpush.bf16.msrb.mxu2 %v10234_v53  ;;  %7110 = vmatpush.bf16.msrb.mxu3 %v10282_v63  ;;  %v10170_v63 = vor.u32 %v11086_v33, %v10167_v22  ;;  %v10154_v17 = vor.u32 %v11082_v6, %v10151_v1  ;;  %vm12667_vm10 = vmor %vm6580_vm9, %vm6581_vm5 }
 0x63e   :  { %v6260_v29 = vsel %vm6259_vm2, %v12570_v7, %v6256_v23  ;;  %v12609_v62 = vadd.f32 1.0, %v11364_v45  ;;  %11367 = vpow2.f32 %v10104_v38  ;;  %v10261_v7 = vld [vmem:[#allocation8 + $0x128] sm:$0xf]  ;;  %v11366_v43 = vpop.eup %11365  ;;  %v6577_v14 = vsub.f32 1.0, %v6576_v59 }
 0x63f   :  { %v6265_v41 = vsel %vm6262_vm3, %v6264_v49, %v6260_v29  ;;  %v10262_v52 = vor.u32 %v11112_v50, %v10261_v7  ;;  %v6288_v40 = vmul.f32 %v11366_v43, %v6246_v25  ;;  %7068 = vmatpush.bf16.msrb.mxu0 %v10198_v46  ;;  %v6586_v29 = vand.u32 2147483648, %v12566_v3  ;;  %v11078_v43 = vld [vmem:[#allocation8 + $0x2c] sm:$0xf] }
 0x640   :  { %11369 = vrcp.f32 %v12609_v62  ;;  %v12616_v28 = vpop.f32.mrf.mxu2  ;;  %v6287_v56 = vmul.f32 %v6265_v41, %v12447_v34  ;;  %v11092_v34 = vld [vmem:[#allocation8 + $0x94] sm:$0xf0]  ;;  %v6578_v24 = vmul.f32 %v12593_v32, %v6577_v14  ;;  %v6283_v38 = vand.u32 2147483648, %v12609_v62 }
 0x641   :  { %v6506_v26 = vpop.f32.mrf.mxu0  ;;  %7093 = vmatpush.bf16.msrb.mxu2 %v10218_v47  ;;  %11371 = vrcp.f32 %v12611_v15  ;;  %7085 = vmatpush.bf16.msrb.mxu1 %v10262_v52  ;;  %v10182_v55 = vor.u32 %v11092_v34, %v10181_v51  ;;  %v6281_v45 = vand.u32 2147483647, %v12609_v62  ;;  %vm6277_vm6 = vweird.f32 %v12609_v62  ;;  %v11074_v34 = vld [vmem:[#allocation8 + $0xc] sm:$0xf] }
 0x642   :  { %v12624_v10 = vadd.f32 %v6288_v40, %v6287_v56  ;;  %7111 = vmatpush.bf16.msrb.mxu3 %v10266_v35  ;;  %v6549_v41 = vadd.f32 %v9974_v30, %v12616_v28  ;;  %v6579_v20 = vadd.f32 %v12593_v32, %v6578_v24  ;;  %v6284_v25 = vor.u32 1.1754944e-38, %v6283_v38  ;;  %v10133_v28 = vld [vmem:[#allocation8 + $0x28] sm:$0xf]  ;;  %v10135_v56 = vld [vmem:[#allocation8 + $0x38] sm:$0xf0] }
 0x643   :  { %7069 = vmatpush.bf16.msrb.mxu0 %v10182_v55  ;;  %vm12656_vm8 = vcmp.eq.f32.partialorder %v6281_v45, 8.507059e+37  ;;  %v6587_v58 = vor.u32 1.1754944e-38, %v6586_v29  ;;  %v6584_v52 = vand.u32 2147483647, %v12566_v3  ;;  %v10134_v51 = vor.u32 %v11080_v4, %v10133_v28 }
 0x644   :  { %v11368_v16 = vpop.eup %11367  ;;  %v6583_v14 = vsel %vm12667_vm10, %v12593_v32, %v6579_v20  ;;  %v11076_v32 = vld [vmem:[#allocation8 + $0x14] sm:$0xf0]  ;;  %v10122_v44 = vor.u32 %v11074_v34, %v10119_v0  ;;  %v6604_v38 = vand.u32 2147483647, %v12611_v15 }
 0x645   :  { %v12626_v39 = vadd.f32 1.0, %v11368_v16  ;;  %7094 = vmatpush.bf16.msrb.mxu2 %v10202_v27  ;;  %7086 = vmatpush.bf16.msrb.mxu1 %v10246_v19  ;;  %v10138_v16 = vor.u32 %v11078_v43, %v10135_v56  ;;  %v10117_v19 = vld [vmem:[#allocation8 + $0x8] sm:$0xf]  ;;  %vm6585_vm13 = vcmp.eq.f32.partialorder %v6584_v52, 8.507059e+37 }
 0x646   :  { %v12622_v8 = vpop.eup %11369  ;;  %7112 = vmatpush.bf16.msrb.mxu3 %v10250_v36  ;;  %v6588_v36 = vsel %vm6585_vm13, %v6587_v58, %v6583_v14  ;;  %vm6605_vm3 = vcmp.eq.f32.partialorder %v6604_v38, 8.507059e+37 }
 0x647   :  { %v6273_v18 = vmul.f32 %v12622_v8, %v12609_v62  ;;  %11373 = vrcp.f32 %v12626_v39  ;;  %v12638_v49 = vpop.eup %11371  ;;  %vm6278_vm4 = vweird.f32 %v12622_v8  ;;  %v10150_v62 = vor.u32 %v11084_v11, %v10149_v31  ;;  %7070 = vmatpush.bf16.msrb.mxu0 %v10166_v57 }
 0x648   :  { %v6532_v60 = vpop.f32.mrf.mxu2  ;;  %11375 = vtanh.f32 %v12624_v10  ;;  %v6596_v50 = vmul.f32 %v12638_v49, %v12611_v15  ;;  %vm12652_vm7 = vmor %vm6277_vm6, %vm6278_vm4  ;;  %v6567_v42 = vand.u32 2147483648, %v12626_v39  ;;  %v6565_v27 = vand.u32 2147483647, %v12626_v39 }
 0x649   :  { %v6274_v23 = vsub.f32 1.0, %v6273_v18  ;;  %7095 = vmatpush.bf16.msrb.mxu2 %v10186_v37  ;;  %11377 = vtanh.f32 %v6549_v41  ;;  %vm6561_vm12 = vweird.f32 %v12626_v39  ;;  %v10118_v37 = vor.u32 %v11076_v32, %v10117_v19 }
 0x64a   :  { %v6597_v35 = vsub.f32 1.0, %v6596_v50  ;;  %vm6566_vm15 = vcmp.eq.f32.partialorder %v6565_v27, 8.507059e+37  ;;  %v6610_v33 = vmul.f32 %v6588_v36, %v12506_v54  ;;  %vm6601_vm0 = vweird.f32 %v12638_v49 }
 0x64b   :  { %v6275_v53 = vmul.f32 %v12622_v8, %v6274_v23  ;;  %7071 = vmatpush.bf16.msrb.mxu0 %v10150_v62  ;;  %v6606_v23 = vand.u32 2147483648, %v12611_v15  ;;  %vm6602_vm2 = vmor %vm6600_vm1, %vm6601_vm0 }
 0x64c   :  { %v6598_v60 = vmul.f32 %v12638_v49, %v6597_v35 }
 0x64d   :  { %v6276_v59 = vadd.f32 %v12622_v8, %v6275_v53  ;;  %v11374_v7 = vpop.eup %11373  ;;  %7096 = vmatpush.bf16.msrb.mxu2 %v10170_v63  ;;  %v6607_v30 = vor.u32 1.1754944e-38, %v6606_v23 }
 0x64e   :  { %v6557_v47 = vmul.f32 %v11374_v7, %v12626_v39  ;;  %v11376_v21 = vpop.eup %11375  ;;  %vm6562_vm11 = vweird.f32 %v11374_v7  ;;  %v6599_v24 = vadd.f32 %v12638_v49, %v6598_v60 }
 0x64f   :  { %v6280_v13 = vsel %vm12652_vm7, %v12622_v8, %v6276_v59  ;;  %vm6563_vm14 = vmor %vm6561_vm12, %vm6562_vm11  ;;  %v6568_v8 = vor.u32 1.1754944e-38, %v6567_v42  ;;  %v11378_v18 = vpop.eup %11377  ;;  %7072 = vmatpush.bf16.msrb.mxu0 %v10134_v51 }
 0x650   :  { %v6285_v2 = vsel %vm12656_vm8, %v6284_v25, %v6280_v13  ;;  %v6558_v61 = vsub.f32 1.0, %v6557_v47  ;;  %v6603_v54 = vsel %vm6602_vm2, %v12638_v49, %v6599_v24  ;;  %v6684_v49 = vld [vmem:[%s12714_s3] sm:$0xf] }
 0x651   :  { %v6291_v40 = vmul.f32 %v11376_v21, %v6285_v2  ;;  %7097 = vmatpush.bf16.msrb.mxu2 %v10154_v17  ;;  %v6608_v53 = vsel %vm6605_vm3, %v6607_v30, %v6603_v54  ;;  %v6686_v1 = vperm.slane %v6684_v49, 0  ;;  %v6687_v50 = vperm.slane %v6684_v49, 1 }
 0x652   :  { %v6559_v46 = vmul.f32 %v11374_v7, %v6558_v61  ;;  %v6689_v58 = vperm.slane %v6684_v49, 3  ;;  %v6688_v2 = vperm.slane %v6684_v49, 2 }
 0x653   :  { %9971 = vst [vmem:[%s12717_s6 + $0x30] sm:$0xff] %v6291_v40  ;;  %v6619_v3 = vpack.c.bf16 %v6291_v40, %v6291_v40  ;;  %7073 = vmatpush.bf16.msrb.mxu0 %v10118_v37 }
 0x654   :  { %v6560_v12 = vadd.f32 %v11374_v7, %v6559_v46 }
 0x655   :  { %7035 = vmatmul.bf16.vlgmr.msra.gmra.mxu1 %v6619_v3  ;;  %7061 = vmatmul.bf16.vlgmr.msra.gmra.mxu3 %v6619_v3 }
 0x656   :  { %v6564_v55 = vsel %vm6563_vm14, %v11374_v7, %v6560_v12  ;;  %7098 = vmatpush.bf16.msrb.mxu2 %v10138_v16 }
 0x657   :  { %v6569_v48 = vsel %vm6566_vm15, %v6568_v8, %v6564_v55 }
 0x658   :  { %v6611_v39 = vmul.f32 %v11378_v18, %v6569_v48 }
 0x65a   :  { %v6612_v22 = vadd.f32 %v6611_v39, %v6610_v33  ;;  %7099 = vmatpush.bf16.msrb.mxu2 %v10122_v44 }
 0x65c   :  { %11379 = vtanh.f32 %v6612_v22  ;;  %7192 = vst [vmem:[%s12719_s8] sm:$0xff] %v6612_v22 }
 0x662   :  { %v11380_v45 = vpop.eup %11379 }
 0x663   :  { %v6614_v57 = vmul.f32 %v11380_v45, %v6608_v53 }
 0x665   :  { %7087 = vmatmul.bf16.vlgmr.msrb.gmra.mxu1 %v6619_v3  ;;  %7113 = vmatmul.bf16.vlgmr.msrb.gmra.mxu3 %v6619_v3  ;;  %v6618_v63 = vpack.c.bf16 %v6614_v57, %v6614_v57  ;;  %7187 = vst [vmem:[%s12718_s7] sm:$0xff] %v6614_v57 }
 0x667   :  { %7022 = vmatmul.bf16.vlgmr.msra.gmra.mxu0 %v6618_v63  ;;  %7048 = vmatmul.bf16.vlgmr.msra.gmra.mxu2 %v6618_v63 }
 0x677   :  { %7074 = vmatmul.bf16.vlgmr.msrb.gmra.mxu0 %v6618_v63  ;;  %7100 = vmatmul.bf16.vlgmr.msrb.gmra.mxu2 %v6618_v63 }
 0x6d2   :  { %v7036_v15 = vpop.f32.mrf.mxu1 }
 0x6d8   :  { %v7062_v31 = vpop.f32.mrf.mxu3 }
 0x6da   :  { %v7038_v11 = vpop.f32.mrf.mxu1 }
 0x6e0   :  { %v7064_v29 = vpop.f32.mrf.mxu3 }
 0x6e2   :  { %v7088_v6 = vpop.f32.mrf.mxu1 }
 0x6e4   :  { %v7023_v41 = vpop.f32.mrf.mxu0 }
 0x6e5   :  { %v7024_v20 = vadd.f32 %v7023_v41, %v6686_v1 }
 0x6e7   :  { %v7037_v59 = vadd.f32 %v7036_v15, %v7024_v20 }
 0x6e8   :  { %v7114_v7 = vpop.f32.mrf.mxu3 }
 0x6e9   :  { %v10363_v5 = vmul.f32 -1.442695, %v7037_v59 }
 0x6ea   :  { %v7090_v25 = vpop.f32.mrf.mxu1  ;;  %v7049_v26 = vpop.f32.mrf.mxu2 }
 0x6eb   :  { %11381 = vpow2.f32 %v10363_v5  ;;  %v7050_v62 = vadd.f32 %v7049_v26, %v6687_v50 }
 0x6ec   :  { %v7025_v28 = vpop.f32.mrf.mxu0 }
 0x6ed   :  { %v7063_v47 = vadd.f32 %v7062_v31, %v7050_v62 }
 0x6ef   :  { %v10364_v13 = vmul.f32 -1.442695, %v7063_v47 }
 0x6f0   :  { %v7116_v17 = vpop.f32.mrf.mxu3 }
 0x6f1   :  { %v11382_v4 = vpop.eup %11381  ;;  %11383 = vpow2.f32 %v10364_v13 }
 0x6f2   :  { %v7122_v43 = vadd.f32 1.0, %v11382_v4  ;;  %v7051_v56 = vpop.f32.mrf.mxu2 }
 0x6f4   :  { %11385 = vrcp.f32 %v7122_v43  ;;  %v7075_v21 = vpop.f32.mrf.mxu0  ;;  %v7134_v12 = vand.u32 2147483648, %v7122_v43  ;;  %vm7128_vm5 = vweird.f32 %v7122_v43  ;;  %v7132_v18 = vand.u32 2147483647, %v7122_v43 }
 0x6f5   :  { %v7076_v42 = vadd.f32 %v7075_v21, %v6688_v2 }
 0x6f6   :  { %v7135_v48 = vor.u32 1.1754944e-38, %v7134_v12  ;;  %vm7133_vm9 = vcmp.eq.f32.partialorder %v7132_v18, 8.507059e+37 }
 0x6f7   :  { %v11384_v9 = vpop.eup %11383  ;;  %v7089_v32 = vadd.f32 %v7088_v6, %v7076_v42 }
 0x6f8   :  { %v7141_v52 = vadd.f32 1.0, %v11384_v9 }
 0x6fa   :  { %v11386_v61 = vpop.eup %11385  ;;  %11387 = vrcp.f32 %v7141_v52  ;;  %v7101_v14 = vpop.f32.mrf.mxu2  ;;  %v7153_v55 = vand.u32 2147483648, %v7141_v52  ;;  %v7151_v60 = vand.u32 2147483647, %v7141_v52  ;;  %vm7147_vm8 = vweird.f32 %v7141_v52 }
 0x6fb   :  { %v7124_v40 = vmul.f32 %v11386_v61, %v7122_v43  ;;  %v7102_v35 = vadd.f32 %v7101_v14, %v6689_v58  ;;  %vm7129_vm4 = vweird.f32 %v11386_v61 }
 0x6fc   :  { %v7077_v51 = vpop.f32.mrf.mxu0  ;;  %vm7130_vm6 = vmor %vm7128_vm5, %vm7129_vm4  ;;  %v7154_v22 = vor.u32 1.1754944e-38, %v7153_v55  ;;  %vm7152_vm11 = vcmp.eq.f32.partialorder %v7151_v60, 8.507059e+37 }
 0x6fd   :  { %v7125_v16 = vsub.f32 1.0, %v7124_v40  ;;  %v7115_v46 = vadd.f32 %v7114_v7, %v7102_v35 }
 0x6ff   :  { %v7126_v27 = vmul.f32 %v11386_v61, %v7125_v16  ;;  %v10365_v3 = vmul.f32 -1.442695, %v7115_v46 }
 0x700   :  { %v11388_v19 = vpop.eup %11387 }
 0x701   :  { %v7143_v34 = vmul.f32 %v11388_v19, %v7141_v52  ;;  %v7127_v0 = vadd.f32 %v11386_v61, %v7126_v27  ;;  %11389 = vpow2.f32 %v10365_v3  ;;  %vm7148_vm7 = vweird.f32 %v11388_v19 }
 0x702   :  { %v7103_v8 = vpop.f32.mrf.mxu2  ;;  %11391 = vtanh.f32 %v7089_v32  ;;  %vm7149_vm10 = vmor %vm7147_vm8, %vm7148_vm7 }
 0x703   :  { %v7144_v36 = vsub.f32 1.0, %v7143_v34  ;;  %v7131_v44 = vsel %vm7130_vm6, %v11386_v61, %v7127_v0 }
 0x704   :  { %v7136_v24 = vsel %vm7133_vm9, %v7135_v48, %v7131_v44 }
 0x705   :  { %v7145_v37 = vmul.f32 %v11388_v19, %v7144_v36 }
 0x707   :  { %v11390_v33 = vpop.eup %11389  ;;  %v7146_v39 = vadd.f32 %v11388_v19, %v7145_v37 }
 0x708   :  { %v7161_v23 = vadd.f32 1.0, %v11390_v33  ;;  %v11392_v54 = vpop.eup %11391 }
 0x709   :  { %v7150_v38 = vsel %vm7149_vm10, %v11388_v19, %v7146_v39  ;;  %v7178_v53 = vmul.f32 %v11392_v54, %v7136_v24 }
 0x70a   :  { %v7155_v30 = vsel %vm7152_vm11, %v7154_v22, %v7150_v38  ;;  %11393 = vrcp.f32 %v7161_v23  ;;  %v7173_v11 = vand.u32 2147483648, %v7161_v23  ;;  %v7171_v29 = vand.u32 2147483647, %v7161_v23 }
 0x70b   :  { %v7177_v45 = vmul.f32 %v7155_v30, %v12624_v10  ;;  %vm7167_vm13 = vweird.f32 %v7161_v23 }
 0x70c   :  { %v7174_v1 = vor.u32 1.1754944e-38, %v7173_v11  ;;  %vm7172_vm15 = vcmp.eq.f32.partialorder %v7171_v29, 8.507059e+37 }
 0x70d   :  { %v7179_v57 = vadd.f32 %v7178_v53, %v7177_v45 }
 0x70f   :  { %10368 = vst [vmem:[%s12719_s8 + $0x8] sm:$0xff] %v7179_v57  ;;  %11395 = vtanh.f32 %v7179_v57 }
 0x710   :  { %v11394_v63 = vpop.eup %11393 }
 0x711   :  { %v7163_v15 = vmul.f32 %v11394_v63, %v7161_v23  ;;  %vm7168_vm12 = vweird.f32 %v11394_v63 }
 0x712   :  { %vm7169_vm14 = vmor %vm7167_vm13, %vm7168_vm12 }
 0x713   :  { %v7164_v31 = vsub.f32 1.0, %v7163_v15 }
 0x715   :  { %v7165_v49 = vmul.f32 %v11394_v63, %v7164_v31  ;;  %v11396_v10 = vpop.eup %11395 }
 0x717   :  { %v7166_v6 = vadd.f32 %v11394_v63, %v7165_v49 }
 0x719   :  { %v7170_v41 = vsel %vm7169_vm14, %v11394_v63, %v7166_v6 }
 0x71a   :  { %v7175_v20 = vsel %vm7172_vm15, %v7174_v1, %v7170_v41 }
 0x71b   :  { %v7181_v59 = vmul.f32 %v11396_v10, %v7175_v20 }
 0x71d   :  { %10366 = vst [vmem:[%s12717_s6 + $0x38] sm:$0xff] %v7181_v59 }
 0x71e   :  { %10367 = vst [vmem:[%s12718_s7 + $0x8] sm:$0xff] %v7181_v59 }
 0x71f   :  { %7208 = vsyncpa [#allocation7], 1 }
 0x720   :  { %7209 = vsyncpa [#allocation9], 1 }

</bundles_post_ra>
